<compile_context>
chip_gen: v5e
topology: v5e:2x2
jax: 0.10.0
libtpu: 0.0.40
codegen_flags: <defaults>
</compile_context>

<pallas_src>
import functools

import jax
import jax.numpy as jnp
from jax import lax
from jax.experimental import pallas as pl
from jax.experimental.pallas import tpu as pltpu


# ---------------------------------------------------------------------------
# Fused kernel: conv3x3 + bn1 + relu -> conv3x3 + bn2 + residual add + relu
# ---------------------------------------------------------------------------
def _basicblock_kernel(x_ref, w1_ref, s1_ref, b1_ref, w2_ref, s2_ref, b2_ref,
                       o_ref, xs1_ref, xs2_ref, *, hb):
    # x_ref : (1, H, W, C)   one image, C = channels padded to a multiple of 128
    # w*_ref: (3, 3*C, C)    per-dy weight slab, K dim = (dx, ci) merged (bf16)
    # s/b   : (1, C)         folded BatchNorm scale / bias (f32)
    # xs*_ref: (H+2, W, 3*C) W-shifted, channel-concatenated padded activations
    _, H, W, C = x_ref.shape
    K3 = 3 * C
    nb = H // hb
    HWb = hb * W
    cdt = xs1_ref.dtype                      # bf16 MXU operand dtype
    unroll = nb <= 8

    # ---- zero ONLY the never-written halo slabs (megacore-safe, cheap) ----
    for ref in (xs1_ref, xs2_ref):
        ref[0:1, :, :] = jnp.zeros((1, W, K3), cdt)                  # top pad row
        ref[H + 1:H + 2, :, :] = jnp.zeros((1, W, K3), cdt)          # bottom pad row
        ref[1:H + 1, 0:1, 0:C] = jnp.zeros((H, 1, C), cdt)           # left pad (dx=0)
        ref[1:H + 1, W - 1:W, 2 * C:K3] = jnp.zeros((H, 1, C), cdt)  # right pad (dx=2)

    # ---- build the shifted input slab once: xs1[h, w, dx*C+ci] = xpad[h, w+dx, ci]
    xs1_ref[1:H + 1, 1:W, 0:C] = x_ref[0, :, 0:W - 1, :].astype(cdt)
    xs1_ref[1:H + 1, :, C:2 * C] = x_ref[0].astype(cdt)
    xs1_ref[1:H + 1, 0:W - 1, 2 * C:K3] = x_ref[0, :, 1:W, :].astype(cdt)

    s1 = s1_ref[...]
    b1 = b1_ref[...]
    s2 = s2_ref[...]
    b2 = b2_ref[...]

    # ---- phase A: conv1 (3x3 SAME) + bn1 + relu, banded over image rows ----
    def conv1_band(b, carry):
        r0 = pl.multiple_of(b * hb, hb)
        acc = jnp.dot(xs1_ref[pl.ds(r0, hb), :, :].reshape(HWb, K3),
                      w1_ref[0], preferred_element_type=jnp.float32)
        for dy in (1, 2):                       # 3 deep-K dots instead of 9 shallow
            acc += jnp.dot(xs1_ref[pl.ds(r0 + dy, hb), :, :].reshape(HWb, K3),
                           w1_ref[dy], preferred_element_type=jnp.float32)
        h1 = jnp.maximum(acc * s1 + b1, 0.0)
        # TODO(synk): SNorm (norm1) has no definition in the spec -> identity.
        h1 = h1.reshape(hb, W, C).astype(cdt)
        # scatter the band into the shifted slab for conv2 (stays in VMEM)
        xs2_ref[pl.ds(r0 + 1, hb), 1:W, 0:C] = h1[:, 0:W - 1, :]
        xs2_ref[pl.ds(r0 + 1, hb), :, C:2 * C] = h1
        xs2_ref[pl.ds(r0 + 1, hb), 0:W - 1, 2 * C:K3] = h1[:, 1:W, :]
        return carry

    lax.fori_loop(0, nb, conv1_band, 0, unroll=unroll)

    # ---- phase B: conv2 (3x3 SAME) + bn2 + identity add + relu, banded ----
    def conv2_band(b, carry):
        r0 = pl.multiple_of(b * hb, hb)
        acc = jnp.dot(xs2_ref[pl.ds(r0, hb), :, :].reshape(HWb, K3),
                      w2_ref[0], preferred_element_type=jnp.float32)
        for dy in (1, 2):
            acc += jnp.dot(xs2_ref[pl.ds(r0 + dy, hb), :, :].reshape(HWb, K3),
                           w2_ref[dy], preferred_element_type=jnp.float32)
        identity = x_ref[0, pl.ds(r0, hb), :, :].reshape(HWb, C).astype(jnp.float32)
        out = jnp.maximum(acc * s2 + b2 + identity, 0.0)
        # TODO(synk): SNorm (norm2) has no definition in the spec -> identity.
        o_ref[0, pl.ds(r0, hb), :, :] = out.reshape(hb, W, C).astype(o_ref.dtype)
        return carry

    lax.fori_loop(0, nb, conv2_band, 0, unroll=unroll)


# ---------------------------------------------------------------------------
# Wrapper
# ---------------------------------------------------------------------------
def _round_up(x, m):
    return (x + m - 1) // m * m


def _pick_band_rows(H, W, target_rows=512):
    """Largest divisor of H with band rows (Hb*W) <= target (multiple-of-8 friendly)."""
    best = 1
    for d in range(1, H + 1):
        if H % d == 0 and d * W <= target_rows:
            best = d
    return best


def basicblock_forward(x_nchw, params, *, compute_dtype=jnp.bfloat16):
    """BasicBlock forward, NCHW in / NCHW out (PyTorch convention)."""
    w1, w2 = params["w1"], params["w2"]            # (3, 3, C, C) HWIO
    s1, b1, s2, b2 = params["s1"], params["b1"], params["s2"], params["b2"]

    N, C, H, W = x_nchw.shape
    assert w1.shape == (3, 3, C, C) and w2.shape == (3, 3, C, C), \
        "identity residual requires inplanes == planes (downsample=None)"
    assert H >= 1 and W >= 2

    Cp = max(128, _round_up(C, 128))               # lane-dense channel width
    Hb = _pick_band_rows(H, W)                     # accumulator row-band size

    # Boundary layout work (one pass): NCHW -> NHWC + zero-pad channels.
    # TODO(synk): when chaining blocks, keep activations in padded NHWC between
    #             blocks and convert once at network boundaries.
    x = jnp.transpose(x_nchw, (0, 2, 3, 1))
    if Cp != C:
        x = jnp.pad(x, ((0, 0), (0, 0), (0, 0), (0, Cp - C)))

    def pack_w(w):                                  # (3,3,C,C) -> (3, 3*Cp, Cp) bf16
        w = jnp.pad(w, ((0, 0), (0, 0), (0, Cp - C), (0, Cp - C)))
        return w.reshape(3, 3 * Cp, Cp).astype(compute_dtype)

    def pack_v(v):                                  # (C,) -> (1, Cp) f32
        return jnp.pad(v, (0, Cp - C)).reshape(1, Cp).astype(jnp.float32)

    w1p, w2p = pack_w(w1), pack_w(w2)
    s1p, b1p, s2p, b2p = pack_v(s1), pack_v(b1), pack_v(s2), pack_v(b2)

    # ---- generation-aware VMEM budget ----
    try:
        vmem_cap = int(pltpu.get_tpu_info().vmem_capacity_bytes)
    except Exception:
        vmem_cap = 64 * 2**20                       # conservative (v7x per-TC)
    csize = jnp.dtype(compute_dtype).itemsize
    xsize = jnp.dtype(x.dtype).itemsize
    need = (2 * (H + 2) * W * 3 * Cp * csize        # xs1 + xs2 scratch slabs
            + 2 * 2 * H * W * Cp * xsize            # double-buffered in/out blocks
            + 2 * 2 * 3 * 3 * Cp * Cp * csize       # (double-buffered) weight slabs
            + 8 * 4 * Cp + (1 << 20))
    vmem_limit = int(min(max(int(1.25 * need), 8 * 2**20), int(0.9 * vmem_cap)))

    cost = pl.CostEstimate(
        flops=2 * N * 2 * 9 * H * W * Cp * Cp,
        transcendentals=0,
        bytes_accessed=int(2 * N * H * W * Cp * xsize
                           + 2 * 3 * 3 * Cp * Cp * csize + 4 * 4 * Cp))

    kernel = functools.partial(_basicblock_kernel, hb=Hb)

    out = pl.pallas_call(
        kernel,
        out_shape=jax.ShapeDtypeStruct((N, H, W, Cp), x.dtype),
        grid=(N,),
        in_specs=[
            pl.BlockSpec((1, H, W, Cp), lambda i: (i, 0, 0, 0)),   # x (pipelined)
            pl.BlockSpec((3, 3 * Cp, Cp), lambda i: (0, 0, 0)),    # w1 (constant idx)
            pl.BlockSpec((1, Cp), lambda i: (0, 0)),               # s1
            pl.BlockSpec((1, Cp), lambda i: (0, 0)),               # b1
            pl.BlockSpec((3, 3 * Cp, Cp), lambda i: (0, 0, 0)),    # w2
            pl.BlockSpec((1, Cp), lambda i: (0, 0)),               # s2
            pl.BlockSpec((1, Cp), lambda i: (0, 0)),               # b2
        ],
        out_specs=pl.BlockSpec((1, H, W, Cp), lambda i: (i, 0, 0, 0)),
        scratch_shapes=[
            pltpu.VMEM((H + 2, W, 3 * Cp), compute_dtype),         # shifted input slab
            pltpu.VMEM((H + 2, W, 3 * Cp), compute_dtype),         # shifted conv1 slab
        ],
        compiler_params=pltpu.CompilerParams(
            dimension_semantics=("parallel",),                     # megacore over batch
            vmem_limit_bytes=vmem_limit),
        cost_estimate=cost,
    )(x, w1p, s1p, b1p, w2p, s2p, b2p)

    out = out[..., :C]                                             # drop pad channels
    return jnp.transpose(out, (0, 3, 1, 2))                        # NHWC -> NCHW


# ---------------------------------------------------------------------------
# Deterministic parameters (eval-mode BN folded) + pure-JAX reference
# ---------------------------------------------------------------------------
def fold_bn(gamma, beta, mean, var, eps=1e-5):
    scale = gamma / jnp.sqrt(var + eps)
    return scale, beta - mean * scale


def make_params(key, planes):
    ks = jax.random.split(key, 4)
    w1 = 0.1 * jax.random.normal(ks[0], (3, 3, planes, planes), jnp.float32)
    w2 = 0.1 * jax.random.normal(ks[1], (3, 3, planes, planes), jnp.float32)

    def bn(k, c):
        k1, k2, k3, k4 = jax.random.split(k, 4)
        gamma = 1.0 + 0.1 * jax.random.normal(k1, (c,), jnp.float32)
        beta = 0.1 * jax.random.normal(k2, (c,), jnp.float32)
        mean = 0.1 * jax.random.normal(k3, (c,), jnp.float32)
        var = 1.0 + 0.1 * jax.random.uniform(k4, (c,), jnp.float32)
        return fold_bn(gamma, beta, mean, var)

    s1, b1 = bn(ks[2], planes)
    s2, b2 = bn(ks[3], planes)
    return dict(w1=w1, w2=w2, s1=s1, b1=b1, s2=s2, b2=b2)


def reference_forward(x_nchw, p, compute_dtype=jnp.bfloat16):
    """Pure-JAX reference with the same bf16-operand / f32-accumulate math."""
    dn = ("NHWC", "HWIO", "NHWC")
    x = jnp.transpose(x_nchw, (0, 2, 3, 1))

    def c3(y, w):
        return lax.conv_general_dilated(
            y.astype(compute_dtype), w.astype(compute_dtype), (1, 1), "SAME",
            dimension_numbers=dn, preferred_element_type=jnp.float32)

    h = jnp.maximum(c3(x, p["w1"]) * p["s1"] + p["b1"], 0.0)
    out = c3(h, p["w2"]) * p["s2"] + p["b2"] + x.astype(jnp.float32)
    out = jnp.maximum(out, 0.0)
    return jnp.transpose(out, (0, 3, 1, 2))


# ---------------------------------------------------------------------------
if __name__ == "__main__":
    key = jax.random.PRNGKey(0)
    kx, kp = jax.random.split(key)

    N, planes, H, W = 2, 4, 16, 16                 # inplanes == planes (BasicBlock)
    x = jax.random.normal(kx, (N, planes, H, W), jnp.float32)   # NCHW
    params = make_params(kp, planes)

    out = jax.block_until_ready(basicblock_forward(x, params))
    ref = jax.block_until_ready(reference_forward(x, params))

    assert out.shape == (N, planes, H, W)
    err = float(jnp.max(jnp.abs(out - ref)))
    assert err < 1e-2, f"mismatch vs pure-JAX reference (max abs err = {err})"

    print("KERNEL_OK")
</pallas_src>

<mosaic_0001>
module attributes {stable_mosaic.version = 11 : i64} {
  func.func @_basicblock_kernel(%arg0: i32, %arg1: memref<1x16x16x128xf32, #tpu.memory_space<vmem>>, %arg2: memref<3x384x128xbf16, #tpu.memory_space<vmem>>, %arg3: memref<1x128xf32, #tpu.memory_space<vmem>>, %arg4: memref<1x128xf32, #tpu.memory_space<vmem>>, %arg5: memref<3x384x128xbf16, #tpu.memory_space<vmem>>, %arg6: memref<1x128xf32, #tpu.memory_space<vmem>>, %arg7: memref<1x128xf32, #tpu.memory_space<vmem>>, %arg8: memref<1x16x16x128xf32, #tpu.memory_space<vmem>>, %arg9: memref<18x16x384xbf16, #tpu.memory_space<vmem>>, %arg10: memref<18x16x384xbf16, #tpu.memory_space<vmem>>) attributes {dimension_semantics = [#tpu.dimension_semantics<parallel>], iteration_bounds = array<i64: 2>, scalar_prefetch = 0 : i64, scratch_operands = 2 : i64, tpu.core_type = #tpu.core_type<tc>, window_params = [{transform_indices = @transform_0, window_bounds = array<i64: 1, 16, 16, 128>}, {pipeline_mode = #tpu.pipeline_mode<synchronous>, transform_indices = @transform_1, window_bounds = array<i64: 3, 384, 128>}, {pipeline_mode = #tpu.pipeline_mode<synchronous>, transform_indices = @transform_2, window_bounds = array<i64: 1, 128>}, {pipeline_mode = #tpu.pipeline_mode<synchronous>, transform_indices = @transform_3, window_bounds = array<i64: 1, 128>}, {pipeline_mode = #tpu.pipeline_mode<synchronous>, transform_indices = @transform_4, window_bounds = array<i64: 3, 384, 128>}, {pipeline_mode = #tpu.pipeline_mode<synchronous>, transform_indices = @transform_5, window_bounds = array<i64: 1, 128>}, {pipeline_mode = #tpu.pipeline_mode<synchronous>, transform_indices = @transform_6, window_bounds = array<i64: 1, 128>}, {transform_indices = @transform_7, window_bounds = array<i64: 1, 16, 16, 128>}]} {
    %cst = arith.constant 0.000000e+00 : bf16
    %0 = vector.broadcast %cst : bf16 to vector<1x16x384xbf16>
    %c0 = arith.constant 0 : index
    %c0_0 = arith.constant 0 : index
    %c0_1 = arith.constant 0 : index
    %1 = vector.load %arg9[%c0, %c0_0, %c0_1] : memref<18x16x384xbf16, #tpu.memory_space<vmem>>, vector<1x16x384xbf16>
    tpu.vector_store %arg9[%c0, %c0_0, %c0_1], %0 {strides = array<i32>} : memref<18x16x384xbf16, #tpu.memory_space<vmem>>, vector<1x16x384xbf16>,
    %cst_2 = arith.constant 0.000000e+00 : bf16
    %2 = vector.broadcast %cst_2 : bf16 to vector<1x16x384xbf16>
    %c17 = arith.constant 17 : index
    %c0_3 = arith.constant 0 : index
    %c0_4 = arith.constant 0 : index
    %3 = vector.load %arg9[%c17, %c0_3, %c0_4] : memref<18x16x384xbf16, #tpu.memory_space<vmem>>, vector<1x16x384xbf16>
    tpu.vector_store %arg9[%c17, %c0_3, %c0_4], %2 {strides = array<i32>} : memref<18x16x384xbf16, #tpu.memory_space<vmem>>, vector<1x16x384xbf16>,
    %cst_5 = arith.constant 0.000000e+00 : bf16
    %4 = vector.broadcast %cst_5 : bf16 to vector<16x1x128xbf16>
    %c1 = arith.constant 1 : index
    %c0_6 = arith.constant 0 : index
    %c0_7 = arith.constant 0 : index
    %5 = vector.load %arg9[%c1, %c0_6, %c0_7] : memref<18x16x384xbf16, #tpu.memory_space<vmem>>, vector<16x1x128xbf16>
    tpu.vector_store %arg9[%c1, %c0_6, %c0_7], %4 {strides = array<i32>} : memref<18x16x384xbf16, #tpu.memory_space<vmem>>, vector<16x1x128xbf16>,
    %cst_8 = arith.constant 0.000000e+00 : bf16
    %6 = vector.broadcast %cst_8 : bf16 to vector<16x1x128xbf16>
    %c1_9 = arith.constant 1 : index
    %c15 = arith.constant 15 : index
    %c256 = arith.constant 256 : index
    %7 = vector.load %arg9[%c1_9, %c15, %c256] : memref<18x16x384xbf16, #tpu.memory_space<vmem>>, vector<16x1x128xbf16>
    tpu.vector_store %arg9[%c1_9, %c15, %c256], %6 {strides = array<i32>} : memref<18x16x384xbf16, #tpu.memory_space<vmem>>, vector<16x1x128xbf16>,
    %cst_10 = arith.constant 0.000000e+00 : bf16
    %8 = vector.broadcast %cst_10 : bf16 to vector<1x16x384xbf16>
    %c0_11 = arith.constant 0 : index
    %c0_12 = arith.constant 0 : index
    %c0_13 = arith.constant 0 : index
    %9 = vector.load %arg10[%c0_11, %c0_12, %c0_13] : memref<18x16x384xbf16, #tpu.memory_space<vmem>>, vector<1x16x384xbf16>
    tpu.vector_store %arg10[%c0_11, %c0_12, %c0_13], %8 {strides = array<i32>} : memref<18x16x384xbf16, #tpu.memory_space<vmem>>, vector<1x16x384xbf16>,
    %cst_14 = arith.constant 0.000000e+00 : bf16
    %10 = vector.broadcast %cst_14 : bf16 to vector<1x16x384xbf16>
    %c17_15 = arith.constant 17 : index
    %c0_16 = arith.constant 0 : index
    %c0_17 = arith.constant 0 : index
    %11 = vector.load %arg10[%c17_15, %c0_16, %c0_17] : memref<18x16x384xbf16, #tpu.memory_space<vmem>>, vector<1x16x384xbf16>
    tpu.vector_store %arg10[%c17_15, %c0_16, %c0_17], %10 {strides = array<i32>} : memref<18x16x384xbf16, #tpu.memory_space<vmem>>, vector<1x16x384xbf16>,
    %cst_18 = arith.constant 0.000000e+00 : bf16
    %12 = vector.broadcast %cst_18 : bf16 to vector<16x1x128xbf16>
    %c1_19 = arith.constant 1 : index
    %c0_20 = arith.constant 0 : index
    %c0_21 = arith.constant 0 : index
    %13 = vector.load %arg10[%c1_19, %c0_20, %c0_21] : memref<18x16x384xbf16, #tpu.memory_space<vmem>>, vector<16x1x128xbf16>
    tpu.vector_store %arg10[%c1_19, %c0_20, %c0_21], %12 {strides = array<i32>} : memref<18x16x384xbf16, #tpu.memory_space<vmem>>, vector<16x1x128xbf16>,
    %cst_22 = arith.constant 0.000000e+00 : bf16
    %14 = vector.broadcast %cst_22 : bf16 to vector<16x1x128xbf16>
    %c1_23 = arith.constant 1 : index
    %c15_24 = arith.constant 15 : index
    %c256_25 = arith.constant 256 : index
    %15 = vector.load %arg10[%c1_23, %c15_24, %c256_25] : memref<18x16x384xbf16, #tpu.memory_space<vmem>>, vector<16x1x128xbf16>
    tpu.vector_store %arg10[%c1_23, %c15_24, %c256_25], %14 {strides = array<i32>} : memref<18x16x384xbf16, #tpu.memory_space<vmem>>, vector<16x1x128xbf16>,
    %c0_26 = arith.constant 0 : index
    %c0_27 = arith.constant 0 : index
    %c0_28 = arith.constant 0 : index
    %c0_29 = arith.constant 0 : index
    %16 = vector.load %arg1[%c0_26, %c0_27, %c0_28, %c0_29] : memref<1x16x16x128xf32, #tpu.memory_space<vmem>>, vector<1x16x15x128xf32>
    %17 = vector.shape_cast %16 : vector<1x16x15x128xf32> to vector<16x15x128xf32>
    %18 = arith.truncf %17 : vector<16x15x128xf32> to vector<16x15x128xbf16>
    %c1_30 = arith.constant 1 : index
    %c1_31 = arith.constant 1 : index
    %c0_32 = arith.constant 0 : index
    %19 = vector.load %arg9[%c1_30, %c1_31, %c0_32] : memref<18x16x384xbf16, #tpu.memory_space<vmem>>, vector<16x15x128xbf16>
    tpu.vector_store %arg9[%c1_30, %c1_31, %c0_32], %18 {strides = array<i32>} : memref<18x16x384xbf16, #tpu.memory_space<vmem>>, vector<16x15x128xbf16>,
    %c0_33 = arith.constant 0 : index
    %c0_34 = arith.constant 0 : index
    %c0_35 = arith.constant 0 : index
    %c0_36 = arith.constant 0 : index
    %20 = vector.load %arg1[%c0_33, %c0_34, %c0_35, %c0_36] : memref<1x16x16x128xf32, #tpu.memory_space<vmem>>, vector<1x16x16x128xf32>
    %21 = vector.shape_cast %20 : vector<1x16x16x128xf32> to vector<16x16x128xf32>
    %22 = arith.truncf %21 : vector<16x16x128xf32> to vector<16x16x128xbf16>
    %c1_37 = arith.constant 1 : index
    %c0_38 = arith.constant 0 : index
    %c128 = arith.constant 128 : index
    %23 = vector.load %arg9[%c1_37, %c0_38, %c128] : memref<18x16x384xbf16, #tpu.memory_space<vmem>>, vector<16x16x128xbf16>
    tpu.vector_store %arg9[%c1_37, %c0_38, %c128], %22 {strides = array<i32>} : memref<18x16x384xbf16, #tpu.memory_space<vmem>>, vector<16x16x128xbf16>,
    %c0_39 = arith.constant 0 : index
    %c0_40 = arith.constant 0 : index
    %c1_41 = arith.constant 1 : index
    %c0_42 = arith.constant 0 : index
    %24 = vector.load %arg1[%c0_39, %c0_40, %c1_41, %c0_42] : memref<1x16x16x128xf32, #tpu.memory_space<vmem>>, vector<1x16x15x128xf32>
    %25 = vector.shape_cast %24 : vector<1x16x15x128xf32> to vector<16x15x128xf32>
    %26 = arith.truncf %25 : vector<16x15x128xf32> to vector<16x15x128xbf16>
    %c1_43 = arith.constant 1 : index
    %c0_44 = arith.constant 0 : index
    %c256_45 = arith.constant 256 : index
    %27 = vector.load %arg9[%c1_43, %c0_44, %c256_45] : memref<18x16x384xbf16, #tpu.memory_space<vmem>>, vector<16x15x128xbf16>
    tpu.vector_store %arg9[%c1_43, %c0_44, %c256_45], %26 {strides = array<i32>} : memref<18x16x384xbf16, #tpu.memory_space<vmem>>, vector<16x15x128xbf16>,
    %c0_46 = arith.constant 0 : index
    %c0_47 = arith.constant 0 : index
    %28 = vector.load %arg3[%c0_46, %c0_47] : memref<1x128xf32, #tpu.memory_space<vmem>>, vector<1x128xf32>
    %c0_48 = arith.constant 0 : index
    %c0_49 = arith.constant 0 : index
    %29 = vector.load %arg4[%c0_48, %c0_49] : memref<1x128xf32, #tpu.memory_space<vmem>>, vector<1x128xf32>
    %c0_50 = arith.constant 0 : index
    %c0_51 = arith.constant 0 : index
    %30 = vector.load %arg6[%c0_50, %c0_51] : memref<1x128xf32, #tpu.memory_space<vmem>>, vector<1x128xf32>
    %c0_52 = arith.constant 0 : index
    %c0_53 = arith.constant 0 : index
    %31 = vector.load %arg7[%c0_52, %c0_53] : memref<1x128xf32, #tpu.memory_space<vmem>>, vector<1x128xf32>
    %c0_i32 = arith.constant 0 : i32
    %c16_i32 = arith.constant 16 : i32
    %32 = arith.muli %c0_i32, %c16_i32 : i32
    %33 = tpu.assume_multiple %32, 16 : i32
    %34 = arith.index_cast %33 : i32 to index
    %c0_54 = arith.constant 0 : index
    %c0_55 = arith.constant 0 : index
    %35 = vector.load %arg9[%34, %c0_54, %c0_55] : memref<18x16x384xbf16, #tpu.memory_space<vmem>>, vector<16x16x384xbf16>
    %36 = vector.shape_cast %35 : vector<16x16x384xbf16> to vector<256x384xbf16>
    %c0_56 = arith.constant 0 : index
    %c0_57 = arith.constant 0 : index
    %c0_58 = arith.constant 0 : index
    %37 = vector.load %arg2[%c0_56, %c0_57, %c0_58] : memref<3x384x128xbf16, #tpu.memory_space<vmem>>, vector<1x384x128xbf16>
    %38 = vector.shape_cast %37 : vector<1x384x128xbf16> to vector<384x128xbf16>
    %cst_59 = arith.constant dense<0.000000e+00> : vector<256x128xf32>
    %39 = tpu.matmul %36, %38, %cst_59 {dimension_numbers = #tpu.dot_dimension_numbers<[1], [0], [0], [1], [0, 0, 1, 1], [], []>} : vector<256x384xbf16>, vector<384x128xbf16>, vector<256x128xf32> -> vector<256x128xf32>
    %c1_i32 = arith.constant 1 : i32
    %40 = arith.addi %33, %c1_i32 : i32
    %41 = arith.index_cast %40 : i32 to index
    %c0_60 = arith.constant 0 : index
    %c0_61 = arith.constant 0 : index
    %42 = vector.load %arg9[%41, %c0_60, %c0_61] : memref<18x16x384xbf16, #tpu.memory_space<vmem>>, vector<16x16x384xbf16>
    %43 = vector.shape_cast %42 : vector<16x16x384xbf16> to vector<256x384xbf16>
    %c1_62 = arith.constant 1 : index
    %c0_63 = arith.constant 0 : index
    %c0_64 = arith.constant 0 : index
    %44 = vector.load %arg2[%c1_62, %c0_63, %c0_64] : memref<3x384x128xbf16, #tpu.memory_space<vmem>>, vector<1x384x128xbf16>
    %45 = vector.shape_cast %44 : vector<1x384x128xbf16> to vector<384x128xbf16>
    %cst_65 = arith.constant dense<0.000000e+00> : vector<256x128xf32>
    %46 = tpu.matmul %43, %45, %cst_65 {dimension_numbers = #tpu.dot_dimension_numbers<[1], [0], [0], [1], [0, 0, 1, 1], [], []>} : vector<256x384xbf16>, vector<384x128xbf16>, vector<256x128xf32> -> vector<256x128xf32>
    %47 = arith.addf %39, %46 : vector<256x128xf32>
    %c2_i32 = arith.constant 2 : i32
    %48 = arith.addi %33, %c2_i32 : i32
    %49 = arith.index_cast %48 : i32 to index
    %c0_66 = arith.constant 0 : index
    %c0_67 = arith.constant 0 : index
    %50 = vector.load %arg9[%49, %c0_66, %c0_67] : memref<18x16x384xbf16, #tpu.memory_space<vmem>>, vector<16x16x384xbf16>
    %51 = vector.shape_cast %50 : vector<16x16x384xbf16> to vector<256x384xbf16>
    %c2 = arith.constant 2 : index
    %c0_68 = arith.constant 0 : index
    %c0_69 = arith.constant 0 : index
    %52 = vector.load %arg2[%c2, %c0_68, %c0_69] : memref<3x384x128xbf16, #tpu.memory_space<vmem>>, vector<1x384x128xbf16>
    %53 = vector.shape_cast %52 : vector<1x384x128xbf16> to vector<384x128xbf16>
    %cst_70 = arith.constant dense<0.000000e+00> : vector<256x128xf32>
    %54 = tpu.matmul %51, %53, %cst_70 {dimension_numbers = #tpu.dot_dimension_numbers<[1], [0], [0], [1], [0, 0, 1, 1], [], []>} : vector<256x384xbf16>, vector<384x128xbf16>, vector<256x128xf32> -> vector<256x128xf32>
    %55 = arith.addf %47, %54 : vector<256x128xf32>
    %56 = vector.broadcast %28 : vector<1x128xf32> to vector<256x128xf32>
    %57 = arith.mulf %55, %56 : vector<256x128xf32>
    %58 = vector.broadcast %29 : vector<1x128xf32> to vector<256x128xf32>
    %59 = arith.addf %57, %58 : vector<256x128xf32>
    %cst_71 = arith.constant 0.000000e+00 : f32
    %60 = vector.broadcast %cst_71 : f32 to vector<256x128xf32>
    %61 = arith.maximumf %59, %60 : vector<256x128xf32>
    %62 = vector.shape_cast %61 : vector<256x128xf32> to vector<16x16x128xf32>
    %63 = arith.truncf %62 : vector<16x16x128xf32> to vector<16x16x128xbf16>
    %64 = vector.extract_strided_slice %63 {offsets = [0, 0, 0], sizes = [16, 15, 128], strides = [1, 1, 1]} : vector<16x16x128xbf16> to vector<16x15x128xbf16>
    %c1_i32_72 = arith.constant 1 : i32
    %65 = arith.addi %33, %c1_i32_72 : i32
    %66 = arith.index_cast %65 : i32 to index
    %c1_73 = arith.constant 1 : index
    %c0_74 = arith.constant 0 : index
    %67 = vector.load %arg10[%66, %c1_73, %c0_74] : memref<18x16x384xbf16, #tpu.memory_space<vmem>>, vector<16x15x128xbf16>
    tpu.vector_store %arg10[%66, %c1_73, %c0_74], %64 {strides = array<i32>} : memref<18x16x384xbf16, #tpu.memory_space<vmem>>, vector<16x15x128xbf16>,
    %c1_i32_75 = arith.constant 1 : i32
    %68 = arith.addi %33, %c1_i32_75 : i32
    %69 = arith.index_cast %68 : i32 to index
    %c0_76 = arith.constant 0 : index
    %c128_77 = arith.constant 128 : index
    %70 = vector.load %arg10[%69, %c0_76, %c128_77] : memref<18x16x384xbf16, #tpu.memory_space<vmem>>, vector<16x16x128xbf16>
    tpu.vector_store %arg10[%69, %c0_76, %c128_77], %63 {strides = array<i32>} : memref<18x16x384xbf16, #tpu.memory_space<vmem>>, vector<16x16x128xbf16>,
    %71 = vector.extract_strided_slice %63 {offsets = [0, 1, 0], sizes = [16, 15, 128], strides = [1, 1, 1]} : vector<16x16x128xbf16> to vector<16x15x128xbf16>
    %c1_i32_78 = arith.constant 1 : i32
    %72 = arith.addi %33, %c1_i32_78 : i32
    %73 = arith.index_cast %72 : i32 to index
    %c0_79 = arith.constant 0 : index
    %c256_80 = arith.constant 256 : index
    %74 = vector.load %arg10[%73, %c0_79, %c256_80] : memref<18x16x384xbf16, #tpu.memory_space<vmem>>, vector<16x15x128xbf16>
    tpu.vector_store %arg10[%73, %c0_79, %c256_80], %71 {strides = array<i32>} : memref<18x16x384xbf16, #tpu.memory_space<vmem>>, vector<16x15x128xbf16>,
    %c1_i32_81 = arith.constant 1 : i32
    %c0_i32_82 = arith.constant 0 : i32
    %c16_i32_83 = arith.constant 16 : i32
    %75 = arith.muli %c0_i32_82, %c16_i32_83 : i32
    %76 = tpu.assume_multiple %75, 16 : i32
    %77 = arith.index_cast %76 : i32 to index
    %c0_84 = arith.constant 0 : index
    %c0_85 = arith.constant 0 : index
    %78 = vector.load %arg10[%77, %c0_84, %c0_85] : memref<18x16x384xbf16, #tpu.memory_space<vmem>>, vector<16x16x384xbf16>
    %79 = vector.shape_cast %78 : vector<16x16x384xbf16> to vector<256x384xbf16>
    %c0_86 = arith.constant 0 : index
    %c0_87 = arith.constant 0 : index
    %c0_88 = arith.constant 0 : index
    %80 = vector.load %arg5[%c0_86, %c0_87, %c0_88] : memref<3x384x128xbf16, #tpu.memory_space<vmem>>, vector<1x384x128xbf16>
    %81 = vector.shape_cast %80 : vector<1x384x128xbf16> to vector<384x128xbf16>
    %cst_89 = arith.constant dense<0.000000e+00> : vector<256x128xf32>
    %82 = tpu.matmul %79, %81, %cst_89 {dimension_numbers = #tpu.dot_dimension_numbers<[1], [0], [0], [1], [0, 0, 1, 1], [], []>} : vector<256x384xbf16>, vector<384x128xbf16>, vector<256x128xf32> -> vector<256x128xf32>
    %c1_i32_90 = arith.constant 1 : i32
    %83 = arith.addi %76, %c1_i32_90 : i32
    %84 = arith.index_cast %83 : i32 to index
    %c0_91 = arith.constant 0 : index
    %c0_92 = arith.constant 0 : index
    %85 = vector.load %arg10[%84, %c0_91, %c0_92] : memref<18x16x384xbf16, #tpu.memory_space<vmem>>, vector<16x16x384xbf16>
    %86 = vector.shape_cast %85 : vector<16x16x384xbf16> to vector<256x384xbf16>
    %c1_93 = arith.constant 1 : index
    %c0_94 = arith.constant 0 : index
    %c0_95 = arith.constant 0 : index
    %87 = vector.load %arg5[%c1_93, %c0_94, %c0_95] : memref<3x384x128xbf16, #tpu.memory_space<vmem>>, vector<1x384x128xbf16>
    %88 = vector.shape_cast %87 : vector<1x384x128xbf16> to vector<384x128xbf16>
    %cst_96 = arith.constant dense<0.000000e+00> : vector<256x128xf32>
    %89 = tpu.matmul %86, %88, %cst_96 {dimension_numbers = #tpu.dot_dimension_numbers<[1], [0], [0], [1], [0, 0, 1, 1], [], []>} : vector<256x384xbf16>, vector<384x128xbf16>, vector<256x128xf32> -> vector<256x128xf32>
    %90 = arith.addf %82, %89 : vector<256x128xf32>
    %c2_i32_97 = arith.constant 2 : i32
    %91 = arith.addi %76, %c2_i32_97 : i32
    %92 = arith.index_cast %91 : i32 to index
    %c0_98 = arith.constant 0 : index
    %c0_99 = arith.constant 0 : index
    %93 = vector.load %arg10[%92, %c0_98, %c0_99] : memref<18x16x384xbf16, #tpu.memory_space<vmem>>, vector<16x16x384xbf16>
    %94 = vector.shape_cast %93 : vector<16x16x384xbf16> to vector<256x384xbf16>
    %c2_100 = arith.constant 2 : index
    %c0_101 = arith.constant 0 : index
    %c0_102 = arith.constant 0 : index
    %95 = vector.load %arg5[%c2_100, %c0_101, %c0_102] : memref<3x384x128xbf16, #tpu.memory_space<vmem>>, vector<1x384x128xbf16>
    %96 = vector.shape_cast %95 : vector<1x384x128xbf16> to vector<384x128xbf16>
    %cst_103 = arith.constant dense<0.000000e+00> : vector<256x128xf32>
    %97 = tpu.matmul %94, %96, %cst_103 {dimension_numbers = #tpu.dot_dimension_numbers<[1], [0], [0], [1], [0, 0, 1, 1], [], []>} : vector<256x384xbf16>, vector<384x128xbf16>, vector<256x128xf32> -> vector<256x128xf32>
    %98 = arith.addf %90, %97 : vector<256x128xf32>
    %c0_104 = arith.constant 0 : index
    %99 = arith.index_cast %76 : i32 to index
    %c0_105 = arith.constant 0 : index
    %c0_106 = arith.constant 0 : index
    %100 = vector.load %arg1[%c0_104, %99, %c0_105, %c0_106] : memref<1x16x16x128xf32, #tpu.memory_space<vmem>>, vector<1x16x16x128xf32>
    %101 = vector.shape_cast %100 : vector<1x16x16x128xf32> to vector<16x16x128xf32>
    %102 = vector.shape_cast %101 : vector<16x16x128xf32> to vector<256x128xf32>
    %103 = vector.broadcast %30 : vector<1x128xf32> to vector<256x128xf32>
    %104 = arith.mulf %98, %103 : vector<256x128xf32>
    %105 = vector.broadcast %31 : vector<1x128xf32> to vector<256x128xf32>
    %106 = arith.addf %104, %105 : vector<256x128xf32>
    %107 = arith.addf %106, %102 : vector<256x128xf32>
    %cst_107 = arith.constant 0.000000e+00 : f32
    %108 = vector.broadcast %cst_107 : f32 to vector<256x128xf32>
    %109 = arith.maximumf %107, %108 : vector<256x128xf32>
    %110 = vector.shape_cast %109 : vector<256x128xf32> to vector<16x16x128xf32>
    %c0_108 = arith.constant 0 : index
    %111 = arith.index_cast %76 : i32 to index
    %c0_109 = arith.constant 0 : index
    %c0_110 = arith.constant 0 : index
    %112 = vector.load %arg8[%c0_108, %111, %c0_109, %c0_110] : memref<1x16x16x128xf32, #tpu.memory_space<vmem>>, vector<1x16x16x128xf32>
    %113 = vector.shape_cast %112 : vector<1x16x16x128xf32> to vector<16x16x128xf32>
    %114 = vector.shape_cast %110 : vector<16x16x128xf32> to vector<1x16x16x128xf32>
    tpu.vector_store %arg8[%c0_108, %111, %c0_109, %c0_110], %114 {strides = array<i32>} : memref<1x16x16x128xf32, #tpu.memory_space<vmem>>, vector<1x16x16x128xf32>,
    %c1_i32_111 = arith.constant 1 : i32
    return
  }
  func.func @transform_0(%arg0: i32) -> (i32, i32, i32, i32) {
    %c0_i32 = arith.constant 0 : i32
    %c0_i32_0 = arith.constant 0 : i32
    %c0_i32_1 = arith.constant 0 : i32
    %c0_i32_2 = arith.constant 0 : i32
    return %arg0, %c0_i32, %c0_i32_0, %c0_i32_1 : i32, i32, i32, i32
  }
  func.func @transform_1(%arg0: i32) -> (i32, i32, i32) {
    %c0_i32 = arith.constant 0 : i32
    %c0_i32_0 = arith.constant 0 : i32
    %c0_i32_1 = arith.constant 0 : i32
    %c0_i32_2 = arith.constant 0 : i32
    return %c0_i32, %c0_i32_0, %c0_i32_1 : i32, i32, i32
  }
  func.func @transform_2(%arg0: i32) -> (i32, i32) {
    %c0_i32 = arith.constant 0 : i32
    %c0_i32_0 = arith.constant 0 : i32
    %c0_i32_1 = arith.constant 0 : i32
    return %c0_i32, %c0_i32_0 : i32, i32
  }
  func.func @transform_3(%arg0: i32) -> (i32, i32) {
    %c0_i32 = arith.constant 0 : i32
    %c0_i32_0 = arith.constant 0 : i32
    %c0_i32_1 = arith.constant 0 : i32
    return %c0_i32, %c0_i32_0 : i32, i32
  }
  func.func @transform_4(%arg0: i32) -> (i32, i32, i32) {
    %c0_i32 = arith.constant 0 : i32
    %c0_i32_0 = arith.constant 0 : i32
    %c0_i32_1 = arith.constant 0 : i32
    %c0_i32_2 = arith.constant 0 : i32
    return %c0_i32, %c0_i32_0, %c0_i32_1 : i32, i32, i32
  }
  func.func @transform_5(%arg0: i32) -> (i32, i32) {
    %c0_i32 = arith.constant 0 : i32
    %c0_i32_0 = arith.constant 0 : i32
    %c0_i32_1 = arith.constant 0 : i32
    return %c0_i32, %c0_i32_0 : i32, i32
  }
  func.func @transform_6(%arg0: i32) -> (i32, i32) {
    %c0_i32 = arith.constant 0 : i32
    %c0_i32_0 = arith.constant 0 : i32
    %c0_i32_1 = arith.constant 0 : i32
    return %c0_i32, %c0_i32_0 : i32, i32
  }
  func.func @transform_7(%arg0: i32) -> (i32, i32, i32, i32) {
    %c0_i32 = arith.constant 0 : i32
    %c0_i32_0 = arith.constant 0 : i32
    %c0_i32_1 = arith.constant 0 : i32
    %c0_i32_2 = arith.constant 0 : i32
    return %arg0, %c0_i32, %c0_i32_0, %c0_i32_1 : i32, i32, i32, i32
  }
}

</mosaic_0001>

<bundles_post_ra>
// kernel: tpu_custom_call.1
= control target key start
LH: loop header
LB: loop body
LE: loop exit
PB: predicated region body
PF: predicated region fallthrough
CT: control target
= control target key end

     0   :  { %s11146_s0 = inlined_call_operand.hbm [shape: f32[2,16,16,128], index: 0, kind: input, shape index: {}]   ;;  %s11147_s1 = inlined_call_operand.hbm [shape: bf16[3,384,128], index: 1, kind: input, shape index: {}]   ;;  %s11148_s2 = inlined_call_operand.vmem [shape: f32[1,128], index: 2, kind: input, shape index: {}]   ;;  %s11149_s3 = inlined_call_operand.vmem [shape: f32[1,128], index: 3, kind: input, shape index: {}]   ;;  %s11150_s4 = inlined_call_operand.hbm [shape: bf16[3,384,128], index: 4, kind: input, shape index: {}]   ;;  %s11151_s5 = inlined_call_operand.vmem [shape: f32[1,128], index: 5, kind: input, shape index: {}]   ;;  %s11152_s6 = inlined_call_operand.vmem [shape: f32[1,128], index: 6, kind: input, shape index: {}]   ;;  %s11153_s7 = inlined_call_operand.hbm [shape: f32[2,16,16,128], index: 7, kind: output, shape index: {}]  }
   0x1   :  { %11154 = sst [smem:[#allocation27_spill]] %s11147_s1 }
   0x2   :  { %12 = vsyncpa [#allocation5], 0 }
   0x3   :  { %14 = vsyncpa [#allocation5 + $0x1], 0 }
   0x4   :  { %15 = vsyncpa [#allocation8], 0 }
   0x5   :  { %16 = vsyncpa [#allocation6], 0 }
   0x6   :  { %18 = vsyncpa [#allocation6 + $0x1], 0  ;;  %s9523_s24 = smov 0   ;;  %s9525_s25 = smov 0  }
   0x7   :  { %s9527_s26 = smov 0   ;;  %s9529_s27 = smov 0  }
   0x8 LB: > { %s9544_s28 = sadd.s32 4294967295, %s9472_s27   ;;  %s7034_s29 = sadd.s32 4294967294, %s9472_s27   ;;  %s9472_s27 = sphi %s9529_s27, %s11203_s27   ;;  %s9468_s26 = sphi %s9527_s26, %s11202_s26   ;;  %s9464_s25 = sphi %s9525_s25, %s11201_s25   ;;  %s9460_s24 = sphi %s9523_s24, %s11200_s24  }
   0x9   : > { %p44_p0 = scmp.ne.s32.totalorder %s9464_s25, %s9460_s24  ;;  %p45_p1 = scmp.eq.s32.totalorder %s9544_s28, 0 }
   0xa   : > { %p194_p2 = scmp.eq.s32.totalorder %s9544_s28, 1  ;;  %p200_p3 = scmp.eq.s32.totalorder %s7034_s29, 1 }
   0xb   : > { %p9553_p4 = por %p45_p1, %p44_p0  ;;  %p7035_p5 = scmp.ge.s32.totalorder %s9472_s27, 1 }
   0xc   : > { %p9558_p6 = por %p200_p3, %p44_p0  ;;  %p207_p7 = scmp.lt.s32.totalorder %s9472_s27, 3 }
   0xd   : > { %s11157_s1 = sld [smem:[#allocation27_spill]]  ;;  %s9474_s13 = smov [#allocation7]  }
   0xe   : > { %p9566_p8 = pnand %p7035_p5, %p207_p7  ;;  %s220_s14 = sshll.u32 %s9474_s13, 4  ;;  %s221_s14 = int_to_ptr.vmem [resolvable:$true] %s220_s14 }
   0xf   : > { %s238_s17 = sshll.u32 %s11150_s4, 4  ;;  %s9475_s18 = smov 64   ;;  %s239_s17 = int_to_ptr.hbm [resolvable:$true] %s238_s17 }
  0x10   : > { %p9242_p9 = pneg %p9566_p8  ;;  %s9476_s19 = smov 4  }
  0x11   : > { %s9477_s20 = smov [#allocation9]   ;;  %s9579_s22 = sadd.s32 1, %s9472_s27  }
  0x12   : > { %p9243_p10 = pnand %p9242_p9, %p45_p1  ;;  %s240_s21 = sshll.u32 %s9477_s20, 4  ;;  %s241_s21 = int_to_ptr.vmem [resolvable:$true] %s240_s21 }
  0x13   : > { %s218_s11 = sshll.u32 %s11157_s1, 4  ;;  %s31_s23 = sadd.s32 1, %s9468_s26  ;;  %s219_s11 = int_to_ptr.hbm [resolvable:$true] %s218_s11 }
  0x14   : > { %9245 = dma.hbm_to_vmem [thread:$0]  (!%p9243_p10), %s219_s11, 9216, %s221_s14, [#allocation8], %s9475_s18, %s9475_s18, %s9476_s19  }
  0x15   : > { %9248 = dma.hbm_to_vmem [thread:$0]  (!%p9243_p10), %s239_s17, 9216, %s241_s21, [#allocation8], %s9475_s18, %s9475_s18, %s9476_s19  }
  0x16   : > { %s28_s29 = ssub.s32 %s9472_s27, %s9579_s22  ;;  %p38_p12 = scmp.ne.s32.totalorder %s9468_s26, %s9464_s25 }
  0x17   : > { %p29_p13 = scmp.eq.s32.totalorder %s28_s29, 0  ;;  %p39_p0 = scmp.eq.s32.totalorder %s9472_s27, 0 }
  0x18   : > { %p9589_p3 = por %p194_p2, %p38_p12  ;;  %p9259_p5 = scmp.lt.s32.totalorder %s9472_s27, 2 }
  0x19   : > { %s9595_s10 = scalar_select %p29_p13, %s9468_s26, %s31_s23  }
  0x1a   : > { %p40_p7 = por %p39_p0, %p38_p12  ;;  %s260_s11 = sand.u32 1, %s9468_s26  }
  0x1b   : > { %s7039_s13 = sshll.u32 %s260_s11, 8  ;;  %s8780_s14 = sshll.u32 %s9472_s27, 8 }
  0x1c   : > { %s269_s17 = scalar_lea.hbm %s11146_s0, %s8780_s14  ;;  %s264_s18 = scalar_lea.vmem [#allocation4], %s7039_s13 }
  0x1d   : > { %s272_s19 = sshll.u32 %s264_s18, 4  ;;  %s270_s20 = sshll.u32 %s269_s17, 4  ;;  %s273_s19 = int_to_ptr.vmem [resolvable:$true] %s272_s19  ;;  %s271_s20 = int_to_ptr.hbm [resolvable:$true] %s270_s20 }
  0x1e   : > { %p9602_p2 = pnand %p9259_p5, %p40_p7  ;;  %s261_s23 = scalar_lea.sflag [#allocation5], %s260_s11 }
  0x1f   : > { %s9372_s29 = sshra.s32 %s271_s20, 4  ;;  %s9379_s15 = scalar_lea.hbm %s11146_s0, 512  ;;  %s9373_s29 = int_to_ptr.hbm [resolvable:$true] %s9372_s29 }
  0x20   : > { %s9374_s1 = scalar_lea.hbm %s9373_s29, 256  ;;  %p9376_p10 = pneg %p9602_p2 }
  0x21   : > { %p9375_p9 = scmp.ne.s32.totalorder %s9373_s29, %s9374_s1  ;;  %p9380_p0 = scmp.lt.s32.totalorder %s9373_s29, %s11146_s0 }
  0x22   : > { %p9381_p5 = scmp.lt.s32.totalorder %s9379_s15, %s9374_s1 }
  0x23   : > { %p9377_p12 = pnand %p9376_p10, %p9375_p9 }
  0x24   : > { %p9382_p7 = por %p9381_p5, %p9380_p0 }
  0x25   : > { %p9378_p13 = pneg %p9377_p12 }
  0x27   : > { %p9383_p11 = pnand %p9382_p7, %p9378_p13 }
  0x29   : > { %9386 = shalt.err (!%p9383_p11)
}
  0x2a   : > { %s9478_s11 = smov 128   ;;  %s9479_s18 = smov 8  }
  0x2b   : > { %9252 = dma.hbm_to_vmem [thread:$0]  (!%p9602_p2), %s271_s20, 4096, %s273_s19, %s261_s23, %s9478_s11, %s9478_s11, %s9479_s18  }
  0x2c   : > { %284 = sbr.rel (%p9566_p8) target bundleno = 1548 (0x60c), region = 48 }
  0x31   : > { %s9619_s14 = sand.u32 1, %s9464_s25  }
  0x32   : > { %s7043_s29 = sshll.u32 %s9619_s14, 8  ;;  %s287_s1 = scalar_lea.sflag [#allocation5], %s9619_s14 }
  0x33   : > { %s9625_s13 = scalar_lea.vmem [#allocation4], %s7043_s29 }
  0x34   : > { %9447 = dma.done.wait (%p9553_p4), %s287_s1, 4096  }
  0x35   : > { %9449 = vsyncadd (%p9553_p4), %s287_s1, 4294963200 }
  0x36   : > { %9451 = dma.done.wait (%p45_p1), [#allocation8], 18432  }
  0x37   : > { %9453 = vsyncadd (%p45_p1), [#allocation8], 4294948864  ;;  %v8908_v0 = vld [vmem:[#allocation7 + $0xf8] sm:$0xff]  ;;  %vm343_vm0 = vcmask 1040384   ;;  %vm344_vm1 = vsmask.f32 256 }
  0x38   : > { %v8916_v1 = vld [vmem:[#allocation7 + $0x138] sm:$0xff]  ;;  %1834 = vmatpush.bf16.msra.mxu0 %v8908_v0  ;;  %9214 = vmatpush.bf16.msra.mxu2 %v8908_v0  ;;  %v8907_v2 = vld [vmem:[#allocation7 + $0xf0] sm:$0xff]  ;;  %vm9636_vm2 = vmand %vm343_vm0, %vm344_vm1  ;;  %vm615_vm3 = vsmask.f32 4368  ;;  %vm905_vm4 = vcmask 1043456   ;;  %vm394_vm8 = vcmask 1043459  }
  0x39   : > { %1923 = vmatpush.bf16.msra.mxu1 %v8916_v1  ;;  %9222 = vmatpush.bf16.msra.mxu3 %v8916_v1  ;;  %v8915_v3 = vld [vmem:[#allocation7 + $0x130] sm:$0xff]  ;;  %v8906_v5 = vld [vmem:[#allocation7 + $0xe8] sm:$0xff]  ;;  %v346_v6 = vld [vmem:[#allocation2 + $0x18] sm:$0x1]  ;;  %vm906_vm5 = vsmask.f32 7938 }
  0x3a   : > { %v551_v7 = vld [vmem:[%s9625_s13] sm:$0xff]  ;;  %v8914_v8 = vld [vmem:[#allocation7 + $0x128] sm:$0xff]  ;;  %v347_v9 = vsel %vm9636_vm2, 0, %v346_v6  ;;  %v370_v12 = vld [vmem:[#allocation2 + $0xd8] sm:$0x1]  ;;  %s10872_s21 = scalar_lea.vmem [#allocation10], %s7043_s29 }
  0x3b   : > { %v552_v10 = vld [vmem:[%s9625_s13 + $0x8] sm:$0x7f]  ;;  %v583_v11 = vpack.c.bf16 %v551_v7, %v551_v7  ;;  %348 = vst [vmem:[#allocation2 + $0x18] sm:$0x1] %v347_v9  ;;  %v371_v14 = vsel %vm9636_vm2, 0, %v370_v12  ;;  %v567_v15 = vld [vmem:[%s9625_s13 + $0x80] sm:$0xff]  ;;  %vm9652_vm6 = vmor %vm344_vm1, %vm615_vm3 }
  0x3c   : > { %1835 = vmatpush.bf16.msra.mxu0 %v8907_v2  ;;  %9215 = vmatpush.bf16.msra.mxu2 %v8907_v2  ;;  %v584_v13 = vpack.c.bf16 %v552_v10, %v552_v10  ;;  %v568_v16 = vld [vmem:[%s9625_s13 + $0x88] sm:$0x7f]  ;;  %372 = vst [vmem:[#allocation2 + $0xd8] sm:$0x1] %v371_v14  ;;  %v599_v19 = vpack.c.bf16 %v567_v15, %v567_v15  ;;  %v8905_v23 = vld [vmem:[#allocation7 + $0xe0] sm:$0xff]  ;;  %v553_v36 = vld [vmem:[%s9625_s13 + $0x10] sm:$0xff] }
  0x3d   : > { %1924 = vmatpush.bf16.msra.mxu1 %v8915_v3  ;;  %9223 = vmatpush.bf16.msra.mxu3 %v8915_v3  ;;  %v618_v17 = vshrl.u32 %v583_v11, 16  ;;  %v621_v18 = vshll.u32 %v583_v11, 16  ;;  %v600_v20 = vpack.c.bf16 %v568_v16, %v568_v16  ;;  %v973_v21 = vld [vmem:[%s9625_s13 + $0x8] sm:$0xff]  ;;  %1036 = vst [vmem:[#allocation2 + $0x1c] sm:$0xf] %v583_v11  ;;  %v8913_v32 = vld [vmem:[#allocation7 + $0x120] sm:$0xff]  ;;  %vm9659_vm7 = vmand %vm905_vm4, %vm906_vm5  ;;  %v585_v47 = vpack.c.bf16 %v553_v36, %v553_v36 }
  0x3e   : > { %v989_v22 = vld [vmem:[%s9625_s13 + $0x88] sm:$0xff]  ;;  %v626_v24 = vshrl.u32 %v584_v13, 16  ;;  %v629_v25 = vshll.u32 %v584_v13, 16  ;;  %v1005_v26 = vpack.c.bf16 %v973_v21, %v973_v21  ;;  %v746_v29 = vshrl.u32 %v599_v19, 16  ;;  %1052 = vst [vmem:[#allocation2 + $0xdc] sm:$0xf] %v599_v19 }
  0x3f   : > { %v1021_v27 = vpack.c.bf16 %v989_v22, %v989_v22  ;;  %v620_v28 = vrot.slane %v618_v17, 7  ;;  %v749_v30 = vshll.u32 %v599_v19, 16  ;;  %v754_v31 = vshrl.u32 %v600_v20, 16  ;;  %v8904_v37 = vld [vmem:[#allocation7 + $0xd8] sm:$0xff]  ;;  %v569_v43 = vld [vmem:[%s9625_s13 + $0x90] sm:$0xff]  ;;  %v8902_v17 = vld [vmem:[#allocation7 + $0xc8] sm:$0xff] }
  0x40   : > { %1836 = vmatpush.bf16.msra.mxu0 %v8906_v5  ;;  %9216 = vmatpush.bf16.msra.mxu2 %v8906_v5  ;;  %v628_v34 = vrot.slane %v626_v24, 7  ;;  %v757_v35 = vshll.u32 %v600_v20, 16  ;;  %1037 = vst [vmem:[#allocation2 + $0x28] sm:$0xf] %v1005_v26  ;;  %v748_v41 = vrot.slane %v746_v29, 7  ;;  %v9665_v49 = vpack.c.bf16 %v569_v43, %v569_v43  ;;  %v8912_v56 = vld [vmem:[#allocation7 + $0x118] sm:$0xff] }
  0x41   : > { %1925 = vmatpush.bf16.msra.mxu1 %v8914_v8  ;;  %9224 = vmatpush.bf16.msra.mxu3 %v8914_v8  ;;  %v623_v38 = vor.u32 %v621_v18, %v620_v28  ;;  %v624_v39 = vrot.slane %v620_v28, 4  ;;  %v756_v42 = vrot.slane %v754_v31, 7  ;;  %1053 = vst [vmem:[#allocation2 + $0xe8] sm:$0xf] %v1021_v27  ;;  %v349_v45 = vld [vmem:[#allocation2 + $0x30] sm:$0x1] }
  0x42   : > { %v631_v44 = vor.u32 %v629_v25, %v628_v34  ;;  %v554_v46 = vld [vmem:[%s9625_s13 + $0x18] sm:$0x7f]  ;;  %v373_v48 = vld [vmem:[#allocation2 + $0xf0] sm:$0x1]  ;;  %v751_v51 = vor.u32 %v749_v30, %v748_v41  ;;  %v752_v52 = vrot.slane %v748_v41, 4  ;;  %v350_v54 = vsel %vm9636_vm2, 0, %v349_v45 }
  0x43   : > { %v908_v50 = vld [vmem:[#allocation2 + $0x18] sm:$0xf]  ;;  %v759_v53 = vor.u32 %v757_v35, %v756_v42  ;;  %351 = vst [vmem:[#allocation2 + $0x30] sm:$0x1] %v350_v54  ;;  %v586_v60 = vpack.c.bf16 %v554_v46, %v554_v46  ;;  %v634_v0 = vshrl.u32 %v585_v47, 16  ;;  %v637_v1 = vshll.u32 %v585_v47, 16 }
  0x44   : > { %1837 = vmatpush.bf16.msra.mxu0 %v8905_v23  ;;  %9217 = vmatpush.bf16.msra.mxu2 %v8905_v23  ;;  %v570_v55 = vld [vmem:[%s9625_s13 + $0x98] sm:$0x7f]  ;;  %v632_v57 = vsel %vm9652_vm6, %v624_v39, %v631_v44  ;;  %v909_v58 = vsel %vm9659_vm7, %v623_v38, %v908_v50  ;;  %v8903_v6 = vld [vmem:[#allocation7 + $0xd0] sm:$0xff]  ;;  %v374_v8 = vsel %vm9636_vm2, 0, %v373_v48  ;;  %v762_v12 = vshrl.u32 %v9665_v49, 16  ;;  %v8910_v25 = vld [vmem:[#allocation7 + $0x108] sm:$0xff] }
  0x45   : > { %1926 = vmatpush.bf16.msra.mxu1 %v8913_v32  ;;  %9225 = vmatpush.bf16.msra.mxu3 %v8913_v32  ;;  %v940_v59 = vld [vmem:[#allocation2 + $0xd8] sm:$0xf]  ;;  %910 = vst [vmem:[#allocation2 + $0x18] sm:$0xf] %v909_v58  ;;  %v760_v62 = vsel %vm9652_vm6, %v752_v52, %v759_v53  ;;  %v642_v2 = vshrl.u32 %v586_v60, 16  ;;  %v645_v3 = vshll.u32 %v586_v60, 16  ;;  %v602_v5 = vpack.c.bf16 %v570_v55, %v570_v55 }
  0x46   : > { %v975_v61 = vld [vmem:[%s9625_s13 + $0x18] sm:$0xff]  ;;  %v941_v63 = vsel %vm9659_vm7, %v751_v51, %v940_v59  ;;  %911 = vst [vmem:[#allocation2 + $0x24] sm:$0xf] %v632_v57  ;;  %v636_v7 = vrot.slane %v634_v0, 7  ;;  %v8911_v10 = vld [vmem:[#allocation7 + $0x110] sm:$0xff]  ;;  %v765_v16 = vshll.u32 %v9665_v49, 16 }
  0x47   : > { %942 = vst [vmem:[#allocation2 + $0xd8] sm:$0xf] %v941_v63  ;;  %v1007_v9 = vpack.c.bf16 %v975_v61, %v975_v61  ;;  %v644_v11 = vrot.slane %v642_v2, 7  ;;  %v991_v13 = vld [vmem:[%s9625_s13 + $0x98] sm:$0xff]  ;;  %v764_v19 = vrot.slane %v762_v12, 7  ;;  %v770_v20 = vshrl.u32 %v602_v5, 16 }
  0x48   : > { %1838 = vmatpush.bf16.msra.mxu0 %v8904_v37  ;;  %9218 = vmatpush.bf16.msra.mxu2 %v8904_v37  ;;  %943 = vst [vmem:[#allocation2 + $0xe4] sm:$0xf] %v760_v62  ;;  %v639_v14 = vor.u32 %v637_v1, %v636_v7  ;;  %v640_v15 = vrot.slane %v636_v7, 4  ;;  %v773_v21 = vshll.u32 %v602_v5, 16  ;;  %v1023_v23 = vpack.c.bf16 %v991_v13, %v991_v13  ;;  %v352_v24 = vld [vmem:[#allocation2 + $0x48] sm:$0x1] }
  0x49   : > { %1927 = vmatpush.bf16.msra.mxu1 %v8912_v56  ;;  %9226 = vmatpush.bf16.msra.mxu3 %v8912_v56  ;;  %375 = vst [vmem:[#allocation2 + $0xf0] sm:$0x1] %v374_v8  ;;  %v647_v18 = vor.u32 %v645_v3, %v644_v11  ;;  %v767_v28 = vor.u32 %v765_v16, %v764_v19  ;;  %v768_v29 = vrot.slane %v764_v19, 4  ;;  %v555_v30 = vld [vmem:[%s9625_s13 + $0x20] sm:$0xff]  ;;  %v556_v31 = vld [vmem:[%s9625_s13 + $0x28] sm:$0x7f] }
  0x4a   : > { %1038 = vst [vmem:[#allocation2 + $0x34] sm:$0xf] %v585_v47  ;;  %v912_v22 = vld [vmem:[#allocation2 + $0x30] sm:$0xf]  ;;  %v8901_v32 = vld [vmem:[#allocation7 + $0xc0] sm:$0xff]  ;;  %v772_v36 = vrot.slane %v770_v20, 7  ;;  %v587_v38 = vpack.c.bf16 %v555_v30, %v555_v30  ;;  %v588_v39 = vpack.c.bf16 %v556_v31, %v556_v31 }
  0x4b   : > { %1039 = vst [vmem:[#allocation2 + $0x40] sm:$0xf] %v1007_v9  ;;  %v648_v26 = vsel %vm9652_vm6, %v640_v15, %v647_v18  ;;  %v913_v27 = vsel %vm9659_vm7, %v639_v14, %v912_v22  ;;  %v353_v37 = vsel %vm9636_vm2, 0, %v352_v24  ;;  %v8909_v41 = vld [vmem:[#allocation7 + $0x100] sm:$0xff]  ;;  %v8853_v43 = vld [vmem:[#allocation2 + $0x1c] sm:$0xf] }
  0x4c   : > { %1839 = vmatpush.bf16.msra.mxu0 %v8903_v6  ;;  %9219 = vmatpush.bf16.msra.mxu2 %v8903_v6  ;;  %v9690_v34 = vld [vmem:[#allocation2 + $0x18] sm:$0xf]  ;;  %914 = vst [vmem:[#allocation2 + $0x30] sm:$0xf] %v913_v27  ;;  %v7051_v44 = vld [vmem:[#allocation2 + $0x24] sm:$0xf0]  ;;  %v775_v50 = vor.u32 %v773_v21, %v772_v36 }
  0x4d   : > { %1928 = vmatpush.bf16.msra.mxu1 %v8911_v10  ;;  %9227 = vmatpush.bf16.msra.mxu3 %v8911_v10  ;;  %v9692_v35 = vld [vmem:[#allocation2 + $0x20] sm:$0xf0]  ;;  %v8877_v45 = vld [vmem:[#allocation2 + $0xdc] sm:$0xf]  ;;  %v7147_v46 = vld [vmem:[#allocation2 + $0xe4] sm:$0xf0]  ;;  %v7054_v1 = vor.u32 %v8853_v43, %v7051_v44 }
  0x4e   : > { %v7145_v42 = vld [vmem:[#allocation2 + $0xd8] sm:$0xf]  ;;  %915 = vst [vmem:[#allocation2 + $0x3c] sm:$0xf] %v648_v26  ;;  %v376_v47 = vld [vmem:[#allocation2 + $0x108] sm:$0x1]  ;;  %v776_v58 = vsel %vm9652_vm6, %v768_v29, %v775_v50  ;;  %v7050_v61 = vor.u32 %v9692_v35, %v9690_v34  ;;  %v7150_v2 = vor.u32 %v8877_v45, %v7147_v46 }
  0x4f   : > { %v8878_v48 = vld [vmem:[#allocation2 + $0xe0] sm:$0xf0]  ;;  %1054 = vst [vmem:[#allocation2 + $0xf4] sm:$0xf] %v9665_v49  ;;  %v650_v51 = vshrl.u32 %v587_v38, 16  ;;  %v653_v52 = vshll.u32 %v587_v38, 16 }
  0x50   : > { %1840 = vmatpush.bf16.msra.mxu0 %v8902_v17  ;;  %9220 = vmatpush.bf16.msra.mxu2 %v8902_v17  ;;  %v944_v53 = vld [vmem:[#allocation2 + $0xf0] sm:$0xf]  ;;  %1055 = vst [vmem:[#allocation2 + $0x100] sm:$0xf] %v1023_v23  ;;  %v658_v54 = vshrl.u32 %v588_v39, 16  ;;  %v661_v55 = vshll.u32 %v588_v39, 16  ;;  %v7146_v62 = vor.u32 %v8878_v48, %v7145_v42 }
  0x51   : > { %1929 = vmatpush.bf16.msra.mxu1 %v8910_v25  ;;  %9228 = vmatpush.bf16.msra.mxu3 %v8910_v25  ;;  %v8924_v56 = vld [vmem:[#allocation7 + $0x178] sm:$0xff]  ;;  %v945_v59 = vsel %vm9659_vm7, %v767_v28, %v944_v53  ;;  %354 = vst [vmem:[#allocation2 + $0x48] sm:$0x1] %v353_v37  ;;  %v652_v49 = vrot.slane %v650_v51, 7  ;;  %v377_v60 = vsel %vm9636_vm2, 0, %v376_v47  ;;  %v571_v0 = vld [vmem:[%s9625_s13 + $0xa0] sm:$0xff] }
  0x52   : > { %v8836_v57 = vld [vmem:[#allocation7 + $0x38] sm:$0xff]  ;;  %946 = vst [vmem:[#allocation2 + $0xf0] sm:$0xf] %v945_v59  ;;  %v660_v63 = vrot.slane %v658_v54, 7  ;;  %v572_v5 = vld [vmem:[%s9625_s13 + $0xa8] sm:$0x7f]  ;;  %v603_v9 = vpack.c.bf16 %v571_v0, %v571_v0 }
  0x53   : > { %947 = vst [vmem:[#allocation2 + $0xfc] sm:$0xf] %v776_v58  ;;  %v656_v3 = vrot.slane %v652_v49, 4  ;;  %v977_v6 = vld [vmem:[%s9625_s13 + $0x28] sm:$0xff]  ;;  %v8844_v7 = vld [vmem:[#allocation7 + $0x78] sm:$0xff]  ;;  %v604_v10 = vpack.c.bf16 %v572_v5, %v572_v5  ;;  %v557_v12 = vld [vmem:[%s9625_s13 + $0x30] sm:$0xff]  ;;  %v655_v15 = vor.u32 %v653_v52, %v652_v49 }
  0x54   : > { %1841 = vmatpush.bf16.msra.mxu0 %v8901_v32  ;;  %9221 = vmatpush.bf16.msra.mxu2 %v8901_v32  ;;  %v663_v8 = vor.u32 %v661_v55, %v660_v63  ;;  %378 = vst [vmem:[#allocation2 + $0x108] sm:$0x1] %v377_v60  ;;  %v993_v11 = vld [vmem:[%s9625_s13 + $0xa8] sm:$0xff]  ;;  %v8923_v13 = vld [vmem:[#allocation7 + $0x170] sm:$0xff]  ;;  %v1009_v16 = vpack.c.bf16 %v977_v6, %v977_v6  ;;  %v778_v19 = vshrl.u32 %v603_v9, 16  ;;  %v781_v20 = vshll.u32 %v603_v9, 16 }
  0x55   : > { %1930 = vmatpush.bf16.msra.mxu1 %v8909_v41  ;;  %9229 = vmatpush.bf16.msra.mxu3 %v8909_v41  ;;  %v8835_v14 = vld [vmem:[#allocation7 + $0x30] sm:$0xff]  ;;  %1040 = vst [vmem:[#allocation2 + $0x4c] sm:$0xf] %v587_v38  ;;  %v1025_v17 = vpack.c.bf16 %v993_v11, %v993_v11  ;;  %v786_v21 = vshrl.u32 %v604_v10, 16  ;;  %v789_v22 = vshll.u32 %v604_v10, 16  ;;  %v589_v24 = vpack.c.bf16 %v557_v12, %v557_v12  ;;  %v8922_v30 = vld [vmem:[#allocation7 + $0x168] sm:$0xff] }
  0x56   : > { %v664_v18 = vsel %vm9652_vm6, %v656_v3, %v663_v8  ;;  %1056 = vst [vmem:[#allocation2 + $0x10c] sm:$0xf] %v603_v9  ;;  %v355_v23 = vld [vmem:[#allocation2 + $0x60] sm:$0x1]  ;;  %v8843_v25 = vld [vmem:[#allocation7 + $0x70] sm:$0xff]  ;;  %v780_v27 = vrot.slane %v778_v19, 7 }
  0x57   : > { %1842 = vmatmul.bf16.vlgmr.msra.gmra.mxu0 %v7050_v61  ;;  %1882 = vmatmul.bf16.vlgmr.msra.gmra.mxu2 %v7146_v62  ;;  %919 = vst [vmem:[#allocation2 + $0x54] sm:$0xf] %v664_v18  ;;  %v788_v29 = vrot.slane %v786_v21, 7  ;;  %v8834_v31 = vld [vmem:[#allocation7 + $0x28] sm:$0xff]  ;;  %v356_v37 = vsel %vm9636_vm2, 0, %v355_v23  ;;  %v666_v39 = vshrl.u32 %v589_v24, 16 }
  0x58   : > { %2012 = vmatpush.bf16.msrb.mxu2 %v8924_v56  ;;  %1931 = vmatmul.bf16.vlgmr.msra.gmra.mxu1 %v7054_v1  ;;  %v916_v26 = vld [vmem:[#allocation2 + $0x48] sm:$0xf]  ;;  %1041 = vst [vmem:[#allocation2 + $0x58] sm:$0xf] %v1009_v16  ;;  %v783_v32 = vor.u32 %v781_v20, %v780_v27  ;;  %v784_v34 = vrot.slane %v780_v27, 4  ;;  %v669_v44 = vshll.u32 %v589_v24, 16 }
  0x59   : > { %2501 = vmatpush.bf16.msrb.mxu3 %v8836_v57  ;;  %2590 = vmatpush.bf16.msrb.mxu0 %v8844_v7  ;;  %v917_v28 = vsel %vm9659_vm7, %v655_v15, %v916_v26  ;;  %1057 = vst [vmem:[#allocation2 + $0x118] sm:$0xf] %v1025_v17  ;;  %v791_v35 = vor.u32 %v789_v22, %v788_v29  ;;  %v558_v38 = vld [vmem:[%s9625_s13 + $0x38] sm:$0x7f]  ;;  %v8842_v42 = vld [vmem:[#allocation7 + $0x68] sm:$0xff]  ;;  %v573_v45 = vld [vmem:[%s9625_s13 + $0xb0] sm:$0xff] }
  0x5a   : > { %1971 = vmatmul.bf16.vlgmr.msra.gmra.mxu3 %v7150_v2  ;;  %918 = vst [vmem:[#allocation2 + $0x48] sm:$0xf] %v917_v28  ;;  %v590_v43 = vpack.c.bf16 %v558_v38, %v558_v38  ;;  %v7061_v46 = vld [vmem:[#allocation2 + $0x30] sm:$0xf]  ;;  %v8857_v47 = vld [vmem:[#allocation2 + $0x38] sm:$0xf0]  ;;  %v605_v51 = vpack.c.bf16 %v573_v45, %v573_v45 }
  0x5b   : > { %v948_v36 = vld [vmem:[#allocation2 + $0x108] sm:$0xf]  ;;  %357 = vst [vmem:[#allocation2 + $0x60] sm:$0x1] %v356_v37  ;;  %v792_v48 = vsel %vm9652_vm6, %v784_v34, %v791_v35  ;;  %v668_v50 = vrot.slane %v666_v39, 7  ;;  %v979_v52 = vld [vmem:[%s9625_s13 + $0x38] sm:$0xff]  ;;  %v7062_v8 = vor.u32 %v8857_v47, %v7061_v46 }
  0x5c   : > { %2013 = vmatpush.bf16.msrb.mxu2 %v8923_v13  ;;  %v949_v41 = vsel %vm9659_vm7, %v783_v32, %v948_v36  ;;  %v7157_v53 = vld [vmem:[#allocation2 + $0xf0] sm:$0xf]  ;;  %v8856_v54 = vld [vmem:[#allocation2 + $0x34] sm:$0xf]  ;;  %v7063_v55 = vld [vmem:[#allocation2 + $0x3c] sm:$0xf0]  ;;  %v1011_v62 = vpack.c.bf16 %v979_v52, %v979_v52 }
  0x5d   : > { %2502 = vmatpush.bf16.msrb.mxu3 %v8835_v14  ;;  %2591 = vmatpush.bf16.msrb.mxu0 %v8843_v25  ;;  %950 = vst [vmem:[#allocation2 + $0x108] sm:$0xf] %v949_v41  ;;  %v8880_v56 = vld [vmem:[#allocation2 + $0xf4] sm:$0xf]  ;;  %v7159_v57 = vld [vmem:[#allocation2 + $0xfc] sm:$0xf0]  ;;  %v671_v63 = vor.u32 %v669_v44, %v668_v50  ;;  %v7066_v13 = vor.u32 %v8856_v54, %v7063_v55 }
  0x5e   : > { %951 = vst [vmem:[#allocation2 + $0x114] sm:$0xf] %v792_v48  ;;  %v674_v58 = vshrl.u32 %v590_v43, 16  ;;  %v677_v59 = vshll.u32 %v590_v43, 16  ;;  %v8881_v49 = vld [vmem:[#allocation2 + $0xf8] sm:$0xf0]  ;;  %v7162_v14 = vor.u32 %v8880_v56, %v7159_v57 }
  0x5f   : > { %v379_v60 = vld [vmem:[#allocation2 + $0x120] sm:$0x1]  ;;  %v794_v61 = vshrl.u32 %v605_v51, 16  ;;  %v672_v0 = vrot.slane %v668_v50, 4  ;;  %v574_v3 = vld [vmem:[%s9625_s13 + $0xb8] sm:$0x7f]  ;;  %v7158_v9 = vor.u32 %v8881_v49, %v7157_v53 }
  0x60   : > { %2014 = vmatpush.bf16.msrb.mxu2 %v8922_v30  ;;  %v676_v1 = vrot.slane %v674_v58, 7  ;;  %v380_v2 = vsel %vm9636_vm2, 0, %v379_v60  ;;  %v606_v5 = vpack.c.bf16 %v574_v3, %v574_v3  ;;  %v797_v7 = vshll.u32 %v605_v51, 16  ;;  %1042 = vst [vmem:[#allocation2 + $0x64] sm:$0xf] %v589_v24  ;;  %v995_v11 = vld [vmem:[%s9625_s13 + $0xb8] sm:$0xff] }
  0x61   : > { %2503 = vmatpush.bf16.msrb.mxu3 %v8834_v31  ;;  %2592 = vmatpush.bf16.msrb.mxu0 %v8842_v42  ;;  %381 = vst [vmem:[#allocation2 + $0x120] sm:$0x1] %v380_v2  ;;  %v796_v6 = vrot.slane %v794_v61, 7  ;;  %v358_v12 = vld [vmem:[#allocation2 + $0x78] sm:$0x1]  ;;  %v559_v18 = vld [vmem:[%s9625_s13 + $0x40] sm:$0xff]  ;;  %v1027_v22 = vpack.c.bf16 %v995_v11, %v995_v11 }
  0x62   : > { %v679_v10 = vor.u32 %v677_v59, %v676_v1  ;;  %v920_v15 = vld [vmem:[#allocation2 + $0x60] sm:$0xf]  ;;  %v802_v16 = vshrl.u32 %v606_v5, 16  ;;  %v805_v17 = vshll.u32 %v606_v5, 16  ;;  %1043 = vst [vmem:[#allocation2 + $0x70] sm:$0xf] %v1011_v62  ;;  %v591_v27 = vpack.c.bf16 %v559_v18, %v559_v18 }
  0x63   : > { %v921_v20 = vsel %vm9659_vm7, %v671_v63, %v920_v15  ;;  %v799_v21 = vor.u32 %v797_v7, %v796_v6  ;;  %v575_v23 = vld [vmem:[%s9625_s13 + $0xc0] sm:$0xff]  ;;  %v800_v24 = vrot.slane %v796_v6, 4  ;;  %v359_v26 = vsel %vm9636_vm2, 0, %v358_v12  ;;  %v560_v28 = vld [vmem:[%s9625_s13 + $0x48] sm:$0x7f]  ;;  %s9213_s29 = sshll.u32 %s9544_s28, 8 }
  0x64   : > { %v680_v19 = vsel %vm9652_vm6, %v672_v0, %v679_v10  ;;  %922 = vst [vmem:[#allocation2 + $0x60] sm:$0xf] %v921_v20  ;;  %v804_v25 = vrot.slane %v802_v16, 7  ;;  %v382_v29 = vld [vmem:[#allocation2 + $0x138] sm:$0x1]  ;;  %v607_v30 = vpack.c.bf16 %v575_v23, %v575_v23  ;;  %v8921_v32 = vld [vmem:[#allocation7 + $0x160] sm:$0xff]  ;;  %v592_v36 = vpack.c.bf16 %v560_v28, %v560_v28  ;;  %s6934_s16 = scalar_lea.hbm %s11153_s7, %s9213_s29 }
  0x65   : > { %923 = vst [vmem:[#allocation2 + $0x6c] sm:$0xf] %v680_v19  ;;  %v8833_v34 = vld [vmem:[#allocation7 + $0x20] sm:$0xff]  ;;  %v682_v37 = vshrl.u32 %v591_v27, 16  ;;  %v685_v39 = vshll.u32 %v591_v27, 16  ;;  %v383_v41 = vsel %vm9636_vm2, 0, %v382_v29  ;;  %2015 = vmatpush.bf16.msrb.mxu2 %v8921_v32 }
  0x66   : > { %v807_v31 = vor.u32 %v805_v17, %v804_v25  ;;  %1058 = vst [vmem:[#allocation2 + $0x124] sm:$0xf] %v605_v51  ;;  %v8841_v35 = vld [vmem:[#allocation7 + $0x60] sm:$0xff]  ;;  %2504 = vmatpush.bf16.msrb.mxu3 %v8833_v34  ;;  %v690_v45 = vshrl.u32 %v592_v36, 16  ;;  %v693_v46 = vshll.u32 %v592_v36, 16  ;;  %v810_v48 = vshrl.u32 %v607_v30, 16 }
  0x67   : > { %1847 = vmatmul.bf16.gmra.mxu0 %v7062_v8  ;;  %1887 = vmatmul.bf16.gmra.mxu2 %v7158_v9  ;;  %1059 = vst [vmem:[#allocation2 + $0x130] sm:$0xf] %v1027_v22  ;;  %v684_v44 = vrot.slane %v682_v37, 7  ;;  %v576_v47 = vld [vmem:[%s9625_s13 + $0xc8] sm:$0x7f]  ;;  %v813_v54 = vshll.u32 %v607_v30, 16 }
  0x68   : > { %1936 = vmatmul.bf16.gmra.mxu1 %v7066_v13  ;;  %v952_v38 = vld [vmem:[#allocation2 + $0x120] sm:$0xf]  ;;  %v808_v42 = vsel %vm9652_vm6, %v800_v24, %v807_v31  ;;  %360 = vst [vmem:[#allocation2 + $0x78] sm:$0x1] %v359_v26  ;;  %2593 = vmatpush.bf16.msrb.mxu0 %v8841_v35  ;;  %v692_v51 = vrot.slane %v690_v45, 7  ;;  %v608_v52 = vpack.c.bf16 %v576_v47, %v576_v47  ;;  %v812_v53 = vrot.slane %v810_v48, 7 }
  0x69   : > { %v953_v43 = vsel %vm9659_vm7, %v799_v21, %v952_v38  ;;  %955 = vst [vmem:[#allocation2 + $0x12c] sm:$0xf] %v808_v42  ;;  %v688_v50 = vrot.slane %v684_v44, 4  ;;  %v8860_v55 = vld [vmem:[#allocation2 + $0x50] sm:$0xf0]  ;;  %v687_v56 = vor.u32 %v685_v39, %v684_v44  ;;  %v981_v49 = vld [vmem:[%s9625_s13 + $0x48] sm:$0xff] }
  0x6a   : > { %1976 = vmatmul.bf16.gmra.mxu3 %v7162_v14  ;;  %954 = vst [vmem:[#allocation2 + $0x120] sm:$0xf] %v953_v43  ;;  %v695_v57 = vor.u32 %v693_v46, %v692_v51  ;;  %v818_v58 = vshrl.u32 %v608_v52, 16  ;;  %v821_v59 = vshll.u32 %v608_v52, 16  ;;  %v997_v60 = vld [vmem:[%s9625_s13 + $0xc8] sm:$0xff]  ;;  %v1013_v3 = vpack.c.bf16 %v981_v49, %v981_v49  ;;  %v561_v22 = vld [vmem:[%s9625_s13 + $0x50] sm:$0xff] }
  0x6b   : > { %384 = vst [vmem:[#allocation2 + $0x138] sm:$0x1] %v383_v41  ;;  %v7073_v61 = vld [vmem:[#allocation2 + $0x48] sm:$0xf]  ;;  %v8859_v63 = vld [vmem:[#allocation2 + $0x4c] sm:$0xf]  ;;  %v1029_v9 = vpack.c.bf16 %v997_v60, %v997_v60  ;;  %v815_v11 = vor.u32 %v813_v54, %v812_v53  ;;  %v593_v25 = vpack.c.bf16 %v561_v22, %v561_v22 }
  0x6c   : > { %v7169_v62 = vld [vmem:[#allocation2 + $0x108] sm:$0xf]  ;;  %v7075_v0 = vld [vmem:[#allocation2 + $0x54] sm:$0xf0]  ;;  %v8883_v1 = vld [vmem:[#allocation2 + $0x10c] sm:$0xf]  ;;  %v696_v6 = vsel %vm9652_vm6, %v688_v50, %v695_v57  ;;  %v7074_v14 = vor.u32 %v8860_v55, %v7073_v61 }
  0x6d   : > { %v7171_v2 = vld [vmem:[#allocation2 + $0x114] sm:$0xf0]  ;;  %1044 = vst [vmem:[#allocation2 + $0x7c] sm:$0xf] %v591_v27  ;;  %v8884_v5 = vld [vmem:[#allocation2 + $0x110] sm:$0xf0]  ;;  %v7078_v17 = vor.u32 %v8859_v63, %v7075_v0 }
  0x6e   : > { %v816_v7 = vrot.slane %v812_v53, 4  ;;  %v820_v8 = vrot.slane %v818_v58, 7  ;;  %1060 = vst [vmem:[#allocation2 + $0x13c] sm:$0xf] %v607_v30  ;;  %v7170_v15 = vor.u32 %v8884_v5, %v7169_v62  ;;  %v361_v16 = vld [vmem:[#allocation2 + $0x90] sm:$0x1]  ;;  %v7174_v18 = vor.u32 %v8883_v1, %v7171_v2 }
  0x6f   : > { %v924_v10 = vld [vmem:[#allocation2 + $0x78] sm:$0xf]  ;;  %927 = vst [vmem:[#allocation2 + $0x84] sm:$0xf] %v696_v6  ;;  %v362_v21 = vsel %vm9636_vm2, 0, %v361_v16  ;;  %v577_v28 = vld [vmem:[%s9625_s13 + $0xd0] sm:$0xff] }
  0x70   : > { %v925_v12 = vsel %vm9659_vm7, %v687_v56, %v924_v10  ;;  %v823_v13 = vor.u32 %v821_v59, %v820_v8  ;;  %1045 = vst [vmem:[#allocation2 + $0x88] sm:$0xf] %v1013_v3  ;;  %v562_v24 = vld [vmem:[%s9625_s13 + $0x58] sm:$0x7f]  ;;  %v385_v26 = vld [vmem:[#allocation2 + $0x150] sm:$0x1]  ;;  %v609_v31 = vpack.c.bf16 %v577_v28, %v577_v28 }
  0x71   : > { %926 = vst [vmem:[#allocation2 + $0x78] sm:$0xf] %v925_v12  ;;  %v594_v27 = vpack.c.bf16 %v562_v24, %v562_v24  ;;  %v698_v29 = vshrl.u32 %v593_v25, 16  ;;  %v386_v30 = vsel %vm9636_vm2, 0, %v385_v26  ;;  %v8920_v32 = vld [vmem:[#allocation7 + $0x158] sm:$0xff]  ;;  %v701_v35 = vshll.u32 %v593_v25, 16 }
  0x72   : > { %v824_v19 = vsel %vm9652_vm6, %v816_v7, %v823_v13  ;;  %v956_v20 = vld [vmem:[#allocation2 + $0x138] sm:$0xf]  ;;  %1061 = vst [vmem:[#allocation2 + $0x148] sm:$0xf] %v1029_v9  ;;  %v826_v41 = vshrl.u32 %v609_v31, 16  ;;  %2016 = vmatpush.bf16.msrb.mxu2 %v8920_v32  ;;  %v829_v43 = vshll.u32 %v609_v31, 16 }
  0x73   : > { %v957_v23 = vsel %vm9659_vm7, %v815_v11, %v956_v20  ;;  %959 = vst [vmem:[#allocation2 + $0x144] sm:$0xf] %v824_v19  ;;  %v8832_v34 = vld [vmem:[#allocation7 + $0x18] sm:$0xff]  ;;  %v706_v36 = vshrl.u32 %v594_v27, 16  ;;  %v700_v38 = vrot.slane %v698_v29, 7  ;;  %v709_v39 = vshll.u32 %v594_v27, 16 }
  0x74   : > { %958 = vst [vmem:[#allocation2 + $0x138] sm:$0xf] %v957_v23  ;;  %v8840_v37 = vld [vmem:[#allocation7 + $0x58] sm:$0xff]  ;;  %2505 = vmatpush.bf16.msrb.mxu3 %v8832_v34  ;;  %v828_v47 = vrot.slane %v826_v41, 7  ;;  %v7085_v55 = vld [vmem:[#allocation2 + $0x60] sm:$0xf] }
  0x75   : > { %363 = vst [vmem:[#allocation2 + $0x90] sm:$0x1] %v362_v21  ;;  %v708_v42 = vrot.slane %v706_v36, 7  ;;  %2594 = vmatpush.bf16.msrb.mxu0 %v8840_v37  ;;  %v703_v44 = vor.u32 %v701_v35, %v700_v38  ;;  %v704_v45 = vrot.slane %v700_v38, 4  ;;  %v578_v46 = vld [vmem:[%s9625_s13 + $0xd8] sm:$0x7f] }
  0x76   : > { %387 = vst [vmem:[#allocation2 + $0x150] sm:$0x1] %v386_v30  ;;  %v610_v50 = vpack.c.bf16 %v578_v46, %v578_v46  ;;  %v983_v51 = vld [vmem:[%s9625_s13 + $0x58] sm:$0xff]  ;;  %v831_v53 = vor.u32 %v829_v43, %v828_v47  ;;  %v8863_v56 = vld [vmem:[#allocation2 + $0x68] sm:$0xf0]  ;;  %v832_v3 = vrot.slane %v828_v47, 4 }
  0x77   : > { %1852 = vmatmul.bf16.gmra.mxu0 %v7074_v14  ;;  %1892 = vmatmul.bf16.gmra.mxu2 %v7170_v15  ;;  %v711_v48 = vor.u32 %v709_v39, %v708_v42  ;;  %1046 = vst [vmem:[#allocation2 + $0x94] sm:$0xf] %v593_v25  ;;  %v999_v52 = vld [vmem:[%s9625_s13 + $0xd8] sm:$0xff]  ;;  %v1015_v54 = vpack.c.bf16 %v983_v51, %v983_v51  ;;  %v8862_v57 = vld [vmem:[#allocation2 + $0x64] sm:$0xf]  ;;  %v8919_v29 = vld [vmem:[#allocation7 + $0x150] sm:$0xff] }
  0x78   : > { %1941 = vmatmul.bf16.gmra.mxu1 %v7078_v17  ;;  %1062 = vst [vmem:[#allocation2 + $0x154] sm:$0xf] %v609_v31  ;;  %v7087_v58 = vld [vmem:[#allocation2 + $0x6c] sm:$0xf0]  ;;  %v834_v60 = vshrl.u32 %v610_v50, 16  ;;  %v837_v61 = vshll.u32 %v610_v50, 16  ;;  %v1031_v62 = vpack.c.bf16 %v999_v52, %v999_v52  ;;  %v7086_v10 = vor.u32 %v8863_v56, %v7085_v55  ;;  %2017 = vmatpush.bf16.msrb.mxu2 %v8919_v29 }
  0x79   : > { %v712_v59 = vsel %vm9652_vm6, %v704_v45, %v711_v48  ;;  %v7181_v63 = vld [vmem:[#allocation2 + $0x120] sm:$0xf]  ;;  %v8886_v0 = vld [vmem:[#allocation2 + $0x124] sm:$0xf]  ;;  %v8887_v2 = vld [vmem:[#allocation2 + $0x128] sm:$0xf0]  ;;  %v7090_v12 = vor.u32 %v8862_v57, %v7087_v58 }
  0x7a   : > { %1981 = vmatmul.bf16.gmra.mxu3 %v7174_v18  ;;  %931 = vst [vmem:[#allocation2 + $0x9c] sm:$0xf] %v712_v59  ;;  %v836_v5 = vrot.slane %v834_v60, 7  ;;  %v7183_v6 = vld [vmem:[#allocation2 + $0x12c] sm:$0xf0]  ;;  %v7182_v11 = vor.u32 %v8887_v2, %v7181_v63  ;;  %v563_v18 = vld [vmem:[%s9625_s13 + $0x60] sm:$0xff] }
  0x7b   : > { %1047 = vst [vmem:[#allocation2 + $0xa0] sm:$0xf] %v1015_v54  ;;  %v364_v13 = vld [vmem:[#allocation2 + $0xa8] sm:$0x1]  ;;  %v7186_v15 = vor.u32 %v8886_v0, %v7183_v6  ;;  %v579_v21 = vld [vmem:[%s9625_s13 + $0xe0] sm:$0xff]  ;;  %v595_v22 = vpack.c.bf16 %v563_v18, %v563_v18  ;;  %v8831_v30 = vld [vmem:[#allocation7 + $0x10] sm:$0xff] }
  0x7c   : > { %v928_v49 = vld [vmem:[#allocation2 + $0x90] sm:$0xf]  ;;  %v839_v8 = vor.u32 %v837_v61, %v836_v5  ;;  %1063 = vst [vmem:[#allocation2 + $0x160] sm:$0xf] %v1031_v62  ;;  %v388_v14 = vld [vmem:[#allocation2 + $0x168] sm:$0x1]  ;;  %v611_v24 = vpack.c.bf16 %v579_v21, %v579_v21  ;;  %2506 = vmatpush.bf16.msrb.mxu3 %v8831_v30 }
  0x7d   : > { %v929_v1 = vsel %vm9659_vm7, %v703_v44, %v928_v49  ;;  %v960_v7 = vld [vmem:[#allocation2 + $0x150] sm:$0xf]  ;;  %v365_v17 = vsel %vm9636_vm2, 0, %v364_v13  ;;  %v564_v19 = vld [vmem:[%s9625_s13 + $0x68] sm:$0x7f]  ;;  %v389_v20 = vsel %vm9636_vm2, 0, %v388_v14 }
  0x7e   : > { %930 = vst [vmem:[#allocation2 + $0x90] sm:$0xf] %v929_v1  ;;  %v961_v9 = vsel %vm9659_vm7, %v831_v53, %v960_v7  ;;  %v840_v16 = vsel %vm9652_vm6, %v832_v3, %v839_v8  ;;  %v596_v23 = vpack.c.bf16 %v564_v19, %v564_v19  ;;  %v580_v25 = vld [vmem:[%s9625_s13 + $0xe8] sm:$0x7f]  ;;  %v714_v26 = vshrl.u32 %v595_v22, 16  ;;  %v8839_v34 = vld [vmem:[#allocation7 + $0x50] sm:$0xff] }
  0x7f   : > { %962 = vst [vmem:[#allocation2 + $0x150] sm:$0xf] %v961_v9  ;;  %v612_v28 = vpack.c.bf16 %v580_v25, %v580_v25  ;;  %v717_v31 = vshll.u32 %v595_v22, 16  ;;  %v842_v37 = vshrl.u32 %v611_v24, 16  ;;  %v845_v38 = vshll.u32 %v611_v24, 16  ;;  %2595 = vmatpush.bf16.msrb.mxu0 %v8839_v34  ;;  %v985_v46 = vld [vmem:[%s9625_s13 + $0x68] sm:$0xff] }
  0x80   : > { %963 = vst [vmem:[#allocation2 + $0x15c] sm:$0xf] %v840_v16  ;;  %v722_v27 = vshrl.u32 %v596_v23, 16  ;;  %v725_v32 = vshll.u32 %v596_v23, 16  ;;  %v716_v35 = vrot.slane %v714_v26, 7  ;;  %v1001_v48 = vld [vmem:[%s9625_s13 + $0xe8] sm:$0xff]  ;;  %v1017_v57 = vpack.c.bf16 %v985_v46, %v985_v46 }
  0x81   : > { %366 = vst [vmem:[#allocation2 + $0xa8] sm:$0x1] %v365_v17  ;;  %v850_v39 = vshrl.u32 %v612_v28, 16  ;;  %v853_v41 = vshll.u32 %v612_v28, 16  ;;  %v844_v45 = vrot.slane %v842_v37, 7  ;;  %v1033_v62 = vpack.c.bf16 %v1001_v48, %v1001_v48  ;;  %v8918_v23 = vld [vmem:[#allocation7 + $0x148] sm:$0xff] }
  0x82   : > { %390 = vst [vmem:[#allocation2 + $0x168] sm:$0x1] %v389_v20  ;;  %v724_v36 = vrot.slane %v722_v27, 7  ;;  %v719_v42 = vor.u32 %v717_v31, %v716_v35  ;;  %v720_v43 = vrot.slane %v716_v35, 4  ;;  %v7097_v58 = vld [vmem:[#allocation2 + $0x78] sm:$0xf]  ;;  %2018 = vmatpush.bf16.msrb.mxu2 %v8918_v23 }
  0x83   : > { %1048 = vst [vmem:[#allocation2 + $0xac] sm:$0xf] %v595_v22  ;;  %v852_v47 = vrot.slane %v850_v39, 7  ;;  %v847_v52 = vor.u32 %v845_v38, %v844_v45  ;;  %v848_v53 = vrot.slane %v844_v45, 4  ;;  %v8866_v59 = vld [vmem:[#allocation2 + $0x80] sm:$0xf0] }
  0x84   : > { %v727_v44 = vor.u32 %v725_v32, %v724_v36  ;;  %1064 = vst [vmem:[#allocation2 + $0x16c] sm:$0xf] %v611_v24  ;;  %v8865_v49 = vld [vmem:[#allocation2 + $0x7c] sm:$0xf]  ;;  %v7193_v63 = vld [vmem:[#allocation2 + $0x138] sm:$0xf]  ;;  %v7098_v5 = vor.u32 %v8866_v59, %v7097_v58 }
  0x85   : > { %v855_v55 = vor.u32 %v853_v41, %v852_v47  ;;  %v8889_v60 = vld [vmem:[#allocation2 + $0x13c] sm:$0xf]  ;;  %v8890_v0 = vld [vmem:[#allocation2 + $0x140] sm:$0xf0]  ;;  %v7099_v2 = vld [vmem:[#allocation2 + $0x84] sm:$0xf0] }
  0x86   : > { %v728_v50 = vsel %vm9652_vm6, %v720_v43, %v727_v44  ;;  %v7195_v3 = vld [vmem:[#allocation2 + $0x144] sm:$0xf0]  ;;  %1049 = vst [vmem:[#allocation2 + $0xb8] sm:$0xf] %v1017_v57  ;;  %v7194_v6 = vor.u32 %v8890_v0, %v7193_v63  ;;  %v367_v7 = vld [vmem:[#allocation2 + $0xc0] sm:$0x1]  ;;  %v7102_v9 = vor.u32 %v8865_v49, %v7099_v2 }
  0x87   : > { %1857 = vmatmul.bf16.gmra.mxu0 %v7086_v10  ;;  %1897 = vmatmul.bf16.gmra.mxu2 %v7182_v11  ;;  %935 = vst [vmem:[#allocation2 + $0xb4] sm:$0xf] %v728_v50  ;;  %v856_v1 = vsel %vm9652_vm6, %v848_v53, %v855_v55  ;;  %v391_v8 = vld [vmem:[#allocation2 + $0x180] sm:$0x1]  ;;  %v7198_v10 = vor.u32 %v8889_v60, %v7195_v3  ;;  %v368_v11 = vsel %vm9636_vm2, 0, %v367_v7  ;;  %v8830_v24 = vld [vmem:[#allocation7 + $0x8] sm:$0xff] }
  0x88   : > { %1946 = vmatmul.bf16.gmra.mxu1 %v7090_v12  ;;  %v932_v51 = vld [vmem:[#allocation2 + $0xa8] sm:$0xf]  ;;  %967 = vst [vmem:[#allocation2 + $0x174] sm:$0xf] %v856_v1  ;;  %v565_v12 = vld [vmem:[%s9625_s13 + $0x70] sm:$0xff]  ;;  %v392_v14 = vsel %vm9636_vm2, 0, %v391_v8  ;;  %2507 = vmatpush.bf16.msrb.mxu3 %v8830_v24 }
  0x89   : > { %v933_v54 = vsel %vm9659_vm7, %v719_v42, %v932_v51  ;;  %v964_v56 = vld [vmem:[#allocation2 + $0x168] sm:$0xf]  ;;  %1065 = vst [vmem:[#allocation2 + $0x178] sm:$0xf] %v1033_v62  ;;  %v566_v13 = vld [vmem:[%s9625_s13 + $0x78] sm:$0x7f]  ;;  %v597_v16 = vpack.c.bf16 %v565_v12, %v565_v12 }
  0x8a   : > { %1986 = vmatmul.bf16.gmra.mxu3 %v7186_v15  ;;  %934 = vst [vmem:[#allocation2 + $0xa8] sm:$0xf] %v933_v54  ;;  %v965_v61 = vsel %vm9659_vm7, %v847_v52, %v964_v56  ;;  %v581_v15 = vld [vmem:[%s9625_s13 + $0xf0] sm:$0xff]  ;;  %v598_v17 = vpack.c.bf16 %v566_v13, %v566_v13  ;;  %v582_v18 = vld [vmem:[%s9625_s13 + $0xf8] sm:$0x7f]  ;;  %v8838_v27 = vld [vmem:[#allocation7 + $0x48] sm:$0xff] }
  0x8b   : > { %966 = vst [vmem:[#allocation2 + $0x168] sm:$0xf] %v965_v61  ;;  %v613_v19 = vpack.c.bf16 %v581_v15, %v581_v15  ;;  %v730_v20 = vshrl.u32 %v597_v16, 16  ;;  %v614_v22 = vpack.c.bf16 %v582_v18, %v582_v18  ;;  %v733_v25 = vshll.u32 %v597_v16, 16  ;;  %v8852_v28 = vld [vmem:[#allocation7 + $0xb8] sm:$0xff]  ;;  %2596 = vmatpush.bf16.msrb.mxu0 %v8838_v27  ;;  %v8851_v7 = vld [vmem:[#allocation7 + $0xb0] sm:$0xff] }
  0x8c   : > { %369 = vst [vmem:[#allocation2 + $0xc0] sm:$0x1] %v368_v11  ;;  %v738_v21 = vshrl.u32 %v598_v17, 16  ;;  %v741_v26 = vshll.u32 %v598_v17, 16  ;;  %2679 = vmatpush.bf16.msrb.mxu1 %v8852_v28  ;;  %v987_v38 = vld [vmem:[%s9625_s13 + $0x78] sm:$0xff]  ;;  %v8917_v8 = vld [vmem:[#allocation7 + $0x140] sm:$0xff] }
  0x8d   : > { %393 = vst [vmem:[#allocation2 + $0x180] sm:$0x1] %v392_v14  ;;  %v732_v29 = vrot.slane %v730_v20, 7  ;;  %v858_v31 = vshrl.u32 %v613_v19, 16  ;;  %v861_v32 = vshll.u32 %v613_v19, 16  ;;  %v866_v34 = vshrl.u32 %v614_v22, 16  ;;  %2019 = vmatpush.bf16.msrb.mxu2 %v8917_v8 }
  0x8e   : > { %v740_v30 = vrot.slane %v738_v21, 7  ;;  %v869_v42 = vshll.u32 %v614_v22, 16  ;;  %v1019_v43 = vpack.c.bf16 %v987_v38, %v987_v38  ;;  %1050 = vst [vmem:[#allocation2 + $0xc4] sm:$0xf] %v597_v16  ;;  %v1003_v44 = vld [vmem:[%s9625_s13 + $0xf8] sm:$0xff]  ;;  %v8837_v11 = vld [vmem:[#allocation7 + $0x40] sm:$0xff] }
  0x8f   : > { %v735_v35 = vor.u32 %v733_v25, %v732_v29  ;;  %v736_v36 = vrot.slane %v732_v29, 4  ;;  %v860_v39 = vrot.slane %v858_v31, 7  ;;  %v868_v41 = vrot.slane %v866_v34, 7  ;;  %1066 = vst [vmem:[#allocation2 + $0x184] sm:$0xf] %v613_v19  ;;  %2597 = vmatpush.bf16.msrb.mxu0 %v8837_v11  ;;  %v1068_v14 = vld [vmem:[%s9625_s13 + $0x1] sm:$0xff] }
  0x90   : > { %v743_v37 = vor.u32 %v741_v26, %v740_v30  ;;  %v7109_v53 = vld [vmem:[#allocation2 + $0x90] sm:$0xf]  ;;  %v8869_v54 = vld [vmem:[#allocation2 + $0x98] sm:$0xf0]  ;;  %v8868_v55 = vld [vmem:[#allocation2 + $0x94] sm:$0xf]  ;;  %v1035_v57 = vpack.c.bf16 %v1003_v44, %v1003_v44  ;;  %2680 = vmatpush.bf16.msrb.mxu1 %v8851_v7  ;;  %v1100_v16 = vpack.c.bf16 %v1068_v14, %v1068_v14 }
  0x91   : > { %v863_v48 = vor.u32 %v861_v32, %v860_v39  ;;  %v864_v50 = vrot.slane %v860_v39, 4  ;;  %v871_v51 = vor.u32 %v869_v42, %v868_v41  ;;  %v8892_v56 = vld [vmem:[#allocation2 + $0x154] sm:$0xf]  ;;  %v7205_v58 = vld [vmem:[#allocation2 + $0x150] sm:$0xf]  ;;  %v7110_v63 = vor.u32 %v8869_v54, %v7109_v53  ;;  %v8849_v17 = vld [vmem:[#allocation7 + $0xa0] sm:$0xff] }
  0x92   : > { %v744_v45 = vsel %vm9652_vm6, %v736_v36, %v743_v37  ;;  %v8893_v59 = vld [vmem:[#allocation2 + $0x158] sm:$0xf0]  ;;  %1051 = vst [vmem:[#allocation2 + $0xd0] sm:$0xf] %v1019_v43  ;;  %v7111_v61 = vld [vmem:[#allocation2 + $0x9c] sm:$0xf0] }
  0x93   : > { %v936_v46 = vld [vmem:[#allocation2 + $0xc0] sm:$0xf]  ;;  %939 = vst [vmem:[#allocation2 + $0xcc] sm:$0xf] %v744_v45  ;;  %v872_v49 = vsel %vm9652_vm6, %v864_v50, %v871_v51  ;;  %vm395_vm9 = vsmask.f32 7950  ;;  %v7206_v0 = vor.u32 %v8893_v59, %v7205_v58  ;;  %v7114_v3 = vor.u32 %v8868_v55, %v7111_v61 }
  0x94   : > { %v937_v47 = vsel %vm9659_vm7, %v735_v35, %v936_v46  ;;  %v968_v52 = vld [vmem:[#allocation2 + $0x180] sm:$0xf]  ;;  %971 = vst [vmem:[#allocation2 + $0x18c] sm:$0xf] %v872_v49  ;;  %vm9807_vm10 = vmand %vm394_vm8, %vm395_vm9  ;;  %v397_v2 = vld [vmem:[#allocation2 + $0x2c] sm:$0x8] }
  0x95   : > { %938 = vst [vmem:[#allocation2 + $0xc0] sm:$0xf] %v937_v47  ;;  %v969_v60 = vsel %vm9659_vm7, %v863_v48, %v968_v52  ;;  %v7207_v62 = vld [vmem:[#allocation2 + $0x15c] sm:$0xf0]  ;;  %vm1133_vm11 = vsmask.f32 3328 }
  0x96   : > { %970 = vst [vmem:[#allocation2 + $0x180] sm:$0xf] %v969_v60  ;;  %v1069_v12 = vld [vmem:[%s9625_s13 + $0x9] sm:$0x7f]  ;;  %vm9816_vm12 = vmand %vm905_vm4, %vm1133_vm11  ;;  %v8872_v19 = vld [vmem:[#allocation2 + $0xb0] sm:$0xf0] }
  0x97   : > { %1862 = vmatmul.bf16.gmra.mxu0 %v7098_v5  ;;  %1902 = vmatmul.bf16.gmra.mxu2 %v7194_v6  ;;  %1067 = vst [vmem:[#allocation2 + $0x190] sm:$0xf] %v1035_v57  ;;  %v7210_v5 = vor.u32 %v8892_v56, %v7207_v62  ;;  %v398_v6 = vsel %vm9807_vm10, 0, %v397_v2  ;;  %v1101_v15 = vpack.c.bf16 %v1069_v12, %v1069_v12  ;;  %v7121_v21 = vld [vmem:[#allocation2 + $0xa8] sm:$0xf]  ;;  %v9480_v26 = vmov 0  }
  0x98   : > { %1951 = vmatmul.bf16.gmra.mxu1 %v7102_v9  ;;  %399 = vst [vmem:[#allocation2 + $0x2c] sm:$0x8] %v398_v6  ;;  %v8829_v9 = vld [vmem:[#allocation7] sm:$0xff]  ;;  %v8871_v22 = vld [vmem:[#allocation2 + $0xac] sm:$0xf]  ;;  %v7122_v29 = vor.u32 %v8872_v19, %v7121_v21  ;;  %v8848_v31 = vld [vmem:[#allocation7 + $0x98] sm:$0xff] }
  0x99   : > { %2508 = vmatpush.bf16.msrb.mxu3 %v8829_v9  ;;  %1132 = vst [vmem:[#allocation2 + $0x20] sm:$0xf] %v1100_v16  ;;  %v8895_v23 = vld [vmem:[#allocation2 + $0x16c] sm:$0xf]  ;;  %v7217_v24 = vld [vmem:[#allocation2 + $0x168] sm:$0xf] }
  0x9a   : > { %1991 = vmatmul.bf16.gmra.mxu3 %v7198_v10  ;;  %v8850_v10 = vld [vmem:[#allocation7 + $0xa8] sm:$0xff]  ;;  %v8896_v25 = vld [vmem:[#allocation2 + $0x170] sm:$0xf0]  ;;  %333 = vst [vmem:[#allocation2] sm:$0xff] %v9480_v26  ;;  %v7123_v27 = vld [vmem:[#allocation2 + $0xb4] sm:$0xf0] }
  0x9b   : > { %2681 = vmatpush.bf16.msrb.mxu1 %v8850_v10  ;;  %v7219_v28 = vld [vmem:[#allocation2 + $0x174] sm:$0xf0]  ;;  %335 = vst [vmem:[#allocation2 + $0xc] sm:$0xff] %v9480_v26  ;;  %v7218_v30 = vor.u32 %v8896_v25, %v7217_v24  ;;  %v7126_v32 = vor.u32 %v8871_v22, %v7123_v27  ;;  %v8847_v37 = vld [vmem:[#allocation7 + $0x90] sm:$0xff]  ;;  %v400_v38 = vld [vmem:[#allocation2 + $0x44] sm:$0x8] }
  0x9c   : > { %334 = vst [vmem:[#allocation2 + $0x8] sm:$0xf] %v9480_v26  ;;  %v7222_v34 = vor.u32 %v8895_v23, %v7219_v28  ;;  %v8980_v35 = vld [vmem:[#allocation7 + $0x1b8] sm:$0xff]  ;;  %v8846_v39 = vld [vmem:[#allocation7 + $0x88] sm:$0xff]  ;;  %v401_v42 = vsel %vm9807_vm10, 0, %v400_v38  ;;  %v8845_v51 = vld [vmem:[#allocation7 + $0x80] sm:$0xff] }
  0x9d   : > { %336 = vst [vmem:[#allocation2 + $0x14] sm:$0xf] %v9480_v26  ;;  %v8988_v36 = vld [vmem:[#allocation7 + $0x1f8] sm:$0xff]  ;;  %3285 = vmatpush.bf16.msra.mxu2 %v8980_v35  ;;  %v7133_v44 = vld [vmem:[#allocation2 + $0xc0] sm:$0xf]  ;;  %v8987_v27 = vld [vmem:[#allocation7 + $0x1f0] sm:$0xff] }
  0x9e   : > { %338 = vst [vmem:[#allocation2 + $0x198] sm:$0xff] %v9480_v26  ;;  %3374 = vmatpush.bf16.msra.mxu3 %v8988_v36  ;;  %v1070_v41 = vld [vmem:[%s9625_s13 + $0x11] sm:$0xff]  ;;  %v8875_v45 = vld [vmem:[#allocation2 + $0xc8] sm:$0xf0]  ;;  %v8874_v47 = vld [vmem:[#allocation2 + $0xc4] sm:$0xf] }
  0x9f   : > { %v1135_v18 = vld [vmem:[#allocation2 + $0x2c] sm:$0xf]  ;;  %2682 = vmatpush.bf16.msrb.mxu1 %v8849_v17  ;;  %339 = vst [vmem:[#allocation2 + $0x1a0] sm:$0xf] %v9480_v26  ;;  %v1102_v43 = vpack.c.bf16 %v1070_v41, %v1070_v41  ;;  %v8996_v46 = vld [vmem:[#allocation7 + $0x238] sm:$0xff]  ;;  %v7134_v56 = vor.u32 %v8875_v45, %v7133_v44  ;;  %v1072_v2 = vld [vmem:[%s9625_s13 + $0x21] sm:$0xff] }
  0xa0   : > { %v1136_v20 = vsel %vm9816_vm12, %v1101_v15, %v1135_v18  ;;  %340 = vst [vmem:[#allocation2 + $0x1a4] sm:$0xff] %v9480_v26  ;;  %v7135_v48 = vld [vmem:[#allocation2 + $0xcc] sm:$0xf0]  ;;  %v8898_v50 = vld [vmem:[#allocation2 + $0x184] sm:$0xf]  ;;  %3463 = vmatpush.bf16.msra.mxu0 %v8996_v46  ;;  %s6935_s17 = sshll.u32 %s10872_s21, 4  ;;  %s6936_s17 = int_to_ptr.vmem [resolvable:$true] %s6935_s17 }
  0xa1   : > { %1137 = vst [vmem:[#allocation2 + $0x2c] sm:$0xf] %v1136_v20  ;;  %v7229_v52 = vld [vmem:[#allocation2 + $0x180] sm:$0xf]  ;;  %v8899_v53 = vld [vmem:[#allocation2 + $0x188] sm:$0xf0]  ;;  %v7138_v59 = vor.u32 %v8874_v47, %v7135_v48 }
  0xa2   : > { %341 = vst [vmem:[#allocation2 + $0x1ac] sm:$0xf] %v9480_v26  ;;  %v7231_v54 = vld [vmem:[#allocation2 + $0x18c] sm:$0xf0]  ;;  %v1071_v55 = vld [vmem:[%s9625_s13 + $0x19] sm:$0x7f]  ;;  %v7230_v57 = vor.u32 %v8899_v53, %v7229_v52  ;;  %3375 = vmatpush.bf16.msra.mxu3 %v8987_v27 }
  0xa3   : > { %2683 = vmatpush.bf16.msrb.mxu1 %v8848_v31  ;;  %445 = vst [vmem:[#allocation3] sm:$0xff] %v9480_v26  ;;  %v403_v58 = vld [vmem:[#allocation2 + $0x5c] sm:$0x8]  ;;  %v7234_v49 = vor.u32 %v8898_v50, %v7231_v54  ;;  %v1103_v60 = vpack.c.bf16 %v1071_v55, %v1071_v55  ;;  %v7057_v8 = vld [vmem:[#allocation2 + $0x20] sm:$0xf]  ;;  %v1074_v31 = vld [vmem:[%s9625_s13 + $0x31] sm:$0xff] }
  0xa4   : > { %446 = vst [vmem:[#allocation3 + $0x8] sm:$0xf] %v9480_v26  ;;  %v404_v61 = vsel %vm9807_vm10, 0, %v403_v58  ;;  %v7337_v10 = vld [vmem:[#allocation2] sm:$0xf]  ;;  %v1106_v36 = vpack.c.bf16 %v1074_v31, %v1074_v31  ;;  %s6937_s11 = sshll.u32 %s6934_s16, 4  ;;  %s6938_s11 = int_to_ptr.hbm [resolvable:$true] %s6937_s11 }
  0xa5   : > { %447 = vst [vmem:[#allocation3 + $0xc] sm:$0xff] %v9480_v26  ;;  %v8781_v11 = vld [vmem:[#allocation2 + $0x4] sm:$0xf]  ;;  %v7339_v12 = vld [vmem:[#allocation2 + $0xc] sm:$0xf0]  ;;  %s6923_s28 = scalar_lea.sflag [#allocation6], %s9619_s14 }
  0xa6   : > { %448 = vst [vmem:[#allocation3 + $0x14] sm:$0xf] %v9480_v26  ;;  %v8782_v14 = vld [vmem:[#allocation2 + $0x8] sm:$0xf0]  ;;  %v7345_v15 = vld [vmem:[#allocation2 + $0x8] sm:$0xf]  ;;  %v7342_v18 = vor.u32 %v8781_v11, %v7339_v12 }
  0xa7   : > { %1867 = vmatmul.bf16.gmra.mxu0 %v7110_v63  ;;  %1907 = vmatmul.bf16.gmra.mxu2 %v7206_v0  ;;  %450 = vst [vmem:[#allocation3 + $0x198] sm:$0xff] %v9480_v26  ;;  %v1073_v0 = vld [vmem:[%s9625_s13 + $0x29] sm:$0x7f]  ;;  %v8783_v16 = vld [vmem:[#allocation2 + $0x10] sm:$0xf0]  ;;  %v7338_v21 = vor.u32 %v8782_v14, %v7337_v10  ;;  %s9416_s18 = sshra.s32 %s6938_s11, 4  ;;  %s9417_s18 = int_to_ptr.hbm [resolvable:$true] %s9416_s18 }
  0xa8   : > { %1956 = vmatmul.bf16.gmra.mxu1 %v7114_v3  ;;  %451 = vst [vmem:[#allocation3 + $0x1a0] sm:$0xf] %v9480_v26  ;;  %v1105_v3 = vpack.c.bf16 %v1073_v0, %v1073_v0  ;;  %v8855_v9 = vld [vmem:[#allocation2 + $0x28] sm:$0xf0]  ;;  %v406_v19 = vld [vmem:[#allocation2 + $0x74] sm:$0x8]  ;;  %v7346_v22 = vor.u32 %v8783_v16, %v7345_v15  ;;  %p9423_p11 = scmp.lt.s32.totalorder %s9417_s18, %s11153_s7 }
  0xa9   : > { %2684 = vmatpush.bf16.msrb.mxu1 %v8847_v37  ;;  %452 = vst [vmem:[#allocation3 + $0x1a4] sm:$0xff] %v9480_v26  ;;  %v7058_v17 = vor.u32 %v8855_v9, %v7057_v8  ;;  %v407_v23 = vsel %vm9807_vm10, 0, %v406_v19  ;;  %v7351_v44 = vld [vmem:[#allocation2 + $0x24] sm:$0xf0]  ;;  %v8785_v48 = vld [vmem:[#allocation2 + $0x20] sm:$0xf0] }
  0xaa   : > { %1996 = vmatmul.bf16.gmra.mxu3 %v7210_v5  ;;  %453 = vst [vmem:[#allocation3 + $0x1ac] sm:$0xf] %v9480_v26  ;;  %v1104_v5 = vpack.c.bf16 %v1072_v2, %v1072_v2  ;;  %v8979_v26 = vld [vmem:[#allocation7 + $0x1b0] sm:$0xff]  ;;  %v7357_v50 = vld [vmem:[#allocation2 + $0x20] sm:$0xf]  ;;  %s9418_s1 = scalar_lea.hbm %s9417_s18, 256 }
  0xab   : > { %402 = vst [vmem:[#allocation2 + $0x44] sm:$0x8] %v401_v42  ;;  %3286 = vmatpush.bf16.msra.mxu2 %v8979_v26  ;;  %v7349_v42 = vld [vmem:[#allocation2 + $0x18] sm:$0xf]  ;;  %v1077_v0 = vld [vmem:[%s9625_s13 + $0x49] sm:$0x7f]  ;;  %p9419_p1 = scmp.ne.s32.totalorder %s9417_s18, %s9418_s1 }
  0xac   : > { %1138 = vst [vmem:[#allocation2 + $0x38] sm:$0xf] %v1102_v43  ;;  %v8784_v43 = vld [vmem:[#allocation2 + $0x1c] sm:$0xf]  ;;  %v7361_v15 = vld [vmem:[#allocation2 + $0x30] sm:$0xf] }
  0xad   : > { %2685 = vmatpush.bf16.msrb.mxu1 %v8846_v39  ;;  %405 = vst [vmem:[#allocation2 + $0x5c] sm:$0x8] %v404_v61  ;;  %v8995_v39 = vld [vmem:[#allocation7 + $0x230] sm:$0xff]  ;;  %v7354_v55 = vor.u32 %v8784_v43, %v7351_v44  ;;  %v8788_v19 = vld [vmem:[#allocation2 + $0x38] sm:$0xf0]  ;;  %p9420_p4 = pnand %p9419_p1, %p9589_p3 }
  0xae   : > { %1142 = vst [vmem:[#allocation2 + $0x50] sm:$0xf] %v1104_v5  ;;  %3464 = vmatpush.bf16.msra.mxu0 %v8995_v39  ;;  %v1109_v5 = vpack.c.bf16 %v1077_v0, %v1077_v0  ;;  %v412_v27 = vld [vmem:[#allocation2 + $0xa4] sm:$0x8]  ;;  %v8986_v39 = vld [vmem:[#allocation7 + $0x1e8] sm:$0xff]  ;;  %v1078_v44 = vld [vmem:[%s9625_s13 + $0x51] sm:$0xff] }
  0xaf   : > { %408 = vst [vmem:[#allocation2 + $0x74] sm:$0x8] %v407_v23  ;;  %3376 = vmatpush.bf16.msra.mxu3 %v8986_v39  ;;  %v7387_v39 = vld [vmem:[#allocation2 + $0x6c] sm:$0xf0]  ;;  %vm4104_vm13 = vsmask.f32 7440  ;;  %p9421_p8 = pneg %p9420_p4 }
  0xb0   : > { %1146 = vst [vmem:[#allocation2 + $0x68] sm:$0xf] %v1106_v36  ;;  %vm10126_vm14 = vmor %vm1133_vm11, %vm4104_vm13 }
  0xb1   : > { %2686 = vmatpush.bf16.msrb.mxu1 %v8845_v51  ;;  %v8786_v51 = vld [vmem:[#allocation2 + $0x28] sm:$0xf0] }
  0xb2   : > { %v1139_v62 = vld [vmem:[#allocation2 + $0x44] sm:$0xf] }
  0xb3   : > { %v1140_v63 = vsel %vm9816_vm12, %v1103_v60, %v1139_v62  ;;  %v7069_v46 = vld [vmem:[#allocation2 + $0x38] sm:$0xf] }
  0xb4   : > { %1141 = vst [vmem:[#allocation2 + $0x44] sm:$0xf] %v1140_v63  ;;  %v1143_v6 = vld [vmem:[#allocation2 + $0x5c] sm:$0xf] }
  0xb5   : > { %v1144_v7 = vsel %vm9816_vm12, %v1105_v3, %v1143_v6  ;;  %v1076_v3 = vld [vmem:[%s9625_s13 + $0x41] sm:$0xff]  ;;  %v7081_v14 = vld [vmem:[#allocation2 + $0x50] sm:$0xf] }
  0xb6   : > { %1145 = vst [vmem:[#allocation2 + $0x5c] sm:$0xf] %v1144_v7  ;;  %v1147_v41 = vld [vmem:[#allocation2 + $0x74] sm:$0xf]  ;;  %v1108_v8 = vpack.c.bf16 %v1076_v3, %v1076_v3 }
  0xb7   : > { %1872 = vmatmul.bf16.gmra.mxu0 %v7122_v29  ;;  %1912 = vmatmul.bf16.gmra.mxu2 %v7218_v30  ;;  %v1075_v29 = vld [vmem:[%s9625_s13 + $0x39] sm:$0x7f] }
  0xb8   : > { %1961 = vmatmul.bf16.gmra.mxu1 %v7126_v32  ;;  %v1107_v32 = vpack.c.bf16 %v1075_v29, %v1075_v29  ;;  %1150 = vst [vmem:[#allocation2 + $0x80] sm:$0xf] %v1108_v8 }
  0xba   : > { %2001 = vmatmul.bf16.gmra.mxu3 %v7222_v34  ;;  %v1148_v45 = vsel %vm9816_vm12, %v1107_v32, %v1147_v41  ;;  %v413_v32 = vsel %vm9807_vm10, 0, %v412_v27 }
  0xbb   : > { %v8858_v47 = vld [vmem:[#allocation2 + $0x40] sm:$0xf0]  ;;  %1149 = vst [vmem:[#allocation2 + $0x74] sm:$0xf] %v1148_v45 }
  0xbc   : > { %v7070_v54 = vor.u32 %v8858_v47, %v7069_v46  ;;  %414 = vst [vmem:[#allocation2 + $0xa4] sm:$0x8] %v413_v32  ;;  %v7385_v32 = vld [vmem:[#allocation2 + $0x60] sm:$0xf] }
  0xbd   : > { %v8861_v16 = vld [vmem:[#allocation2 + $0x58] sm:$0xf0] }
  0xc7   : > { %1877 = vmatmul.bf16.gmra.mxu0 %v7134_v56  ;;  %1917 = vmatmul.bf16.gmra.mxu2 %v7230_v57  ;;  %v409_v56 = vld [vmem:[#allocation2 + $0x8c] sm:$0x8] }
  0xc8   : > { %1966 = vmatmul.bf16.gmra.mxu1 %v7138_v59  ;;  %v7350_v59 = vor.u32 %v8785_v48, %v7349_v42  ;;  %v410_v60 = vsel %vm9807_vm10, 0, %v409_v56  ;;  %v1079_v42 = vld [vmem:[%s9625_s13 + $0x59] sm:$0x7f]  ;;  %v1110_v48 = vpack.c.bf16 %v1078_v44, %v1078_v44  ;;  %v8790_v56 = vld [vmem:[#allocation2 + $0x4c] sm:$0xf] }
  0xc9   : > { %411 = vst [vmem:[#allocation2 + $0x8c] sm:$0x8] %v410_v60  ;;  %v1111_v45 = vpack.c.bf16 %v1079_v42, %v1079_v42  ;;  %v8791_v60 = vld [vmem:[#allocation2 + $0x50] sm:$0xf0]  ;;  %v7393_v42 = vld [vmem:[#allocation2 + $0x68] sm:$0xf] }
  0xca   : > { %2006 = vmatmul.bf16.gmra.mxu3 %v7234_v49  ;;  %v7358_v49 = vor.u32 %v8786_v51, %v7357_v50  ;;  %1154 = vst [vmem:[#allocation2 + $0x98] sm:$0xf] %v1110_v48 }
  0xd0   : > { %v1151_v10 = vld [vmem:[#allocation2 + $0x8c] sm:$0xf] }
  0xd1   : > { %v1152_v12 = vsel %vm9816_vm12, %v1109_v5, %v1151_v10 }
  0xd2   : > { %1153 = vst [vmem:[#allocation2 + $0x8c] sm:$0xf] %v1152_v12 }
  0xd4   : > { %v1843_v20 = vpop.f32.mrf.mxu0 }
  0xd5   : > { %v1932_v24 = vpop.f32.mrf.mxu1 }
  0xd6   : > { %v9837_v25 = vadd.f32 %v1932_v24, %v1843_v20  ;;  %v7369_v20 = vld [vmem:[#allocation2 + $0x38] sm:$0xf]  ;;  %v7082_v24 = vor.u32 %v8861_v16, %v7081_v14 }
  0xd7   : > { %2020 = vmatmul.bf16.vlgmr.msrb.gmra.mxu2 %v7058_v17  ;;  %2598 = vmatmul.bf16.vlgmr.msrb.gmra.mxu0 %v7342_v18  ;;  %v8787_v17 = vld [vmem:[#allocation2 + $0x34] sm:$0xf]  ;;  %v7363_v18 = vld [vmem:[#allocation2 + $0x3c] sm:$0xf0] }
  0xd8   : > { %2687 = vmatmul.bf16.vlgmr.msrb.gmra.mxu1 %v7346_v22  ;;  %v7366_v26 = vor.u32 %v8787_v17, %v7363_v18  ;;  %v1081_v18 = vld [vmem:[%s9625_s13 + $0x69] sm:$0x7f] }
  0xda   : > { %2509 = vmatmul.bf16.vlgmr.msrb.gmra.mxu3 %v7338_v21  ;;  %v1883_v28 = vpop.f32.mrf.mxu2  ;;  %v8789_v21 = vld [vmem:[#allocation2 + $0x40] sm:$0xf0] }
  0xdb   : > { %v7370_v31 = vor.u32 %v8789_v21, %v7369_v20  ;;  %v1080_v20 = vld [vmem:[%s9625_s13 + $0x61] sm:$0xff]  ;;  %v1113_v21 = vpack.c.bf16 %v1081_v18, %v1081_v18  ;;  %v7397_v18 = vld [vmem:[#allocation2 + $0x78] sm:$0xf] }
  0xdc   : > { %v1845_v35 = vpop.f32.mrf.mxu0 }
  0xdd   : > { %v1972_v30 = vpop.f32.mrf.mxu3  ;;  %v1934_v37 = vpop.f32.mrf.mxu1 }
  0xde   : > { %v9841_v34 = vadd.f32 %v1972_v30, %v1883_v28  ;;  %v9843_v38 = vadd.f32 %v1934_v37, %v1845_v35  ;;  %v7362_v30 = vor.u32 %v8788_v19, %v7361_v15  ;;  %v8978_v37 = vld [vmem:[#allocation7 + $0x1a8] sm:$0xff] }
  0xdf   : > { %3287 = vmatpush.bf16.msra.mxu2 %v8978_v37  ;;  %v8793_v37 = vld [vmem:[#allocation2 + $0x64] sm:$0xf] }
  0xe0   : > { %v7390_v48 = vor.u32 %v8793_v37, %v7387_v39  ;;  %v421_v37 = vld [vmem:[#allocation2 + $0xec] sm:$0x8] }
  0xe2   : > { %v1885_v52 = vpop.f32.mrf.mxu2 }
  0xe4   : > { %v1848_v58 = vpop.f32.mrf.mxu0 }
  0xe5   : > { %v1974_v53 = vpop.f32.mrf.mxu3  ;;  %v1937_v61 = vpop.f32.mrf.mxu1 }
  0xe6   : > { %v9847_v57 = vadd.f32 %v1974_v53, %v1885_v52  ;;  %v9851_v62 = vadd.f32 %v1937_v61, %v1848_v58  ;;  %v8994_v52 = vld [vmem:[#allocation7 + $0x228] sm:$0xff]  ;;  %v1155_v53 = vld [vmem:[#allocation2 + $0xa4] sm:$0xf]  ;;  %v7381_v61 = vld [vmem:[#allocation2 + $0x50] sm:$0xf] }
  0xe7   : > { %2025 = vmatmul.bf16.gmra.mxu2 %v7070_v54  ;;  %2603 = vmatmul.bf16.gmra.mxu0 %v7354_v55  ;;  %v7093_v54 = vld [vmem:[#allocation2 + $0x68] sm:$0xf]  ;;  %v1156_v58 = vsel %vm9816_vm12, %v1111_v45, %v1155_v53 }
  0xe8   : > { %2692 = vmatmul.bf16.gmra.mxu1 %v7358_v49  ;;  %v7373_v55 = vld [vmem:[#allocation2 + $0x48] sm:$0xf]  ;;  %v7375_v49 = vld [vmem:[#allocation2 + $0x54] sm:$0xf0]  ;;  %3465 = vmatpush.bf16.msra.mxu0 %v8994_v52  ;;  %1157 = vst [vmem:[#allocation2 + $0xa4] sm:$0xf] %v1156_v58 }
  0xe9   : > { %v7378_v5 = vor.u32 %v8790_v56, %v7375_v49  ;;  %v7374_v10 = vor.u32 %v8791_v60, %v7373_v55  ;;  %v8977_v49 = vld [vmem:[#allocation7 + $0x1a0] sm:$0xff] }
  0xea   : > { %2514 = vmatmul.bf16.gmra.mxu3 %v7350_v59  ;;  %v1888_v63 = vpop.f32.mrf.mxu2  ;;  %v8864_v59 = vld [vmem:[#allocation2 + $0x70] sm:$0xf0]  ;;  %v8985_v60 = vld [vmem:[#allocation7 + $0x1e0] sm:$0xff]  ;;  %3288 = vmatpush.bf16.msra.mxu2 %v8977_v49 }
  0xeb   : > { %v7094_v3 = vor.u32 %v8864_v59, %v7093_v54  ;;  %3377 = vmatpush.bf16.msra.mxu3 %v8985_v60 }
  0xec   : > { %v1850_v7 = vpop.f32.mrf.mxu0 }
  0xed   : > { %v1977_v2 = vpop.f32.mrf.mxu3  ;;  %v1939_v9 = vpop.f32.mrf.mxu1 }
  0xee   : > { %v9855_v6 = vadd.f32 %v1977_v2, %v1888_v63  ;;  %v9857_v11 = vadd.f32 %v1939_v9, %v1850_v7  ;;  %v8792_v63 = vld [vmem:[#allocation2 + $0x58] sm:$0xf0] }
  0xef   : > { %v415_v7 = vld [vmem:[#allocation2 + $0xbc] sm:$0x8]  ;;  %v7382_v12 = vor.u32 %v8792_v63, %v7381_v61 }
  0xf0   : > { %v416_v14 = vsel %vm9807_vm10, 0, %v415_v7  ;;  %v1083_v63 = vld [vmem:[%s9625_s13 + $0x79] sm:$0x7f] }
  0xf1   : > { %417 = vst [vmem:[#allocation2 + $0xbc] sm:$0x8] %v416_v14  ;;  %v8993_v14 = vld [vmem:[#allocation7 + $0x220] sm:$0xff] }
  0xf2   : > { %v1890_v22 = vpop.f32.mrf.mxu2  ;;  %3466 = vmatpush.bf16.msra.mxu0 %v8993_v14  ;;  %v8800_v14 = vld [vmem:[#allocation2 + $0x98] sm:$0xf0] }
  0xf4   : > { %v1853_v29 = vpop.f32.mrf.mxu0 }
  0xf5   : > { %v1979_v23 = vpop.f32.mrf.mxu3  ;;  %v1942_v35 = vpop.f32.mrf.mxu1 }
  0xf6   : > { %v9861_v28 = vadd.f32 %v1979_v23, %v1890_v22  ;;  %v9865_v36 = vadd.f32 %v1942_v35, %v1853_v29  ;;  %v8867_v35 = vld [vmem:[#allocation2 + $0x88] sm:$0xf0] }
  0xf7   : > { %2030 = vmatmul.bf16.gmra.mxu2 %v7082_v24  ;;  %2608 = vmatmul.bf16.gmra.mxu0 %v7366_v26  ;;  %v1112_v24 = vpack.c.bf16 %v1080_v20, %v1080_v20 }
  0xf8   : > { %2697 = vmatmul.bf16.gmra.mxu1 %v7370_v31  ;;  %v1159_v27 = vld [vmem:[#allocation2 + $0xbc] sm:$0xf]  ;;  %v7105_v31 = vld [vmem:[#allocation2 + $0x80] sm:$0xf] }
  0xf9   : > { %1158 = vst [vmem:[#allocation2 + $0xb0] sm:$0xf] %v1112_v24  ;;  %v8797_v24 = vld [vmem:[#allocation2 + $0x80] sm:$0xf0] }
  0xfa   : > { %2519 = vmatmul.bf16.gmra.mxu3 %v7362_v30  ;;  %v1893_v41 = vpop.f32.mrf.mxu2  ;;  %v1160_v30 = vsel %vm9816_vm12, %v1113_v21, %v1159_v27  ;;  %v8870_v21 = vld [vmem:[#allocation2 + $0xa0] sm:$0xf0]  ;;  %v8798_v27 = vld [vmem:[#allocation2 + $0x88] sm:$0xf0] }
  0xfb   : > { %1161 = vst [vmem:[#allocation2 + $0xbc] sm:$0xf] %v1160_v30 }
  0xfc   : > { %v1855_v47 = vpop.f32.mrf.mxu0 }
  0xfd   : > { %v1982_v43 = vpop.f32.mrf.mxu3  ;;  %v1944_v50 = vpop.f32.mrf.mxu1 }
  0xfe   : > { %v9869_v46 = vadd.f32 %v1982_v43, %v1893_v41  ;;  %v9871_v51 = vadd.f32 %v1944_v50, %v1855_v47  ;;  %v8794_v41 = vld [vmem:[#allocation2 + $0x68] sm:$0xf0]  ;;  %v8795_v43 = vld [vmem:[#allocation2 + $0x70] sm:$0xf0]  ;;  %v7106_v47 = vor.u32 %v8867_v35, %v7105_v31 }
  0xff   : > { %v418_v50 = vld [vmem:[#allocation2 + $0xd4] sm:$0x8]  ;;  %v7386_v54 = vor.u32 %v8794_v41, %v7385_v32  ;;  %v7394_v55 = vor.u32 %v8795_v43, %v7393_v42  ;;  %v7398_v42 = vor.u32 %v8797_v24, %v7397_v18 }
 0x100   : > { %v419_v56 = vsel %vm9807_vm10, 0, %v418_v50  ;;  %v1085_v50 = vld [vmem:[%s9625_s13 + $0x89] sm:$0x7f] }
 0x101   : > { %420 = vst [vmem:[#allocation2 + $0xd4] sm:$0x8] %v419_v56 }
 0x102   : > { %v1895_v0 = vpop.f32.mrf.mxu2 }
 0x104   : > { %v1858_v9 = vpop.f32.mrf.mxu0 }
 0x105   : > { %v1984_v2 = vpop.f32.mrf.mxu3  ;;  %v1947_v15 = vpop.f32.mrf.mxu1 }
 0x106   : > { %v9875_v8 = vadd.f32 %v1984_v2, %v1895_v0  ;;  %v9879_v16 = vadd.f32 %v1947_v15, %v1858_v9  ;;  %v1082_v2 = vld [vmem:[%s9625_s13 + $0x71] sm:$0xff] }
 0x107   : > { %2035 = vmatmul.bf16.gmra.mxu2 %v7094_v3  ;;  %2613 = vmatmul.bf16.gmra.mxu0 %v7378_v5  ;;  %v1115_v3 = vpack.c.bf16 %v1083_v63, %v1083_v63  ;;  %v1114_v9 = vpack.c.bf16 %v1082_v2, %v1082_v2  ;;  %v7129_v2 = vld [vmem:[#allocation2 + $0xb0] sm:$0xf] }
 0x108   : > { %2702 = vmatmul.bf16.gmra.mxu1 %v7382_v12  ;;  %v1163_v15 = vld [vmem:[#allocation2 + $0xd4] sm:$0xf] }
 0x109   : > { %1162 = vst [vmem:[#allocation2 + $0xc8] sm:$0xf] %v1114_v9  ;;  %v1164_v20 = vsel %vm9816_vm12, %v1115_v3, %v1163_v15  ;;  %v7409_v3 = vld [vmem:[#allocation2 + $0x90] sm:$0xf]  ;;  %v8799_v9 = vld [vmem:[#allocation2 + $0x94] sm:$0xf] }
 0x10a   : > { %2524 = vmatmul.bf16.gmra.mxu3 %v7374_v10  ;;  %v1898_v17 = vpop.f32.mrf.mxu2  ;;  %1165 = vst [vmem:[#allocation2 + $0xd4] sm:$0xf] %v1164_v20  ;;  %v7417_v15 = vld [vmem:[#allocation2 + $0x98] sm:$0xf] }
 0x10c   : > { %v1860_v23 = vpop.f32.mrf.mxu0 }
 0x10d   : > { %v1987_v19 = vpop.f32.mrf.mxu3  ;;  %v1949_v26 = vpop.f32.mrf.mxu1 }
 0x10e   : > { %v9883_v22 = vadd.f32 %v1987_v19, %v1898_v17  ;;  %v9885_v29 = vadd.f32 %v1949_v26, %v1860_v23  ;;  %v7117_v17 = vld [vmem:[#allocation2 + $0x98] sm:$0xf]  ;;  %v8796_v19 = vld [vmem:[#allocation2 + $0x7c] sm:$0xf]  ;;  %v7399_v23 = vld [vmem:[#allocation2 + $0x84] sm:$0xf0] }
 0x10f   : > { %v7405_v26 = vld [vmem:[#allocation2 + $0x80] sm:$0xf]  ;;  %v7118_v32 = vor.u32 %v8870_v21, %v7117_v17  ;;  %v7402_v35 = vor.u32 %v8796_v19, %v7399_v23  ;;  %v8801_v17 = vld [vmem:[#allocation2 + $0xa0] sm:$0xf0] }
 0x110   : > { %v7406_v43 = vor.u32 %v8798_v27, %v7405_v26  ;;  %v424_v23 = vld [vmem:[#allocation2 + $0x104] sm:$0x8]  ;;  %v7410_v27 = vor.u32 %v8800_v14, %v7409_v3  ;;  %v7429_v14 = vld [vmem:[#allocation2 + $0xb0] sm:$0xf] }
 0x112   : > { %v1900_v44 = vpop.f32.mrf.mxu2 }
 0x114   : > { %v1863_v53 = vpop.f32.mrf.mxu0 }
 0x115   : > { %v1989_v45 = vpop.f32.mrf.mxu3  ;;  %v1952_v58 = vpop.f32.mrf.mxu1 }
 0x116   : > { %v9889_v52 = vadd.f32 %v1989_v45, %v1900_v44  ;;  %v9893_v59 = vadd.f32 %v1952_v58, %v1863_v53  ;;  %v422_v44 = vsel %vm9807_vm10, 0, %v421_v37  ;;  %v8976_v37 = vld [vmem:[#allocation7 + $0x198] sm:$0xff] }
 0x117   : > { %2040 = vmatmul.bf16.gmra.mxu2 %v7106_v47  ;;  %2618 = vmatmul.bf16.gmra.mxu0 %v7390_v48  ;;  %423 = vst [vmem:[#allocation2 + $0xec] sm:$0x8] %v422_v44 }
 0x118   : > { %2707 = vmatmul.bf16.gmra.mxu1 %v7394_v55  ;;  %v1117_v55 = vpack.c.bf16 %v1085_v50, %v1085_v50  ;;  %3289 = vmatpush.bf16.msra.mxu2 %v8976_v37 }
 0x11a   : > { %2529 = vmatmul.bf16.gmra.mxu3 %v7386_v54  ;;  %v1903_v61 = vpop.f32.mrf.mxu2  ;;  %v1084_v54 = vld [vmem:[%s9625_s13 + $0x81] sm:$0xff] }
 0x11b   : > { %v1116_v49 = vpack.c.bf16 %v1084_v54, %v1084_v54 }
 0x11c   : > { %v1865_v7 = vpop.f32.mrf.mxu0 }
 0x11d   : > { %v1992_v0 = vpop.f32.mrf.mxu3  ;;  %v1954_v10 = vpop.f32.mrf.mxu1  ;;  %1166 = vst [vmem:[#allocation2 + $0xe0] sm:$0xf] %v1116_v49 }
 0x11e   : > { %v9897_v5 = vadd.f32 %v1992_v0, %v1903_v61  ;;  %v9899_v12 = vadd.f32 %v1954_v10, %v1865_v7  ;;  %v1167_v61 = vld [vmem:[#allocation2 + $0xec] sm:$0xf]  ;;  %v8873_v7 = vld [vmem:[#allocation2 + $0xb8] sm:$0xf0]  ;;  %v7411_v10 = vld [vmem:[#allocation2 + $0x9c] sm:$0xf0] }
 0x11f   : > { %v1168_v0 = vsel %vm9816_vm12, %v1117_v55, %v1167_v61  ;;  %v7130_v20 = vor.u32 %v8873_v7, %v7129_v2  ;;  %v7414_v21 = vor.u32 %v8799_v9, %v7411_v10  ;;  %v7141_v61 = vld [vmem:[#allocation2 + $0xc8] sm:$0xf]  ;;  %v8802_v2 = vld [vmem:[#allocation2 + $0xac] sm:$0xf]  ;;  %v8876_v7 = vld [vmem:[#allocation2 + $0xd0] sm:$0xf0] }
 0x120   : > { %1169 = vst [vmem:[#allocation2 + $0xec] sm:$0xf] %v1168_v0  ;;  %v7421_v0 = vld [vmem:[#allocation2 + $0xa8] sm:$0xf]  ;;  %v7423_v9 = vld [vmem:[#allocation2 + $0xb4] sm:$0xf0] }
 0x121   : > { %v8803_v10 = vld [vmem:[#allocation2 + $0xb0] sm:$0xf0] }
 0x122   : > { %v1905_v30 = vpop.f32.mrf.mxu2 }
 0x124   : > { %v1868_v41 = vpop.f32.mrf.mxu0 }
 0x125   : > { %v1994_v31 = vpop.f32.mrf.mxu3  ;;  %v1957_v45 = vpop.f32.mrf.mxu1 }
 0x126   : > { %v9903_v39 = vadd.f32 %v1994_v31, %v1905_v30  ;;  %v9907_v47 = vadd.f32 %v1957_v45, %v1868_v41  ;;  %v7418_v30 = vor.u32 %v8801_v17, %v7417_v15  ;;  %v425_v31 = vsel %vm9807_vm10, 0, %v424_v23  ;;  %v8984_v41 = vld [vmem:[#allocation7 + $0x1d8] sm:$0xff] }
 0x127   : > { %2045 = vmatmul.bf16.gmra.mxu2 %v7118_v32  ;;  %2623 = vmatmul.bf16.gmra.mxu0 %v7402_v35  ;;  %426 = vst [vmem:[#allocation2 + $0x104] sm:$0x8] %v425_v31  ;;  %v1086_v45 = vld [vmem:[%s9625_s13 + $0x91] sm:$0xff]  ;;  %v8804_v15 = vld [vmem:[#allocation2 + $0xb8] sm:$0xf0] }
 0x128   : > { %2712 = vmatmul.bf16.gmra.mxu1 %v7406_v43  ;;  %3378 = vmatpush.bf16.msra.mxu3 %v8984_v41  ;;  %v1087_v43 = vld [vmem:[%s9625_s13 + $0x99] sm:$0x7f]  ;;  %v1118_v54 = vpack.c.bf16 %v1086_v45, %v1086_v45 }
 0x12a   : > { %2534 = vmatmul.bf16.gmra.mxu3 %v7398_v42  ;;  %v1908_v48 = vpop.f32.mrf.mxu2  ;;  %1170 = vst [vmem:[#allocation2 + $0xf8] sm:$0xf] %v1118_v54 }
 0x12c   : > { %v1870_v58 = vpop.f32.mrf.mxu0 }
 0x12d   : > { %v1997_v53 = vpop.f32.mrf.mxu3  ;;  %v1959_v60 = vpop.f32.mrf.mxu1 }
 0x12e   : > { %v9911_v56 = vadd.f32 %v1997_v53, %v1908_v48  ;;  %v9913_v63 = vadd.f32 %v1959_v60, %v1870_v58  ;;  %v1119_v48 = vpack.c.bf16 %v1087_v43, %v1087_v43  ;;  %v8992_v58 = vld [vmem:[#allocation7 + $0x218] sm:$0xff]  ;;  %v1171_v60 = vld [vmem:[#allocation2 + $0x104] sm:$0xf] }
 0x12f   : > { %3467 = vmatpush.bf16.msra.mxu0 %v8992_v58 }
 0x130   : > { %v1172_v3 = vsel %vm9816_vm12, %v1119_v48, %v1171_v60 }
 0x131   : > { %1173 = vst [vmem:[#allocation2 + $0x104] sm:$0xf] %v1172_v3  ;;  %v8879_v3 = vld [vmem:[#allocation2 + $0xe8] sm:$0xf0] }
 0x132   : > { %v1910_v18 = vpop.f32.mrf.mxu2 }
 0x134   : > { %v1873_v26 = vpop.f32.mrf.mxu0 }
 0x135   : > { %v1999_v19 = vpop.f32.mrf.mxu3  ;;  %v1962_v32 = vpop.f32.mrf.mxu1 }
 0x136   : > { %v9917_v24 = vadd.f32 %v1999_v19, %v1910_v18  ;;  %v9921_v35 = vadd.f32 %v1962_v32, %v1873_v26  ;;  %v7142_v19 = vor.u32 %v8876_v7, %v7141_v61  ;;  %v8805_v7 = vld [vmem:[#allocation2 + $0xc4] sm:$0xf] }
 0x137   : > { %2050 = vmatmul.bf16.gmra.mxu2 %v7130_v20  ;;  %2628 = vmatmul.bf16.gmra.mxu0 %v7414_v21  ;;  %v7426_v20 = vor.u32 %v8802_v2, %v7423_v9  ;;  %v427_v21 = vld [vmem:[#allocation2 + $0x11c] sm:$0x8]  ;;  %v7433_v2 = vld [vmem:[#allocation2 + $0xc0] sm:$0xf]  ;;  %v7435_v9 = vld [vmem:[#allocation2 + $0xcc] sm:$0xf0] }
 0x138   : > { %2717 = vmatmul.bf16.gmra.mxu1 %v7418_v30  ;;  %v7430_v30 = vor.u32 %v8804_v15, %v7429_v14  ;;  %v428_v31 = vsel %vm9807_vm10, 0, %v427_v21  ;;  %v7441_v14 = vld [vmem:[#allocation2 + $0xc8] sm:$0xf]  ;;  %v8807_v15 = vld [vmem:[#allocation2 + $0xd0] sm:$0xf0] }
 0x139   : > { %429 = vst [vmem:[#allocation2 + $0x11c] sm:$0x8] %v428_v31  ;;  %v430_v21 = vld [vmem:[#allocation2 + $0x134] sm:$0x8]  ;;  %v7442_v31 = vor.u32 %v8807_v15, %v7441_v14  ;;  %v7165_v14 = vld [vmem:[#allocation2 + $0xf8] sm:$0xf] }
 0x13a   : > { %2539 = vmatmul.bf16.gmra.mxu3 %v7410_v27  ;;  %v1913_v42 = vpop.f32.mrf.mxu2  ;;  %v7422_v27 = vor.u32 %v8803_v10, %v7421_v0  ;;  %v7153_v0 = vld [vmem:[#allocation2 + $0xe0] sm:$0xf]  ;;  %v8806_v10 = vld [vmem:[#allocation2 + $0xc8] sm:$0xf0]  ;;  %v7445_v15 = vld [vmem:[#allocation2 + $0xd8] sm:$0xf] }
 0x13c   : > { %v1875_v53 = vpop.f32.mrf.mxu0 }
 0x13d   : > { %v2002_v44 = vpop.f32.mrf.mxu3  ;;  %v1964_v55 = vpop.f32.mrf.mxu1 }
 0x13e   : > { %v9925_v50 = vadd.f32 %v2002_v44, %v1913_v42  ;;  %v9927_v49 = vadd.f32 %v1964_v55, %v1875_v53  ;;  %v1089_v42 = vld [vmem:[%s9625_s13 + $0xa9] sm:$0x7f]  ;;  %v1088_v44 = vld [vmem:[%s9625_s13 + $0xa1] sm:$0xff] }
 0x13f   : > { %v1121_v45 = vpack.c.bf16 %v1089_v42, %v1089_v42  ;;  %v1120_v54 = vpack.c.bf16 %v1088_v44, %v1088_v44  ;;  %v8975_v42 = vld [vmem:[#allocation7 + $0x190] sm:$0xff] }
 0x140   : > { %v1175_v58 = vld [vmem:[#allocation2 + $0x11c] sm:$0xf]  ;;  %3290 = vmatpush.bf16.msra.mxu2 %v8975_v42 }
 0x141   : > { %1174 = vst [vmem:[#allocation2 + $0x110] sm:$0xf] %v1120_v54  ;;  %v1176_v61 = vsel %vm9816_vm12, %v1121_v45, %v1175_v58  ;;  %v1091_v45 = vld [vmem:[%s9625_s13 + $0xb9] sm:$0x7f] }
 0x142   : > { %v1915_v17 = vpop.f32.mrf.mxu2  ;;  %1177 = vst [vmem:[#allocation2 + $0x11c] sm:$0xf] %v1176_v61  ;;  %v1123_v58 = vpack.c.bf16 %v1091_v45, %v1091_v45  ;;  %v433_v45 = vld [vmem:[#allocation2 + $0x14c] sm:$0x8] }
 0x144   : > { %v1878_v26 = vpop.f32.mrf.mxu0 }
 0x145   : > { %v2004_v18 = vpop.f32.mrf.mxu3  ;;  %v1967_v32 = vpop.f32.mrf.mxu1 }
 0x146   : > { %v9931_v23 = vadd.f32 %v2004_v18, %v1915_v17  ;;  %v9935_v37 = vadd.f32 %v1967_v32, %v1878_v26  ;;  %v431_v32 = vsel %vm9807_vm10, 0, %v430_v21  ;;  %v8809_v21 = vld [vmem:[#allocation2 + $0xe0] sm:$0xf0] }
 0x147   : > { %2055 = vmatmul.bf16.gmra.mxu2 %v7142_v19  ;;  %2633 = vmatmul.bf16.gmra.mxu0 %v7426_v20  ;;  %v7154_v19 = vor.u32 %v8879_v3, %v7153_v0  ;;  %v7438_v20 = vor.u32 %v8805_v7, %v7435_v9  ;;  %432 = vst [vmem:[#allocation2 + $0x134] sm:$0x8] %v431_v32  ;;  %v8991_v7 = vld [vmem:[#allocation7 + $0x210] sm:$0xff] }
 0x148   : > { %2722 = vmatmul.bf16.gmra.mxu1 %v7430_v30  ;;  %v7434_v30 = vor.u32 %v8806_v10, %v7433_v2  ;;  %3468 = vmatpush.bf16.msra.mxu0 %v8991_v7 }
 0x14a   : > { %2544 = vmatmul.bf16.gmra.mxu3 %v7422_v27  ;;  %v1918_v41 = vpop.f32.mrf.mxu2 }
 0x14c   : > { %v1880_v53 = vpop.f32.mrf.mxu0 }
 0x14d   : > { %v2007_v43 = vpop.f32.mrf.mxu3  ;;  %v1969_v55 = vpop.f32.mrf.mxu1 }
 0x14e   : > { %v9939_v48 = vadd.f32 %v2007_v43, %v1918_v41  ;;  %v9941_v60 = vadd.f32 %v1969_v55, %v1880_v53  ;;  %v8983_v43 = vld [vmem:[#allocation7 + $0x1d0] sm:$0xff] }
 0x14f   : > { %3379 = vmatpush.bf16.msra.mxu3 %v8983_v43  ;;  %v1090_v55 = vld [vmem:[%s9625_s13 + $0xb1] sm:$0xff] }
 0x150   : > { %v1122_v0 = vpack.c.bf16 %v1090_v55, %v1090_v55  ;;  %v1179_v9 = vld [vmem:[#allocation2 + $0x134] sm:$0xf] }
 0x152   : > { %v1920_v17 = vpop.f32.mrf.mxu2  ;;  %1178 = vst [vmem:[#allocation2 + $0x128] sm:$0xf] %v1122_v0 }
 0x154   : > { %v2599_v27 = vpop.f32.mrf.mxu0 }
 0x155   : > { %v2009_v18 = vpop.f32.mrf.mxu3  ;;  %v2688_v41 = vpop.f32.mrf.mxu1 }
 0x156   : > { %v9945_v26 = vadd.f32 %v2009_v18, %v1920_v17  ;;  %v8808_v17 = vld [vmem:[#allocation2 + $0xdc] sm:$0xf]  ;;  %v1180_v18 = vsel %vm9816_vm12, %v1123_v58, %v1179_v9  ;;  %v434_v58 = vsel %vm9807_vm10, 0, %v433_v45 }
 0x157   : > { %2060 = vmatmul.bf16.gmra.mxu2 %v7154_v19  ;;  %2638 = vmatmul.bf16.gmra.mxu0 %v7438_v20  ;;  %v8882_v19 = vld [vmem:[#allocation2 + $0x100] sm:$0xf0]  ;;  %1181 = vst [vmem:[#allocation2 + $0x134] sm:$0xf] %v1180_v18  ;;  %v8812_v45 = vld [vmem:[#allocation2 + $0xf8] sm:$0xf0] }
 0x158   : > { %2727 = vmatmul.bf16.gmra.mxu1 %v7442_v31  ;;  %v8810_v31 = vld [vmem:[#allocation2 + $0xe8] sm:$0xf0]  ;;  %435 = vst [vmem:[#allocation2 + $0x14c] sm:$0x8] %v434_v58 }
 0x15a   : > { %2549 = vmatmul.bf16.gmra.mxu3 %v7434_v30  ;;  %v2021_v44 = vpop.f32.mrf.mxu2  ;;  %v7453_v30 = vld [vmem:[#allocation2 + $0xe0] sm:$0xf] }
 0x15b   : > { %v2022_v53 = vadd.f32 %v2021_v44, %v9837_v25  ;;  %v7447_v25 = vld [vmem:[#allocation2 + $0xe4] sm:$0xf0]  ;;  %v7454_v55 = vor.u32 %v8810_v31, %v7453_v30 }
 0x15c   : > { %v2601_v61 = vpop.f32.mrf.mxu0  ;;  %v7450_v44 = vor.u32 %v8808_v17, %v7447_v25  ;;  %v1092_v17 = vld [vmem:[%s9625_s13 + $0xc1] sm:$0xff] }
 0x15d   : > { %v2510_v54 = vpop.f32.mrf.mxu3  ;;  %v2690_v3 = vpop.f32.mrf.mxu1  ;;  %v1124_v25 = vpack.c.bf16 %v1092_v17, %v1092_v17 }
 0x15e   : > { %v2511_v2 = vadd.f32 %v2510_v54, %v2022_v53  ;;  %v7446_v54 = vor.u32 %v8809_v21, %v7445_v15 }
 0x15f   : > { %1182 = vst [vmem:[#allocation2 + $0x140] sm:$0xf] %v1124_v25  ;;  %v1183_v31 = vld [vmem:[#allocation2 + $0x14c] sm:$0xf] }
 0x160   : > { %v2600_v10 = vadd.f32 %v2599_v27, %v2511_v2  ;;  %v7166_v27 = vor.u32 %v8882_v19, %v7165_v14  ;;  %v9124_v2 = vld [vmem:[#allocation9 + $0xf8] sm:$0xff] }
 0x161   : > { %4973 = vmatpush.bf16.msra.mxu1 %v9124_v2 }
 0x162   : > { %v9954_v20 = vadd.f32 %v2688_v41, %v2600_v10  ;;  %v2023_v32 = vpop.f32.mrf.mxu2  ;;  %v1093_v10 = vld [vmem:[%s9625_s13 + $0xc9] sm:$0x7f] }
 0x163   : > { %v2024_v42 = vadd.f32 %v2023_v32, %v9843_v38  ;;  %v1125_v18 = vpack.c.bf16 %v1093_v10, %v1093_v10  ;;  %v7177_v32 = vld [vmem:[#allocation2 + $0x110] sm:$0xf] }
 0x164   : > { %v2604_v53 = vpop.f32.mrf.mxu0 }
 0x165   : > { %v2512_v43 = vpop.f32.mrf.mxu3  ;;  %v2693_v0 = vpop.f32.mrf.mxu1 }
 0x166   : > { %v2513_v41 = vadd.f32 %v2512_v43, %v2024_v42  ;;  %v8885_v42 = vld [vmem:[#allocation2 + $0x118] sm:$0xf0]  ;;  %v7457_v43 = vld [vmem:[#allocation2 + $0xf0] sm:$0xf] }
 0x167   : > { %2065 = vmatmul.bf16.gmra.mxu2 %v7166_v27  ;;  %2643 = vmatmul.bf16.gmra.mxu0 %v7450_v44  ;;  %v8811_v27 = vld [vmem:[#allocation2 + $0xf4] sm:$0xf]  ;;  %v7459_v44 = vld [vmem:[#allocation2 + $0xfc] sm:$0xf0] }
 0x168   : > { %v2602_v7 = vadd.f32 %v2601_v61, %v2513_v41  ;;  %2732 = vmatmul.bf16.gmra.mxu1 %v7454_v55  ;;  %v8813_v55 = vld [vmem:[#allocation2 + $0x100] sm:$0xf0] }
 0x16a   : > { %2554 = vmatmul.bf16.gmra.mxu3 %v7446_v54  ;;  %v9959_v38 = vadd.f32 %v2690_v3, %v2602_v7  ;;  %v2026_v9 = vpop.f32.mrf.mxu2  ;;  %v1184_v3 = vsel %vm9816_vm12, %v1125_v18, %v1183_v31  ;;  %v7465_v54 = vld [vmem:[#allocation2 + $0xf8] sm:$0xf]  ;;  %v7178_v7 = vor.u32 %v8885_v42, %v7177_v32 }
 0x16b   : > { %v2027_v14 = vadd.f32 %v2026_v9, %v9851_v62  ;;  %1185 = vst [vmem:[#allocation2 + $0x14c] sm:$0xf] %v1184_v3  ;;  %v436_v9 = vld [vmem:[#allocation2 + $0x164] sm:$0x8]  ;;  %v1095_v32 = vld [vmem:[%s9625_s13 + $0xd9] sm:$0x7f] }
 0x16c   : > { %v2606_v19 = vpop.f32.mrf.mxu0  ;;  %v437_v17 = vsel %vm9807_vm10, 0, %v436_v9  ;;  %v1094_v3 = vld [vmem:[%s9625_s13 + $0xd1] sm:$0xff] }
 0x16d   : > { %v2515_v15 = vpop.f32.mrf.mxu3  ;;  %v2695_v30 = vpop.f32.mrf.mxu1  ;;  %438 = vst [vmem:[#allocation2 + $0x164] sm:$0x8] %v437_v17  ;;  %v7471_v9 = vld [vmem:[#allocation2 + $0x114] sm:$0xf0]  ;;  %v7477_v17 = vld [vmem:[#allocation2 + $0x110] sm:$0xf] }
 0x16e   : > { %v2516_v21 = vadd.f32 %v2515_v15, %v2027_v14  ;;  %v7458_v14 = vor.u32 %v8812_v45, %v7457_v43  ;;  %v7466_v15 = vor.u32 %v8813_v55, %v7465_v54  ;;  %v1126_v45 = vpack.c.bf16 %v1094_v3, %v1094_v3 }
 0x170   : > { %v2605_v61 = vadd.f32 %v2604_v53, %v2516_v21  ;;  %v7462_v53 = vor.u32 %v8811_v27, %v7459_v44  ;;  %v8982_v21 = vld [vmem:[#allocation7 + $0x1c8] sm:$0xff]  ;;  %v1127_v27 = vpack.c.bf16 %v1095_v32, %v1095_v32  ;;  %1186 = vst [vmem:[#allocation2 + $0x158] sm:$0xf] %v1126_v45 }
 0x171   : > { %3380 = vmatpush.bf16.msra.mxu3 %v8982_v21 }
 0x172   : > { %v9966_v62 = vadd.f32 %v2693_v0, %v2605_v61  ;;  %v2028_v58 = vpop.f32.mrf.mxu2 }
 0x173   : > { %v2029_v41 = vadd.f32 %v2028_v58, %v9857_v11  ;;  %v8974_v11 = vld [vmem:[#allocation7 + $0x188] sm:$0xff] }
 0x174   : > { %v2609_v10 = vpop.f32.mrf.mxu0  ;;  %3291 = vmatpush.bf16.msra.mxu2 %v8974_v11  ;;  %v1187_v58 = vld [vmem:[#allocation2 + $0x164] sm:$0xf] }
 0x175   : > { %v2517_v2 = vpop.f32.mrf.mxu3  ;;  %v2698_v0 = vpop.f32.mrf.mxu1 }
 0x176   : > { %v2518_v18 = vadd.f32 %v2517_v2, %v2029_v41  ;;  %v7189_v2 = vld [vmem:[#allocation2 + $0x128] sm:$0xf] }
 0x177   : > { %2070 = vmatmul.bf16.gmra.mxu2 %v7178_v7  ;;  %2648 = vmatmul.bf16.gmra.mxu0 %v7462_v53  ;;  %v7469_v7 = vld [vmem:[#allocation2 + $0x108] sm:$0xf]  ;;  %v8888_v53 = vld [vmem:[#allocation2 + $0x130] sm:$0xf0] }
 0x178   : > { %v2607_v25 = vadd.f32 %v2606_v19, %v2518_v18  ;;  %2737 = vmatmul.bf16.gmra.mxu1 %v7466_v15  ;;  %v8990_v19 = vld [vmem:[#allocation7 + $0x208] sm:$0xff]  ;;  %v8815_v15 = vld [vmem:[#allocation2 + $0x110] sm:$0xf0]  ;;  %v8816_v18 = vld [vmem:[#allocation2 + $0x118] sm:$0xf0] }
 0x179   : > { %3469 = vmatpush.bf16.msra.mxu0 %v8990_v19  ;;  %v7478_v3 = vor.u32 %v8816_v18, %v7477_v17 }
 0x17a   : > { %2559 = vmatmul.bf16.gmra.mxu3 %v7458_v14  ;;  %v9971_v31 = vadd.f32 %v2695_v30, %v2607_v25  ;;  %v2031_v61 = vpop.f32.mrf.mxu2  ;;  %v1188_v30 = vsel %vm9816_vm12, %v1127_v27, %v1187_v58 }
 0x17b   : > { %v2032_v42 = vadd.f32 %v2031_v61, %v9865_v36  ;;  %1189 = vst [vmem:[#allocation2 + $0x164] sm:$0xf] %v1188_v30  ;;  %v8814_v36 = vld [vmem:[#allocation2 + $0x10c] sm:$0xf]  ;;  %v7190_v61 = vor.u32 %v8888_v53, %v7189_v2 }
 0x17c   : > { %v2611_v44 = vpop.f32.mrf.mxu0  ;;  %v7474_v32 = vor.u32 %v8814_v36, %v7471_v9  ;;  %v1097_v30 = vld [vmem:[%s9625_s13 + $0xe9] sm:$0x7f] }
 0x17d   : > { %v2520_v43 = vpop.f32.mrf.mxu3  ;;  %v2700_v55 = vpop.f32.mrf.mxu1  ;;  %v1129_v53 = vpack.c.bf16 %v1097_v30, %v1097_v30 }
 0x17e   : > { %v2521_v54 = vadd.f32 %v2520_v43, %v2032_v42  ;;  %v439_v42 = vld [vmem:[#allocation2 + $0x17c] sm:$0x8]  ;;  %v7470_v43 = vor.u32 %v8815_v15, %v7469_v7  ;;  %v1096_v7 = vld [vmem:[%s9625_s13 + $0xe1] sm:$0xff] }
 0x17f   : > { %v440_v27 = vsel %vm9807_vm10, 0, %v439_v42  ;;  %v1128_v9 = vpack.c.bf16 %v1096_v7, %v1096_v7  ;;  %v8818_v42 = vld [vmem:[#allocation2 + $0x128] sm:$0xf0] }
 0x180   : > { %v2610_v41 = vadd.f32 %v2609_v10, %v2521_v54  ;;  %v9123_v54 = vld [vmem:[#allocation9 + $0xf0] sm:$0xff]  ;;  %441 = vst [vmem:[#allocation2 + $0x17c] sm:$0x8] %v440_v27 }
 0x181   : > { %4974 = vmatpush.bf16.msra.mxu1 %v9123_v54  ;;  %1190 = vst [vmem:[#allocation2 + $0x170] sm:$0xf] %v1128_v9 }
 0x182   : > { %v9978_v14 = vadd.f32 %v2698_v0, %v2610_v41  ;;  %v2033_v25 = vpop.f32.mrf.mxu2 }
 0x183   : > { %v2034_v11 = vadd.f32 %v2033_v25, %v9871_v51  ;;  %v7201_v25 = vld [vmem:[#allocation2 + $0x140] sm:$0xf] }
 0x184   : > { %v2614_v10 = vpop.f32.mrf.mxu0 }
 0x185   : > { %v2522_v21 = vpop.f32.mrf.mxu3  ;;  %v2703_v45 = vpop.f32.mrf.mxu1 }
 0x186   : > { %v2523_v0 = vadd.f32 %v2522_v21, %v2034_v11  ;;  %v7481_v11 = vld [vmem:[#allocation2 + $0x120] sm:$0xf]  ;;  %v8817_v21 = vld [vmem:[#allocation2 + $0x124] sm:$0xf] }
 0x187   : > { %2075 = vmatmul.bf16.gmra.mxu2 %v7190_v61  ;;  %2653 = vmatmul.bf16.gmra.mxu0 %v7474_v32  ;;  %v1191_v18 = vld [vmem:[#allocation2 + $0x17c] sm:$0xf]  ;;  %v8891_v61 = vld [vmem:[#allocation2 + $0x148] sm:$0xf0]  ;;  %v7483_v32 = vld [vmem:[#allocation2 + $0x12c] sm:$0xf0] }
 0x188   : > { %v2612_v19 = vadd.f32 %v2611_v44, %v2523_v0  ;;  %2742 = vmatmul.bf16.gmra.mxu1 %v7478_v3  ;;  %v8819_v3 = vld [vmem:[#allocation2 + $0x130] sm:$0xf0] }
 0x18a   : > { %2564 = vmatmul.bf16.gmra.mxu3 %v7470_v43  ;;  %v9983_v51 = vadd.f32 %v2700_v55, %v2612_v19  ;;  %v2036_v58 = vpop.f32.mrf.mxu2  ;;  %v1192_v55 = vsel %vm9816_vm12, %v1129_v53, %v1191_v18  ;;  %v7489_v43 = vld [vmem:[#allocation2 + $0x128] sm:$0xf]  ;;  %v7202_v19 = vor.u32 %v8891_v61, %v7201_v25  ;;  %v1099_v25 = vld [vmem:[%s9625_s13 + $0xf9] sm:$0x7f] }
 0x18b   : > { %v2037_v41 = vadd.f32 %v2036_v58, %v9879_v16  ;;  %1193 = vst [vmem:[#allocation2 + $0x17c] sm:$0xf] %v1192_v55  ;;  %v442_v58 = vld [vmem:[#allocation2 + $0x194] sm:$0x8]  ;;  %v1131_v61 = vpack.c.bf16 %v1099_v25, %v1099_v25 }
 0x18c   : > { %v2616_v36 = vpop.f32.mrf.mxu0  ;;  %v443_v7 = vsel %vm9807_vm10, 0, %v442_v58  ;;  %v1098_v55 = vld [vmem:[%s9625_s13 + $0xf1] sm:$0xff]  ;;  %v7495_v58 = vld [vmem:[#allocation2 + $0x144] sm:$0xf0] }
 0x18d   : > { %v2525_v2 = vpop.f32.mrf.mxu3  ;;  %v2705_v17 = vpop.f32.mrf.mxu1  ;;  %444 = vst [vmem:[#allocation2 + $0x194] sm:$0x8] %v443_v7  ;;  %v7501_v7 = vld [vmem:[#allocation2 + $0x140] sm:$0xf] }
 0x18e   : > { %v2526_v15 = vadd.f32 %v2525_v2, %v2037_v41  ;;  %v7482_v41 = vor.u32 %v8818_v42, %v7481_v11  ;;  %v7490_v2 = vor.u32 %v8819_v3, %v7489_v43  ;;  %v1130_v42 = vpack.c.bf16 %v1098_v55, %v1098_v55 }
 0x190   : > { %v2615_v44 = vadd.f32 %v2614_v10, %v2526_v15  ;;  %v7486_v10 = vor.u32 %v8817_v21, %v7483_v32  ;;  %v8981_v15 = vld [vmem:[#allocation7 + $0x1c0] sm:$0xff]  ;;  %1194 = vst [vmem:[#allocation2 + $0x188] sm:$0xf] %v1130_v42  ;;  %v9122_v42 = vld [vmem:[#allocation9 + $0xe8] sm:$0xff] }
 0x191   : > { %3381 = vmatpush.bf16.msra.mxu3 %v8981_v15  ;;  %4975 = vmatpush.bf16.msra.mxu1 %v9122_v42 }
 0x192   : > { %v9990_v16 = vadd.f32 %v2703_v45, %v2615_v44  ;;  %v2038_v27 = vpop.f32.mrf.mxu2 }
 0x193   : > { %v2039_v0 = vadd.f32 %v2038_v27, %v9885_v29  ;;  %v8973_v29 = vld [vmem:[#allocation7 + $0x180] sm:$0xff] }
 0x194   : > { %v2619_v30 = vpop.f32.mrf.mxu0  ;;  %3292 = vmatpush.bf16.msra.mxu2 %v8973_v29  ;;  %v1195_v27 = vld [vmem:[#allocation2 + $0x194] sm:$0xf] }
 0x195   : > { %v2527_v54 = vpop.f32.mrf.mxu3  ;;  %v2708_v45 = vpop.f32.mrf.mxu1 }
 0x196   : > { %v2528_v53 = vadd.f32 %v2527_v54, %v2039_v0  ;;  %v7213_v54 = vld [vmem:[#allocation2 + $0x158] sm:$0xf] }
 0x197   : > { %2080 = vmatmul.bf16.gmra.mxu2 %v7202_v19  ;;  %2658 = vmatmul.bf16.gmra.mxu0 %v7486_v10  ;;  %v7493_v19 = vld [vmem:[#allocation2 + $0x138] sm:$0xf]  ;;  %v8820_v10 = vld [vmem:[#allocation2 + $0x13c] sm:$0xf] }
 0x198   : > { %v2617_v9 = vadd.f32 %v2616_v36, %v2528_v53  ;;  %2747 = vmatmul.bf16.gmra.mxu1 %v7490_v2  ;;  %v8989_v36 = vld [vmem:[#allocation7 + $0x200] sm:$0xff]  ;;  %v8822_v53 = vld [vmem:[#allocation2 + $0x148] sm:$0xf0]  ;;  %v7498_v25 = vor.u32 %v8820_v10, %v7495_v58  ;;  %v8897_v10 = vld [vmem:[#allocation2 + $0x178] sm:$0xf0] }
 0x199   : > { %3470 = vmatpush.bf16.msra.mxu0 %v8989_v36  ;;  %v8821_v2 = vld [vmem:[#allocation2 + $0x140] sm:$0xf0]  ;;  %v8823_v58 = vld [vmem:[#allocation2 + $0x154] sm:$0xf] }
 0x19a   : > { %2569 = vmatmul.bf16.gmra.mxu3 %v7482_v41  ;;  %v9995_v18 = vadd.f32 %v2705_v17, %v2617_v9  ;;  %v2041_v44 = vpop.f32.mrf.mxu2  ;;  %v1196_v17 = vsel %vm9816_vm12, %v1131_v61, %v1195_v27 }
 0x19b   : > { %v2042_v11 = vadd.f32 %v2041_v44, %v9893_v59  ;;  %1197 = vst [vmem:[#allocation2 + $0x194] sm:$0xf] %v1196_v17  ;;  %v8894_v59 = vld [vmem:[#allocation2 + $0x160] sm:$0xf0] }
 0x19c   : > { %v2621_v32 = vpop.f32.mrf.mxu0  ;;  %v7214_v44 = vor.u32 %v8894_v59, %v7213_v54  ;;  %v7505_v59 = vld [vmem:[#allocation2 + $0x150] sm:$0xf] }
 0x19d   : > { %v2530_v21 = vpop.f32.mrf.mxu3  ;;  %v10000_v3 = vpop.f32.mrf.mxu1 }
 0x19e   : > { %v2531_v43 = vadd.f32 %v2530_v21, %v2042_v11  ;;  %v7502_v21 = vor.u32 %v8822_v53, %v7501_v7  ;;  %v7513_v53 = vld [vmem:[#allocation2 + $0x158] sm:$0xf] }
 0x1a0   : > { %v2620_v0 = vadd.f32 %v2619_v30, %v2531_v43  ;;  %v7494_v30 = vor.u32 %v8821_v2, %v7493_v19  ;;  %v7225_v19 = vld [vmem:[#allocation2 + $0x170] sm:$0xf]  ;;  %v7507_v2 = vld [vmem:[#allocation2 + $0x15c] sm:$0xf0] }
 0x1a2   : > { %v10004_v41 = vadd.f32 %v2708_v45, %v2620_v0  ;;  %v2043_v9 = vpop.f32.mrf.mxu2 }
 0x1a3   : > { %v2044_v29 = vadd.f32 %v2043_v9, %v9899_v12  ;;  %v8825_v9 = vld [vmem:[#allocation2 + $0x160] sm:$0xf0] }
 0x1a4   : > { %v2624_v11 = vpop.f32.mrf.mxu0 }
 0x1a5   : > { %v2532_v15 = vpop.f32.mrf.mxu3  ;;  %v2713_v61 = vpop.f32.mrf.mxu1 }
 0x1a6   : > { %v2533_v55 = vadd.f32 %v2532_v15, %v2044_v29 }
 0x1a7   : > { %2085 = vmatmul.bf16.gmra.mxu2 %v7214_v44  ;;  %2663 = vmatmul.bf16.gmra.mxu0 %v7498_v25  ;;  %v7226_v44 = vor.u32 %v8897_v10, %v7225_v19  ;;  %v7510_v25 = vor.u32 %v8823_v58, %v7507_v2  ;;  %v7237_v10 = vld [vmem:[#allocation2 + $0x188] sm:$0xf]  ;;  %v8900_v58 = vld [vmem:[#allocation2 + $0x190] sm:$0xf0]  ;;  %v8826_v2 = vld [vmem:[#allocation2 + $0x16c] sm:$0xf] }
 0x1a8   : > { %v10007_v43 = vadd.f32 %v2621_v32, %v2533_v55  ;;  %2752 = vmatmul.bf16.gmra.mxu1 %v7502_v21  ;;  %v8824_v32 = vld [vmem:[#allocation2 + $0x158] sm:$0xf0]  ;;  %v7514_v55 = vor.u32 %v8825_v9, %v7513_v53  ;;  %v7525_v9 = vld [vmem:[#allocation2 + $0x170] sm:$0xf] }
 0x1a9   : > { %v7506_v21 = vor.u32 %v8824_v32, %v7505_v59  ;;  %v7517_v59 = vld [vmem:[#allocation2 + $0x168] sm:$0xf]  ;;  %v7519_v32 = vld [vmem:[#allocation2 + $0x174] sm:$0xf0] }
 0x1aa   : > { %2574 = vmatmul.bf16.gmra.mxu3 %v7494_v30  ;;  %v2046_v45 = vpop.f32.mrf.mxu2 }
 0x1ab   : > { %v2047_v36 = vadd.f32 %v2046_v45, %v9907_v47 }
 0x1ac   : > { %v2626_v27 = vpop.f32.mrf.mxu0 }
 0x1ad   : > { %v2535_v12 = vpop.f32.mrf.mxu3  ;;  %v10010_v0 = vpop.f32.mrf.mxu1 }
 0x1ae   : > { %v2536_v17 = vadd.f32 %v2535_v12, %v2047_v36 }
 0x1b0   : > { %v2625_v54 = vadd.f32 %v2624_v11, %v2536_v17 }
 0x1b2   : > { %v10012_v7 = vadd.f32 %v2713_v61, %v2625_v54  ;;  %v2048_v29 = vpop.f32.mrf.mxu2 }
 0x1b3   : > { %v2049_v15 = vadd.f32 %v2048_v29, %v9913_v63  ;;  %v8828_v29 = vld [vmem:[#allocation2 + $0x178] sm:$0xf0] }
 0x1b4   : > { %v2629_v30 = vpop.f32.mrf.mxu0 }
 0x1b5   : > { %v2537_v47 = vpop.f32.mrf.mxu3  ;;  %v2718_v42 = vpop.f32.mrf.mxu1 }
 0x1b6   : > { %v2538_v11 = vadd.f32 %v2537_v47, %v2049_v15 }
 0x1b7   : > { %2090 = vmatmul.bf16.gmra.mxu2 %v7226_v44  ;;  %2668 = vmatmul.bf16.gmra.mxu0 %v7510_v25  ;;  %v7238_v44 = vor.u32 %v8900_v58, %v7237_v10  ;;  %v7522_v25 = vor.u32 %v8826_v2, %v7519_v32  ;;  %v7625_v2 = vld [vmem:[#allocation2 + $0x30] sm:$0xf]  ;;  %v8926_v32 = vld [vmem:[#allocation2 + $0x38] sm:$0xf0] }
 0x1b8   : > { %v10015_v45 = vadd.f32 %v2626_v27, %v2538_v11  ;;  %2757 = vmatmul.bf16.gmra.mxu1 %v7514_v55  ;;  %v8827_v27 = vld [vmem:[#allocation2 + $0x170] sm:$0xf0]  ;;  %v7526_v11 = vor.u32 %v8828_v29, %v7525_v9  ;;  %v8927_v9 = vld [vmem:[#allocation2 + $0x40] sm:$0xf0] }
 0x1b9   : > { %v7518_v55 = vor.u32 %v8827_v27, %v7517_v59  ;;  %v7633_v27 = vld [vmem:[#allocation2 + $0x38] sm:$0xf] }
 0x1ba   : > { %2579 = vmatmul.bf16.gmra.mxu3 %v7506_v21  ;;  %v2051_v61 = vpop.f32.mrf.mxu2 }
 0x1bb   : > { %v2052_v36 = vadd.f32 %v2051_v61, %v9921_v35 }
 0x1bc   : > { %v2631_v17 = vpop.f32.mrf.mxu0 }
 0x1bd   : > { %v2540_v12 = vpop.f32.mrf.mxu3  ;;  %v10018_v54 = vpop.f32.mrf.mxu1 }
 0x1be   : > { %v2541_v63 = vadd.f32 %v2540_v12, %v2052_v36  ;;  %v9121_v36 = vld [vmem:[#allocation9 + $0xe0] sm:$0xff] }
 0x1bf   : > { %4976 = vmatpush.bf16.msra.mxu1 %v9121_v36 }
 0x1c0   : > { %v2630_v19 = vadd.f32 %v2629_v30, %v2541_v63 }
 0x1c2   : > { %v10020_v53 = vadd.f32 %v2718_v42, %v2630_v19  ;;  %v2053_v15 = vpop.f32.mrf.mxu2 }
 0x1c3   : > { %v2054_v47 = vadd.f32 %v2053_v15, %v9927_v49  ;;  %v7627_v15 = vld [vmem:[#allocation2 + $0x3c] sm:$0xf0] }
 0x1c4   : > { %v2634_v21 = vpop.f32.mrf.mxu0 }
 0x1c5   : > { %v2542_v35 = vpop.f32.mrf.mxu3  ;;  %v2723_v61 = vpop.f32.mrf.mxu1 }
 0x1c6   : > { %v2543_v30 = vadd.f32 %v2542_v35, %v2054_v47 }
 0x1c7   : > { %2095 = vmatmul.bf16.gmra.mxu2 %v7238_v44  ;;  %2673 = vmatmul.bf16.gmra.mxu0 %v7522_v25  ;;  %v7626_v25 = vor.u32 %v8926_v32, %v7625_v2  ;;  %v7637_v2 = vld [vmem:[#allocation2 + $0x48] sm:$0xf]  ;;  %v8929_v32 = vld [vmem:[#allocation2 + $0x50] sm:$0xf0] }
 0x1c8   : > { %v10023_v12 = vadd.f32 %v2631_v17, %v2543_v30  ;;  %2762 = vmatmul.bf16.gmra.mxu1 %v7526_v11  ;;  %v8925_v17 = vld [vmem:[#allocation2 + $0x34] sm:$0xf] }
 0x1c9   : > { %v7630_v11 = vor.u32 %v8925_v17, %v7627_v15  ;;  %v8928_v15 = vld [vmem:[#allocation2 + $0x4c] sm:$0xf] }
 0x1ca   : > { %2584 = vmatmul.bf16.gmra.mxu3 %v7518_v55  ;;  %v2056_v42 = vpop.f32.mrf.mxu2 }
 0x1cb   : > { %v2057_v63 = vadd.f32 %v2056_v42, %v9935_v37  ;;  %v7634_v37 = vor.u32 %v8927_v9, %v7633_v27  ;;  %v7645_v27 = vld [vmem:[#allocation2 + $0x50] sm:$0xf]  ;;  %v8930_v9 = vld [vmem:[#allocation2 + $0x58] sm:$0xf0] }
 0x1cc   : > { %v2636_v19 = vpop.f32.mrf.mxu0 }
 0x1cd   : > { %v2545_v49 = vpop.f32.mrf.mxu3  ;;  %v10026_v58 = vpop.f32.mrf.mxu1 }
 0x1ce   : > { %v2546_v10 = vadd.f32 %v2545_v49, %v2057_v63 }
 0x1d0   : > { %v2635_v59 = vadd.f32 %v2634_v21, %v2546_v10 }
 0x1d2   : > { %v10028_v29 = vadd.f32 %v2723_v61, %v2635_v59  ;;  %v2058_v47 = vpop.f32.mrf.mxu2 }
 0x1d3   : > { %v2059_v35 = vadd.f32 %v2058_v47, %v9941_v60  ;;  %v7639_v47 = vld [vmem:[#allocation2 + $0x54] sm:$0xf0] }
 0x1d4   : > { %v2639_v55 = vpop.f32.mrf.mxu0 }
 0x1d5   : > { %v2547_v44 = vpop.f32.mrf.mxu3  ;;  %v2728_v36 = vpop.f32.mrf.mxu1 }
 0x1d6   : > { %v2548_v30 = vadd.f32 %v2547_v44, %v2059_v35 }
 0x1d7   : > { %3293 = vmatmul.bf16.vlgmr.msra.gmra.mxu2 %v7626_v25  ;;  %3471 = vmatmul.bf16.vlgmr.msra.gmra.mxu0 %v7634_v37  ;;  %v7638_v25 = vor.u32 %v8929_v32, %v7637_v2  ;;  %v7649_v32 = vld [vmem:[#allocation2 + $0x60] sm:$0xf] }
 0x1d8   : > { %v10031_v21 = vadd.f32 %v2636_v19, %v2548_v30 }
 0x1da   : > { %3382 = vmatmul.bf16.vlgmr.msra.gmra.mxu3 %v7630_v11  ;;  %v2061_v42 = vpop.f32.mrf.mxu2  ;;  %v7642_v11 = vor.u32 %v8928_v15, %v7639_v47  ;;  %v8933_v15 = vld [vmem:[#allocation2 + $0x70] sm:$0xf0] }
 0x1db   : > { %v2062_v61 = vadd.f32 %v2061_v42, %v9841_v34  ;;  %v7646_v34 = vor.u32 %v8930_v9, %v7645_v27  ;;  %v8932_v27 = vld [vmem:[#allocation2 + $0x68] sm:$0xf0]  ;;  %v7657_v9 = vld [vmem:[#allocation2 + $0x68] sm:$0xf] }
 0x1dc   : > { %v2641_v49 = vpop.f32.mrf.mxu0 }
 0x1dd   : > { %v2550_v63 = vpop.f32.mrf.mxu3  ;;  %v10034_v59 = vpop.f32.mrf.mxu1 }
 0x1de   : > { %v2551_v10 = vadd.f32 %v2550_v63, %v2062_v61  ;;  %v9120_v61 = vld [vmem:[#allocation9 + $0xd8] sm:$0xff] }
 0x1df   : > { %4977 = vmatpush.bf16.msra.mxu1 %v9120_v61 }
 0x1e0   : > { %v2640_v60 = vadd.f32 %v2639_v55, %v2551_v10 }
 0x1e2   : > { %v10036_v17 = vadd.f32 %v2728_v36, %v2640_v60  ;;  %v2063_v19 = vpop.f32.mrf.mxu2 }
 0x1e3   : > { %v2064_v35 = vadd.f32 %v2063_v19, %v9847_v57 }
 0x1e4   : > { %v2644_v37 = vpop.f32.mrf.mxu0 }
 0x1e5   : > { %v2552_v44 = vpop.f32.mrf.mxu3  ;;  %v2733_v42 = vpop.f32.mrf.mxu1 }
 0x1e6   : > { %v2553_v30 = vadd.f32 %v2552_v44, %v2064_v35  ;;  %v8931_v35 = vld [vmem:[#allocation2 + $0x64] sm:$0xf] }
 0x1e7   : > { %3298 = vmatmul.bf16.gmra.mxu2 %v7638_v25  ;;  %3476 = vmatmul.bf16.gmra.mxu0 %v7646_v34 }
 0x1e8   : > { %v10039_v55 = vadd.f32 %v2641_v49, %v2553_v30  ;;  %v7651_v49 = vld [vmem:[#allocation2 + $0x6c] sm:$0xf0] }
 0x1e9   : > { %v7654_v61 = vor.u32 %v8931_v35, %v7651_v49  ;;  %v8934_v49 = vld [vmem:[#allocation2 + $0x7c] sm:$0xf] }
 0x1ea   : > { %3387 = vmatmul.bf16.gmra.mxu3 %v7642_v11  ;;  %v2066_v36 = vpop.f32.mrf.mxu2  ;;  %v7650_v11 = vor.u32 %v8932_v27, %v7649_v32  ;;  %v7661_v32 = vld [vmem:[#allocation2 + $0x78] sm:$0xf]  ;;  %v8935_v27 = vld [vmem:[#allocation2 + $0x80] sm:$0xf0] }
 0x1eb   : > { %v2067_v63 = vadd.f32 %v2066_v36, %v9855_v6  ;;  %v7658_v6 = vor.u32 %v8933_v15, %v7657_v9  ;;  %v7669_v9 = vld [vmem:[#allocation2 + $0x80] sm:$0xf]  ;;  %v8936_v15 = vld [vmem:[#allocation2 + $0x88] sm:$0xf0] }
 0x1ec   : > { %v2646_v60 = vpop.f32.mrf.mxu0 }
 0x1ed   : > { %v2555_v10 = vpop.f32.mrf.mxu3  ;;  %v10042_v19 = vpop.f32.mrf.mxu1 }
 0x1ee   : > { %v2556_v57 = vadd.f32 %v2555_v10, %v2067_v63  ;;  %11171 = vst [vmem:[#allocation14_spill] sm:$0xff] %v10042_v19 }
 0x1f0   : > { %v2645_v2 = vadd.f32 %v2644_v37, %v2556_v57 }
 0x1f2   : > { %v10044_v47 = vadd.f32 %v2733_v42, %v2645_v2  ;;  %v2068_v44 = vpop.f32.mrf.mxu2 }
 0x1f3   : > { %v2069_v25 = vadd.f32 %v2068_v44, %v9861_v28  ;;  %v7663_v44 = vld [vmem:[#allocation2 + $0x84] sm:$0xf0] }
 0x1f4   : > { %11172 = vst [vmem:[#allocation15_spill] sm:$0xff] %v10044_v47  ;;  %v2649_v30 = vpop.f32.mrf.mxu0 }
 0x1f5   : > { %v2557_v34 = vpop.f32.mrf.mxu3  ;;  %v2738_v63 = vpop.f32.mrf.mxu1 }
 0x1f6   : > { %v2558_v36 = vadd.f32 %v2557_v34, %v2069_v25 }
 0x1f7   : > { %3303 = vmatmul.bf16.gmra.mxu2 %v7650_v11  ;;  %3481 = vmatmul.bf16.gmra.mxu0 %v7658_v6  ;;  %v7662_v11 = vor.u32 %v8935_v27, %v7661_v32  ;;  %v7673_v27 = vld [vmem:[#allocation2 + $0x90] sm:$0xf] }
 0x1f8   : > { %v10047_v37 = vadd.f32 %v2646_v60, %v2558_v36 }
 0x1fa   : > { %3392 = vmatmul.bf16.gmra.mxu3 %v7654_v61  ;;  %v2071_v10 = vpop.f32.mrf.mxu2  ;;  %v7666_v61 = vor.u32 %v8934_v49, %v7663_v44  ;;  %v8939_v49 = vld [vmem:[#allocation2 + $0xa0] sm:$0xf0] }
 0x1fb   : > { %v2072_v42 = vadd.f32 %v2071_v10, %v9869_v46  ;;  %v7670_v46 = vor.u32 %v8936_v15, %v7669_v9  ;;  %v8938_v9 = vld [vmem:[#allocation2 + $0x98] sm:$0xf0]  ;;  %v7681_v15 = vld [vmem:[#allocation2 + $0x98] sm:$0xf] }
 0x1fc   : > { %v2651_v2 = vpop.f32.mrf.mxu0 }
 0x1fd   : > { %v2560_v57 = vpop.f32.mrf.mxu3  ;;  %v10050_v47 = vpop.f32.mrf.mxu1 }
 0x1fe   : > { %v2561_v19 = vadd.f32 %v2560_v57, %v2072_v42  ;;  %v9119_v42 = vld [vmem:[#allocation9 + $0xd0] sm:$0xff] }
 0x1ff   : > { %4978 = vmatpush.bf16.msra.mxu1 %v9119_v42 }
 0x200   : > { %v2650_v28 = vadd.f32 %v2649_v30, %v2561_v19 }
 0x202   : > { %v10052_v35 = vadd.f32 %v2738_v63, %v2650_v28  ;;  %v2073_v60 = vpop.f32.mrf.mxu2 }
 0x203   : > { %v2074_v25 = vadd.f32 %v2073_v60, %v9875_v8 }
 0x204   : > { %v2654_v6 = vpop.f32.mrf.mxu0 }
 0x205   : > { %v2562_v34 = vpop.f32.mrf.mxu3  ;;  %v2743_v10 = vpop.f32.mrf.mxu1 }
 0x206   : > { %v2563_v36 = vadd.f32 %v2562_v34, %v2074_v25  ;;  %v8937_v25 = vld [vmem:[#allocation2 + $0x94] sm:$0xf] }
 0x207   : > { %3308 = vmatmul.bf16.gmra.mxu2 %v7662_v11  ;;  %3486 = vmatmul.bf16.gmra.mxu0 %v7670_v46 }
 0x208   : > { %v10055_v19 = vadd.f32 %v2651_v2, %v2563_v36  ;;  %v7675_v2 = vld [vmem:[#allocation2 + $0x9c] sm:$0xf0] }
 0x209   : > { %v7678_v42 = vor.u32 %v8937_v25, %v7675_v2  ;;  %v8940_v2 = vld [vmem:[#allocation2 + $0xac] sm:$0xf] }
 0x20a   : > { %3397 = vmatmul.bf16.gmra.mxu3 %v7666_v61  ;;  %v2076_v30 = vpop.f32.mrf.mxu2  ;;  %v7674_v61 = vor.u32 %v8938_v9, %v7673_v27  ;;  %v7685_v27 = vld [vmem:[#allocation2 + $0xa8] sm:$0xf]  ;;  %v8941_v9 = vld [vmem:[#allocation2 + $0xb0] sm:$0xf0] }
 0x20b   : > { %v2077_v63 = vadd.f32 %v2076_v30, %v9883_v22  ;;  %v7682_v22 = vor.u32 %v8939_v49, %v7681_v15  ;;  %v7693_v15 = vld [vmem:[#allocation2 + $0xb0] sm:$0xf]  ;;  %v8942_v49 = vld [vmem:[#allocation2 + $0xb8] sm:$0xf0] }
 0x20c   : > { %v2656_v28 = vpop.f32.mrf.mxu0 }
 0x20d   : > { %v2565_v57 = vpop.f32.mrf.mxu3  ;;  %v10058_v60 = vpop.f32.mrf.mxu1 }
 0x20e   : > { %v2566_v8 = vadd.f32 %v2565_v57, %v2077_v63  ;;  %11173 = vst [vmem:[#allocation16_spill] sm:$0xff] %v10058_v60 }
 0x210   : > { %v2655_v32 = vadd.f32 %v2654_v6, %v2566_v8 }
 0x212   : > { %v10060_v44 = vadd.f32 %v2743_v10, %v2655_v32  ;;  %v2078_v34 = vpop.f32.mrf.mxu2 }
 0x213   : > { %v2079_v11 = vadd.f32 %v2078_v34, %v9889_v52  ;;  %v7687_v34 = vld [vmem:[#allocation2 + $0xb4] sm:$0xf0] }
 0x214   : > { %11174 = vst [vmem:[#allocation17_spill] sm:$0xff] %v10060_v44  ;;  %v2659_v36 = vpop.f32.mrf.mxu0 }
 0x215   : > { %v2567_v46 = vpop.f32.mrf.mxu3  ;;  %v2748_v63 = vpop.f32.mrf.mxu1 }
 0x216   : > { %v2568_v30 = vadd.f32 %v2567_v46, %v2079_v11 }
 0x217   : > { %3313 = vmatmul.bf16.gmra.mxu2 %v7674_v61  ;;  %3491 = vmatmul.bf16.gmra.mxu0 %v7682_v22  ;;  %v7686_v61 = vor.u32 %v8941_v9, %v7685_v27  ;;  %v7697_v27 = vld [vmem:[#allocation2 + $0xc0] sm:$0xf]  ;;  %v8944_v9 = vld [vmem:[#allocation2 + $0xc8] sm:$0xf0] }
 0x218   : > { %v10063_v6 = vadd.f32 %v2656_v28, %v2568_v30 }
 0x21a   : > { %3402 = vmatmul.bf16.gmra.mxu3 %v7678_v42  ;;  %v2081_v57 = vpop.f32.mrf.mxu2  ;;  %v7690_v42 = vor.u32 %v8940_v2, %v7687_v34 }
 0x21b   : > { %v2082_v10 = vadd.f32 %v2081_v57, %v9897_v5  ;;  %v7694_v5 = vor.u32 %v8942_v49, %v7693_v15  ;;  %v9118_v57 = vld [vmem:[#allocation9 + $0xc8] sm:$0xff]  ;;  %v8945_v49 = vld [vmem:[#allocation2 + $0xd0] sm:$0xf0] }
 0x21c   : > { %v2661_v32 = vpop.f32.mrf.mxu0  ;;  %4979 = vmatpush.bf16.msra.mxu1 %v9118_v57  ;;  %v7705_v15 = vld [vmem:[#allocation2 + $0xc8] sm:$0xf] }
 0x21d   : > { %v2570_v8 = vpop.f32.mrf.mxu3  ;;  %v10066_v44 = vpop.f32.mrf.mxu1 }
 0x21e   : > { %v2571_v60 = vadd.f32 %v2570_v8, %v2082_v10  ;;  %11175 = vst [vmem:[#allocation18_spill] sm:$0xff] %v10066_v44 }
 0x220   : > { %v2660_v52 = vadd.f32 %v2659_v36, %v2571_v60 }
 0x222   : > { %v10068_v25 = vadd.f32 %v2748_v63, %v2660_v52  ;;  %v2083_v28 = vpop.f32.mrf.mxu2 }
 0x223   : > { %v2084_v11 = vadd.f32 %v2083_v28, %v9903_v39 }
 0x224   : > { %v2664_v22 = vpop.f32.mrf.mxu0 }
 0x225   : > { %v2572_v46 = vpop.f32.mrf.mxu3  ;;  %v2753_v10 = vpop.f32.mrf.mxu1 }
 0x226   : > { %v2573_v30 = vadd.f32 %v2572_v46, %v2084_v11  ;;  %v8943_v11 = vld [vmem:[#allocation2 + $0xc4] sm:$0xf] }
 0x227   : > { %3318 = vmatmul.bf16.gmra.mxu2 %v7686_v61  ;;  %3496 = vmatmul.bf16.gmra.mxu0 %v7694_v5 }
 0x228   : > { %v10071_v60 = vadd.f32 %v2661_v32, %v2573_v30  ;;  %v7699_v32 = vld [vmem:[#allocation2 + $0xcc] sm:$0xf0] }
 0x229   : > { %v7702_v57 = vor.u32 %v8943_v11, %v7699_v32  ;;  %v7717_v11 = vld [vmem:[#allocation2 + $0xe0] sm:$0xf]  ;;  %v8948_v32 = vld [vmem:[#allocation2 + $0xe8] sm:$0xf0] }
 0x22a   : > { %3407 = vmatmul.bf16.gmra.mxu3 %v7690_v42  ;;  %v2086_v36 = vpop.f32.mrf.mxu2  ;;  %v7698_v42 = vor.u32 %v8944_v9, %v7697_v27 }
 0x22b   : > { %v2087_v63 = vadd.f32 %v2086_v36, %v9911_v56  ;;  %v7706_v56 = vor.u32 %v8945_v49, %v7705_v15  ;;  %v7709_v15 = vld [vmem:[#allocation2 + $0xd8] sm:$0xf]  ;;  %v8947_v49 = vld [vmem:[#allocation2 + $0xe0] sm:$0xf0] }
 0x22c   : > { %v2666_v52 = vpop.f32.mrf.mxu0 }
 0x22d   : > { %v2575_v8 = vpop.f32.mrf.mxu3  ;;  %v10074_v2 = vpop.f32.mrf.mxu1 }
 0x22e   : > { %v2576_v39 = vadd.f32 %v2575_v8, %v2087_v63  ;;  %11176 = vst [vmem:[#allocation19_spill] sm:$0xff] %v10074_v2 }
 0x230   : > { %v2665_v28 = vadd.f32 %v2664_v22, %v2576_v39 }
 0x232   : > { %v10076_v34 = vadd.f32 %v2753_v10, %v2665_v28  ;;  %v2088_v46 = vpop.f32.mrf.mxu2  ;;  %v455_v10 = vld [vmem:[#allocation3 + $0x18] sm:$0x1] }
 0x233   : > { %v2089_v61 = vadd.f32 %v2088_v46, %v9917_v24  ;;  %v456_v24 = vsel %vm9636_vm2, 0, %v455_v10 }
 0x234   : > { %11177 = vst [vmem:[#allocation20_spill] sm:$0xff] %v10076_v34  ;;  %v2669_v30 = vpop.f32.mrf.mxu0 }
 0x235   : > { %v2577_v5 = vpop.f32.mrf.mxu3  ;;  %v2758_v8 = vpop.f32.mrf.mxu1  ;;  %457 = vst [vmem:[#allocation3 + $0x18] sm:$0x1] %v456_v24 }
 0x236   : > { %v2578_v36 = vadd.f32 %v2577_v5, %v2089_v61  ;;  %v8946_v61 = vld [vmem:[#allocation2 + $0xdc] sm:$0xf]  ;;  %v7711_v5 = vld [vmem:[#allocation2 + $0xe4] sm:$0xf0] }
 0x237   : > { %3323 = vmatmul.bf16.gmra.mxu2 %v7698_v42  ;;  %3501 = vmatmul.bf16.gmra.mxu0 %v7706_v56  ;;  %v7714_v10 = vor.u32 %v8946_v61, %v7711_v5  ;;  %v503_v61 = vld [vmem:[#allocation3 + $0x2c] sm:$0x8] }
 0x238   : > { %v10079_v22 = vadd.f32 %v2666_v52, %v2578_v36  ;;  %v7718_v36 = vor.u32 %v8948_v32, %v7717_v11  ;;  %v7729_v11 = vld [vmem:[#allocation2 + $0xf8] sm:$0xf]  ;;  %v8951_v32 = vld [vmem:[#allocation2 + $0x100] sm:$0xf0] }
 0x23a   : > { %11178 = vst [vmem:[#allocation21_spill] sm:$0xff] %v10079_v22  ;;  %3412 = vmatmul.bf16.gmra.mxu3 %v7702_v57  ;;  %v2091_v63 = vpop.f32.mrf.mxu2  ;;  %v7710_v57 = vor.u32 %v8947_v49, %v7709_v15  ;;  %v7721_v15 = vld [vmem:[#allocation2 + $0xf0] sm:$0xf]  ;;  %v8950_v49 = vld [vmem:[#allocation2 + $0xf8] sm:$0xf0] }
 0x23b   : > { %v2092_v39 = vadd.f32 %v2091_v63, %v9925_v50 }
 0x23c   : > { %v2671_v46 = vpop.f32.mrf.mxu0 }
 0x23d   : > { %v2580_v28 = vpop.f32.mrf.mxu3  ;;  %v10087_v2 = vpop.f32.mrf.mxu1 }
 0x23e   : > { %v2581_v27 = vadd.f32 %v2580_v28, %v2092_v39  ;;  %11180 = vst [vmem:[#allocation23_spill] sm:$0xff] %v10087_v2  ;;  %v461_v2 = vld [vmem:[#allocation3 + $0x48] sm:$0x1] }
 0x240   : > { %v2670_v9 = vadd.f32 %v2669_v30, %v2581_v27 }
 0x242   : > { %v10084_v52 = vadd.f32 %v2758_v8, %v2670_v9  ;;  %v2093_v42 = vpop.f32.mrf.mxu2 }
 0x243   : > { %v2094_v56 = vadd.f32 %v2093_v42, %v9931_v23 }
 0x244   : > { %11179 = vst [vmem:[#allocation22_spill] sm:$0xff] %v10084_v52  ;;  %v2674_v63 = vpop.f32.mrf.mxu0 }
 0x245   : > { %v2582_v50 = vpop.f32.mrf.mxu3  ;;  %v2763_v23 = vpop.f32.mrf.mxu1 }
 0x246   : > { %v2583_v39 = vadd.f32 %v2582_v50, %v2094_v56  ;;  %v8949_v56 = vld [vmem:[#allocation2 + $0xf4] sm:$0xf]  ;;  %v7723_v50 = vld [vmem:[#allocation2 + $0xfc] sm:$0xf0] }
 0x247   : > { %3328 = vmatmul.bf16.gmra.mxu2 %v7710_v57  ;;  %3506 = vmatmul.bf16.gmra.mxu0 %v7718_v36 }
 0x248   : > { %v10089_v30 = vadd.f32 %v2671_v46, %v2583_v39  ;;  %v504_v46 = vsel %vm9807_vm10, 0, %v503_v61  ;;  %v7730_v39 = vor.u32 %v8951_v32, %v7729_v11  ;;  %v7733_v11 = vld [vmem:[#allocation2 + $0x108] sm:$0xf] }
 0x249   : > { %505 = vst [vmem:[#allocation3 + $0x2c] sm:$0x8] %v504_v46  ;;  %v9117_v46 = vld [vmem:[#allocation9 + $0xc0] sm:$0xff] }
 0x24a   : > { %11181 = vst [vmem:[#allocation24_spill] sm:$0xff] %v10089_v30  ;;  %3417 = vmatmul.bf16.gmra.mxu3 %v7714_v10  ;;  %v2096_v8 = vpop.f32.mrf.mxu2  ;;  %v7722_v10 = vor.u32 %v8950_v49, %v7721_v15  ;;  %4980 = vmatpush.bf16.msra.mxu1 %v9117_v46  ;;  %v10104_v49 = vld [vmem:[%s11148_s2] ss:$0 sm:$0xff]  ;;  %v9140_v30 = vld [vmem:[#allocation9 + $0x178] sm:$0xff] }
 0x24b   : > { %v2097_v28 = vadd.f32 %v2096_v8, %v9939_v48  ;;  %v7726_v8 = vor.u32 %v8949_v56, %v7723_v50  ;;  %v8953_v56 = vld [vmem:[#allocation2 + $0x110] sm:$0xf0]  ;;  %v7741_v50 = vld [vmem:[#allocation2 + $0x110] sm:$0xf]  ;;  %5151 = vmatpush.bf16.msrb.mxu3 %v9140_v30 }
 0x24c   : > { %v2676_v27 = vpop.f32.mrf.mxu0 }
 0x24d   : > { %v2585_v24 = vpop.f32.mrf.mxu3 }
 0x24e   : > { %v2586_v9 = vadd.f32 %v2585_v24, %v2097_v28  ;;  %v458_v24 = vld [vmem:[#allocation3 + $0x30] sm:$0x1] }
 0x250   : > { %v2675_v42 = vadd.f32 %v2674_v63, %v2586_v9 }
 0x252   : > { %v10092_v5 = vadd.f32 %v2763_v23, %v2675_v42  ;;  %v2098_v57 = vpop.f32.mrf.mxu2  ;;  %v459_v23 = vsel %vm9636_vm2, 0, %v458_v24  ;;  %v7734_v24 = vor.u32 %v8953_v56, %v7733_v11  ;;  %v462_v11 = vsel %vm9636_vm2, 0, %v461_v2 }
 0x253   : > { %v2099_v48 = vadd.f32 %v2098_v57, %v9945_v26  ;;  %460 = vst [vmem:[#allocation3 + $0x30] sm:$0x1] %v459_v23 }
 0x254   : > { %11182 = vst [vmem:[#allocation25_spill] sm:$0xff] %v10092_v5  ;;  %v3472_v63 = vpop.f32.mrf.mxu0 }
 0x255   : > { %v2587_v36 = vpop.f32.mrf.mxu3  ;;  %463 = vst [vmem:[#allocation3 + $0x48] sm:$0x1] %v462_v11  ;;  %v7753_v11 = vld [vmem:[#allocation2 + $0x128] sm:$0xf] }
 0x256   : > { %v2588_v28 = vadd.f32 %v2587_v36, %v2099_v48  ;;  %v8954_v48 = vld [vmem:[#allocation2 + $0x118] sm:$0xf0]  ;;  %v8952_v36 = vld [vmem:[#allocation2 + $0x10c] sm:$0xf] }
 0x257   : > { %3333 = vmatmul.bf16.gmra.mxu2 %v7722_v10  ;;  %3511 = vmatmul.bf16.gmra.mxu0 %v7730_v39  ;;  %v7735_v10 = vld [vmem:[#allocation2 + $0x114] sm:$0xf0]  ;;  %v7742_v23 = vor.u32 %v8954_v48, %v7741_v50 }
 0x258   : > { %v10097_v9 = vadd.f32 %v2676_v27, %v2588_v28  ;;  %v10109_v27 = vld [vmem:[%s11149_s3] ss:$0 sm:$0xff] }
 0x25a   : > { %11183 = vst [vmem:[#allocation26_spill] sm:$0xff] %v10097_v9  ;;  %3422 = vmatmul.bf16.gmra.mxu3 %v7726_v8  ;;  %v3294_v42 = vpop.f32.mrf.mxu2  ;;  %v506_v8 = vld [vmem:[#allocation3 + $0x44] sm:$0x8] }
 0x25c   : > { %v3474_v57 = vpop.f32.mrf.mxu0 }
 0x25d   : > { %v3383_v61 = vpop.f32.mrf.mxu3 }
 0x25e   : > { %v3384_v26 = vadd.f32 %v3383_v61, %v3294_v42  ;;  %v507_v42 = vsel %vm9807_vm10, 0, %v506_v8 }
 0x25f   : > { %508 = vst [vmem:[#allocation3 + $0x44] sm:$0x8] %v507_v42 }
 0x260   : > { %v3473_v15 = vadd.f32 %v3472_v63, %v3384_v26 }
 0x262   : > { %v3552_v32 = vadd.f32 %v3473_v15, %v9954_v20  ;;  %v3296_v63 = vpop.f32.mrf.mxu2  ;;  %v7738_v20 = vor.u32 %v8952_v36, %v7735_v10 }
 0x264   : > { %v3587_v39 = vmul.f32 %v10104_v49, %v3552_v32  ;;  %v3477_v26 = vpop.f32.mrf.mxu0 }
 0x265   : > { %v3385_v28 = vpop.f32.mrf.mxu3 }
 0x266   : > { %v3622_v61 = vadd.f32 %v10109_v27, %v3587_v39  ;;  %v3386_v46 = vadd.f32 %v3385_v28, %v3296_v63 }
 0x267   : > { %3338 = vmatmul.bf16.gmra.mxu2 %v7734_v24  ;;  %3516 = vmatmul.bf16.gmra.mxu0 %v7742_v23 }
 0x268   : > { %v3654_v15 = vmax.f32 %v3622_v61, 0.0  ;;  %v3475_v9 = vadd.f32 %v3474_v57, %v3386_v46  ;;  %v7745_v61 = vld [vmem:[#allocation2 + $0x120] sm:$0xf]  ;;  %v8955_v46 = vld [vmem:[#allocation2 + $0x124] sm:$0xf] }
 0x26a   : > { %v3686_v5 = vpack.c.bf16 %v3654_v15, %v3654_v15  ;;  %v3553_v32 = vadd.f32 %v3475_v9, %v9959_v38  ;;  %3427 = vmatmul.bf16.gmra.mxu3 %v7738_v20  ;;  %v3299_v39 = vpop.f32.mrf.mxu2  ;;  %v4008_v38 = vld [vmem:[#allocation3 + $0x18] sm:$0xf] }
 0x26c   : > { %v3719_v56 = vshrl.u32 %v3686_v5, 16  ;;  %v3722_v50 = vshll.u32 %v3686_v5, 16  ;;  %4072 = vst [vmem:[#allocation3 + $0x1c] sm:$0xf] %v3686_v5  ;;  %v3588_v48 = vmul.f32 %v10104_v49, %v3553_v32  ;;  %v3479_v28 = vpop.f32.mrf.mxu0  ;;  %v8956_v5 = vld [vmem:[#allocation2 + $0x128] sm:$0xf0] }
 0x26d   : > { %v3388_v36 = vpop.f32.mrf.mxu3  ;;  %v7747_v32 = vld [vmem:[#allocation2 + $0x12c] sm:$0xf0] }
 0x26e   : > { %v3721_v10 = vrot.slane %v3719_v56, 7  ;;  %v4106_v57 = vrot.slane %v3719_v56, 4  ;;  %v4107_v63 = vrot.slane %v3722_v50, 5  ;;  %v3623_v8 = vadd.f32 %v10109_v27, %v3588_v48  ;;  %v8957_v56 = vld [vmem:[#allocation2 + $0x130] sm:$0xf0] }
 0x26f   : > { %v3389_v9 = vadd.f32 %v3388_v36, %v3299_v39  ;;  %v9132_v39 = vld [vmem:[#allocation9 + $0x138] sm:$0xff] }
 0x270   : > { %v3724_v24 = vor.u32 %v3722_v50, %v3721_v10  ;;  %v3655_v23 = vmax.f32 %v3623_v8, 0.0  ;;  %v4108_v2 = vor.u32 %v4107_v63, %v4106_v57  ;;  %v9052_v50 = vld [vmem:[#allocation9 + $0x38] sm:$0xff]  ;;  %v7746_v57 = vor.u32 %v8956_v5, %v7745_v61  ;;  %5062 = vmatpush.bf16.msrb.mxu2 %v9132_v39 }
 0x271   : > { %v3478_v42 = vadd.f32 %v3477_v26, %v3389_v9  ;;  %5640 = vmatpush.bf16.msrb.mxu0 %v9052_v50  ;;  %v464_v50 = vld [vmem:[#allocation3 + $0x60] sm:$0x1] }
 0x272   : > { %v4009_v20 = vsel %vm9659_vm7, %v3724_v24, %v4008_v38  ;;  %v3687_v15 = vpack.c.bf16 %v3655_v23, %v3655_v23  ;;  %v3301_v26 = vpop.f32.mrf.mxu2  ;;  %v4109_v63 = vrot.slane %v4108_v2, 4  ;;  %v7750_v23 = vor.u32 %v8955_v46, %v7747_v32 }
 0x273   : > { %4010 = vst [vmem:[#allocation3 + $0x18] sm:$0xf] %v4009_v20  ;;  %v3554_v48 = vadd.f32 %v3478_v42, %v9966_v62  ;;  %v7754_v62 = vor.u32 %v8957_v56, %v7753_v11  ;;  %v509_v42 = vld [vmem:[#allocation3 + $0x5c] sm:$0x8]  ;;  %v3725_v2 = vrot.slane %v3721_v10, 4 }
 0x274   : > { %v3727_v36 = vshrl.u32 %v3687_v15, 16  ;;  %v3730_v8 = vshll.u32 %v3687_v15, 16  ;;  %4073 = vst [vmem:[#allocation3 + $0x28] sm:$0xf] %v3687_v15  ;;  %v3482_v61 = vpop.f32.mrf.mxu0  ;;  %v510_v34 = vsel %vm9807_vm10, 0, %v509_v42 }
 0x275   : > { %v3589_v9 = vmul.f32 %v10104_v49, %v3554_v48  ;;  %v3390_v24 = vpop.f32.mrf.mxu3  ;;  %511 = vst [vmem:[#allocation3 + $0x5c] sm:$0x8] %v510_v34  ;;  %v4283_v11 = vld [vmem:[#allocation3 + $0x2c] sm:$0xf] }
 0x276   : > { %v3729_v20 = vrot.slane %v3727_v36, 7  ;;  %v4110_v52 = vrot.slane %v3730_v8, 5  ;;  %v4112_v15 = vrot.slane %v3727_v36, 4  ;;  %v3391_v22 = vadd.f32 %v3390_v24, %v3301_v26 }
 0x277   : > { %v3624_v5 = vadd.f32 %v10109_v27, %v3589_v9  ;;  %3343 = vmatmul.bf16.gmra.mxu2 %v7746_v57  ;;  %3521 = vmatmul.bf16.gmra.mxu0 %v7754_v62  ;;  %v9060_v9 = vld [vmem:[#allocation9 + $0x78] sm:$0xff] }
 0x278   : > { %v3732_v44 = vor.u32 %v3730_v8, %v3729_v20  ;;  %v4111_v46 = vsel %vm10126_vm14, %v4109_v63, %v4110_v52  ;;  %v4113_v32 = vor.u32 %v4112_v15, %v4110_v52  ;;  %v3480_v30 = vadd.f32 %v3479_v28, %v3391_v22  ;;  %5729 = vmatpush.bf16.msrb.mxu1 %v9060_v9 }
 0x279   : > { %4282 = vst [vmem:[#allocation3 + $0x20] sm:$0xf] %v4111_v46  ;;  %v3656_v56 = vmax.f32 %v3624_v5, 0.0  ;;  %v465_v52 = vsel %vm9636_vm2, 0, %v464_v50  ;;  %v8959_v5 = vld [vmem:[#allocation2 + $0x140] sm:$0xf0] }
 0x27a   : > { %v3733_v10 = vsel %vm9652_vm6, %v3725_v2, %v3732_v44  ;;  %v4114_v48 = vrot.slane %v4113_v32, 4  ;;  %v3555_v39 = vadd.f32 %v3480_v30, %v9971_v31  ;;  %3432 = vmatmul.bf16.gmra.mxu3 %v7750_v23  ;;  %v3304_v28 = vpop.f32.mrf.mxu2  ;;  %466 = vst [vmem:[#allocation3 + $0x60] sm:$0x1] %v465_v52  ;;  %v4012_v23 = vld [vmem:[#allocation3 + $0x30] sm:$0xf] }
 0x27b   : > { %4011 = vst [vmem:[#allocation3 + $0x24] sm:$0xf] %v3733_v10  ;;  %v3688_v36 = vpack.c.bf16 %v3656_v56, %v3656_v56  ;;  %v7757_v2 = vld [vmem:[#allocation2 + $0x138] sm:$0xf]  ;;  %v8958_v30 = vld [vmem:[#allocation2 + $0x13c] sm:$0xf] }
 0x27c   : > { %v4284_v34 = vsel %vm9816_vm12, %v4114_v48, %v4283_v11  ;;  %v3590_v22 = vmul.f32 %v10104_v49, %v3555_v39  ;;  %v3484_v63 = vpop.f32.mrf.mxu0  ;;  %v7759_v11 = vld [vmem:[#allocation2 + $0x144] sm:$0xf0]  ;;  %v7765_v56 = vld [vmem:[#allocation2 + $0x140] sm:$0xf] }
 0x27d   : > { %4285 = vst [vmem:[#allocation3 + $0x2c] sm:$0xf] %v4284_v34  ;;  %v3735_v8 = vshrl.u32 %v3688_v36, 16  ;;  %v3738_v44 = vshll.u32 %v3688_v36, 16  ;;  %v3393_v26 = vpop.f32.mrf.mxu3  ;;  %v7913_v39 = vld [vmem:[#allocation3 + $0x18] sm:$0xf]  ;;  %v7762_v9 = vor.u32 %v8958_v30, %v7759_v11 }
 0x27e   : > { %4074 = vst [vmem:[#allocation3 + $0x34] sm:$0xf] %v3688_v36  ;;  %v3625_v31 = vadd.f32 %v10109_v27, %v3590_v22  ;;  %v3394_v57 = vadd.f32 %v3393_v26, %v3304_v28  ;;  %v8960_v36 = vld [vmem:[#allocation2 + $0x148] sm:$0xf0]  ;;  %v512_v22 = vld [vmem:[#allocation3 + $0x74] sm:$0x8] }
 0x27f   : > { %v3737_v24 = vrot.slane %v3735_v8, 7  ;;  %v4115_v62 = vrot.slane %v3735_v8, 4  ;;  %v4116_v42 = vrot.slane %v3738_v44, 5  ;;  %v513_v26 = vsel %vm9807_vm10, 0, %v512_v22 }
 0x280   : > { %v3657_v20 = vmax.f32 %v3625_v31, 0.0  ;;  %v3483_v15 = vadd.f32 %v3482_v61, %v3394_v57  ;;  %v7758_v57 = vor.u32 %v8959_v5, %v7757_v2  ;;  %514 = vst [vmem:[#allocation3 + $0x74] sm:$0x8] %v513_v26 }
 0x281   : > { %v3740_v46 = vor.u32 %v3738_v44, %v3737_v24  ;;  %v4117_v32 = vor.u32 %v4116_v42, %v4115_v62  ;;  %v7766_v62 = vor.u32 %v8960_v36, %v7765_v56  ;;  %v467_v56 = vld [vmem:[#allocation3 + $0x78] sm:$0x1] }
 0x282   : > { %v3689_v10 = vpack.c.bf16 %v3657_v20, %v3657_v20  ;;  %v3556_v48 = vadd.f32 %v3483_v15, %v9978_v14  ;;  %v9070_v50 = vld [vmem:[#allocation3 + $0x20] sm:$0xf0]  ;;  %v3306_v44 = vpop.f32.mrf.mxu2  ;;  %v468_v36 = vsel %vm9636_vm2, 0, %v467_v56  ;;  %v7771_v56 = vld [vmem:[#allocation2 + $0x15c] sm:$0xf0] }
 0x283   : > { %v4013_v52 = vsel %vm9659_vm7, %v3740_v46, %v4012_v23  ;;  %v7914_v34 = vor.u32 %v9070_v50, %v7913_v39  ;;  %v4118_v31 = vrot.slane %v4117_v32, 4  ;;  %v3741_v39 = vrot.slane %v3737_v24, 4  ;;  %469 = vst [vmem:[#allocation3 + $0x78] sm:$0x1] %v468_v36  ;;  %v9139_v36 = vld [vmem:[#allocation9 + $0x170] sm:$0xff] }
 0x284   : > { %4014 = vst [vmem:[#allocation3 + $0x30] sm:$0xf] %v4013_v52  ;;  %v3743_v61 = vshrl.u32 %v3689_v10, 16  ;;  %v3746_v28 = vshll.u32 %v3689_v10, 16  ;;  %v3591_v8 = vmul.f32 %v10104_v49, %v3556_v48  ;;  %v3487_v46 = vpop.f32.mrf.mxu0  ;;  %5152 = vmatpush.bf16.msrb.mxu3 %v9139_v36 }
 0x285   : > { %4075 = vst [vmem:[#allocation3 + $0x40] sm:$0xf] %v3689_v10  ;;  %v3395_v14 = vpop.f32.mrf.mxu3  ;;  %4981 = vmatmul.bf16.vlgmr.msra.gmra.mxu1 %v7914_v34  ;;  %v4287_v34 = vld [vmem:[#allocation3 + $0x44] sm:$0xf] }
 0x286   : > { %v3745_v42 = vrot.slane %v3743_v61, 7  ;;  %v4119_v23 = vrot.slane %v3746_v28, 5  ;;  %v4121_v20 = vrot.slane %v3743_v61, 4  ;;  %v3626_v15 = vadd.f32 %v10109_v27, %v3591_v8 }
 0x287   : > { %v3396_v48 = vadd.f32 %v3395_v14, %v3306_v44  ;;  %3348 = vmatmul.bf16.gmra.mxu2 %v7758_v57  ;;  %3526 = vmatmul.bf16.gmra.mxu0 %v7766_v62 }
 0x288   : > { %v3748_v50 = vor.u32 %v3746_v28, %v3745_v42  ;;  %v4120_v52 = vsel %vm10126_vm14, %v4118_v31, %v4119_v23  ;;  %v4122_v32 = vor.u32 %v4121_v20, %v4119_v23  ;;  %v3658_v10 = vmax.f32 %v3626_v15, 0.0  ;;  %v7769_v20 = vld [vmem:[#allocation2 + $0x150] sm:$0xf] }
 0x289   : > { %4286 = vst [vmem:[#allocation3 + $0x38] sm:$0xf] %v4120_v52  ;;  %v3485_v2 = vadd.f32 %v3484_v63, %v3396_v48  ;;  %v7777_v48 = vld [vmem:[#allocation2 + $0x158] sm:$0xf] }
 0x28a   : > { %v3749_v5 = vsel %vm9652_vm6, %v3741_v39, %v3748_v50  ;;  %v4123_v30 = vrot.slane %v4122_v32, 4  ;;  %v3690_v11 = vpack.c.bf16 %v3658_v10, %v3658_v10  ;;  %3437 = vmatmul.bf16.gmra.mxu3 %v7762_v9  ;;  %v3309_v28 = vpop.f32.mrf.mxu2  ;;  %v4016_v9 = vld [vmem:[#allocation3 + $0x48] sm:$0xf]  ;;  %v8962_v39 = vld [vmem:[#allocation2 + $0x158] sm:$0xf0] }
 0x28b   : > { %4015 = vst [vmem:[#allocation3 + $0x3c] sm:$0xf] %v3749_v5  ;;  %v3557_v24 = vadd.f32 %v3485_v2, %v9983_v51  ;;  %v7925_v10 = vld [vmem:[#allocation3 + $0x30] sm:$0xf]  ;;  %v8963_v2 = vld [vmem:[#allocation2 + $0x160] sm:$0xf0] }
 0x28c   : > { %v4288_v22 = vsel %vm9816_vm12, %v4123_v30, %v4287_v34  ;;  %v3751_v61 = vshrl.u32 %v3690_v11, 16  ;;  %v3754_v63 = vshll.u32 %v3690_v11, 16  ;;  %4076 = vst [vmem:[#allocation3 + $0x4c] sm:$0xf] %v3690_v11  ;;  %v3489_v51 = vpop.f32.mrf.mxu0  ;;  %v8961_v11 = vld [vmem:[#allocation2 + $0x154] sm:$0xf] }
 0x28d   : > { %4289 = vst [vmem:[#allocation3 + $0x44] sm:$0xf] %v4288_v22  ;;  %v3592_v8 = vmul.f32 %v10104_v49, %v3557_v24  ;;  %v3398_v44 = vpop.f32.mrf.mxu3  ;;  %v9131_v22 = vld [vmem:[#allocation9 + $0x130] sm:$0xff] }
 0x28e   : > { %v10162_v26 = vrot.slane %v3751_v61, 7  ;;  %v4124_v31 = vrot.slane %v3751_v61, 4  ;;  %v4125_v14 = vrot.slane %v3754_v63, 5  ;;  %v3399_v57 = vadd.f32 %v3398_v44, %v3309_v28  ;;  %v9051_v61 = vld [vmem:[#allocation9 + $0x30] sm:$0xff]  ;;  %5063 = vmatpush.bf16.msrb.mxu2 %v9131_v22 }
 0x28f   : > { %v3627_v62 = vadd.f32 %v10109_v27, %v3592_v8  ;;  %v7778_v44 = vor.u32 %v8963_v2, %v7777_v48  ;;  %5641 = vmatpush.bf16.msrb.mxu0 %v9051_v61  ;;  %v4291_v2 = vld [vmem:[#allocation3 + $0x5c] sm:$0xf] }
 0x290   : > { %v3756_v42 = vor.u32 %v3754_v63, %v10162_v26  ;;  %v3488_v23 = vadd.f32 %v3487_v46, %v3399_v57  ;;  %v4126_v52 = vor.u32 %v4125_v14, %v4124_v31 }
 0x291   : > { %v3659_v15 = vmax.f32 %v3627_v62, 0.0  ;;  %v7774_v62 = vor.u32 %v8961_v11, %v7771_v56  ;;  %v470_v11 = vld [vmem:[#allocation3 + $0x90] sm:$0x1] }
 0x292   : > { %v4017_v50 = vsel %vm9659_vm7, %v3756_v42, %v4016_v9  ;;  %v3558_v32 = vadd.f32 %v3488_v23, %v9990_v16  ;;  %v9073_v34 = vld [vmem:[#allocation3 + $0x38] sm:$0xf0]  ;;  %v3311_v24 = vpop.f32.mrf.mxu2  ;;  %v7770_v16 = vor.u32 %v8962_v39, %v7769_v20  ;;  %v4127_v31 = vrot.slane %v4126_v52, 4  ;;  %v515_v42 = vld [vmem:[#allocation3 + $0x8c] sm:$0x8] }
 0x293   : > { %4018 = vst [vmem:[#allocation3 + $0x48] sm:$0xf] %v4017_v50  ;;  %v3691_v5 = vpack.c.bf16 %v3659_v15, %v3659_v15  ;;  %v7926_v30 = vor.u32 %v9073_v34, %v7925_v10  ;;  %v3757_v20 = vrot.slane %v10162_v26, 4  ;;  %v471_v22 = vsel %vm9636_vm2, 0, %v470_v11 }
 0x294   : > { %v3593_v46 = vmul.f32 %v10104_v49, %v3558_v32  ;;  %v3492_v9 = vpop.f32.mrf.mxu0  ;;  %v516_v32 = vsel %vm9807_vm10, 0, %v515_v42  ;;  %472 = vst [vmem:[#allocation3 + $0x90] sm:$0x1] %v471_v22 }
 0x295   : > { %v3759_v63 = vshrl.u32 %v3691_v5, 16  ;;  %v3762_v28 = vshll.u32 %v3691_v5, 16  ;;  %4077 = vst [vmem:[#allocation3 + $0x58] sm:$0xf] %v3691_v5  ;;  %v3400_v8 = vpop.f32.mrf.mxu3  ;;  %4986 = vmatmul.bf16.gmra.mxu1 %v7926_v30 }
 0x296   : > { %v3628_v14 = vadd.f32 %v10109_v27, %v3593_v46  ;;  %v3401_v57 = vadd.f32 %v3400_v8, %v3311_v24  ;;  %517 = vst [vmem:[#allocation3 + $0x8c] sm:$0x8] %v516_v32 }
 0x297   : > { %v3761_v23 = vrot.slane %v3759_v63, 7  ;;  %v4128_v15 = vrot.slane %v3762_v28, 5  ;;  %v4130_v50 = vrot.slane %v3759_v63, 4  ;;  %3353 = vmatmul.bf16.gmra.mxu2 %v7770_v16  ;;  %3531 = vmatmul.bf16.gmra.mxu0 %v7778_v44  ;;  %v9059_v63 = vld [vmem:[#allocation9 + $0x70] sm:$0xff] }
 0x298   : > { %v3660_v10 = vmax.f32 %v3628_v14, 0.0  ;;  %v3490_v34 = vadd.f32 %v3489_v51, %v3401_v57  ;;  %v4020_v14 = vld [vmem:[#allocation3 + $0x60] sm:$0xf]  ;;  %5730 = vmatpush.bf16.msrb.mxu1 %v9059_v63 }
 0x299   : > { %v3764_v39 = vor.u32 %v3762_v28, %v3761_v23  ;;  %v4129_v48 = vsel %vm10126_vm14, %v4127_v31, %v4128_v15  ;;  %v4131_v52 = vor.u32 %v4130_v50, %v4128_v15  ;;  %v7781_v23 = vld [vmem:[#allocation2 + $0x168] sm:$0xf]  ;;  %v8965_v15 = vld [vmem:[#allocation2 + $0x170] sm:$0xf0] }
 0x29a   : > { %4290 = vst [vmem:[#allocation3 + $0x50] sm:$0xf] %v4129_v48  ;;  %v3692_v5 = vpack.c.bf16 %v3660_v10, %v3660_v10  ;;  %v3559_v30 = vadd.f32 %v3490_v34, %v9995_v18  ;;  %3442 = vmatmul.bf16.gmra.mxu3 %v7774_v62  ;;  %v3314_v36 = vpop.f32.mrf.mxu2  ;;  %v8964_v10 = vld [vmem:[#allocation2 + $0x16c] sm:$0xf]  ;;  %v7783_v34 = vld [vmem:[#allocation2 + $0x174] sm:$0xf0]  ;;  %v7782_v11 = vor.u32 %v8965_v15, %v7781_v23 }
 0x29b   : > { %v3765_v51 = vsel %vm9652_vm6, %v3757_v20, %v3764_v39  ;;  %v4132_v56 = vrot.slane %v4131_v52, 4  ;;  %v7937_v48 = vld [vmem:[#allocation3 + $0x48] sm:$0xf]  ;;  %v7789_v52 = vld [vmem:[#allocation2 + $0x170] sm:$0xf]  ;;  %v7786_v63 = vor.u32 %v8964_v10, %v7783_v34  ;;  %v2711_v23 = vadd.f32 %v10000_v3, %v10007_v43  ;;  %v9137_v10 = vld [vmem:[#allocation9 + $0x160] sm:$0xff] }
 0x29c   : > { %4019 = vst [vmem:[#allocation3 + $0x54] sm:$0xf] %v3765_v51  ;;  %v3767_v26 = vshrl.u32 %v3692_v5, 16  ;;  %v3770_v46 = vshll.u32 %v3692_v5, 16  ;;  %v3594_v24 = vmul.f32 %v10104_v49, %v3559_v30  ;;  %v3494_v31 = vpop.f32.mrf.mxu0  ;;  %v518_v51 = vld [vmem:[#allocation3 + $0xa4] sm:$0x8] }
 0x29d   : > { %v4292_v61 = vsel %vm9816_vm12, %v4132_v56, %v4291_v2  ;;  %4078 = vst [vmem:[#allocation3 + $0x64] sm:$0xf] %v3692_v5  ;;  %v3403_v18 = vpop.f32.mrf.mxu3  ;;  %v8966_v2 = vld [vmem:[#allocation2 + $0x178] sm:$0xf0] }
 0x29e   : > { %4293 = vst [vmem:[#allocation3 + $0x5c] sm:$0xf] %v4292_v61  ;;  %v10184_v28 = vrot.slane %v3767_v26, 7  ;;  %v4133_v8 = vrot.slane %v3767_v26, 4  ;;  %v4134_v16 = vrot.slane %v3770_v46, 5  ;;  %v3629_v44 = vadd.f32 %v10109_v27, %v3594_v24 }
 0x29f   : > { %v3404_v57 = vadd.f32 %v3403_v18, %v3314_v36  ;;  %v519_v24 = vsel %vm9807_vm10, 0, %v518_v51  ;;  %v9138_v36 = vld [vmem:[#allocation9 + $0x168] sm:$0xff] }
 0x2a0   : > { %v3772_v62 = vor.u32 %v3770_v46, %v10184_v28  ;;  %v3661_v42 = vmax.f32 %v3629_v44, 0.0  ;;  %v4135_v50 = vor.u32 %v4134_v16, %v4133_v8  ;;  %v7790_v8 = vor.u32 %v8966_v2, %v7789_v52  ;;  %520 = vst [vmem:[#allocation3 + $0xa4] sm:$0x8] %v519_v24  ;;  %v9050_v16 = vld [vmem:[#allocation9 + $0x28] sm:$0xff]  ;;  %5153 = vmatpush.bf16.msrb.mxu3 %v9138_v36  ;;  %v9049_v52 = vld [vmem:[#allocation9 + $0x20] sm:$0xff] }
 0x2a1   : > { %v3493_v32 = vadd.f32 %v3492_v9, %v3404_v57  ;;  %v3773_v15 = vrot.slane %v10184_v28, 4  ;;  %5642 = vmatpush.bf16.msrb.mxu0 %v9050_v16  ;;  %v4295_v2 = vld [vmem:[#allocation3 + $0x74] sm:$0xf] }
 0x2a2   : > { %v4021_v20 = vsel %vm9659_vm7, %v3772_v62, %v4020_v14  ;;  %v3693_v39 = vpack.c.bf16 %v3661_v42, %v3661_v42  ;;  %v3316_v46 = vpop.f32.mrf.mxu2  ;;  %v4136_v22 = vrot.slane %v4135_v50, 4 }
 0x2a3   : > { %4022 = vst [vmem:[#allocation3 + $0x60] sm:$0xf] %v4021_v20  ;;  %v3560_v5 = vadd.f32 %v3493_v32, %v10004_v41  ;;  %v9076_v30 = vld [vmem:[#allocation3 + $0x50] sm:$0xf0]  ;;  %v9130_v41 = vld [vmem:[#allocation9 + $0x128] sm:$0xff] }
 0x2a4   : > { %v3775_v56 = vshrl.u32 %v3693_v39, 16  ;;  %v3778_v26 = vshll.u32 %v3693_v39, 16  ;;  %4079 = vst [vmem:[#allocation3 + $0x70] sm:$0xf] %v3693_v39  ;;  %v7938_v9 = vor.u32 %v9076_v30, %v7937_v48  ;;  %v3497_v42 = vpop.f32.mrf.mxu0  ;;  %5064 = vmatpush.bf16.msrb.mxu2 %v9130_v41  ;;  %v9129_v32 = vld [vmem:[#allocation9 + $0x120] sm:$0xff]  ;;  %5154 = vmatpush.bf16.msrb.mxu3 %v9137_v10 }
 0x2a5   : > { %v3595_v61 = vmul.f32 %v10104_v49, %v3560_v5  ;;  %v3405_v18 = vpop.f32.mrf.mxu3  ;;  %v473_v30 = vld [vmem:[#allocation3 + $0xa8] sm:$0x1]  ;;  %5643 = vmatpush.bf16.msrb.mxu0 %v9049_v52  ;;  %v10212_v41 = vld [vmem:[#allocation2 + $0x188] sm:$0xf0]  ;;  %v7795_v10 = vld [vmem:[#allocation2 + $0x18c] sm:$0xf0] }
 0x2a6   : > { %v3777_v44 = vrot.slane %v3775_v56, 7  ;;  %v4137_v14 = vrot.slane %v3778_v26, 5  ;;  %v4139_v57 = vrot.slane %v3775_v56, 4  ;;  %v3406_v62 = vadd.f32 %v3405_v18, %v3316_v46  ;;  %4991 = vmatmul.bf16.gmra.mxu1 %v7938_v9  ;;  %v9047_v52 = vld [vmem:[#allocation9 + $0x10] sm:$0xff] }
 0x2a7   : > { %v3630_v50 = vadd.f32 %v10109_v27, %v3595_v61  ;;  %3358 = vmatmul.bf16.gmra.mxu2 %v7782_v11  ;;  %3536 = vmatmul.bf16.gmra.mxu0 %v7790_v8  ;;  %v474_v56 = vsel %vm9636_vm2, 0, %v473_v30  ;;  %v10210_v8 = vld [vmem:[#allocation2 + $0x180] sm:$0xf] }
 0x2a8   : > { %v3780_v34 = vor.u32 %v3778_v26, %v3777_v44  ;;  %v4138_v20 = vsel %vm10126_vm14, %v4136_v22, %v4137_v14  ;;  %v4140_v39 = vor.u32 %v4139_v57, %v4137_v14  ;;  %v3495_v48 = vadd.f32 %v3494_v31, %v3406_v62  ;;  %5065 = vmatpush.bf16.msrb.mxu2 %v9129_v32  ;;  %v9128_v31 = vld [vmem:[#allocation9 + $0x118] sm:$0xff]  ;;  %v4024_v22 = vld [vmem:[#allocation3 + $0x78] sm:$0xf]  ;;  %v8967_v32 = vld [vmem:[#allocation2 + $0x184] sm:$0xf] }
 0x2a9   : > { %4294 = vst [vmem:[#allocation3 + $0x68] sm:$0xf] %v4138_v20  ;;  %v3662_v5 = vmax.f32 %v3630_v50, 0.0  ;;  %v9136_v57 = vld [vmem:[#allocation9 + $0x158] sm:$0xff] }
 0x2aa   : > { %v3781_v3 = vsel %vm9652_vm6, %v3773_v15, %v3780_v34  ;;  %v4141_v43 = vrot.slane %v4140_v39, 4  ;;  %v3561_v28 = vadd.f32 %v3495_v48, %v2711_v23  ;;  %3447 = vmatmul.bf16.gmra.mxu3 %v7786_v63  ;;  %v3319_v46 = vpop.f32.mrf.mxu2  ;;  %475 = vst [vmem:[#allocation3 + $0xa8] sm:$0x1] %v474_v56  ;;  %v9048_v62 = vld [vmem:[#allocation9 + $0x18] sm:$0xff]  ;;  %v9127_v23 = vld [vmem:[#allocation9 + $0x110] sm:$0xff] }
 0x2ab   : > { %4023 = vst [vmem:[#allocation3 + $0x6c] sm:$0xf] %v3781_v3  ;;  %v3694_v51 = vpack.c.bf16 %v3662_v5, %v3662_v5  ;;  %v7801_v39 = vld [vmem:[#allocation2 + $0x188] sm:$0xf]  ;;  %5155 = vmatpush.bf16.msrb.mxu3 %v9136_v57  ;;  %5644 = vmatpush.bf16.msrb.mxu0 %v9048_v62  ;;  %v9135_v48 = vld [vmem:[#allocation9 + $0x150] sm:$0xff] }
 0x2ac   : > { %v4296_v26 = vsel %vm9816_vm12, %v4141_v43, %v4295_v2  ;;  %v3596_v11 = vmul.f32 %v10104_v49, %v3561_v28  ;;  %v10208_v63 = vpop.f32.mrf.mxu0  ;;  %5066 = vmatpush.bf16.msrb.mxu2 %v9128_v31  ;;  %v7949_v3 = vld [vmem:[#allocation3 + $0x60] sm:$0xf]  ;;  %v8969_v28 = vld [vmem:[#allocation2 + $0x190] sm:$0xf0]  ;;  %v521_v56 = vld [vmem:[#allocation3 + $0xbc] sm:$0x8] }
 0x2ad   : > { %4297 = vst [vmem:[#allocation3 + $0x74] sm:$0xf] %v4296_v26  ;;  %v3783_v9 = vshrl.u32 %v3694_v51, 16  ;;  %v3786_v24 = vshll.u32 %v3694_v51, 16  ;;  %v3408_v36 = vpop.f32.mrf.mxu3  ;;  %v9126_v31 = vld [vmem:[#allocation9 + $0x108] sm:$0xff] }
 0x2ae   : > { %4080 = vst [vmem:[#allocation3 + $0x7c] sm:$0xf] %v3694_v51  ;;  %v3631_v61 = vadd.f32 %v10109_v27, %v3596_v11  ;;  %v3409_v18 = vadd.f32 %v3408_v36, %v3319_v46  ;;  %v7794_v51 = vor.u32 %v10212_v41, %v10210_v8  ;;  %v9046_v57 = vld [vmem:[#allocation9 + $0x8] sm:$0xff] }
 0x2af   : > { %v10214_v16 = vrot.slane %v3783_v9, 7  ;;  %v4142_v44 = vrot.slane %v3783_v9, 4  ;;  %v4143_v14 = vrot.slane %v3786_v24, 5  ;;  %5156 = vmatpush.bf16.msrb.mxu3 %v9135_v48  ;;  %5645 = vmatpush.bf16.msrb.mxu0 %v9047_v52  ;;  %v4299_v48 = vld [vmem:[#allocation3 + $0x8c] sm:$0xf] }
 0x2b0   : > { %v3663_v15 = vmax.f32 %v3631_v61, 0.0  ;;  %v3498_v50 = vadd.f32 %v3497_v42, %v3409_v18  ;;  %5067 = vmatpush.bf16.msrb.mxu2 %v9127_v23  ;;  %v7802_v61 = vor.u32 %v8969_v28, %v7801_v39  ;;  %v2716_v39 = vadd.f32 %v10010_v0, %v10015_v45  ;;  %v9133_v45 = vld [vmem:[#allocation9 + $0x140] sm:$0xff] }
 0x2b1   : > { %v3788_v34 = vor.u32 %v3786_v24, %v10214_v16  ;;  %v4144_v20 = vor.u32 %v4143_v14, %v4142_v44  ;;  %v3789_v62 = vrot.slane %v10214_v16, 4 }
 0x2b2   : > { %v3695_v2 = vpack.c.bf16 %v3663_v15, %v3663_v15  ;;  %v3562_v5 = vadd.f32 %v3498_v50, %v10012_v7  ;;  %v9079_v43 = vld [vmem:[#allocation3 + $0x68] sm:$0xf0]  ;;  %v3321_v9 = vpop.f32.mrf.mxu2  ;;  %v522_v7 = vsel %vm9807_vm10, 0, %v521_v56  ;;  %v9134_v15 = vld [vmem:[#allocation9 + $0x148] sm:$0xff]  ;;  %v9125_v50 = vld [vmem:[#allocation9 + $0x100] sm:$0xff] }
 0x2b3   : > { %v4025_v30 = vsel %vm9659_vm7, %v3788_v34, %v4024_v22  ;;  %v7950_v42 = vor.u32 %v9079_v43, %v7949_v3  ;;  %v4145_v24 = vrot.slane %v4144_v20, 4  ;;  %v7798_v22 = vor.u32 %v8967_v32, %v7795_v10  ;;  %523 = vst [vmem:[#allocation3 + $0xbc] sm:$0x8] %v522_v7  ;;  %v476_v3 = vld [vmem:[#allocation3 + $0xc0] sm:$0x1]  ;;  %5646 = vmatpush.bf16.msrb.mxu0 %v9046_v57  ;;  %v9045_v43 = vld [vmem:[#allocation9] sm:$0xff] }
 0x2b4   : > { %4026 = vst [vmem:[#allocation3 + $0x78] sm:$0xf] %v4025_v30  ;;  %v3791_v26 = vshrl.u32 %v3695_v2, 16  ;;  %v3794_v11 = vshll.u32 %v3695_v2, 16  ;;  %v3597_v46 = vmul.f32 %v10104_v49, %v3562_v5  ;;  %v3502_v14 = vpop.f32.mrf.mxu0  ;;  %5068 = vmatpush.bf16.msrb.mxu2 %v9126_v31  ;;  %v477_v0 = vsel %vm9636_vm2, 0, %v476_v3  ;;  %5157 = vmatpush.bf16.msrb.mxu3 %v9134_v15 }
 0x2b5   : > { %4081 = vst [vmem:[#allocation3 + $0x88] sm:$0xf] %v3695_v2  ;;  %v3410_v36 = vpop.f32.mrf.mxu3  ;;  %v4028_v7 = vld [vmem:[#allocation3 + $0x90] sm:$0xf] }
 0x2b6   : > { %v3793_v18 = vrot.slane %v3791_v26, 7  ;;  %v4146_v8 = vrot.slane %v3794_v11, 5  ;;  %v4148_v41 = vrot.slane %v3791_v26, 4  ;;  %v3632_v44 = vadd.f32 %v10109_v27, %v3597_v46  ;;  %4996 = vmatmul.bf16.gmra.mxu1 %v7950_v42  ;;  %v9058_v26 = vld [vmem:[#allocation9 + $0x68] sm:$0xff]  ;;  %478 = vst [vmem:[#allocation3 + $0xc0] sm:$0x1] %v477_v0 }
 0x2b7   : > { %v3411_v23 = vadd.f32 %v3410_v36, %v3321_v9  ;;  %3363 = vmatmul.bf16.gmra.mxu2 %v7794_v51  ;;  %3541 = vmatmul.bf16.gmra.mxu0 %v7802_v61  ;;  %v7813_v57 = vld [vmem:[#allocation2 + $0x1a0] sm:$0xf] }
 0x2b8   : > { %v3796_v34 = vor.u32 %v3794_v11, %v3793_v18  ;;  %v4147_v32 = vsel %vm10126_vm14, %v4145_v24, %v4146_v8  ;;  %v4149_v10 = vor.u32 %v4148_v41, %v4146_v8  ;;  %v3664_v20 = vmax.f32 %v3632_v44, 0.0  ;;  %5069 = vmatpush.bf16.msrb.mxu2 %v9125_v50  ;;  %5647 = vmatpush.bf16.msrb.mxu0 %v9045_v43  ;;  %v7805_v8 = vld [vmem:[#allocation2 + $0x198] sm:$0xf]  ;;  %v8971_v44 = vld [vmem:[#allocation2 + $0x1a0] sm:$0xf0] }
 0x2b9   : > { %4298 = vst [vmem:[#allocation3 + $0x80] sm:$0xf] %v4147_v32  ;;  %v3500_v52 = vadd.f32 %v10208_v63, %v3411_v23  ;;  %5731 = vmatpush.bf16.msrb.mxu1 %v9058_v26  ;;  %5158 = vmatpush.bf16.msrb.mxu3 %v9133_v45  ;;  %v7806_v43 = vor.u32 %v8971_v44, %v7805_v8 }
 0x2ba   : > { %v3797_v16 = vsel %vm9652_vm6, %v3789_v62, %v3796_v34  ;;  %v4150_v2 = vrot.slane %v4149_v10, 4  ;;  %v3696_v5 = vpack.c.bf16 %v3664_v20, %v3664_v20  ;;  %3452 = vmatmul.bf16.gmra.mxu3 %v7798_v22  ;;  %v3324_v51 = vpop.f32.mrf.mxu2  ;;  %v8972_v34 = vld [vmem:[#allocation2 + $0x1a8] sm:$0xf0]  ;;  %v2721_v26 = vadd.f32 %v10018_v54, %v10023_v12 }
 0x2bb   : > { %4027 = vst [vmem:[#allocation3 + $0x84] sm:$0xf] %v3797_v16  ;;  %v3563_v28 = vadd.f32 %v3500_v52, %v2716_v39  ;;  %v7961_v15 = vld [vmem:[#allocation3 + $0x78] sm:$0xf]  ;;  %v8970_v39 = vld [vmem:[#allocation2 + $0x19c] sm:$0xf] }
 0x2bc   : > { %v4300_v63 = vsel %vm9816_vm12, %v4150_v2, %v4299_v48  ;;  %v3799_v30 = vshrl.u32 %v3696_v5, 16  ;;  %v3802_v42 = vshll.u32 %v3696_v5, 16  ;;  %4082 = vst [vmem:[#allocation3 + $0x94] sm:$0xf] %v3696_v5  ;;  %v3504_v9 = vpop.f32.mrf.mxu0  ;;  %v7807_v48 = vld [vmem:[#allocation2 + $0x1a4] sm:$0xf0] }
 0x2bd   : > { %4301 = vst [vmem:[#allocation3 + $0x8c] sm:$0xf] %v4300_v63  ;;  %v3598_v56 = vmul.f32 %v10104_v49, %v3563_v28  ;;  %v3413_v31 = vpop.f32.mrf.mxu3  ;;  %v524_v16 = vld [vmem:[#allocation3 + $0xd4] sm:$0x8]  ;;  %v7814_v28 = vor.u32 %v8972_v34, %v7813_v57  ;;  %v7810_v63 = vor.u32 %v8970_v39, %v7807_v48 }
 0x2be   : > { %v10239_v11 = vrot.slane %v3799_v30, 7  ;;  %v3414_v46 = vadd.f32 %v3413_v31, %v3324_v51  ;;  %v4151_v24 = vrot.slane %v3799_v30, 4  ;;  %v4152_v36 = vrot.slane %v3802_v42, 5 }
 0x2bf   : > { %v3633_v22 = vadd.f32 %v10109_v27, %v3598_v56  ;;  %v525_v30 = vsel %vm9807_vm10, 0, %v524_v16 }
 0x2c0   : > { %v3804_v61 = vor.u32 %v3802_v42, %v10239_v11  ;;  %v3503_v18 = vadd.f32 %v3502_v14, %v3414_v46  ;;  %v4153_v32 = vor.u32 %v4152_v36, %v4151_v24  ;;  %526 = vst [vmem:[#allocation3 + $0xd4] sm:$0x8] %v525_v30  ;;  %v3805_v24 = vrot.slane %v10239_v11, 4 }
 0x2c1   : > { %v3665_v41 = vmax.f32 %v3633_v22, 0.0 }
 0x2c2   : > { %v4029_v62 = vsel %vm9659_vm7, %v3804_v61, %v4028_v7  ;;  %v3564_v23 = vadd.f32 %v3503_v18, %v10020_v53  ;;  %v9082_v50 = vld [vmem:[#allocation3 + $0x80] sm:$0xf0]  ;;  %v3326_v52 = vpop.f32.mrf.mxu2  ;;  %v4154_v42 = vrot.slane %v4153_v32, 4  ;;  %v10263_v32 = vld [vmem:[%s11149_s3] ss:$0 sm:$0xff] }
 0x2c3   : > { %4030 = vst [vmem:[#allocation3 + $0x90] sm:$0xf] %v4029_v62  ;;  %v3697_v10 = vpack.c.bf16 %v3665_v41, %v3665_v41  ;;  %v7962_v20 = vor.u32 %v9082_v50, %v7961_v15  ;;  %v4303_v61 = vld [vmem:[#allocation3 + $0xa4] sm:$0xf] }
 0x2c4   : > { %v3599_v14 = vmul.f32 %v10104_v49, %v3564_v23  ;;  %v3507_v45 = vpop.f32.mrf.mxu0  ;;  %v479_v23 = vld [vmem:[#allocation3 + $0xd8] sm:$0x1] }
 0x2c5   : > { %v3807_v2 = vshrl.u32 %v3697_v10, 16  ;;  %v3810_v5 = vshll.u32 %v3697_v10, 16  ;;  %4083 = vst [vmem:[#allocation3 + $0xa0] sm:$0xf] %v3697_v10  ;;  %v3415_v3 = vpop.f32.mrf.mxu3  ;;  %v480_v48 = vsel %vm9636_vm2, 0, %v479_v23 }
 0x2c6   : > { %v3634_v53 = vadd.f32 %v10109_v27, %v3599_v14  ;;  %v3416_v0 = vadd.f32 %v3415_v3, %v3326_v52  ;;  %5001 = vmatmul.bf16.gmra.mxu1 %v7962_v20  ;;  %481 = vst [vmem:[#allocation3 + $0xd8] sm:$0x1] %v480_v48 }
 0x2c7   : > { %v3809_v51 = vrot.slane %v3807_v2, 7  ;;  %v4155_v56 = vrot.slane %v3810_v5, 5  ;;  %v4157_v31 = vrot.slane %v3807_v2, 4  ;;  %3368 = vmatmul.bf16.gmra.mxu2 %v7806_v43  ;;  %3546 = vmatmul.bf16.gmra.mxu0 %v7814_v28  ;;  %v7915_v28 = vld [vmem:[#allocation3 + $0x24] sm:$0xf0] }
 0x2c8   : > { %v3666_v46 = vmax.f32 %v3634_v53, 0.0  ;;  %v3505_v7 = vadd.f32 %v3504_v9, %v3416_v0  ;;  %v9071_v53 = vld [vmem:[#allocation3 + $0x28] sm:$0xf0]  ;;  %v8201_v0 = vld [vmem:[#allocation3] sm:$0xf] }
 0x2c9   : > { %v3812_v27 = vor.u32 %v3810_v5, %v3809_v51  ;;  %v4156_v36 = vsel %vm10126_vm14, %v4154_v42, %v4155_v56  ;;  %v4158_v22 = vor.u32 %v4157_v31, %v4155_v56  ;;  %v527_v51 = vld [vmem:[#allocation3 + $0xec] sm:$0x8] }
 0x2ca   : > { %4302 = vst [vmem:[#allocation3 + $0x98] sm:$0xf] %v4156_v36  ;;  %v3698_v18 = vpack.c.bf16 %v3666_v46, %v3666_v46  ;;  %v3565_v8 = vadd.f32 %v3505_v7, %v2721_v26  ;;  %3457 = vmatmul.bf16.gmra.mxu3 %v7810_v63  ;;  %v3329_v44 = vpop.f32.mrf.mxu2  ;;  %v7973_v43 = vld [vmem:[#allocation3 + $0x90] sm:$0xf]  ;;  %v8998_v63 = vld [vmem:[#allocation3 + $0x8] sm:$0xf0]  ;;  %v2726_v7 = vadd.f32 %v10026_v58, %v10031_v21 }
 0x2cb   : > { %v3813_v41 = vsel %vm9652_vm6, %v3805_v24, %v3812_v27  ;;  %v4159_v54 = vrot.slane %v4158_v22, 4  ;;  %v10278_v27 = vld [vmem:[%s11148_s2] ss:$0 sm:$0xff]  ;;  %v9069_v22 = vld [vmem:[#allocation3 + $0x1c] sm:$0xf] }
 0x2cc   : > { %4031 = vst [vmem:[#allocation3 + $0x9c] sm:$0xf] %v3813_v41  ;;  %v3815_v12 = vshrl.u32 %v3698_v18, 16  ;;  %v3818_v9 = vshll.u32 %v3698_v18, 16  ;;  %v3600_v11 = vmul.f32 %v10104_v49, %v3565_v8  ;;  %v3509_v20 = vpop.f32.mrf.mxu0  ;;  %v4032_v49 = vld [vmem:[#allocation3 + $0xa8] sm:$0xf] }
 0x2cd   : > { %v4304_v57 = vsel %vm9816_vm12, %v4159_v54, %v4303_v61  ;;  %4084 = vst [vmem:[#allocation3 + $0xac] sm:$0xf] %v3698_v18  ;;  %v3418_v62 = vpop.f32.mrf.mxu3  ;;  %v8202_v61 = vor.u32 %v8998_v63, %v8201_v0  ;;  %v482_v0 = vld [vmem:[#allocation3 + $0xf0] sm:$0x1] }
 0x2ce   : > { %4305 = vst [vmem:[#allocation3 + $0xa4] sm:$0xf] %v4304_v57  ;;  %v3817_v15 = vrot.slane %v3815_v12, 7  ;;  %v4160_v50 = vrot.slane %v3815_v12, 4  ;;  %v4161_v34 = vrot.slane %v3818_v9, 5  ;;  %v3635_v10 = vadd.f32 %v10263_v32, %v3600_v11 }
 0x2cf   : > { %v3419_v39 = vadd.f32 %v3418_v62, %v3329_v44  ;;  %v7918_v11 = vor.u32 %v9069_v22, %v7915_v28  ;;  %v8213_v22 = vld [vmem:[#allocation3 + $0x18] sm:$0xf] }
 0x2d0   : > { %v3820_v14 = vor.u32 %v3818_v9, %v3817_v15  ;;  %v3667_v52 = vmax.f32 %v3635_v10, 0.0  ;;  %v4162_v16 = vor.u32 %v4161_v34, %v4160_v50  ;;  %v7921_v9 = vld [vmem:[#allocation3 + $0x20] sm:$0xf]  ;;  %v3821_v58 = vrot.slane %v3817_v15, 4  ;;  %v4307_v34 = vld [vmem:[#allocation3 + $0xbc] sm:$0xf] }
 0x2d1   : > { %v3508_v2 = vadd.f32 %v3507_v45, %v3419_v39  ;;  %v528_v45 = vsel %vm9807_vm10, 0, %v527_v51  ;;  %v7922_v44 = vor.u32 %v9071_v53, %v7921_v9  ;;  %v9057_v53 = vld [vmem:[#allocation9 + $0x60] sm:$0xff]  ;;  %v483_v51 = vsel %vm9636_vm2, 0, %v482_v0  ;;  %v530_v9 = vld [vmem:[#allocation3 + $0x104] sm:$0x8] }
 0x2d2   : > { %v4033_v5 = vsel %vm9659_vm7, %v3820_v14, %v4032_v49  ;;  %v3699_v3 = vpack.c.bf16 %v3667_v52, %v3667_v52  ;;  %v3331_v26 = vpop.f32.mrf.mxu2  ;;  %v4163_v24 = vrot.slane %v4162_v16, 4  ;;  %529 = vst [vmem:[#allocation3 + $0xec] sm:$0x8] %v528_v45  ;;  %5732 = vmatpush.bf16.msrb.mxu1 %v9057_v53  ;;  %v4311_v53 = vld [vmem:[#allocation3 + $0xd4] sm:$0xf] }
 0x2d3   : > { %4034 = vst [vmem:[#allocation3 + $0xa8] sm:$0xf] %v4033_v5  ;;  %v3566_v30 = vadd.f32 %v3508_v2, %v10028_v29  ;;  %v9085_v42 = vld [vmem:[#allocation3 + $0x98] sm:$0xf0] }
 0x2d4   : > { %v3823_v56 = vshrl.u32 %v3699_v3, 16  ;;  %v3826_v31 = vshll.u32 %v3699_v3, 16  ;;  %4085 = vst [vmem:[#allocation3 + $0xb8] sm:$0xf] %v3699_v3  ;;  %v7974_v46 = vor.u32 %v9085_v42, %v7973_v43  ;;  %v3512_v12 = vpop.f32.mrf.mxu0 }
 0x2d5   : > { %v3601_v29 = vmul.f32 %v10278_v27, %v3566_v30  ;;  %v3420_v36 = vpop.f32.mrf.mxu3  ;;  %484 = vst [vmem:[#allocation3 + $0xf0] sm:$0x1] %v483_v51 }
 0x2d6   : > { %v3825_v18 = vrot.slane %v3823_v56, 7  ;;  %v4164_v8 = vrot.slane %v3826_v31, 5  ;;  %v4166_v41 = vrot.slane %v3823_v56, 4  ;;  %v3421_v54 = vadd.f32 %v3420_v36, %v3331_v26  ;;  %5006 = vmatmul.bf16.gmra.mxu1 %v7974_v46  ;;  %v4036_v56 = vld [vmem:[#allocation3 + $0xc0] sm:$0xf] }
 0x2d7   : > { %v3636_v21 = vadd.f32 %v10263_v32, %v3601_v29  ;;  %5070 = vmatmul.bf16.vlgmr.msrb.gmra.mxu2 %v7918_v11  ;;  %5648 = vmatmul.bf16.vlgmr.msrb.gmra.mxu0 %v8202_v61  ;;  %v9001_v61 = vld [vmem:[#allocation3 + $0x20] sm:$0xf0] }
 0x2d8   : > { %v3828_v57 = vor.u32 %v3826_v31, %v3825_v18  ;;  %v4165_v62 = vsel %vm10126_vm14, %v4163_v24, %v4164_v8  ;;  %v4167_v23 = vor.u32 %v4166_v41, %v4164_v8  ;;  %v3510_v50 = vadd.f32 %v3509_v20, %v3421_v54  ;;  %v7927_v41 = vld [vmem:[#allocation3 + $0x3c] sm:$0xf0]  ;;  %v9074_v54 = vld [vmem:[#allocation3 + $0x40] sm:$0xf0] }
 0x2d9   : > { %4306 = vst [vmem:[#allocation3 + $0xb0] sm:$0xf] %v4165_v62  ;;  %v3668_v10 = vmax.f32 %v3636_v21, 0.0 }
 0x2da   : > { %v3829_v49 = vsel %vm9652_vm6, %v3821_v58, %v3828_v57  ;;  %v4168_v39 = vrot.slane %v4167_v23, 4  ;;  %v3567_v15 = vadd.f32 %v3510_v50, %v2726_v7  ;;  %5159 = vmatmul.bf16.vlgmr.msrb.gmra.mxu3 %v7922_v44  ;;  %v3334_v16 = vpop.f32.mrf.mxu2  ;;  %v7985_v29 = vld [vmem:[#allocation3 + $0xa8] sm:$0xf]  ;;  %v9072_v44 = vld [vmem:[#allocation3 + $0x34] sm:$0xf]  ;;  %v8214_v50 = vor.u32 %v9001_v61, %v8213_v22 }
 0x2db   : > { %4035 = vst [vmem:[#allocation3 + $0xb4] sm:$0xf] %v3829_v49  ;;  %v3700_v48 = vpack.c.bf16 %v3668_v10, %v3668_v10  ;;  %v7933_v23 = vld [vmem:[#allocation3 + $0x38] sm:$0xf] }
 0x2dc   : > { %v4308_v14 = vsel %vm9816_vm12, %v4168_v39, %v4307_v34  ;;  %v3602_v52 = vmul.f32 %v10278_v27, %v3567_v15  ;;  %v3514_v28 = vpop.f32.mrf.mxu0 }
 0x2dd   : > { %4309 = vst [vmem:[#allocation3 + $0xbc] sm:$0xf] %v4308_v14  ;;  %v3831_v20 = vshrl.u32 %v3700_v48, 16  ;;  %v3834_v2 = vshll.u32 %v3700_v48, 16  ;;  %v3423_v5 = vpop.f32.mrf.mxu3 }
 0x2de   : > { %4086 = vst [vmem:[#allocation3 + $0xc4] sm:$0xf] %v3700_v48  ;;  %v3637_v3 = vadd.f32 %v10263_v32, %v3602_v52  ;;  %v3424_v43 = vadd.f32 %v3423_v5, %v3334_v16  ;;  %v7930_v52 = vor.u32 %v9072_v44, %v7927_v41  ;;  %v7934_v16 = vor.u32 %v9074_v54, %v7933_v23  ;;  %v9004_v44 = vld [vmem:[#allocation3 + $0x38] sm:$0xf0]  ;;  %v7939_v23 = vld [vmem:[#allocation3 + $0x54] sm:$0xf0] }
 0x2df   : > { %v3833_v63 = vrot.slane %v3831_v20, 7  ;;  %v4169_v30 = vrot.slane %v3831_v20, 4  ;;  %v4170_v42 = vrot.slane %v3834_v2, 5 }
 0x2e0   : > { %v3669_v31 = vmax.f32 %v3637_v3, 0.0  ;;  %v3513_v26 = vadd.f32 %v3512_v12, %v3424_v43  ;;  %v2731_v43 = vadd.f32 %v10034_v59, %v10039_v55 }
 0x2e1   : > { %v3836_v46 = vor.u32 %v3834_v2, %v3833_v63  ;;  %v4171_v45 = vor.u32 %v4170_v42, %v4169_v30  ;;  %v3837_v48 = vrot.slane %v3833_v63, 4 }
 0x2e2   : > { %v3701_v7 = vpack.c.bf16 %v3669_v31, %v3669_v31  ;;  %v3568_v24 = vadd.f32 %v3513_v26, %v10036_v17  ;;  %v9088_v36 = vld [vmem:[#allocation3 + $0xb0] sm:$0xf0]  ;;  %v3336_v11 = vpop.f32.mrf.mxu2  ;;  %v531_v17 = vsel %vm9807_vm10, 0, %v530_v9 }
 0x2e3   : > { %v4037_v18 = vsel %vm9659_vm7, %v3836_v46, %v4036_v56  ;;  %v7986_v8 = vor.u32 %v9088_v36, %v7985_v29  ;;  %v4172_v57 = vrot.slane %v4171_v45, 4  ;;  %532 = vst [vmem:[#allocation3 + $0x104] sm:$0x8] %v531_v17  ;;  %v485_v46 = vld [vmem:[#allocation3 + $0x108] sm:$0x1] }
 0x2e4   : > { %4038 = vst [vmem:[#allocation3 + $0xc0] sm:$0xf] %v4037_v18  ;;  %v3839_v12 = vshrl.u32 %v3701_v7, 16  ;;  %v3842_v58 = vshll.u32 %v3701_v7, 16  ;;  %v3603_v21 = vmul.f32 %v10278_v27, %v3568_v24  ;;  %v3517_v15 = vpop.f32.mrf.mxu0  ;;  %v4040_v29 = vld [vmem:[#allocation3 + $0xd8] sm:$0xf] }
 0x2e5   : > { %4087 = vst [vmem:[#allocation3 + $0xd0] sm:$0xf] %v3701_v7  ;;  %v3425_v62 = vpop.f32.mrf.mxu3  ;;  %v486_v18 = vsel %vm9636_vm2, 0, %v485_v46 }
 0x2e6   : > { %v3841_v34 = vrot.slane %v3839_v12, 7  ;;  %v4173_v10 = vrot.slane %v3842_v58, 5  ;;  %v4175_v49 = vrot.slane %v3839_v12, 4  ;;  %v3638_v39 = vadd.f32 %v10263_v32, %v3603_v21  ;;  %5011 = vmatmul.bf16.gmra.mxu1 %v7986_v8  ;;  %487 = vst [vmem:[#allocation3 + $0x108] sm:$0x1] %v486_v18  ;;  %v11186_v12 = vld [vmem:[#allocation15_spill] sm:$0xff] }
 0x2e7   : > { %v3426_v14 = vadd.f32 %v3425_v62, %v3336_v11  ;;  %5075 = vmatmul.bf16.gmra.mxu2 %v7930_v52  ;;  %5653 = vmatmul.bf16.gmra.mxu0 %v8214_v50  ;;  %v8225_v50 = vld [vmem:[#allocation3 + $0x30] sm:$0xf] }
 0x2e8   : > { %v3844_v20 = vor.u32 %v3842_v58, %v3841_v34  ;;  %v4174_v2 = vsel %vm10126_vm14, %v4172_v57, %v4173_v10  ;;  %v4176_v5 = vor.u32 %v4175_v49, %v4173_v10  ;;  %v3670_v3 = vmax.f32 %v3638_v39, 0.0  ;;  %v9075_v49 = vld [vmem:[#allocation3 + $0x4c] sm:$0xf]  ;;  %v9077_v39 = vld [vmem:[#allocation3 + $0x58] sm:$0xf0] }
 0x2e9   : > { %4310 = vst [vmem:[#allocation3 + $0xc8] sm:$0xf] %v4174_v2  ;;  %v3515_v0 = vadd.f32 %v3514_v28, %v3426_v14 }
 0x2ea   : > { %v3845_v63 = vsel %vm9652_vm6, %v3837_v48, %v3844_v20  ;;  %v4177_v30 = vrot.slane %v4176_v5, 4  ;;  %v3702_v42 = vpack.c.bf16 %v3670_v3, %v3670_v3  ;;  %5164 = vmatmul.bf16.gmra.mxu3 %v7934_v16  ;;  %v3339_v59 = vpop.f32.mrf.mxu2  ;;  %v8226_v16 = vor.u32 %v9004_v44, %v8225_v50 }
 0x2eb   : > { %4039 = vst [vmem:[#allocation3 + $0xcc] sm:$0xf] %v3845_v63  ;;  %v3569_v51 = vadd.f32 %v3515_v0, %v2731_v43  ;;  %v7997_v21 = vld [vmem:[#allocation3 + $0xc0] sm:$0xf]  ;;  %v7942_v43 = vor.u32 %v9075_v49, %v7939_v23 }
 0x2ec   : > { %v4312_v56 = vsel %vm9816_vm12, %v4177_v30, %v4311_v53  ;;  %v3847_v31 = vshrl.u32 %v3702_v42, 16  ;;  %v3850_v26 = vshll.u32 %v3702_v42, 16  ;;  %4088 = vst [vmem:[#allocation3 + $0xdc] sm:$0xf] %v3702_v42  ;;  %v3519_v24 = vpop.f32.mrf.mxu0  ;;  %v7945_v42 = vld [vmem:[#allocation3 + $0x50] sm:$0xf] }
 0x2ed   : > { %4313 = vst [vmem:[#allocation3 + $0xd4] sm:$0xf] %v4312_v56  ;;  %v3604_v55 = vmul.f32 %v10278_v27, %v3569_v51  ;;  %v3428_v28 = vpop.f32.mrf.mxu3  ;;  %v11187_v51 = vld [vmem:[#allocation14_spill] sm:$0xff]  ;;  %v488_v23 = vld [vmem:[#allocation3 + $0x120] sm:$0x1] }
 0x2ee   : > { %v10308_v45 = vrot.slane %v3847_v31, 7  ;;  %v3429_v7 = vadd.f32 %v3428_v28, %v3339_v59  ;;  %v4178_v36 = vrot.slane %v3847_v31, 4  ;;  %v4179_v22 = vrot.slane %v3850_v26, 5 }
 0x2ef   : > { %v3639_v61 = vadd.f32 %v10263_v32, %v3604_v55  ;;  %v2736_v56 = vadd.f32 %v11187_v51, %v10047_v37  ;;  %v7946_v59 = vor.u32 %v9077_v39, %v7945_v42  ;;  %v9007_v39 = vld [vmem:[#allocation3 + $0x50] sm:$0xf0] }
 0x2f0   : > { %v3852_v8 = vor.u32 %v3850_v26, %v10308_v45  ;;  %v3518_v41 = vadd.f32 %v3517_v15, %v3429_v7  ;;  %v4180_v17 = vor.u32 %v4179_v22, %v4178_v36  ;;  %v533_v15 = vld [vmem:[#allocation3 + $0x11c] sm:$0x8]  ;;  %v3853_v55 = vrot.slane %v10308_v45, 4  ;;  %v4315_v36 = vld [vmem:[#allocation3 + $0xec] sm:$0xf] }
 0x2f1   : > { %v3671_v54 = vmax.f32 %v3639_v61, 0.0  ;;  %v534_v20 = vsel %vm9807_vm10, 0, %v533_v15  ;;  %v489_v15 = vsel %vm9636_vm2, 0, %v488_v23 }
 0x2f2   : > { %v4041_v9 = vsel %vm9659_vm7, %v3852_v8, %v4040_v29  ;;  %v3570_v58 = vadd.f32 %v3518_v41, %v11186_v12  ;;  %v9091_v11 = vld [vmem:[#allocation3 + $0xc8] sm:$0xf0]  ;;  %v3341_v10 = vpop.f32.mrf.mxu2  ;;  %535 = vst [vmem:[#allocation3 + $0x11c] sm:$0x8] %v534_v20  ;;  %v4181_v53 = vrot.slane %v4180_v17, 4  ;;  %v10326_v29 = vpop.f32.mrf.mxu1 }
 0x2f3   : > { %4042 = vst [vmem:[#allocation3 + $0xd8] sm:$0xf] %v4041_v9  ;;  %v3703_v57 = vpack.c.bf16 %v3671_v54, %v3671_v54  ;;  %v7998_v62 = vor.u32 %v9091_v11, %v7997_v21  ;;  %v9056_v12 = vld [vmem:[#allocation9 + $0x58] sm:$0xff]  ;;  %v7951_v20 = vld [vmem:[#allocation3 + $0x6c] sm:$0xf0] }
 0x2f4   : > { %v3605_v34 = vmul.f32 %v10278_v27, %v3570_v58  ;;  %v3522_v3 = vpop.f32.mrf.mxu0  ;;  %5733 = vmatpush.bf16.msrb.mxu1 %v9056_v12  ;;  %490 = vst [vmem:[#allocation3 + $0x120] sm:$0x1] %v489_v15  ;;  %v491_v15 = vld [vmem:[#allocation3 + $0x138] sm:$0x1] }
 0x2f5   : > { %v3855_v48 = vshrl.u32 %v3703_v57, 16  ;;  %v3858_v14 = vshll.u32 %v3703_v57, 16  ;;  %4089 = vst [vmem:[#allocation3 + $0xe8] sm:$0xf] %v3703_v57  ;;  %v3430_v52 = vpop.f32.mrf.mxu3  ;;  %v4044_v57 = vld [vmem:[#allocation3 + $0xf0] sm:$0xf] }
 0x2f6   : > { %v3640_v2 = vadd.f32 %v10263_v32, %v3605_v34  ;;  %v3431_v5 = vadd.f32 %v3430_v52, %v3341_v10  ;;  %5016 = vmatmul.bf16.gmra.mxu1 %v7998_v62 }
 0x2f7   : > { %v3857_v0 = vrot.slane %v3855_v48, 7  ;;  %v4182_v63 = vrot.slane %v3858_v14, 5  ;;  %v4184_v30 = vrot.slane %v3855_v48, 4  ;;  %5080 = vmatmul.bf16.gmra.mxu2 %v7942_v43  ;;  %5658 = vmatmul.bf16.gmra.mxu0 %v8226_v16 }
 0x2f8   : > { %v3672_v31 = vmax.f32 %v3640_v2, 0.0  ;;  %v3520_v26 = vadd.f32 %v3519_v24, %v3431_v5  ;;  %v9080_v2 = vld [vmem:[#allocation3 + $0x70] sm:$0xf0]  ;;  %v8237_v5 = vld [vmem:[#allocation3 + $0x48] sm:$0xf] }
 0x2f9   : > { %v3860_v28 = vor.u32 %v3858_v14, %v3857_v0  ;;  %v4183_v46 = vsel %vm10126_vm14, %v4181_v53, %v4182_v63  ;;  %v4185_v7 = vor.u32 %v4184_v30, %v4182_v63 }
 0x2fa   : > { %4314 = vst [vmem:[#allocation3 + $0xe0] sm:$0xf] %v4183_v46  ;;  %v3704_v22 = vpack.c.bf16 %v3672_v31, %v3672_v31  ;;  %v3571_v61 = vadd.f32 %v3520_v26, %v2736_v56  ;;  %5169 = vmatmul.bf16.gmra.mxu3 %v7946_v59  ;;  %v3344_v41 = vpop.f32.mrf.mxu2  ;;  %v8009_v16 = vld [vmem:[#allocation3 + $0xd8] sm:$0xf]  ;;  %v2741_v56 = vadd.f32 %v10050_v47, %v10055_v19 }
 0x2fb   : > { %v3861_v37 = vsel %vm9652_vm6, %v3853_v55, %v3860_v28  ;;  %v4186_v24 = vrot.slane %v4185_v7, 4  ;;  %v9078_v55 = vld [vmem:[#allocation3 + $0x64] sm:$0xf]  ;;  %v8238_v28 = vor.u32 %v9007_v39, %v8237_v5 }
 0x2fc   : > { %4043 = vst [vmem:[#allocation3 + $0xe4] sm:$0xf] %v3861_v37  ;;  %v3863_v45 = vshrl.u32 %v3704_v22, 16  ;;  %v3866_v18 = vshll.u32 %v3704_v22, 16  ;;  %v3606_v8 = vmul.f32 %v10278_v27, %v3571_v61  ;;  %v3524_v17 = vpop.f32.mrf.mxu0  ;;  %v7957_v61 = vld [vmem:[#allocation3 + $0x68] sm:$0xf] }
 0x2fd   : > { %v4316_v54 = vsel %vm9816_vm12, %v4186_v24, %v4315_v36  ;;  %4090 = vst [vmem:[#allocation3 + $0xf4] sm:$0xf] %v3704_v22  ;;  %v3433_v9 = vpop.f32.mrf.mxu3 }
 0x2fe   : > { %4317 = vst [vmem:[#allocation3 + $0xec] sm:$0xf] %v4316_v54  ;;  %v3865_v58 = vrot.slane %v3863_v45, 7  ;;  %v4187_v21 = vrot.slane %v3863_v45, 4  ;;  %v4188_v11 = vrot.slane %v3866_v18, 5  ;;  %v3641_v44 = vadd.f32 %v10263_v32, %v3606_v8 }
 0x2ff   : > { %v3434_v62 = vadd.f32 %v3433_v9, %v3344_v41  ;;  %v7954_v45 = vor.u32 %v9078_v55, %v7951_v20  ;;  %v4319_v54 = vld [vmem:[#allocation3 + $0x104] sm:$0xf]  ;;  %v492_v20 = vsel %vm9636_vm2, 0, %v491_v15 }
 0x300   : > { %v3868_v50 = vor.u32 %v3866_v18, %v3865_v58  ;;  %v3673_v34 = vmax.f32 %v3641_v44, 0.0  ;;  %v4189_v10 = vor.u32 %v4188_v11, %v4187_v21  ;;  %v3869_v37 = vrot.slane %v3865_v58, 4  ;;  %493 = vst [vmem:[#allocation3 + $0x138] sm:$0x1] %v492_v20 }
 0x301   : > { %v3523_v49 = vadd.f32 %v3522_v3, %v3434_v62  ;;  %v536_v3 = vld [vmem:[#allocation3 + $0x134] sm:$0x8]  ;;  %v7958_v18 = vor.u32 %v9080_v2, %v7957_v61  ;;  %v4048_v2 = vld [vmem:[#allocation3 + $0x108] sm:$0xf] }
 0x302   : > { %v4045_v48 = vsel %vm9659_vm7, %v3868_v50, %v4044_v57  ;;  %v3705_v14 = vpack.c.bf16 %v3673_v34, %v3673_v34  ;;  %v10338_v52 = vpop.f32.mrf.mxu1  ;;  %v3346_v30 = vpop.f32.mrf.mxu2  ;;  %v537_v51 = vsel %vm9807_vm10, 0, %v536_v3  ;;  %v4190_v31 = vrot.slane %v4189_v10, 4 }
 0x303   : > { %4046 = vst [vmem:[#allocation3 + $0xf0] sm:$0xf] %v4045_v48  ;;  %v3572_v43 = vadd.f32 %v3523_v49, %v10052_v35  ;;  %v9094_v53 = vld [vmem:[#allocation3 + $0xe0] sm:$0xf0] }
 0x304   : > { %v3871_v0 = vshrl.u32 %v3705_v14, 16  ;;  %v3874_v63 = vshll.u32 %v3705_v14, 16  ;;  %4091 = vst [vmem:[#allocation3 + $0x100] sm:$0xf] %v3705_v14  ;;  %v8010_v42 = vor.u32 %v9094_v53, %v8009_v16  ;;  %v3527_v22 = vpop.f32.mrf.mxu0 }
 0x305   : > { %v3607_v26 = vmul.f32 %v10278_v27, %v3572_v43  ;;  %v3435_v59 = vpop.f32.mrf.mxu3  ;;  %538 = vst [vmem:[#allocation3 + $0x134] sm:$0x8] %v537_v51 }
 0x306   : > { %v3873_v35 = vrot.slane %v3871_v0, 7  ;;  %v4191_v46 = vrot.slane %v3874_v63, 5  ;;  %v4193_v7 = vrot.slane %v3871_v0, 4  ;;  %v3436_v36 = vadd.f32 %v3435_v59, %v3346_v30  ;;  %5021 = vmatmul.bf16.gmra.mxu1 %v8010_v42 }
 0x307   : > { %v3642_v24 = vadd.f32 %v10263_v32, %v3607_v26  ;;  %5085 = vmatmul.bf16.gmra.mxu2 %v7954_v45  ;;  %5663 = vmatmul.bf16.gmra.mxu0 %v8238_v28  ;;  %v9010_v26 = vld [vmem:[#allocation3 + $0x68] sm:$0xf0]  ;;  %v7963_v28 = vld [vmem:[#allocation3 + $0x84] sm:$0xf0] }
 0x308   : > { %v3876_v47 = vor.u32 %v3874_v63, %v3873_v35  ;;  %v4192_v19 = vsel %vm10126_vm14, %v4190_v31, %v4191_v46  ;;  %v4194_v8 = vor.u32 %v4193_v7, %v4191_v46  ;;  %v3525_v41 = vadd.f32 %v3524_v17, %v3436_v36  ;;  %v11188_v63 = vld [vmem:[#allocation17_spill] sm:$0xff]  ;;  %v8249_v31 = vld [vmem:[#allocation3 + $0x60] sm:$0xf] }
 0x309   : > { %4318 = vst [vmem:[#allocation3 + $0xf8] sm:$0xf] %v4192_v19  ;;  %v3674_v9 = vmax.f32 %v3642_v24, 0.0  ;;  %v9083_v35 = vld [vmem:[#allocation3 + $0x88] sm:$0xf0]  ;;  %v8250_v19 = vor.u32 %v9010_v26, %v8249_v31 }
 0x30a   : > { %v3877_v12 = vsel %vm9652_vm6, %v3869_v37, %v3876_v47  ;;  %v4195_v21 = vrot.slane %v4194_v8, 4  ;;  %v3573_v58 = vadd.f32 %v3525_v41, %v2741_v56  ;;  %v10351_v11 = vpop.f32.mrf.mxu1  ;;  %5174 = vmatmul.bf16.gmra.mxu3 %v7958_v18  ;;  %v3349_v62 = vpop.f32.mrf.mxu2  ;;  %v8021_v51 = vld [vmem:[#allocation3 + $0xf0] sm:$0xf]  ;;  %v539_v46 = vld [vmem:[#allocation3 + $0x14c] sm:$0x8] }
 0x30b   : > { %4047 = vst [vmem:[#allocation3 + $0xfc] sm:$0xf] %v3877_v12  ;;  %v3706_v44 = vpack.c.bf16 %v3674_v9, %v3674_v9  ;;  %v9081_v37 = vld [vmem:[#allocation3 + $0x7c] sm:$0xf]  ;;  %v540_v24 = vsel %vm9807_vm10, 0, %v539_v46 }
 0x30c   : > { %v4320_v57 = vsel %vm9816_vm12, %v4195_v21, %v4319_v54  ;;  %v3608_v17 = vmul.f32 %v10278_v27, %v3573_v58  ;;  %v3529_v39 = vpop.f32.mrf.mxu0  ;;  %v7969_v47 = vld [vmem:[#allocation3 + $0x80] sm:$0xf]  ;;  %541 = vst [vmem:[#allocation3 + $0x14c] sm:$0x8] %v540_v24  ;;  %v9013_v24 = vld [vmem:[#allocation3 + $0x80] sm:$0xf0] }
 0x30d   : > { %4321 = vst [vmem:[#allocation3 + $0x104] sm:$0xf] %v4320_v57  ;;  %v3879_v23 = vshrl.u32 %v3706_v44, 16  ;;  %v3882_v50 = vshll.u32 %v3706_v44, 16  ;;  %v3438_v34 = vpop.f32.mrf.mxu3  ;;  %v7970_v57 = vor.u32 %v9083_v35, %v7969_v47  ;;  %v4052_v31 = vld [vmem:[#allocation3 + $0x120] sm:$0xf] }
 0x30e   : > { %4092 = vst [vmem:[#allocation3 + $0x10c] sm:$0xf] %v3706_v44  ;;  %v3643_v10 = vadd.f32 %v10263_v32, %v3608_v17  ;;  %v3439_v49 = vadd.f32 %v3438_v34, %v3349_v62  ;;  %v7966_v44 = vor.u32 %v9081_v37, %v7963_v28  ;;  %v11189_v34 = vld [vmem:[#allocation16_spill] sm:$0xff] }
 0x30f   : > { %v3881_v48 = vrot.slane %v3879_v23, 7  ;;  %v4196_v14 = vrot.slane %v3879_v23, 4  ;;  %v4197_v16 = vrot.slane %v3882_v50, 5 }
 0x310   : > { %v3675_v5 = vmax.f32 %v3643_v10, 0.0  ;;  %v3528_v43 = vadd.f32 %v3527_v22, %v3439_v49  ;;  %v2746_v10 = vadd.f32 %v11189_v34, %v10063_v6  ;;  %v4323_v49 = vld [vmem:[#allocation3 + $0x11c] sm:$0xf] }
 0x311   : > { %v3884_v53 = vor.u32 %v3882_v50, %v3881_v48  ;;  %v4198_v3 = vor.u32 %v4197_v16, %v4196_v14  ;;  %v3885_v21 = vrot.slane %v3881_v48, 4 }
 0x312   : > { %v3707_v0 = vpack.c.bf16 %v3675_v5, %v3675_v5  ;;  %v3574_v30 = vadd.f32 %v3528_v43, %v11188_v63  ;;  %v10360_v42 = vpop.f32.mrf.mxu1  ;;  %v9097_v56 = vld [vmem:[#allocation3 + $0xf8] sm:$0xf0]  ;;  %v3351_v61 = vpop.f32.mrf.mxu2 }
 0x313   : > { %v4049_v59 = vsel %vm9659_vm7, %v3884_v53, %v4048_v2  ;;  %v8022_v55 = vor.u32 %v9097_v56, %v8021_v51  ;;  %v4199_v45 = vrot.slane %v4198_v3, 4  ;;  %v494_v56 = vld [vmem:[#allocation3 + $0x150] sm:$0x1] }
 0x314   : > { %4050 = vst [vmem:[#allocation3 + $0x108] sm:$0xf] %v4049_v59  ;;  %v3887_v7 = vshrl.u32 %v3707_v0, 16  ;;  %v3890_v36 = vshll.u32 %v3707_v0, 16  ;;  %v3609_v22 = vmul.f32 %v10278_v27, %v3574_v30  ;;  %v3532_v12 = vpop.f32.mrf.mxu0  ;;  %v495_v28 = vsel %vm9636_vm2, 0, %v494_v56 }
 0x315   : > { %4093 = vst [vmem:[#allocation3 + $0x118] sm:$0xf] %v3707_v0  ;;  %v3440_v18 = vpop.f32.mrf.mxu3  ;;  %v9055_v0 = vld [vmem:[#allocation9 + $0x50] sm:$0xff]  ;;  %v4327_v56 = vld [vmem:[#allocation3 + $0x134] sm:$0xf] }
 0x316   : > { %v3889_v8 = vrot.slane %v3887_v7, 7  ;;  %v4200_v41 = vrot.slane %v3890_v36, 5  ;;  %v4202_v54 = vrot.slane %v3887_v7, 4  ;;  %v3644_v9 = vadd.f32 %v10263_v32, %v3609_v22  ;;  %5026 = vmatmul.bf16.gmra.mxu1 %v8022_v55  ;;  %496 = vst [vmem:[#allocation3 + $0x150] sm:$0x1] %v495_v28 }
 0x317   : > { %v3441_v58 = vadd.f32 %v3440_v18, %v3351_v61  ;;  %5090 = vmatmul.bf16.gmra.mxu2 %v7966_v44  ;;  %5668 = vmatmul.bf16.gmra.mxu0 %v8250_v19 }
 0x318   : > { %v3892_v17 = vor.u32 %v3890_v36, %v3889_v8  ;;  %v4201_v62 = vsel %vm10126_vm14, %v4199_v45, %v4200_v41  ;;  %v4203_v23 = vor.u32 %v4202_v54, %v4200_v41  ;;  %v3676_v50 = vmax.f32 %v3644_v9, 0.0  ;;  %5734 = vmatpush.bf16.msrb.mxu1 %v9055_v0  ;;  %v7975_v8 = vld [vmem:[#allocation3 + $0x9c] sm:$0xf0]  ;;  %v8261_v41 = vld [vmem:[#allocation3 + $0x78] sm:$0xf] }
 0x319   : > { %4322 = vst [vmem:[#allocation3 + $0x110] sm:$0xf] %v4201_v62  ;;  %v3530_v15 = vadd.f32 %v3529_v39, %v3441_v58  ;;  %v542_v58 = vld [vmem:[#allocation3 + $0x164] sm:$0x8] }
 0x31a   : > { %v3893_v48 = vsel %vm9652_vm6, %v3885_v21, %v3892_v17  ;;  %v4204_v14 = vrot.slane %v4203_v23, 4  ;;  %v3708_v16 = vpack.c.bf16 %v3676_v50, %v3676_v50  ;;  %v10374_v20 = vpop.f32.mrf.mxu1  ;;  %5179 = vmatmul.bf16.gmra.mxu3 %v7970_v57  ;;  %v3354_v53 = vpop.f32.mrf.mxu2  ;;  %v9086_v21 = vld [vmem:[#allocation3 + $0xa0] sm:$0xf0]  ;;  %v8262_v17 = vor.u32 %v9013_v24, %v8261_v41 }
 0x31b   : > { %4051 = vst [vmem:[#allocation3 + $0x114] sm:$0xf] %v3893_v48  ;;  %v3575_v2 = vadd.f32 %v3530_v15, %v2746_v10  ;;  %v8033_v61 = vld [vmem:[#allocation3 + $0x108] sm:$0xf]  ;;  %v543_v62 = vsel %vm9807_vm10, 0, %v542_v58 }
 0x31c   : > { %v4324_v5 = vsel %vm9816_vm12, %v4204_v14, %v4323_v49  ;;  %v3895_v43 = vshrl.u32 %v3708_v16, 16  ;;  %v3898_v6 = vshll.u32 %v3708_v16, 16  ;;  %4094 = vst [vmem:[#allocation3 + $0x124] sm:$0xf] %v3708_v16  ;;  %v3534_v51 = vpop.f32.mrf.mxu0  ;;  %v7981_v16 = vld [vmem:[#allocation3 + $0x98] sm:$0xf] }
 0x31d   : > { %4325 = vst [vmem:[#allocation3 + $0x11c] sm:$0xf] %v4324_v5  ;;  %v3610_v39 = vmul.f32 %v10278_v27, %v3575_v2  ;;  %v3443_v3 = vpop.f32.mrf.mxu3  ;;  %v11190_v2 = vld [vmem:[#allocation18_spill] sm:$0xff] }
 0x31e   : > { %v10379_v63 = vrot.slane %v3895_v43, 7  ;;  %v3444_v30 = vadd.f32 %v3443_v3, %v3354_v53  ;;  %v4205_v26 = vrot.slane %v3895_v43, 4  ;;  %v4206_v59 = vrot.slane %v3898_v6, 5  ;;  %544 = vst [vmem:[#allocation3 + $0x164] sm:$0x8] %v543_v62 }
 0x31f   : > { %v3645_v55 = vadd.f32 %v10263_v32, %v3610_v39  ;;  %v2751_v5 = vadd.f32 %v11190_v2, %v10071_v60  ;;  %v7982_v53 = vor.u32 %v9086_v21, %v7981_v16  ;;  %v9016_v21 = vld [vmem:[#allocation3 + $0x98] sm:$0xf0]  ;;  %v8273_v62 = vld [vmem:[#allocation3 + $0x90] sm:$0xf] }
 0x320   : > { %v3900_v35 = vor.u32 %v3898_v6, %v10379_v63  ;;  %v3533_v46 = vadd.f32 %v3532_v12, %v3444_v30  ;;  %v4207_v45 = vor.u32 %v4206_v59, %v4205_v26  ;;  %v9084_v12 = vld [vmem:[#allocation3 + $0x94] sm:$0xf]  ;;  %v3901_v39 = vrot.slane %v10379_v63, 4 }
 0x321   : > { %v3677_v7 = vmax.f32 %v3645_v55, 0.0  ;;  %v7978_v10 = vor.u32 %v9084_v12, %v7975_v8 }
 0x322   : > { %v4053_v36 = vsel %vm9659_vm7, %v3900_v35, %v4052_v31  ;;  %v3576_v22 = vadd.f32 %v3533_v46, %v10068_v25  ;;  %v9100_v37 = vld [vmem:[#allocation3 + $0x110] sm:$0xf0]  ;;  %v3356_v9 = vpop.f32.mrf.mxu2  ;;  %v4208_v49 = vrot.slane %v4207_v45, 4 }
 0x323   : > { %4054 = vst [vmem:[#allocation3 + $0x120] sm:$0xf] %v4053_v36  ;;  %v3709_v18 = vpack.c.bf16 %v3677_v7, %v3677_v7  ;;  %v10388_v47 = vpop.f32.mrf.mxu1  ;;  %v8034_v19 = vor.u32 %v9100_v37, %v8033_v61  ;;  %v497_v36 = vld [vmem:[#allocation3 + $0x168] sm:$0x1] }
 0x324   : > { %v3611_v54 = vmul.f32 %v10278_v27, %v3576_v22  ;;  %v3537_v34 = vpop.f32.mrf.mxu0  ;;  %v498_v8 = vsel %vm9636_vm2, 0, %v497_v36 }
 0x325   : > { %v3903_v44 = vshrl.u32 %v3709_v18, 16  ;;  %v3906_v57 = vshll.u32 %v3709_v18, 16  ;;  %4095 = vst [vmem:[#allocation3 + $0x130] sm:$0xf] %v3709_v18  ;;  %v3445_v25 = vpop.f32.mrf.mxu3  ;;  %v4056_v18 = vld [vmem:[#allocation3 + $0x138] sm:$0xf] }
 0x326   : > { %v3646_v23 = vadd.f32 %v10263_v32, %v3611_v54  ;;  %v3446_v50 = vadd.f32 %v3445_v25, %v3356_v9  ;;  %5031 = vmatmul.bf16.gmra.mxu1 %v8034_v19  ;;  %499 = vst [vmem:[#allocation3 + $0x168] sm:$0x1] %v498_v8  ;;  %v7987_v25 = vld [vmem:[#allocation3 + $0xb4] sm:$0xf0] }
 0x327   : > { %v3905_v15 = vrot.slane %v3903_v44, 7  ;;  %v4209_v48 = vrot.slane %v3906_v57, 5  ;;  %v4211_v14 = vrot.slane %v3903_v44, 4  ;;  %5095 = vmatmul.bf16.gmra.mxu2 %v7978_v10  ;;  %5673 = vmatmul.bf16.gmra.mxu0 %v8262_v17  ;;  %v9089_v17 = vld [vmem:[#allocation3 + $0xb8] sm:$0xf0] }
 0x328   : > { %v3678_v43 = vmax.f32 %v3646_v23, 0.0  ;;  %v3535_v6 = vadd.f32 %v3534_v51, %v3446_v50  ;;  %v11191_v23 = vld [vmem:[#allocation20_spill] sm:$0xff] }
 0x329   : > { %v3908_v3 = vor.u32 %v3906_v57, %v3905_v15  ;;  %v4210_v0 = vsel %vm10126_vm14, %v4208_v49, %v4209_v48  ;;  %v4212_v30 = vor.u32 %v4211_v14, %v4209_v48  ;;  %v545_v15 = vld [vmem:[#allocation3 + $0x17c] sm:$0x8] }
 0x32a   : > { %4326 = vst [vmem:[#allocation3 + $0x128] sm:$0xf] %v4210_v0  ;;  %v3710_v31 = vpack.c.bf16 %v3678_v43, %v3678_v43  ;;  %v3577_v26 = vadd.f32 %v3535_v6, %v2751_v5  ;;  %5184 = vmatmul.bf16.gmra.mxu3 %v7982_v53  ;;  %v3359_v35 = vpop.f32.mrf.mxu2  ;;  %v8045_v57 = vld [vmem:[#allocation3 + $0x120] sm:$0xf]  ;;  %v546_v2 = vsel %vm9807_vm10, 0, %v545_v15  ;;  %v11192_v5 = vld [vmem:[#allocation21_spill] sm:$0xff] }
 0x32b   : > { %v3909_v60 = vsel %vm9652_vm6, %v3901_v39, %v3908_v3  ;;  %v4213_v59 = vrot.slane %v4212_v30, 4  ;;  %v10401_v51 = vpop.f32.mrf.mxu1  ;;  %v11193_v43 = vld [vmem:[#allocation19_spill] sm:$0xff]  ;;  %v9087_v0 = vld [vmem:[#allocation3 + $0xac] sm:$0xf]  ;;  %v8274_v30 = vor.u32 %v9016_v21, %v8273_v62  ;;  %547 = vst [vmem:[#allocation3 + $0x17c] sm:$0x8] %v546_v2 }
 0x32c   : > { %4055 = vst [vmem:[#allocation3 + $0x12c] sm:$0xf] %v3909_v60  ;;  %v3911_v63 = vshrl.u32 %v3710_v31, 16  ;;  %v3914_v55 = vshll.u32 %v3710_v31, 16  ;;  %v3612_v28 = vmul.f32 %v10278_v27, %v3577_v26  ;;  %v3539_v45 = vpop.f32.mrf.mxu0  ;;  %v2756_v6 = vadd.f32 %v11193_v43, %v11192_v5  ;;  %v9054_v62 = vld [vmem:[#allocation9 + $0x48] sm:$0xff]  ;;  %v11194_v43 = vld [vmem:[#allocation22_spill] sm:$0xff] }
 0x32d   : > { %v4328_v46 = vsel %vm9816_vm12, %v4213_v59, %v4327_v56  ;;  %4096 = vst [vmem:[#allocation3 + $0x13c] sm:$0xf] %v3710_v31  ;;  %v3448_v7 = vpop.f32.mrf.mxu3  ;;  %5735 = vmatpush.bf16.msrb.mxu1 %v9054_v62  ;;  %v11196_v62 = vld [vmem:[#allocation23_spill] sm:$0xff] }
 0x32e   : > { %4329 = vst [vmem:[#allocation3 + $0x134] sm:$0xf] %v4328_v46  ;;  %v3913_v22 = vrot.slane %v3911_v63, 7  ;;  %v4214_v61 = vrot.slane %v3911_v63, 4  ;;  %v4215_v37 = vrot.slane %v3914_v55, 5  ;;  %v3647_v24 = vadd.f32 %v10263_v32, %v3612_v28 }
 0x32f   : > { %v3449_v19 = vadd.f32 %v3448_v7, %v3359_v35  ;;  %v7993_v63 = vld [vmem:[#allocation3 + $0xb0] sm:$0xf]  ;;  %v7990_v35 = vor.u32 %v9087_v0, %v7987_v25  ;;  %v9019_v0 = vld [vmem:[#allocation3 + $0xb0] sm:$0xf0] }
 0x330   : > { %v3916_v41 = vor.u32 %v3914_v55, %v3913_v22  ;;  %v3679_v54 = vmax.f32 %v3647_v24, 0.0  ;;  %v4216_v9 = vor.u32 %v4215_v37, %v4214_v61  ;;  %v3917_v55 = vrot.slane %v3913_v22, 4  ;;  %v4331_v24 = vld [vmem:[#allocation3 + $0x14c] sm:$0xf] }
 0x331   : > { %v3538_v12 = vadd.f32 %v3537_v34, %v3449_v19  ;;  %v7994_v46 = vor.u32 %v9089_v17, %v7993_v63 }
 0x332   : > { %v4057_v58 = vsel %vm9659_vm7, %v3916_v41, %v4056_v18  ;;  %v3711_v44 = vpack.c.bf16 %v3679_v54, %v3679_v54  ;;  %v3361_v34 = vpop.f32.mrf.mxu2  ;;  %v4217_v53 = vrot.slane %v4216_v9, 4 }
 0x333   : > { %4058 = vst [vmem:[#allocation3 + $0x138] sm:$0xf] %v4057_v58  ;;  %v3578_v50 = vadd.f32 %v3538_v12, %v11191_v23  ;;  %v10412_v10 = vpop.f32.mrf.mxu1  ;;  %v9103_v49 = vld [vmem:[#allocation3 + $0x128] sm:$0xf0]  ;;  %v500_v23 = vld [vmem:[#allocation3 + $0x180] sm:$0x1] }
 0x334   : > { %v3919_v48 = vshrl.u32 %v3711_v44, 16  ;;  %v3922_v14 = vshll.u32 %v3711_v44, 16  ;;  %4097 = vst [vmem:[#allocation3 + $0x148] sm:$0xf] %v3711_v44  ;;  %v8046_v16 = vor.u32 %v9103_v49, %v8045_v57  ;;  %v3542_v59 = vpop.f32.mrf.mxu0  ;;  %v10432_v44 = vld [vmem:[%s11149_s3] ss:$0 sm:$0xff] }
 0x335   : > { %v3613_v39 = vmul.f32 %v10278_v27, %v3578_v50  ;;  %v3450_v3 = vpop.f32.mrf.mxu3  ;;  %v501_v15 = vsel %vm9636_vm2, 0, %v500_v23 }
 0x336   : > { %v3921_v56 = vrot.slane %v3919_v48, 7  ;;  %v4218_v31 = vrot.slane %v3922_v14, 5  ;;  %v4220_v26 = vrot.slane %v3919_v48, 4  ;;  %v3451_v60 = vadd.f32 %v3450_v3, %v3361_v34  ;;  %5036 = vmatmul.bf16.gmra.mxu1 %v8046_v16  ;;  %v4060_v48 = vld [vmem:[#allocation3 + $0x150] sm:$0xf] }
 0x337   : > { %v3648_v28 = vadd.f32 %v10263_v32, %v3613_v39  ;;  %5100 = vmatmul.bf16.gmra.mxu2 %v7990_v35  ;;  %5678 = vmatmul.bf16.gmra.mxu0 %v8274_v30  ;;  %502 = vst [vmem:[#allocation3 + $0x180] sm:$0x1] %v501_v15  ;;  %v8285_v3 = vld [vmem:[#allocation3 + $0xa8] sm:$0xf] }
 0x338   : > { %v3924_v7 = vor.u32 %v3922_v14, %v3921_v56  ;;  %v4219_v36 = vsel %vm10126_vm14, %v4217_v53, %v4218_v31  ;;  %v4221_v61 = vor.u32 %v4220_v26, %v4218_v31  ;;  %v3540_v37 = vadd.f32 %v3539_v45, %v3451_v60  ;;  %v7999_v31 = vld [vmem:[#allocation3 + $0xcc] sm:$0xf0]  ;;  %v9092_v26 = vld [vmem:[#allocation3 + $0xd0] sm:$0xf0] }
 0x339   : > { %4330 = vst [vmem:[#allocation3 + $0x140] sm:$0xf] %v4219_v36  ;;  %v3680_v18 = vmax.f32 %v3648_v28, 0.0  ;;  %v548_v60 = vld [vmem:[#allocation3 + $0x194] sm:$0x8] }
 0x33a   : > { %v3925_v19 = vsel %vm9652_vm6, %v3917_v55, %v3924_v7  ;;  %v4222_v8 = vrot.slane %v4221_v61, 4  ;;  %v3579_v22 = vadd.f32 %v3540_v37, %v2756_v6  ;;  %5189 = vmatmul.bf16.gmra.mxu3 %v7994_v46  ;;  %v3364_v9 = vpop.f32.mrf.mxu2  ;;  %v8057_v53 = vld [vmem:[#allocation3 + $0x138] sm:$0xf]  ;;  %v10445_v55 = vld [vmem:[%s11148_s2] ss:$0 sm:$0xff]  ;;  %v549_v7 = vsel %vm9807_vm10, 0, %v548_v60 }
 0x33b   : > { %4059 = vst [vmem:[#allocation3 + $0x144] sm:$0xf] %v3925_v19  ;;  %v3712_v32 = vpack.c.bf16 %v3680_v18, %v3680_v18  ;;  %v10424_v41 = vpop.f32.mrf.mxu1  ;;  %v9090_v46 = vld [vmem:[#allocation3 + $0xc4] sm:$0xf]  ;;  %v8005_v37 = vld [vmem:[#allocation3 + $0xc8] sm:$0xf] }
 0x33c   : > { %v4332_v54 = vsel %vm9816_vm12, %v4222_v8, %v4331_v24  ;;  %v3614_v45 = vmul.f32 %v10278_v27, %v3579_v22  ;;  %v3544_v17 = vpop.f32.mrf.mxu0  ;;  %v8286_v24 = vor.u32 %v9019_v0, %v8285_v3  ;;  %550 = vst [vmem:[#allocation3 + $0x194] sm:$0x8] %v549_v7 }
 0x33d   : > { %4333 = vst [vmem:[#allocation3 + $0x14c] sm:$0xf] %v4332_v54  ;;  %v3927_v12 = vshrl.u32 %v3712_v32, 16  ;;  %v3930_v21 = vshll.u32 %v3712_v32, 16  ;;  %v3453_v58 = vpop.f32.mrf.mxu3 }
 0x33e   : > { %4098 = vst [vmem:[#allocation3 + $0x154] sm:$0xf] %v3712_v32  ;;  %v3649_v57 = vadd.f32 %v10432_v44, %v3614_v45  ;;  %v3454_v25 = vadd.f32 %v3453_v58, %v3364_v9  ;;  %v8002_v9 = vor.u32 %v9090_v46, %v7999_v31 }
 0x33f   : > { %v3929_v50 = vrot.slane %v3927_v12, 7  ;;  %v4223_v49 = vrot.slane %v3927_v12, 4  ;;  %v4224_v27 = vrot.slane %v3930_v21, 5  ;;  %v8006_v12 = vor.u32 %v9092_v26, %v8005_v37 }
 0x340   : > { %v3681_v14 = vmax.f32 %v3649_v57, 0.0  ;;  %v3543_v34 = vadd.f32 %v3542_v59, %v3454_v25  ;;  %v11195_v25 = vld [vmem:[#allocation24_spill] sm:$0xff] }
 0x341   : > { %v3932_v16 = vor.u32 %v3930_v21, %v3929_v50  ;;  %v4225_v2 = vor.u32 %v4224_v27, %v4223_v49  ;;  %v3933_v54 = vrot.slane %v3929_v50, 4  ;;  %v2761_v23 = vadd.f32 %v11196_v62, %v11195_v25  ;;  %v4335_v49 = vld [vmem:[#allocation3 + $0x164] sm:$0xf] }
 0x342   : > { %v3713_v5 = vpack.c.bf16 %v3681_v14, %v3681_v14  ;;  %v3580_v6 = vadd.f32 %v3543_v34, %v11194_v43  ;;  %v9106_v39 = vld [vmem:[#allocation3 + $0x140] sm:$0xf0]  ;;  %v3366_v35 = vpop.f32.mrf.mxu2 }
 0x343   : > { %v4061_v30 = vsel %vm9659_vm7, %v3932_v16, %v4060_v48  ;;  %v10440_v56 = vpop.f32.mrf.mxu1  ;;  %v8058_v4 = vor.u32 %v9106_v39, %v8057_v53  ;;  %v4226_v36 = vrot.slane %v4225_v2, 4  ;;  %v9053_v53 = vld [vmem:[#allocation9 + $0x40] sm:$0xff] }
 0x344   : > { %4062 = vst [vmem:[#allocation3 + $0x150] sm:$0xf] %v4061_v30  ;;  %v3935_v59 = vshrl.u32 %v3713_v5, 16  ;;  %v3938_v63 = vshll.u32 %v3713_v5, 16  ;;  %v3615_v28 = vmul.f32 %v10445_v55, %v3580_v6  ;;  %v3547_v32 = vpop.f32.mrf.mxu0  ;;  %v4064_v30 = vld [vmem:[#allocation3 + $0x168] sm:$0xf]  ;;  %5736 = vmatpush.bf16.msrb.mxu1 %v9053_v53 }
 0x345   : > { %4099 = vst [vmem:[#allocation3 + $0x160] sm:$0xf] %v3713_v5  ;;  %v3455_v61 = vpop.f32.mrf.mxu3 }
 0x346   : > { %v3937_v18 = vrot.slane %v3935_v59, 7  ;;  %v4227_v19 = vrot.slane %v3938_v63, 5  ;;  %v4229_v8 = vrot.slane %v3935_v59, 4  ;;  %v3650_v22 = vadd.f32 %v10432_v44, %v3615_v28  ;;  %5041 = vmatmul.bf16.gmra.mxu1 %v8058_v4 }
 0x347   : > { %v3456_v45 = vadd.f32 %v3455_v61, %v3366_v35  ;;  %5105 = vmatmul.bf16.gmra.mxu2 %v8002_v9  ;;  %5683 = vmatmul.bf16.gmra.mxu0 %v8286_v24  ;;  %v11197_v35 = vld [vmem:[#allocation25_spill] sm:$0xff] }
 0x348   : > { %v3940_v21 = vor.u32 %v3938_v63, %v3937_v18  ;;  %v4228_v1 = vsel %vm10126_vm14, %v4226_v36, %v4227_v19  ;;  %v4230_v58 = vor.u32 %v4229_v8, %v4227_v19  ;;  %v3682_v57 = vmax.f32 %v3650_v22, 0.0  ;;  %v8011_v19 = vld [vmem:[#allocation3 + $0xe4] sm:$0xf0]  ;;  %v9022_v8 = vld [vmem:[#allocation3 + $0xc8] sm:$0xf0] }
 0x349   : > { %4334 = vst [vmem:[#allocation3 + $0x158] sm:$0xf] %v4228_v1  ;;  %v3545_v27 = vadd.f32 %v3544_v17, %v3456_v45  ;;  %v8297_v45 = vld [vmem:[#allocation3 + $0xc0] sm:$0xf]  ;;  %v9095_v1 = vld [vmem:[#allocation3 + $0xe8] sm:$0xf0] }
 0x34a   : > { %v3941_v50 = vsel %vm9652_vm6, %v3933_v54, %v3940_v21  ;;  %v4231_v15 = vrot.slane %v4230_v58, 4  ;;  %v3714_v48 = vpack.c.bf16 %v3682_v57, %v3682_v57  ;;  %5194 = vmatmul.bf16.gmra.mxu3 %v8006_v12  ;;  %v3369_v43 = vpop.f32.mrf.mxu2 }
 0x34b   : > { %4063 = vst [vmem:[#allocation3 + $0x15c] sm:$0xf] %v3941_v50  ;;  %v3581_v14 = vadd.f32 %v3545_v27, %v2761_v23  ;;  %v10457_v34 = vpop.f32.mrf.mxu1  ;;  %v8069_v7 = vld [vmem:[#allocation3 + $0x150] sm:$0xf]  ;;  %v8298_v23 = vor.u32 %v9022_v8, %v8297_v45 }
 0x34c   : > { %v4336_v16 = vsel %vm9816_vm12, %v4231_v15, %v4335_v49  ;;  %v3943_v2 = vshrl.u32 %v3714_v48, 16  ;;  %v3946_v5 = vshll.u32 %v3714_v48, 16  ;;  %4100 = vst [vmem:[#allocation3 + $0x16c] sm:$0xf] %v3714_v48  ;;  %v3549_v0 = vpop.f32.mrf.mxu0  ;;  %v8017_v48 = vld [vmem:[#allocation3 + $0xe0] sm:$0xf] }
 0x34d   : > { %4337 = vst [vmem:[#allocation3 + $0x164] sm:$0xf] %v4336_v16  ;;  %v3616_v17 = vmul.f32 %v10445_v55, %v3581_v14  ;;  %v3458_v6 = vpop.f32.mrf.mxu3  ;;  %v11198_v14 = vld [vmem:[#allocation26_spill] sm:$0xff] }
 0x34e   : > { %v3945_v39 = vrot.slane %v3943_v2, 7  ;;  %v3459_v3 = vadd.f32 %v3458_v6, %v3369_v43  ;;  %v4232_v4 = vrot.slane %v3943_v2, 4  ;;  %v4233_v31 = vrot.slane %v3946_v5, 5 }
 0x34f   : > { %v3651_v26 = vadd.f32 %v10432_v44, %v3616_v17  ;;  %v2766_v16 = vadd.f32 %v10326_v29, %v11198_v14  ;;  %v8018_v43 = vor.u32 %v9095_v1, %v8017_v48  ;;  %v8023_v1 = vld [vmem:[#allocation3 + $0xfc] sm:$0xf0]  ;;  %v9096_v48 = vld [vmem:[#allocation3 + $0xf4] sm:$0xf]  ;;  %v8309_v14 = vld [vmem:[#allocation3 + $0xd8] sm:$0xf] }
 0x350   : > { %v3948_v60 = vor.u32 %v3946_v5, %v3945_v39  ;;  %v3548_v59 = vadd.f32 %v3547_v32, %v3459_v3  ;;  %v4234_v61 = vor.u32 %v4233_v31, %v4232_v4  ;;  %v9093_v32 = vld [vmem:[#allocation3 + $0xdc] sm:$0xf]  ;;  %v3949_v17 = vrot.slane %v3945_v39, 4 }
 0x351   : > { %v3683_v63 = vmax.f32 %v3651_v26, 0.0  ;;  %v8014_v62 = vor.u32 %v9093_v32, %v8011_v19  ;;  %v4068_v19 = vld [vmem:[#allocation3 + $0x180] sm:$0xf] }
 0x352   : > { %v4065_v28 = vsel %vm9659_vm7, %v3948_v60, %v4064_v30  ;;  %v3582_v46 = vadd.f32 %v3548_v59, %v11197_v35  ;;  %v9109_v36 = vld [vmem:[#allocation3 + $0x158] sm:$0xf0]  ;;  %v3371_v54 = vpop.f32.mrf.mxu2  ;;  %v4235_v49 = vrot.slane %v4234_v61, 4 }
 0x353   : > { %4066 = vst [vmem:[#allocation3 + $0x168] sm:$0xf] %v4065_v28  ;;  %v3715_v37 = vpack.c.bf16 %v3683_v63, %v3683_v63  ;;  %v10466_v24 = vpop.f32.mrf.mxu1  ;;  %v8070_v18 = vor.u32 %v9109_v36, %v8069_v7  ;;  %v4339_v30 = vld [vmem:[#allocation3 + $0x17c] sm:$0xf] }
 0x354   : > { %v3617_v22 = vmul.f32 %v10445_v55, %v3582_v46  ;;  %v5649_v25 = vpop.f32.mrf.mxu0 }
 0x355   : > { %v3951_v9 = vshrl.u32 %v3715_v37, 16  ;;  %v3954_v12 = vshll.u32 %v3715_v37, 16  ;;  %4101 = vst [vmem:[#allocation3 + $0x178] sm:$0xf] %v3715_v37  ;;  %v3460_v21 = vpop.f32.mrf.mxu3 }
 0x356   : > { %v3652_v58 = vadd.f32 %v10432_v44, %v3617_v22  ;;  %v3461_v57 = vadd.f32 %v3460_v21, %v3371_v54  ;;  %5046 = vmatmul.bf16.gmra.mxu1 %v8070_v18  ;;  %v9196_v22 = vld [vmem:[#allocation9 + $0x1b8] sm:$0xff] }
 0x357   : > { %v3953_v27 = vrot.slane %v3951_v9, 7  ;;  %v4236_v50 = vrot.slane %v3954_v12, 5  ;;  %v4238_v15 = vrot.slane %v3951_v9, 4  ;;  %5110 = vmatmul.bf16.gmra.mxu2 %v8014_v62  ;;  %5688 = vmatmul.bf16.gmra.mxu0 %v8298_v23  ;;  %v9068_v54 = vld [vmem:[#allocation9 + $0xb8] sm:$0xff] }
 0x358   : > { %v3684_v2 = vmax.f32 %v3652_v58, 0.0  ;;  %v3550_v5 = vadd.f32 %v3549_v0, %v3461_v57  ;;  %6422 = vmatpush.bf16.msra.mxu3 %v9196_v22  ;;  %5818 = vmatpush.bf16.msra.mxu2 %v9068_v54  ;;  %v9025_v58 = vld [vmem:[#allocation3 + $0xe0] sm:$0xf0]  ;;  %v9204_v62 = vld [vmem:[#allocation9 + $0x1f8] sm:$0xff] }
 0x359   : > { %v3956_v6 = vor.u32 %v3954_v12, %v3953_v27  ;;  %v4237_v53 = vsel %vm10126_vm14, %v4235_v49, %v4236_v50  ;;  %v4239_v3 = vor.u32 %v4238_v15, %v4236_v50  ;;  %6511 = vmatpush.bf16.msra.mxu0 %v9204_v62 }
 0x35a   : > { %4338 = vst [vmem:[#allocation3 + $0x170] sm:$0xf] %v4237_v53  ;;  %v3716_v4 = vpack.c.bf16 %v3684_v2, %v3684_v2  ;;  %v3583_v31 = vadd.f32 %v3550_v5, %v2766_v16  ;;  %5199 = vmatmul.bf16.gmra.mxu3 %v8018_v43  ;;  %v5071_v63 = vpop.f32.mrf.mxu2  ;;  %v8081_v21 = vld [vmem:[#allocation3 + $0x168] sm:$0xf] }
 0x35b   : > { %v3957_v26 = vsel %vm9652_vm6, %v3949_v17, %v3956_v6  ;;  %v4240_v29 = vrot.slane %v4239_v3, 4  ;;  %v10476_v60 = vpop.f32.mrf.mxu1  ;;  %v5072_v35 = vadd.f32 %v5071_v63, %v10338_v52  ;;  %v8029_v6 = vld [vmem:[#allocation3 + $0xf8] sm:$0xf]  ;;  %v8026_v3 = vor.u32 %v9096_v48, %v8023_v1 }
 0x35c   : > { %4067 = vst [vmem:[#allocation3 + $0x174] sm:$0xf] %v3957_v26  ;;  %v3959_v39 = vshrl.u32 %v3716_v4, 16  ;;  %v3962_v0 = vshll.u32 %v3716_v4, 16  ;;  %v3618_v59 = vmul.f32 %v10445_v55, %v3583_v31  ;;  %v5651_v18 = vpop.f32.mrf.mxu0  ;;  %v9212_v31 = vld [vmem:[#allocation9 + $0x238] sm:$0xff] }
 0x35d   : > { %v4340_v28 = vsel %vm9816_vm12, %v4240_v29, %v4339_v30  ;;  %4102 = vst [vmem:[#allocation3 + $0x184] sm:$0xf] %v3716_v4  ;;  %v5160_v46 = vpop.f32.mrf.mxu3  ;;  %v8310_v4 = vor.u32 %v9025_v58, %v8309_v14  ;;  %6600 = vmatpush.bf16.msra.mxu1 %v9212_v31  ;;  %v8203_v14 = vld [vmem:[#allocation3 + $0xc] sm:$0xf0]  ;;  %v9104_v31 = vld [vmem:[#allocation3 + $0x130] sm:$0xf0] }
 0x35e   : > { %4341 = vst [vmem:[#allocation3 + $0x17c] sm:$0xf] %v4340_v28  ;;  %v3961_v7 = vrot.slane %v3959_v39, 7  ;;  %v4241_v36 = vrot.slane %v3959_v39, 4  ;;  %v4242_v61 = vrot.slane %v3962_v0, 5  ;;  %v3653_v37 = vadd.f32 %v10432_v44, %v3618_v59 }
 0x35f   : > { %v5161_v8 = vadd.f32 %v5160_v46, %v5072_v35 }
 0x360   : > { %v3964_v55 = vor.u32 %v3962_v0, %v3961_v7  ;;  %v3685_v32 = vmax.f32 %v3653_v37, 0.0  ;;  %v4243_v9 = vor.u32 %v4242_v61, %v4241_v36  ;;  %v3965_v26 = vrot.slane %v3961_v7, 4  ;;  %v4343_v0 = vld [vmem:[#allocation3 + $0x194] sm:$0xf] }
 0x361   : > { %v10483_v45 = vadd.f32 %v5649_v25, %v5161_v8  ;;  %v9098_v25 = vld [vmem:[#allocation3 + $0x100] sm:$0xf0] }
 0x362   : > { %v4069_v52 = vsel %vm9659_vm7, %v3964_v55, %v4068_v19  ;;  %v3717_v12 = vpack.c.bf16 %v3685_v32, %v3685_v32  ;;  %v5073_v50 = vpop.f32.mrf.mxu2  ;;  %v4244_v16 = vrot.slane %v4243_v9, 4  ;;  %v8030_v30 = vor.u32 %v9098_v25, %v8029_v6  ;;  %v8035_v55 = vld [vmem:[#allocation3 + $0x114] sm:$0xf0]  ;;  %v9028_v32 = vld [vmem:[#allocation3 + $0xf8] sm:$0xf0]  ;;  %v9203_v6 = vld [vmem:[#allocation9 + $0x1f0] sm:$0xff] }
 0x363   : > { %4070 = vst [vmem:[#allocation3 + $0x180] sm:$0xf] %v4069_v52  ;;  %v10487_v44 = vpop.f32.mrf.mxu1  ;;  %v9112_v57 = vld [vmem:[#allocation3 + $0x170] sm:$0xf0]  ;;  %v5074_v15 = vadd.f32 %v5073_v50, %v10351_v11  ;;  %v9101_v9 = vld [vmem:[#allocation3 + $0x118] sm:$0xf0]  ;;  %6512 = vmatpush.bf16.msra.mxu0 %v9203_v6 }
 0x364   : > { %v3967_v23 = vshrl.u32 %v3717_v12, 16  ;;  %v3970_v49 = vshll.u32 %v3717_v12, 16  ;;  %4103 = vst [vmem:[#allocation3 + $0x190] sm:$0xf] %v3717_v12  ;;  %v8082_v27 = vor.u32 %v9112_v57, %v8081_v21  ;;  %v5654_v17 = vpop.f32.mrf.mxu0  ;;  %v8321_v21 = vld [vmem:[#allocation3 + $0xf0] sm:$0xf] }
 0x365   : > { %v5162_v40 = vpop.f32.mrf.mxu3  ;;  %v8041_v57 = vld [vmem:[#allocation3 + $0x110] sm:$0xf]  ;;  %v8322_v62 = vor.u32 %v9028_v32, %v8321_v21  ;;  %v9000_v32 = vld [vmem:[#allocation3 + $0x1c] sm:$0xf] }
 0x366   : > { %v3969_v2 = vrot.slane %v3967_v23, 7  ;;  %v4245_v5 = vrot.slane %v3970_v49, 5  ;;  %v4247_v43 = vrot.slane %v3967_v23, 4  ;;  %5051 = vmatmul.bf16.gmra.mxu1 %v8082_v27  ;;  %v5163_v53 = vadd.f32 %v5162_v40, %v5074_v15  ;;  %v8997_v40 = vld [vmem:[#allocation3 + $0x4] sm:$0xf]  ;;  %v9066_v6 = vld [vmem:[#allocation9 + $0xa8] sm:$0xff] }
 0x367   : > { %5115 = vmatmul.bf16.gmra.mxu2 %v8026_v3  ;;  %5693 = vmatmul.bf16.gmra.mxu0 %v8310_v4  ;;  %v8042_v23 = vor.u32 %v9101_v9, %v8041_v57  ;;  %v8047_v3 = vld [vmem:[#allocation3 + $0x12c] sm:$0xf0]  ;;  %v8059_v9 = vld [vmem:[#allocation3 + $0x144] sm:$0xf0]  ;;  %v8345_v57 = vld [vmem:[#allocation3 + $0x120] sm:$0xf] }
 0x368   : > { %v3972_v29 = vor.u32 %v3970_v49, %v3969_v2  ;;  %v4246_v11 = vsel %vm10126_vm14, %v4244_v16, %v4245_v5  ;;  %v4248_v39 = vor.u32 %v4247_v43, %v4245_v5  ;;  %v10492_v59 = vadd.f32 %v5651_v18, %v5163_v53  ;;  %v9195_v16 = vld [vmem:[#allocation9 + $0x1b0] sm:$0xff] }
 0x369   : > { %4342 = vst [vmem:[#allocation3 + $0x188] sm:$0xf] %v4246_v11  ;;  %v9067_v2 = vld [vmem:[#allocation9 + $0xb0] sm:$0xff]  ;;  %6423 = vmatpush.bf16.msra.mxu3 %v9195_v16  ;;  %v8206_v5 = vor.u32 %v8997_v40, %v8203_v14  ;;  %v8333_v11 = vld [vmem:[#allocation3 + $0x108] sm:$0xf] }
 0x36a   : > { %v3973_v63 = vsel %vm9652_vm6, %v3965_v26, %v3972_v29  ;;  %v4249_v28 = vrot.slane %v4248_v39, 4  ;;  %5204 = vmatmul.bf16.gmra.mxu3 %v8030_v30  ;;  %v5076_v46 = vpop.f32.mrf.mxu2  ;;  %v8093_v18 = vld [vmem:[#allocation3 + $0x180] sm:$0xf]  ;;  %5819 = vmatpush.bf16.msra.mxu2 %v9067_v2  ;;  %v9031_v30 = vld [vmem:[#allocation3 + $0x110] sm:$0xf0] }
 0x36b   : > { %4071 = vst [vmem:[#allocation3 + $0x18c] sm:$0xf] %v3973_v63  ;;  %v10496_v35 = vpop.f32.mrf.mxu1  ;;  %v5077_v7 = vadd.f32 %v5076_v46, %v10360_v42  ;;  %v9099_v42 = vld [vmem:[#allocation3 + $0x10c] sm:$0xf]  ;;  %v9102_v29 = vld [vmem:[#allocation3 + $0x124] sm:$0xf] }
 0x36c   : > { %v4344_v38 = vsel %vm9816_vm12, %v4249_v28, %v4343_v0  ;;  %v5656_v61 = vpop.f32.mrf.mxu0  ;;  %v8038_v58 = vor.u32 %v9099_v42, %v8035_v55  ;;  %v8050_v0 = vor.u32 %v9102_v29, %v8047_v3  ;;  %v8053_v63 = vld [vmem:[#allocation3 + $0x128] sm:$0xf]  ;;  %v8334_v28 = vor.u32 %v9031_v30, %v8333_v11  ;;  %v8071_v29 = vld [vmem:[#allocation3 + $0x15c] sm:$0xf0]  ;;  %v9037_v11 = vld [vmem:[#allocation3 + $0x140] sm:$0xf0] }
 0x36d   : > { %4345 = vst [vmem:[#allocation3 + $0x194] sm:$0xf] %v4344_v38  ;;  %v5165_v36 = vpop.f32.mrf.mxu3  ;;  %v9211_v38 = vld [vmem:[#allocation9 + $0x230] sm:$0xff]  ;;  %v8054_v46 = vor.u32 %v9104_v31, %v8053_v63 }
 0x36e   : > { %v5166_v37 = vadd.f32 %v5165_v36, %v5077_v7  ;;  %6601 = vmatpush.bf16.msra.mxu1 %v9211_v38  ;;  %5820 = vmatpush.bf16.msra.mxu2 %v9066_v6  ;;  %v8077_v38 = vld [vmem:[#allocation3 + $0x158] sm:$0xf]  ;;  %v9040_v6 = vld [vmem:[#allocation3 + $0x158] sm:$0xf0] }
 0x370   : > { %v10501_v33 = vadd.f32 %v5654_v17, %v5166_v37 }
 0x372   : > { %v9115_v19 = vld [vmem:[#allocation3 + $0x188] sm:$0xf0]  ;;  %v5078_v54 = vpop.f32.mrf.mxu2 }
 0x373   : > { %v10503_v8 = vpop.f32.mrf.mxu1  ;;  %v8094_v22 = vor.u32 %v9115_v19, %v8093_v18  ;;  %v5079_v13 = vadd.f32 %v5078_v54, %v10374_v20 }
 0x374   : > { %v5659_v12 = vpop.f32.mrf.mxu0 }
 0x375   : > { %v5167_v52 = vpop.f32.mrf.mxu3 }
 0x376   : > { %5056 = vmatmul.bf16.gmra.mxu1 %v8094_v22  ;;  %v5168_v1 = vadd.f32 %v5167_v52, %v5079_v13  ;;  %v8215_v22 = vld [vmem:[#allocation3 + $0x24] sm:$0xf0] }
 0x377   : > { %5120 = vmatmul.bf16.gmra.mxu2 %v8038_v58  ;;  %5698 = vmatmul.bf16.gmra.mxu0 %v8322_v62  ;;  %v8218_v52 = vor.u32 %v9000_v32, %v8215_v22  ;;  %v9193_v22 = vld [vmem:[#allocation9 + $0x1a0] sm:$0xff] }
 0x378   : > { %v10506_v49 = vadd.f32 %v5656_v61, %v5168_v1  ;;  %v9107_v1 = vld [vmem:[#allocation3 + $0x148] sm:$0xf0] }
 0x37a   : > { %5209 = vmatmul.bf16.gmra.mxu3 %v8042_v23  ;;  %v5081_v50 = vpop.f32.mrf.mxu2 }
 0x37b   : > { %v10508_v27 = vpop.f32.mrf.mxu1  ;;  %v5082_v20 = vadd.f32 %v5081_v50, %v10388_v47  ;;  %v8065_v50 = vld [vmem:[#allocation3 + $0x140] sm:$0xf] }
 0x37c   : > { %v5661_v15 = vpop.f32.mrf.mxu0 }
 0x37d   : > { %v5170_v25 = vpop.f32.mrf.mxu3 }
 0x37e   : > { %v5171_v48 = vadd.f32 %v5170_v25, %v5082_v20  ;;  %v8066_v25 = vor.u32 %v9107_v1, %v8065_v50  ;;  %v9199_v50 = vld [vmem:[#allocation9 + $0x1d0] sm:$0xff] }
 0x380   : > { %v10511_v43 = vadd.f32 %v5659_v12, %v5171_v48  ;;  %v9034_v12 = vld [vmem:[#allocation3 + $0x128] sm:$0xf0] }
 0x381   : > { %v8346_v20 = vor.u32 %v9034_v12, %v8345_v57  ;;  %v9192_v12 = vld [vmem:[#allocation9 + $0x198] sm:$0xff] }
 0x382   : > { %v5083_v53 = vpop.f32.mrf.mxu2 }
 0x383   : > { %v10513_v17 = vpop.f32.mrf.mxu1  ;;  %v5084_v47 = vadd.f32 %v5083_v53, %v10401_v51  ;;  %v8227_v53 = vld [vmem:[#allocation3 + $0x3c] sm:$0xf0] }
 0x384   : > { %v5664_v26 = vpop.f32.mrf.mxu0 }
 0x385   : > { %v5172_v4 = vpop.f32.mrf.mxu3 }
 0x386   : > { %5737 = vmatmul.bf16.vlgmr.msrb.gmra.mxu1 %v8206_v5  ;;  %v5173_v39 = vadd.f32 %v5172_v4, %v5084_v47  ;;  %v9194_v5 = vld [vmem:[#allocation9 + $0x1a8] sm:$0xff]  ;;  %v9003_v47 = vld [vmem:[#allocation3 + $0x34] sm:$0xf] }
 0x387   : > { %5125 = vmatmul.bf16.gmra.mxu2 %v8050_v0  ;;  %5703 = vmatmul.bf16.gmra.mxu0 %v8334_v28  ;;  %v9202_v4 = vld [vmem:[#allocation9 + $0x1e8] sm:$0xff]  ;;  %v9110_v0 = vld [vmem:[#allocation3 + $0x160] sm:$0xf0]  ;;  %v9108_v28 = vld [vmem:[#allocation3 + $0x154] sm:$0xf] }
 0x388   : > { %v10516_v7 = vadd.f32 %v5661_v15, %v5173_v39  ;;  %6424 = vmatpush.bf16.msra.mxu3 %v9194_v5  ;;  %6513 = vmatpush.bf16.msra.mxu0 %v9202_v4  ;;  %v8078_v32 = vor.u32 %v9110_v0, %v8077_v38  ;;  %v8083_v5 = vld [vmem:[#allocation3 + $0x174] sm:$0xf0]  ;;  %v8089_v0 = vld [vmem:[#allocation3 + $0x170] sm:$0xf] }
 0x389   : > { %v9189_v38 = vld [vmem:[#allocation9 + $0x180] sm:$0xff] }
 0x38a   : > { %5214 = vmatmul.bf16.gmra.mxu3 %v8054_v46  ;;  %v5086_v36 = vpop.f32.mrf.mxu2  ;;  %v8357_v46 = vld [vmem:[#allocation3 + $0x138] sm:$0xf] }
 0x38b   : > { %v10518_v51 = vpop.f32.mrf.mxu1  ;;  %v5087_v61 = vadd.f32 %v5086_v36, %v10412_v10  ;;  %v9105_v10 = vld [vmem:[#allocation3 + $0x13c] sm:$0xf] }
 0x38c   : > { %v5666_v18 = vpop.f32.mrf.mxu0  ;;  %v8062_v23 = vor.u32 %v9105_v10, %v8059_v9  ;;  %6425 = vmatpush.bf16.msra.mxu3 %v9193_v22  ;;  %v9064_v9 = vld [vmem:[#allocation9 + $0x98] sm:$0xff] }
 0x38d   : > { %v5175_v37 = vpop.f32.mrf.mxu3 }
 0x38e   : > { %v5176_v19 = vadd.f32 %v5175_v37, %v5087_v61  ;;  %v8074_v61 = vor.u32 %v9108_v28, %v8071_v29  ;;  %v8358_v37 = vor.u32 %v9037_v11, %v8357_v46  ;;  %v9111_v29 = vld [vmem:[#allocation3 + $0x16c] sm:$0xf]  ;;  %v8369_v11 = vld [vmem:[#allocation3 + $0x150] sm:$0xf] }
 0x38f   : > { %v9061_v28 = vld [vmem:[#allocation9 + $0x80] sm:$0xff] }
 0x390   : > { %v10521_v54 = vadd.f32 %v5664_v26, %v5176_v19  ;;  %v8230_v26 = vor.u32 %v9003_v47, %v8227_v53  ;;  %v9065_v19 = vld [vmem:[#allocation9 + $0xa0] sm:$0xff]  ;;  %6426 = vmatpush.bf16.msra.mxu3 %v9192_v12  ;;  %v9198_v53 = vld [vmem:[#allocation9 + $0x1c8] sm:$0xff] }
 0x391   : > { %5821 = vmatpush.bf16.msra.mxu2 %v9065_v19 }
 0x392   : > { %v5088_v13 = vpop.f32.mrf.mxu2 }
 0x393   : > { %v10523_v55 = vpop.f32.mrf.mxu1  ;;  %v5089_v42 = vadd.f32 %v5088_v13, %v10424_v41  ;;  %v9201_v13 = vld [vmem:[#allocation9 + $0x1e0] sm:$0xff] }
 0x394   : > { %v5669_v58 = vpop.f32.mrf.mxu0  ;;  %6514 = vmatpush.bf16.msra.mxu0 %v9201_v13  ;;  %v8251_v13 = vld [vmem:[#allocation3 + $0x6c] sm:$0xf0] }
 0x395   : > { %v5177_v21 = vpop.f32.mrf.mxu3  ;;  %5822 = vmatpush.bf16.msra.mxu2 %v9064_v9 }
 0x396   : > { %5742 = vmatmul.bf16.gmra.mxu1 %v8218_v52  ;;  %v5178_v62 = vadd.f32 %v5177_v21, %v5089_v42  ;;  %v9200_v21 = vld [vmem:[#allocation9 + $0x1d8] sm:$0xff] }
 0x397   : > { %5130 = vmatmul.bf16.gmra.mxu2 %v8062_v23  ;;  %5708 = vmatmul.bf16.gmra.mxu0 %v8346_v20  ;;  %v9191_v23 = vld [vmem:[#allocation9 + $0x190] sm:$0xff]  ;;  %v8239_v20 = vld [vmem:[#allocation3 + $0x54] sm:$0xf0] }
 0x398   : > { %v10526_v15 = vadd.f32 %v5666_v18, %v5178_v62  ;;  %v9210_v18 = vld [vmem:[#allocation9 + $0x228] sm:$0xff]  ;;  %v9063_v62 = vld [vmem:[#allocation9 + $0x90] sm:$0xff]  ;;  %6515 = vmatpush.bf16.msra.mxu0 %v9200_v21  ;;  %6427 = vmatpush.bf16.msra.mxu3 %v9191_v23  ;;  %v9116_v23 = vld [vmem:[#allocation3 + $0x190] sm:$0xf0] }
 0x399   : > { %6602 = vmatpush.bf16.msra.mxu1 %v9210_v18  ;;  %5823 = vmatpush.bf16.msra.mxu2 %v9063_v62 }
 0x39a   : > { %5219 = vmatmul.bf16.gmra.mxu3 %v8066_v25  ;;  %v5091_v48 = vpop.f32.mrf.mxu2 }
 0x39b   : > { %v10528_v40 = vpop.f32.mrf.mxu1  ;;  %v5092_v41 = vadd.f32 %v5091_v48, %v10440_v56 }
 0x39c   : > { %v5671_v16 = vpop.f32.mrf.mxu0  ;;  %6516 = vmatpush.bf16.msra.mxu0 %v9199_v50 }
 0x39d   : > { %v5180_v14 = vpop.f32.mrf.mxu3 }
 0x39e   : > { %v5181_v2 = vadd.f32 %v5180_v14, %v5092_v41  ;;  %v9006_v41 = vld [vmem:[#allocation3 + $0x4c] sm:$0xf]  ;;  %v9062_v14 = vld [vmem:[#allocation9 + $0x88] sm:$0xff] }
 0x39f   : > { %5824 = vmatpush.bf16.msra.mxu2 %v9062_v14 }
 0x3a0   : > { %v10531_v3 = vadd.f32 %v5669_v58, %v5181_v2  ;;  %v8242_v2 = vor.u32 %v9006_v41, %v8239_v20  ;;  %6517 = vmatpush.bf16.msra.mxu0 %v9198_v53  ;;  %v8381_v20 = vld [vmem:[#allocation3 + $0x168] sm:$0xf] }
 0x3a2   : > { %v5093_v31 = vpop.f32.mrf.mxu2 }
 0x3a3   : > { %v10533_v30 = vpop.f32.mrf.mxu1  ;;  %v5094_v56 = vadd.f32 %v5093_v31, %v10457_v34  ;;  %v9113_v31 = vld [vmem:[#allocation3 + $0x178] sm:$0xf0]  ;;  %5825 = vmatpush.bf16.msra.mxu2 %v9061_v28 }
 0x3a4   : > { %v5674_v63 = vpop.f32.mrf.mxu0  ;;  %v8090_v46 = vor.u32 %v9113_v31, %v8089_v0 }
 0x3a5   : > { %v5182_v39 = vpop.f32.mrf.mxu3 }
 0x3a6   : > { %5747 = vmatmul.bf16.gmra.mxu1 %v8230_v26  ;;  %v5183_v36 = vadd.f32 %v5182_v39, %v5094_v56  ;;  %v8086_v39 = vor.u32 %v9111_v29, %v8083_v5  ;;  %v8263_v29 = vld [vmem:[#allocation3 + $0x84] sm:$0xf0] }
 0x3a7   : > { %5135 = vmatmul.bf16.gmra.mxu2 %v8074_v61  ;;  %5713 = vmatmul.bf16.gmra.mxu0 %v8358_v37 }
 0x3a8   : > { %v10536_v34 = vadd.f32 %v5671_v16, %v5183_v36  ;;  %v9190_v16 = vld [vmem:[#allocation9 + $0x188] sm:$0xff]  ;;  %v9197_v36 = vld [vmem:[#allocation9 + $0x1c0] sm:$0xff] }
 0x3a9   : > { %6428 = vmatpush.bf16.msra.mxu3 %v9190_v16  ;;  %6518 = vmatpush.bf16.msra.mxu0 %v9197_v36  ;;  %v8101_v16 = vld [vmem:[#allocation3 + $0x188] sm:$0xf] }
 0x3aa   : > { %5224 = vmatmul.bf16.gmra.mxu3 %v8078_v32  ;;  %v5096_v42 = vpop.f32.mrf.mxu2  ;;  %v8102_v5 = vor.u32 %v9116_v23, %v8101_v16 }
 0x3ab   : > { %v10538_v52 = vpop.f32.mrf.mxu1  ;;  %v5097_v1 = vadd.f32 %v5096_v42, %v10466_v24  ;;  %v9009_v42 = vld [vmem:[#allocation3 + $0x64] sm:$0xf] }
 0x3ac   : > { %v5676_v10 = vpop.f32.mrf.mxu0 }
 0x3ad   : > { %v5185_v58 = vpop.f32.mrf.mxu3  ;;  %6429 = vmatpush.bf16.msra.mxu3 %v9189_v38 }
 0x3ae   : > { %v5186_v57 = vadd.f32 %v5185_v58, %v5097_v1  ;;  %v8254_v1 = vor.u32 %v9009_v42, %v8251_v13  ;;  %v8095_v58 = vld [vmem:[#allocation3 + $0x18c] sm:$0xf0] }
 0x3af   : > { %v8489_v13 = vld [vmem:[#allocation3 + $0x30] sm:$0xf] }
 0x3b0   : > { %v10541_v25 = vadd.f32 %v5674_v63, %v5186_v57  ;;  %v8370_v63 = vor.u32 %v9040_v6, %v8369_v11  ;;  %v8209_v11 = vld [vmem:[#allocation3 + $0x8] sm:$0xf] }
 0x3b2   : > { %v5098_v24 = vpop.f32.mrf.mxu2 }
 0x3b3   : > { %v10543_v48 = vpop.f32.mrf.mxu1  ;;  %v5099_v47 = vadd.f32 %v5098_v24, %v10476_v60 }
 0x3b4   : > { %v5679_v26 = vpop.f32.mrf.mxu0 }
 0x3b5   : > { %v5187_v4 = vpop.f32.mrf.mxu3 }
 0x3b6   : > { %5752 = vmatmul.bf16.gmra.mxu1 %v8242_v2  ;;  %v5188_v56 = vadd.f32 %v5187_v4, %v5099_v47  ;;  %v9209_v2 = vld [vmem:[#allocation9 + $0x220] sm:$0xff] }
 0x3b7   : > { %5140 = vmatmul.bf16.gmra.mxu2 %v8086_v39  ;;  %5718 = vmatmul.bf16.gmra.mxu0 %v8370_v63  ;;  %v9012_v63 = vld [vmem:[#allocation3 + $0x7c] sm:$0xf] }
 0x3b8   : > { %v10546_v60 = vadd.f32 %v5676_v10, %v5188_v56  ;;  %v9043_v10 = vld [vmem:[#allocation3 + $0x170] sm:$0xf0]  ;;  %6603 = vmatpush.bf16.msra.mxu1 %v9209_v2  ;;  %v8266_v38 = vor.u32 %v9012_v63, %v8263_v29  ;;  %v8503_v2 = vld [vmem:[#allocation3 + $0x54] sm:$0xf0]  ;;  %v9208_v63 = vld [vmem:[#allocation9 + $0x218] sm:$0xff] }
 0x3b9   : > { %v8382_v24 = vor.u32 %v9043_v10, %v8381_v20  ;;  %v8999_v56 = vld [vmem:[#allocation3 + $0x10] sm:$0xf0] }
 0x3ba   : > { %5229 = vmatmul.bf16.gmra.mxu3 %v8090_v46  ;;  %v5101_v37 = vpop.f32.mrf.mxu2  ;;  %v8491_v46 = vld [vmem:[#allocation3 + $0x3c] sm:$0xf0] }
 0x3bb   : > { %v10548_v61 = vpop.f32.mrf.mxu1  ;;  %v5102_v18 = vadd.f32 %v5101_v37, %v10487_v44  ;;  %v9114_v44 = vld [vmem:[#allocation3 + $0x184] sm:$0xf] }
 0x3bc   : > { %v5681_v22 = vpop.f32.mrf.mxu0  ;;  %v8098_v14 = vor.u32 %v9114_v44, %v8095_v58  ;;  %6604 = vmatpush.bf16.msra.mxu1 %v9208_v63 }
 0x3bd   : > { %v5190_v19 = vpop.f32.mrf.mxu3 }
 0x3be   : > { %v5191_v32 = vadd.f32 %v5190_v19, %v5102_v18  ;;  %v8210_v18 = vor.u32 %v8999_v56, %v8209_v11  ;;  %v9142_v19 = vld [vmem:[#allocation3 + $0x38] sm:$0xf0]  ;;  %v8501_v11 = vld [vmem:[#allocation3 + $0x48] sm:$0xf] }
 0x3c0   : > { %v10551_v9 = vadd.f32 %v5679_v26, %v5191_v32 }
 0x3c2   : > { %v5103_v21 = vpop.f32.mrf.mxu2 }
 0x3c3   : > { %v10553_v12 = vpop.f32.mrf.mxu1  ;;  %v5104_v57 = vadd.f32 %v5103_v21, %v10496_v35  ;;  %v8490_v21 = vor.u32 %v9142_v19, %v8489_v13  ;;  %v8287_v19 = vld [vmem:[#allocation3 + $0xb4] sm:$0xf0] }
 0x3c4   : > { %v5684_v50 = vpop.f32.mrf.mxu0 }
 0x3c5   : > { %v5192_v62 = vpop.f32.mrf.mxu3 }
 0x3c6   : > { %5757 = vmatmul.bf16.gmra.mxu1 %v8254_v1  ;;  %v5193_v41 = vadd.f32 %v5192_v62, %v5104_v57 }
 0x3c7   : > { %5145 = vmatmul.bf16.gmra.mxu2 %v8098_v14  ;;  %5723 = vmatmul.bf16.gmra.mxu0 %v8382_v24  ;;  %v9002_v24 = vld [vmem:[#allocation3 + $0x28] sm:$0xf0] }
 0x3c8   : > { %v10556_v6 = vadd.f32 %v5681_v22, %v5193_v41  ;;  %v9141_v22 = vld [vmem:[#allocation3 + $0x34] sm:$0xf] }
 0x3c9   : > { %v8494_v42 = vor.u32 %v9141_v22, %v8491_v46  ;;  %v9015_v41 = vld [vmem:[#allocation3 + $0x94] sm:$0xf]  ;;  %v9018_v22 = vld [vmem:[#allocation3 + $0xac] sm:$0xf] }
 0x3ca   : > { %5234 = vmatmul.bf16.gmra.mxu3 %v8102_v5  ;;  %v5106_v35 = vpop.f32.mrf.mxu2  ;;  %v8290_v13 = vor.u32 %v9018_v22, %v8287_v19 }
 0x3cb   : > { %v10558_v53 = vpop.f32.mrf.mxu1  ;;  %v5107_v47 = vadd.f32 %v5106_v35, %v10503_v8 }
 0x3cc   : > { %v5686_v31 = vpop.f32.mrf.mxu0 }
 0x3cd   : > { %v5195_v4 = vpop.f32.mrf.mxu3 }
 0x3ce   : > { %v5196_v26 = vadd.f32 %v5195_v4, %v5107_v47  ;;  %v9145_v47 = vld [vmem:[#allocation3 + $0x50] sm:$0xf0]  ;;  %v8221_v4 = vld [vmem:[#allocation3 + $0x20] sm:$0xf] }
 0x3cf   : > { %v8222_v29 = vor.u32 %v9002_v24, %v8221_v4 }
 0x3d0   : > { %v10561_v39 = vadd.f32 %v5684_v50, %v5196_v26  ;;  %v8275_v50 = vld [vmem:[#allocation3 + $0x9c] sm:$0xf0] }
 0x3d1   : > { %v8278_v16 = vor.u32 %v9015_v41, %v8275_v50  ;;  %v9147_v50 = vld [vmem:[#allocation3 + $0x64] sm:$0xf] }
 0x3d2   : > { %v5108_v28 = vpop.f32.mrf.mxu2 }
 0x3d3   : > { %v10563_v0 = vpop.f32.mrf.mxu1  ;;  %v5109_v36 = vadd.f32 %v5108_v28, %v10508_v27  ;;  %v8502_v28 = vor.u32 %v9145_v47, %v8501_v11 }
 0x3d4   : > { %v5689_v8 = vpop.f32.mrf.mxu0 }
 0x3d5   : > { %v5197_v37 = vpop.f32.mrf.mxu3 }
 0x3d6   : > { %5762 = vmatmul.bf16.gmra.mxu1 %v8266_v38  ;;  %v5198_v32 = vadd.f32 %v5197_v37, %v5109_v36 }
 0x3d7   : > { %5826 = vmatmul.bf16.vlgmr.msra.gmra.mxu2 %v8210_v18  ;;  %6519 = vmatmul.bf16.vlgmr.msra.gmra.mxu0 %v8494_v42  ;;  %v9005_v42 = vld [vmem:[#allocation3 + $0x40] sm:$0xf0] }
 0x3d8   : > { %v10566_v1 = vadd.f32 %v5686_v31, %v5198_v32  ;;  %v9144_v31 = vld [vmem:[#allocation3 + $0x4c] sm:$0xf] }
 0x3d9   : > { %v8506_v56 = vor.u32 %v9144_v31, %v8503_v2 }
 0x3da   : > { %6430 = vmatmul.bf16.vlgmr.msra.gmra.mxu3 %v8490_v21  ;;  %v5111_v10 = vpop.f32.mrf.mxu2  ;;  %v8515_v21 = vld [vmem:[#allocation3 + $0x6c] sm:$0xf0] }
 0x3db   : > { %v10568_v58 = vpop.f32.mrf.mxu1  ;;  %v5112_v27 = vadd.f32 %v5111_v10, %v10513_v17  ;;  %v8518_v24 = vor.u32 %v9147_v50, %v8515_v21 }
 0x3dc   : > { %v10571_v62 = vpop.f32.mrf.mxu0 }
 0x3dd   : > { %v5200_v57 = vpop.f32.mrf.mxu3 }
 0x3de   : > { %v5201_v23 = vadd.f32 %v5200_v57, %v5112_v27  ;;  %v9148_v57 = vld [vmem:[#allocation3 + $0x68] sm:$0xf0] }
 0x3e0   : > { %v10573_v44 = vadd.f32 %v5689_v8, %v5201_v23 }
 0x3e2   : > { %v5113_v14 = vpop.f32.mrf.mxu2 }
 0x3e3   : > { %v10575_v20 = vpop.f32.mrf.mxu1  ;;  %v5114_v5 = vadd.f32 %v5113_v14, %v10518_v51 }
 0x3e4   : > { %v10578_v17 = vpop.f32.mrf.mxu0 }
 0x3e5   : > { %v5202_v35 = vpop.f32.mrf.mxu3 }
 0x3e6   : > { %5767 = vmatmul.bf16.gmra.mxu1 %v8278_v16  ;;  %v10580_v26 = vadd.f32 %v5202_v35, %v5114_v5  ;;  %v8513_v16 = vld [vmem:[#allocation3 + $0x60] sm:$0xf] }
 0x3e7   : > { %5831 = vmatmul.bf16.gmra.mxu2 %v8222_v29  ;;  %6524 = vmatmul.bf16.gmra.mxu0 %v8506_v56  ;;  %v8514_v2 = vor.u32 %v9148_v57, %v8513_v16  ;;  %v8299_v29 = vld [vmem:[#allocation3 + $0xcc] sm:$0xf0]  ;;  %v9021_v56 = vld [vmem:[#allocation3 + $0xc4] sm:$0xf] }
 0x3ea   : > { %6435 = vmatmul.bf16.gmra.mxu3 %v8502_v28  ;;  %v5116_v51 = vpop.f32.mrf.mxu2 }
 0x3eb   : > { %v10582_v38 = vpop.f32.mrf.mxu1  ;;  %v5117_v46 = vadd.f32 %v5116_v51, %v10523_v55  ;;  %v8233_v55 = vld [vmem:[#allocation3 + $0x38] sm:$0xf]  ;;  %v8302_v51 = vor.u32 %v9021_v56, %v8299_v29  ;;  %v9024_v29 = vld [vmem:[#allocation3 + $0xdc] sm:$0xf] }
 0x3ec   : > { %v10585_v37 = vpop.f32.mrf.mxu0  ;;  %v8234_v14 = vor.u32 %v9005_v42, %v8233_v55  ;;  %v9150_v42 = vld [vmem:[#allocation3 + $0x7c] sm:$0xf]  ;;  %v10611_v55 = vadd.f32 %v10571_v62, %v10580_v26  ;;  %v8311_v26 = vld [vmem:[#allocation3 + $0xe4] sm:$0xf0] }
 0x3ed   : > { %v5205_v36 = vpop.f32.mrf.mxu3 }
 0x3ee   : > { %v5206_v18 = vadd.f32 %v5205_v36, %v5117_v46  ;;  %v9008_v46 = vld [vmem:[#allocation3 + $0x58] sm:$0xf0]  ;;  %v8527_v36 = vld [vmem:[#allocation3 + $0x84] sm:$0xf0] }
 0x3ef   : > { %v8530_v57 = vor.u32 %v9150_v42, %v8527_v36  ;;  %v9154_v36 = vld [vmem:[#allocation3 + $0x98] sm:$0xf0] }
 0x3f0   : > { %v10622_v62 = vadd.f32 %v10578_v17, %v5206_v18  ;;  %v9153_v17 = vld [vmem:[#allocation3 + $0x94] sm:$0xf] }
 0x3f2   : > { %v5118_v32 = vpop.f32.mrf.mxu2 }
 0x3f3   : > { %v10587_v8 = vpop.f32.mrf.mxu1  ;;  %v5119_v10 = vadd.f32 %v5118_v32, %v10528_v40  ;;  %v9151_v32 = vld [vmem:[#allocation3 + $0x80] sm:$0xf0] }
 0x3f4   : > { %v10590_v23 = vpop.f32.mrf.mxu0 }
 0x3f5   : > { %v5207_v27 = vpop.f32.mrf.mxu3 }
 0x3f6   : > { %5772 = vmatmul.bf16.gmra.mxu1 %v8290_v13  ;;  %v10592_v41 = vadd.f32 %v5207_v27, %v5119_v10  ;;  %v8245_v13 = vld [vmem:[#allocation3 + $0x50] sm:$0xf]  ;;  %v8525_v27 = vld [vmem:[#allocation3 + $0x78] sm:$0xf] }
 0x3f7   : > { %5836 = vmatmul.bf16.gmra.mxu2 %v8234_v14  ;;  %6529 = vmatmul.bf16.gmra.mxu0 %v8518_v24  ;;  %v8246_v10 = vor.u32 %v9008_v46, %v8245_v13  ;;  %v8526_v50 = vor.u32 %v9151_v32, %v8525_v27  ;;  %v8537_v13 = vld [vmem:[#allocation3 + $0x90] sm:$0xf] }
 0x3fa   : > { %6440 = vmatmul.bf16.gmra.mxu3 %v8514_v2  ;;  %v5121_v35 = vpop.f32.mrf.mxu2 }
 0x3fb   : > { %v10594_v5 = vpop.f32.mrf.mxu1  ;;  %v5122_v40 = vadd.f32 %v5121_v35, %v10533_v30 }
 0x3fc   : > { %v10597_v4 = vpop.f32.mrf.mxu0 }
 0x3fd   : > { %v5210_v47 = vpop.f32.mrf.mxu3 }
 0x3fe   : > { %v10599_v31 = vadd.f32 %v5210_v47, %v5122_v40 }
 0x402   : > { %v5123_v28 = vpop.f32.mrf.mxu2 }
 0x403   : > { %v5738_v11 = vpop.f32.mrf.mxu1  ;;  %v5124_v19 = vadd.f32 %v5123_v28, %v10538_v52  ;;  %v9011_v28 = vld [vmem:[#allocation3 + $0x70] sm:$0xf0] }
 0x404   : > { %v10602_v63 = vadd.f32 %v5738_v11, %v10483_v45  ;;  %v10605_v30 = vpop.f32.mrf.mxu0  ;;  %v9207_v45 = vld [vmem:[#allocation9 + $0x210] sm:$0xff] }
 0x405   : > { %v5212_v22 = vpop.f32.mrf.mxu3  ;;  %6605 = vmatpush.bf16.msra.mxu1 %v9207_v45 }
 0x406   : > { %5777 = vmatmul.bf16.gmra.mxu1 %v8302_v51  ;;  %v10607_v21 = vadd.f32 %v5212_v22, %v5124_v19  ;;  %v8539_v51 = vld [vmem:[#allocation3 + $0x9c] sm:$0xf0]  ;;  %v8257_v22 = vld [vmem:[#allocation3 + $0x68] sm:$0xf] }
 0x407   : > { %5841 = vmatmul.bf16.gmra.mxu2 %v8246_v10  ;;  %6534 = vmatmul.bf16.gmra.mxu0 %v8530_v57  ;;  %v8258_v32 = vor.u32 %v9011_v28, %v8257_v22  ;;  %v8542_v42 = vor.u32 %v9153_v17, %v8539_v51  ;;  %v8538_v10 = vor.u32 %v9154_v36, %v8537_v13  ;;  %v9157_v28 = vld [vmem:[#allocation3 + $0xb0] sm:$0xf0]  ;;  %v8549_v36 = vld [vmem:[#allocation3 + $0xa8] sm:$0xf] }
 0x408   : > { %v10658_v17 = vadd.f32 %v10597_v4, %v10607_v21  ;;  %v8335_v21 = vld [vmem:[#allocation3 + $0x114] sm:$0xf0] }
 0x40a   : > { %6445 = vmatmul.bf16.gmra.mxu3 %v8526_v50  ;;  %v5126_v16 = vpop.f32.mrf.mxu2 }
 0x40b   : > { %v5740_v52 = vpop.f32.mrf.mxu1  ;;  %v5127_v24 = vadd.f32 %v5126_v16, %v10543_v48 }
 0x40c   : > { %v10614_v14 = vadd.f32 %v5740_v52, %v10492_v59  ;;  %v10617_v35 = vpop.f32.mrf.mxu0  ;;  %v8314_v59 = vor.u32 %v9024_v29, %v8311_v26  ;;  %v9014_v29 = vld [vmem:[#allocation3 + $0x88] sm:$0xf0] }
 0x40d   : > { %v5215_v2 = vpop.f32.mrf.mxu3 }
 0x40e   : > { %v10619_v40 = vadd.f32 %v5215_v2, %v5127_v24  ;;  %v9027_v2 = vld [vmem:[#allocation3 + $0xf4] sm:$0xf] }
 0x410   : > { %v10670_v4 = vadd.f32 %v10605_v30, %v10619_v40  ;;  %v9159_v30 = vld [vmem:[#allocation3 + $0xc4] sm:$0xf] }
 0x412   : > { %v5128_v56 = vpop.f32.mrf.mxu2 }
 0x413   : > { %v5743_v47 = vpop.f32.mrf.mxu1  ;;  %v5129_v48 = vadd.f32 %v5128_v56, %v10548_v61  ;;  %v8551_v56 = vld [vmem:[#allocation3 + $0xb4] sm:$0xf0] }
 0x414   : > { %v10625_v11 = vadd.f32 %v5743_v47, %v10501_v33  ;;  %v10628_v19 = vpop.f32.mrf.mxu0  ;;  %v10634_v33 = vadd.f32 %v10585_v37, %v10592_v41  ;;  %v10646_v37 = vadd.f32 %v10590_v23, %v10599_v31  ;;  %v8323_v41 = vld [vmem:[#allocation3 + $0xfc] sm:$0xf0]  ;;  %v9156_v23 = vld [vmem:[#allocation3 + $0xac] sm:$0xf] }
 0x415   : > { %v5217_v46 = vpop.f32.mrf.mxu3  ;;  %v8326_v47 = vor.u32 %v9027_v2, %v8323_v41  ;;  %v8554_v22 = vor.u32 %v9156_v23, %v8551_v56  ;;  %v9030_v41 = vld [vmem:[#allocation3 + $0x10c] sm:$0xf] }
 0x416   : > { %5782 = vmatmul.bf16.gmra.mxu1 %v8314_v59  ;;  %v10630_v18 = vadd.f32 %v5217_v46, %v5129_v48  ;;  %v8269_v48 = vld [vmem:[#allocation3 + $0x80] sm:$0xf]  ;;  %v8338_v2 = vor.u32 %v9030_v41, %v8335_v21  ;;  %v9160_v56 = vld [vmem:[#allocation3 + $0xc8] sm:$0xf0]  ;;  %v9020_v41 = vld [vmem:[#allocation3 + $0xb8] sm:$0xf0] }
 0x417   : > { %5846 = vmatmul.bf16.gmra.mxu2 %v8258_v32  ;;  %6539 = vmatmul.bf16.gmra.mxu0 %v8542_v42  ;;  %v8270_v46 = vor.u32 %v9014_v29, %v8269_v48  ;;  %v8550_v32 = vor.u32 %v9157_v28, %v8549_v36  ;;  %v8561_v48 = vld [vmem:[#allocation3 + $0xc0] sm:$0xf] }
 0x41a   : > { %6450 = vmatmul.bf16.gmra.mxu3 %v8538_v10  ;;  %v5131_v57 = vpop.f32.mrf.mxu2 }
 0x41b   : > { %v5745_v61 = vpop.f32.mrf.mxu1  ;;  %v5132_v45 = vadd.f32 %v5131_v57, %v10553_v12 }
 0x41c   : > { %v10637_v27 = vadd.f32 %v5745_v61, %v10506_v49  ;;  %v10640_v52 = vpop.f32.mrf.mxu0 }
 0x41d   : > { %v5220_v50 = vpop.f32.mrf.mxu3 }
 0x41e   : > { %v10642_v16 = vadd.f32 %v5220_v50, %v5132_v45 }
 0x422   : > { %v5133_v49 = vpop.f32.mrf.mxu2 }
 0x423   : > { %v5748_v24 = vpop.f32.mrf.mxu1  ;;  %v5134_v12 = vadd.f32 %v5133_v49, %v10558_v53  ;;  %v9017_v49 = vld [vmem:[#allocation3 + $0xa0] sm:$0xf0] }
 0x424   : > { %v10649_v26 = vadd.f32 %v5748_v24, %v10511_v43  ;;  %v10652_v51 = vpop.f32.mrf.mxu0  ;;  %v9206_v43 = vld [vmem:[#allocation9 + $0x208] sm:$0xff] }
 0x425   : > { %v5222_v59 = vpop.f32.mrf.mxu3  ;;  %6606 = vmatpush.bf16.msra.mxu1 %v9206_v43 }
 0x426   : > { %5787 = vmatmul.bf16.gmra.mxu1 %v8326_v47  ;;  %v10654_v31 = vadd.f32 %v5222_v59, %v5134_v12  ;;  %v8563_v47 = vld [vmem:[#allocation3 + $0xcc] sm:$0xf0]  ;;  %v8281_v59 = vld [vmem:[#allocation3 + $0x98] sm:$0xf] }
 0x427   : > { %5851 = vmatmul.bf16.gmra.mxu2 %v8270_v46  ;;  %6544 = vmatmul.bf16.gmra.mxu0 %v8554_v22  ;;  %v8282_v28 = vor.u32 %v9017_v49, %v8281_v59  ;;  %v8566_v23 = vor.u32 %v9159_v30, %v8563_v47  ;;  %v8562_v46 = vor.u32 %v9160_v56, %v8561_v48  ;;  %v9163_v49 = vld [vmem:[#allocation3 + $0xe0] sm:$0xf0]  ;;  %v8573_v59 = vld [vmem:[#allocation3 + $0xd8] sm:$0xf] }
 0x428   : > { %v10706_v30 = vadd.f32 %v10640_v52, %v10654_v31  ;;  %v8359_v31 = vld [vmem:[#allocation3 + $0x144] sm:$0xf0] }
 0x42a   : > { %6455 = vmatmul.bf16.gmra.mxu3 %v8550_v32  ;;  %v5136_v42 = vpop.f32.mrf.mxu2 }
 0x42b   : > { %v5750_v53 = vpop.f32.mrf.mxu1  ;;  %v5137_v10 = vadd.f32 %v5136_v42, %v10563_v0 }
 0x42c   : > { %v10661_v13 = vadd.f32 %v5750_v53, %v10516_v7  ;;  %v10664_v57 = vpop.f32.mrf.mxu0 }
 0x42d   : > { %v5225_v61 = vpop.f32.mrf.mxu3 }
 0x42e   : > { %v10666_v45 = vadd.f32 %v5225_v61, %v5137_v10  ;;  %v9033_v61 = vld [vmem:[#allocation3 + $0x124] sm:$0xf] }
 0x430   : > { %v10718_v52 = vadd.f32 %v10652_v51, %v10666_v45 }
 0x432   : > { %v5138_v7 = vpop.f32.mrf.mxu2 }
 0x433   : > { %v5753_v50 = vpop.f32.mrf.mxu1  ;;  %v5139_v0 = vadd.f32 %v5138_v7, %v10568_v58  ;;  %v8575_v7 = vld [vmem:[#allocation3 + $0xe4] sm:$0xf0] }
 0x434   : > { %v10673_v24 = vadd.f32 %v5753_v50, %v10521_v54  ;;  %v10676_v12 = vpop.f32.mrf.mxu0  ;;  %v10682_v54 = vadd.f32 %v10617_v35, %v10630_v18  ;;  %v10694_v35 = vadd.f32 %v10628_v19, %v10642_v16  ;;  %v8347_v18 = vld [vmem:[#allocation3 + $0x12c] sm:$0xf0]  ;;  %v9162_v19 = vld [vmem:[#allocation3 + $0xdc] sm:$0xf] }
 0x435   : > { %v5227_v29 = vpop.f32.mrf.mxu3  ;;  %v8350_v50 = vor.u32 %v9033_v61, %v8347_v18  ;;  %v9205_v16 = vld [vmem:[#allocation9 + $0x200] sm:$0xff]  ;;  %v9036_v18 = vld [vmem:[#allocation3 + $0x13c] sm:$0xf] }
 0x436   : > { %5792 = vmatmul.bf16.gmra.mxu1 %v8338_v2  ;;  %v10678_v40 = vadd.f32 %v5227_v29, %v5139_v0  ;;  %v8293_v0 = vld [vmem:[#allocation3 + $0xb0] sm:$0xf]  ;;  %v8362_v61 = vor.u32 %v9036_v18, %v8359_v31  ;;  %v9026_v18 = vld [vmem:[#allocation3 + $0xe8] sm:$0xf0] }
 0x437   : > { %5856 = vmatmul.bf16.gmra.mxu2 %v8282_v28  ;;  %6549 = vmatmul.bf16.gmra.mxu0 %v8566_v23  ;;  %v8294_v56 = vor.u32 %v9020_v41, %v8293_v0  ;;  %v8574_v28 = vor.u32 %v9163_v49, %v8573_v59  ;;  %v9165_v49 = vld [vmem:[#allocation3 + $0xf4] sm:$0xf]  ;;  %v8585_v0 = vld [vmem:[#allocation3 + $0xf0] sm:$0xf] }
 0x438   : > { %6607 = vmatpush.bf16.msra.mxu1 %v9205_v16 }
 0x43a   : > { %6460 = vmatmul.bf16.gmra.mxu3 %v8562_v46  ;;  %v5141_v22 = vpop.f32.mrf.mxu2 }
 0x43b   : > { %v5755_v58 = vpop.f32.mrf.mxu1  ;;  %v5142_v43 = vadd.f32 %v5141_v22, %v10575_v20 }
 0x43c   : > { %v10685_v36 = vadd.f32 %v5755_v58, %v10526_v15  ;;  %v10688_v53 = vpop.f32.mrf.mxu0 }
 0x43d   : > { %v5230_v32 = vpop.f32.mrf.mxu3 }
 0x43e   : > { %v10690_v42 = vadd.f32 %v5230_v32, %v5142_v43 }
 0x442   : > { %v5143_v15 = vpop.f32.mrf.mxu2 }
 0x443   : > { %v5758_v10 = vpop.f32.mrf.mxu1  ;;  %v5144_v20 = vadd.f32 %v5143_v15, %v10582_v38  ;;  %v9023_v15 = vld [vmem:[#allocation3 + $0xd0] sm:$0xf0] }
 0x444   : > { %v10697_v21 = vadd.f32 %v5758_v10, %v10531_v3  ;;  %v10700_v47 = vpop.f32.mrf.mxu0  ;;  %v8578_v3 = vor.u32 %v9162_v19, %v8575_v7  ;;  %v9166_v7 = vld [vmem:[#allocation3 + $0xf8] sm:$0xf0] }
 0x445   : > { %v5232_v2 = vpop.f32.mrf.mxu3  ;;  %v8586_v16 = vor.u32 %v9166_v7, %v8585_v0  ;;  %v8597_v7 = vld [vmem:[#allocation3 + $0x108] sm:$0xf] }
 0x446   : > { %5797 = vmatmul.bf16.gmra.mxu1 %v8350_v50  ;;  %v10702_v29 = vadd.f32 %v5232_v2, %v5144_v20  ;;  %v8587_v50 = vld [vmem:[#allocation3 + $0xfc] sm:$0xf0]  ;;  %v8305_v2 = vld [vmem:[#allocation3 + $0xc8] sm:$0xf] }
 0x447   : > { %5861 = vmatmul.bf16.gmra.mxu2 %v8294_v56  ;;  %6554 = vmatmul.bf16.gmra.mxu0 %v8578_v3  ;;  %v8306_v45 = vor.u32 %v9023_v15, %v8305_v2  ;;  %v8590_v19 = vor.u32 %v9165_v49, %v8587_v50  ;;  %v9169_v15 = vld [vmem:[#allocation3 + $0x110] sm:$0xf0] }
 0x448   : > { %v8598_v2 = vor.u32 %v9169_v15, %v8597_v7 }
 0x44a   : > { %6465 = vmatmul.bf16.gmra.mxu3 %v8574_v28  ;;  %v5146_v23 = vpop.f32.mrf.mxu2 }
 0x44b   : > { %v5760_v38 = vpop.f32.mrf.mxu1  ;;  %v5147_v46 = vadd.f32 %v5146_v23, %v10587_v8 }
 0x44c   : > { %v10709_v48 = vadd.f32 %v5760_v38, %v10536_v34  ;;  %v10712_v22 = vpop.f32.mrf.mxu0 }
 0x44d   : > { %v5235_v58 = vpop.f32.mrf.mxu3 }
 0x44e   : > { %v10714_v43 = vadd.f32 %v5235_v58, %v5147_v46  ;;  %v9039_v58 = vld [vmem:[#allocation3 + $0x154] sm:$0xf] }
 0x452   : > { %v5148_v34 = vpop.f32.mrf.mxu2 }
 0x453   : > { %v5763_v32 = vpop.f32.mrf.mxu1  ;;  %v5149_v8 = vadd.f32 %v5148_v34, %v10594_v5  ;;  %v8599_v34 = vld [vmem:[#allocation3 + $0x114] sm:$0xf0] }
 0x454   : > { %v10721_v10 = vadd.f32 %v5763_v32, %v10541_v25  ;;  %v6520_v20 = vpop.f32.mrf.mxu0  ;;  %v10728_v25 = vadd.f32 %v10664_v57, %v10678_v40  ;;  %v10740_v57 = vadd.f32 %v10676_v12, %v10690_v42  ;;  %v8371_v40 = vld [vmem:[#allocation3 + $0x15c] sm:$0xf0]  ;;  %v9168_v42 = vld [vmem:[#allocation3 + $0x10c] sm:$0xf] }
 0x455   : > { %v5237_v41 = vpop.f32.mrf.mxu3  ;;  %v8317_v12 = vld [vmem:[#allocation3 + $0xe0] sm:$0xf] }
 0x456   : > { %5802 = vmatmul.bf16.gmra.mxu1 %v8362_v61  ;;  %v10724_v51 = vadd.f32 %v5237_v41, %v5149_v8  ;;  %v8318_v41 = vor.u32 %v9026_v18, %v8317_v12 }
 0x457   : > { %5866 = vmatmul.bf16.gmra.mxu2 %v8306_v45  ;;  %6559 = vmatmul.bf16.gmra.mxu0 %v8590_v19 }
 0x45a   : > { %6470 = vmatmul.bf16.gmra.mxu3 %v8586_v16  ;;  %v5827_v59 = vpop.f32.mrf.mxu2 }
 0x45b   : > { %v5765_v5 = vpop.f32.mrf.mxu1  ;;  %v10734_v3 = vadd.f32 %v5827_v59, %v10602_v63 }
 0x45c   : > { %v10731_v56 = vadd.f32 %v5765_v5, %v10546_v60  ;;  %v6522_v23 = vpop.f32.mrf.mxu0  ;;  %v8374_v60 = vor.u32 %v9039_v58, %v8371_v40  ;;  %v10764_v5 = vadd.f32 %v10700_v47, %v10714_v43  ;;  %v8611_v58 = vld [vmem:[#allocation3 + $0x12c] sm:$0xf0]  ;;  %v8329_v47 = vld [vmem:[#allocation3 + $0xf8] sm:$0xf]  ;;  %v9171_v43 = vld [vmem:[#allocation3 + $0x124] sm:$0xf] }
 0x45d   : > { %v6431_v28 = vpop.f32.mrf.mxu3  ;;  %v8614_v15 = vor.u32 %v9171_v43, %v8611_v58  ;;  %v9174_v58 = vld [vmem:[#allocation3 + $0x13c] sm:$0xf] }
 0x45e   : > { %v10736_v38 = vadd.f32 %v6520_v20, %v6431_v28  ;;  %v8602_v20 = vor.u32 %v9168_v42, %v8599_v34  ;;  %v9042_v28 = vld [vmem:[#allocation3 + $0x16c] sm:$0xf] }
 0x462   : > { %v5829_v32 = vpop.f32.mrf.mxu2 }
 0x463   : > { %v5768_v46 = vpop.f32.mrf.mxu1  ;;  %v10746_v63 = vadd.f32 %v5829_v32, %v10614_v14  ;;  %v9172_v32 = vld [vmem:[#allocation3 + $0x128] sm:$0xf0] }
 0x464   : > { %v10743_v31 = vadd.f32 %v5768_v46, %v10551_v9  ;;  %v6525_v8 = vpop.f32.mrf.mxu0  ;;  %v10752_v9 = vadd.f32 %v10688_v53, %v10702_v29  ;;  %v8383_v29 = vld [vmem:[#allocation3 + $0x174] sm:$0xf0]  ;;  %v9029_v46 = vld [vmem:[#allocation3 + $0x100] sm:$0xf0] }
 0x465   : > { %v6433_v61 = vpop.f32.mrf.mxu3  ;;  %v8330_v34 = vor.u32 %v9029_v46, %v8329_v47  ;;  %v8341_v46 = vld [vmem:[#allocation3 + $0x110] sm:$0xf] }
 0x466   : > { %5807 = vmatmul.bf16.gmra.mxu1 %v8374_v60  ;;  %v10748_v50 = vadd.f32 %v6522_v23, %v6433_v61  ;;  %v8609_v61 = vld [vmem:[#allocation3 + $0x120] sm:$0xf] }
 0x467   : > { %5871 = vmatmul.bf16.gmra.mxu2 %v8318_v41  ;;  %6564 = vmatmul.bf16.gmra.mxu0 %v8602_v20  ;;  %v8610_v12 = vor.u32 %v9172_v32, %v8609_v61  ;;  %v8621_v32 = vld [vmem:[#allocation3 + $0x138] sm:$0xf] }
 0x46a   : > { %6475 = vmatmul.bf16.gmra.mxu3 %v8598_v2  ;;  %v5832_v45 = vpop.f32.mrf.mxu2 }
 0x46b   : > { %v5770_v14 = vpop.f32.mrf.mxu1  ;;  %v10758_v0 = vadd.f32 %v5832_v45, %v10625_v11 }
 0x46c   : > { %v10755_v49 = vadd.f32 %v5770_v14, %v10556_v6  ;;  %v6527_v53 = vpop.f32.mrf.mxu0  ;;  %v8386_v6 = vor.u32 %v9042_v28, %v8383_v29  ;;  %v9143_v14 = vld [vmem:[#allocation3 + $0x40] sm:$0xf0]  ;;  %v9032_v29 = vld [vmem:[#allocation3 + $0x118] sm:$0xf0] }
 0x46d   : > { %v6436_v19 = vpop.f32.mrf.mxu3 }
 0x46e   : > { %v10760_v16 = vadd.f32 %v6525_v8, %v6436_v19 }
 0x472   : > { %v5834_v40 = vpop.f32.mrf.mxu2 }
 0x473   : > { %v5773_v59 = vpop.f32.mrf.mxu1  ;;  %v10770_v11 = vadd.f32 %v5834_v40, %v10637_v27 }
 0x474   : > { %v10767_v23 = vadd.f32 %v5773_v59, %v10561_v39  ;;  %v10776_v39 = vadd.f32 %v10712_v22, %v10724_v51  ;;  %v6530_v27 = vpop.f32.mrf.mxu0  ;;  %v8497_v22 = vld [vmem:[#allocation3 + $0x38] sm:$0xf]  ;;  %v8623_v59 = vld [vmem:[#allocation3 + $0x144] sm:$0xf0] }
 0x475   : > { %v6438_v60 = vpop.f32.mrf.mxu3  ;;  %v8626_v47 = vor.u32 %v9174_v58, %v8623_v59  ;;  %v8521_v58 = vld [vmem:[#allocation3 + $0x68] sm:$0xf] }
 0x476   : > { %5812 = vmatmul.bf16.gmra.mxu1 %v8386_v6  ;;  %v10772_v18 = vadd.f32 %v6527_v53, %v6438_v60  ;;  %v8498_v53 = vor.u32 %v9143_v14, %v8497_v22  ;;  %v8342_v60 = vor.u32 %v9032_v29, %v8341_v46  ;;  %v9035_v14 = vld [vmem:[#allocation3 + $0x130] sm:$0xf0] }
 0x477   : > { %5876 = vmatmul.bf16.gmra.mxu2 %v8330_v34  ;;  %6569 = vmatmul.bf16.gmra.mxu0 %v8614_v15  ;;  %v9146_v15 = vld [vmem:[#allocation3 + $0x58] sm:$0xf0] }
 0x47a   : > { %6480 = vmatmul.bf16.gmra.mxu3 %v8610_v12  ;;  %v5837_v41 = vpop.f32.mrf.mxu2 }
 0x47b   : > { %v5775_v42 = vpop.f32.mrf.mxu1  ;;  %v10782_v7 = vadd.f32 %v5837_v41, %v10649_v26  ;;  %v9175_v26 = vld [vmem:[#allocation3 + $0x140] sm:$0xf0] }
 0x47c   : > { %v10779_v8 = vadd.f32 %v5775_v42, %v10566_v1  ;;  %v6532_v28 = vpop.f32.mrf.mxu0 }
 0x47d   : > { %v6441_v20 = vpop.f32.mrf.mxu3 }
 0x47e   : > { %v10784_v2 = vadd.f32 %v6530_v27, %v6441_v20  ;;  %v8509_v27 = vld [vmem:[#allocation3 + $0x50] sm:$0xf] }
 0x47f   : > { %v8510_v20 = vor.u32 %v9146_v15, %v8509_v27 }
 0x482   : > { %v5839_v19 = vpop.f32.mrf.mxu2 }
 0x483   : > { %v5778_v45 = vpop.f32.mrf.mxu1  ;;  %v10790_v1 = vadd.f32 %v5839_v19, %v10661_v13  ;;  %v9178_v19 = vld [vmem:[#allocation3 + $0x158] sm:$0xf0] }
 0x484   : > { %v10787_v51 = vadd.f32 %v5778_v45, %v10573_v44  ;;  %v8622_v44 = vor.u32 %v9175_v26, %v8621_v32  ;;  %v8635_v45 = vld [vmem:[#allocation3 + $0x15c] sm:$0xf0]  ;;  %v9149_v26 = vld [vmem:[#allocation3 + $0x70] sm:$0xf0]  ;;  %v9038_v32 = vld [vmem:[#allocation3 + $0x148] sm:$0xf0] }
 0x485   : > { %v6443_v6 = vpop.f32.mrf.mxu3 }
 0x486   : > { %v10792_v40 = vadd.f32 %v6532_v28, %v6443_v6  ;;  %6608 = vmatmul.bf16.vlgmr.msra.gmra.mxu1 %v8498_v53  ;;  %v9177_v53 = vld [vmem:[#allocation3 + $0x154] sm:$0xf] }
 0x487   : > { %5881 = vmatmul.bf16.gmra.mxu2 %v8342_v60  ;;  %6574 = vmatmul.bf16.gmra.mxu0 %v8626_v47  ;;  %v8638_v59 = vor.u32 %v9177_v53, %v8635_v45  ;;  %v8522_v60 = vor.u32 %v9149_v26, %v8521_v58  ;;  %v8647_v47 = vld [vmem:[#allocation3 + $0x174] sm:$0xf0]  ;;  %v8533_v45 = vld [vmem:[#allocation3 + $0x80] sm:$0xf]  ;;  %v9041_v53 = vld [vmem:[#allocation3 + $0x160] sm:$0xf0] }
 0x488   : > { %v8657_v26 = vld [vmem:[#allocation3 + $0x180] sm:$0xf] }
 0x48a   : > { %6485 = vmatmul.bf16.gmra.mxu3 %v8622_v44  ;;  %v5842_v13 = vpop.f32.mrf.mxu2  ;;  %v9181_v44 = vld [vmem:[#allocation3 + $0x170] sm:$0xf0] }
 0x48b   : > { %v5780_v43 = vpop.f32.mrf.mxu1  ;;  %v10798_v61 = vadd.f32 %v5842_v13, %v10673_v24  ;;  %v8633_v24 = vld [vmem:[#allocation3 + $0x150] sm:$0xf]  ;;  %v9180_v13 = vld [vmem:[#allocation3 + $0x16c] sm:$0xf] }
 0x48c   : > { %v10795_v34 = vadd.f32 %v5780_v43, %v10611_v55  ;;  %v8353_v55 = vld [vmem:[#allocation3 + $0x128] sm:$0xf]  ;;  %v8634_v28 = vor.u32 %v9178_v19, %v8633_v24  ;;  %v8365_v43 = vld [vmem:[#allocation3 + $0x140] sm:$0xf]  ;;  %v8650_v27 = vor.u32 %v9180_v13, %v8647_v47  ;;  %v9184_v24 = vld [vmem:[#allocation3 + $0x188] sm:$0xf0] }
 0x48d   : > { %v8354_v29 = vor.u32 %v9035_v14, %v8353_v55  ;;  %v8366_v15 = vor.u32 %v9038_v32, %v8365_v43  ;;  %v8658_v58 = vor.u32 %v9184_v24, %v8657_v26  ;;  %v8545_v47 = vld [vmem:[#allocation3 + $0x98] sm:$0xf]  ;;  %v9044_v13 = vld [vmem:[#allocation3 + $0x178] sm:$0xf0]  ;;  %v8569_v24 = vld [vmem:[#allocation3 + $0xc8] sm:$0xf] }
 0x492   : > { %v5844_v41 = vpop.f32.mrf.mxu2 }
 0x493   : > { %v5783_v12 = vpop.f32.mrf.mxu1  ;;  %v10804_v22 = vadd.f32 %v5844_v41, %v10685_v36 }
 0x494   : > { %v10801_v42 = vadd.f32 %v5783_v12, %v10622_v62  ;;  %v8645_v12 = vld [vmem:[#allocation3 + $0x168] sm:$0xf] }
 0x495   : > { %v8646_v41 = vor.u32 %v9181_v44, %v8645_v12 }
 0x496   : > { %6613 = vmatmul.bf16.gmra.mxu1 %v8510_v20 }
 0x497   : > { %5886 = vmatmul.bf16.gmra.mxu2 %v8354_v29  ;;  %6579 = vmatmul.bf16.gmra.mxu0 %v8638_v59  ;;  %v8659_v29 = vld [vmem:[#allocation3 + $0x18c] sm:$0xf0]  ;;  %v8377_v59 = vld [vmem:[#allocation3 + $0x158] sm:$0xf] }
 0x49a   : > { %6490 = vmatmul.bf16.gmra.mxu3 %v8634_v28  ;;  %v9183_v28 = vld [vmem:[#allocation3 + $0x184] sm:$0xf] }
 0x49b   : > { %v5785_v62 = vpop.f32.mrf.mxu1 }
 0x49c   : > { %v10807_v6 = vadd.f32 %v5785_v62, %v10634_v33  ;;  %v8378_v62 = vor.u32 %v9041_v53, %v8377_v59  ;;  %v9161_v53 = vld [vmem:[#allocation3 + $0xd0] sm:$0xf0] }
 0x4a3   : > { %v5788_v46 = vpop.f32.mrf.mxu1 }
 0x4a4   : > { %v10810_v36 = vadd.f32 %v5788_v46, %v10646_v37  ;;  %v9152_v37 = vld [vmem:[#allocation3 + $0x88] sm:$0xf0]  ;;  %v8662_v46 = vor.u32 %v9183_v28, %v8659_v29 }
 0x4a5   : > { %v8534_v55 = vor.u32 %v9152_v37, %v8533_v45 }
 0x4a6   : > { %6618 = vmatmul.bf16.gmra.mxu1 %v8522_v60 }
 0x4a7   : > { %5891 = vmatmul.bf16.gmra.mxu2 %v8366_v15  ;;  %6584 = vmatmul.bf16.gmra.mxu0 %v8650_v27  ;;  %v8389_v15 = vld [vmem:[#allocation3 + $0x170] sm:$0xf] }
 0x4a8   : > { %v8390_v12 = vor.u32 %v9044_v13, %v8389_v15 }
 0x4aa   : > { %6495 = vmatmul.bf16.gmra.mxu3 %v8646_v41 }
 0x4ab   : > { %v5790_v33 = vpop.f32.mrf.mxu1 }
 0x4ac   : > { %v10813_v20 = vadd.f32 %v5790_v33, %v10658_v17  ;;  %v9158_v33 = vld [vmem:[#allocation3 + $0xb8] sm:$0xf0] }
 0x4b3   : > { %v5793_v14 = vpop.f32.mrf.mxu1 }
 0x4b4   : > { %v10816_v19 = vadd.f32 %v5793_v14, %v10670_v4  ;;  %v9155_v4 = vld [vmem:[#allocation3 + $0xa0] sm:$0xf0] }
 0x4b5   : > { %v8546_v43 = vor.u32 %v9155_v4, %v8545_v47  ;;  %v9167_v47 = vld [vmem:[#allocation3 + $0x100] sm:$0xf0] }
 0x4b6   : > { %6623 = vmatmul.bf16.gmra.mxu1 %v8534_v55 }
 0x4b7   : > { %5896 = vmatmul.bf16.gmra.mxu2 %v8378_v62  ;;  %6589 = vmatmul.bf16.gmra.mxu0 %v8662_v46  ;;  %v8581_v46 = vld [vmem:[#allocation3 + $0xe0] sm:$0xf] }
 0x4ba   : > { %6500 = vmatmul.bf16.gmra.mxu3 %v8658_v58 }
 0x4bb   : > { %v5795_v17 = vpop.f32.mrf.mxu1 }
 0x4bc   : > { %v10819_v60 = vadd.f32 %v5795_v17, %v10682_v54  ;;  %v8557_v54 = vld [vmem:[#allocation3 + $0xb0] sm:$0xf] }
 0x4bd   : > { %v8558_v45 = vor.u32 %v9158_v33, %v8557_v54 }
 0x4c3   : > { %v5798_v32 = vpop.f32.mrf.mxu1 }
 0x4c4   : > { %v10822_v44 = vadd.f32 %v5798_v32, %v10694_v35  ;;  %v10847_v32 = vpop.f32.mrf.mxu3 }
 0x4c6   : > { %6628 = vmatmul.bf16.gmra.mxu1 %v8546_v43  ;;  %v8593_v43 = vld [vmem:[#allocation3 + $0xf8] sm:$0xf] }
 0x4c7   : > { %5901 = vmatmul.bf16.gmra.mxu2 %v8390_v12  ;;  %v8594_v15 = vor.u32 %v9167_v47, %v8593_v43 }
 0x4cb   : > { %v5800_v27 = vpop.f32.mrf.mxu1 }
 0x4cc   : > { %v10825_v41 = vadd.f32 %v5800_v27, %v10706_v30  ;;  %v8570_v30 = vor.u32 %v9161_v53, %v8569_v24  ;;  %v10864_v33 = vpop.f32.mrf.mxu3 }
 0x4d3   : > { %v5803_v37 = vpop.f32.mrf.mxu1 }
 0x4d4   : > { %v10828_v14 = vadd.f32 %v5803_v37, %v10718_v52  ;;  %v9164_v52 = vld [vmem:[#allocation3 + $0xe8] sm:$0xf0]  ;;  %v6723_v37 = vld [vmem:[%s9625_s13] sm:$0xff] }
 0x4d6   : > { %6633 = vmatmul.bf16.gmra.mxu1 %v8558_v45 }
 0x4db   : > { %v5805_v35 = vpop.f32.mrf.mxu1 }
 0x4dc   : > { %v10831_v55 = vadd.f32 %v5805_v35, %v10728_v25  ;;  %v8582_v25 = vor.u32 %v9164_v52, %v8581_v46  ;;  %v10882_v46 = vpop.f32.mrf.mxu3 }
 0x4e3   : > { %v5808_v29 = vpop.f32.mrf.mxu1 }
 0x4e4   : > { %v10834_v59 = vadd.f32 %v5808_v29, %v10740_v57  ;;  %v10845_v57 = vpop.f32.mrf.mxu0 }
 0x4e6   : > { %6638 = vmatmul.bf16.gmra.mxu1 %v8570_v30  ;;  %v6724_v30 = vld [vmem:[%s9625_s13 + $0x8] sm:$0xff] }
 0x4eb   : > { %v5810_v28 = vpop.f32.mrf.mxu1 }
 0x4ec   : > { %v10837_v62 = vadd.f32 %v5810_v28, %v10752_v9  ;;  %v10861_v27 = vpop.f32.mrf.mxu0  ;;  %v9170_v28 = vld [vmem:[#allocation3 + $0x118] sm:$0xf0] }
 0x4f3   : > { %v5813_v26 = vpop.f32.mrf.mxu1 }
 0x4f4   : > { %v10840_v58 = vadd.f32 %v5813_v26, %v10764_v5  ;;  %v10853_v5 = vld [vmem:[%s11151_s5] ss:$0 sm:$0xff]  ;;  %v10877_v52 = vpop.f32.mrf.mxu0  ;;  %v10879_v26 = vpop.f32.mrf.mxu2 }
 0x4f6   : > { %6643 = vmatmul.bf16.gmra.mxu1 %v8582_v25  ;;  %v8605_v25 = vld [vmem:[#allocation3 + $0x110] sm:$0xf] }
 0x4fb   : > { %v5815_v17 = vpop.f32.mrf.mxu1 }
 0x4fc   : > { %v10843_v4 = vadd.f32 %v5815_v17, %v10776_v39  ;;  %v10859_v39 = vld [vmem:[%s11152_s6] ss:$0 sm:$0xff] }
 0x503   : > { %v6609_v9 = vpop.f32.mrf.mxu1 }
 0x504   : > { %v6610_v13 = vadd.f32 %v6609_v9, %v10736_v38  ;;  %v8606_v9 = vor.u32 %v9170_v28, %v8605_v25 }
 0x506   : > { %v6689_v12 = vadd.f32 %v6610_v13, %v10734_v3  ;;  %6648 = vmatmul.bf16.gmra.mxu1 %v8594_v15 }
 0x508   : > { %v6758_v38 = vmul.f32 %v10853_v5, %v6689_v12  ;;  %v6725_v12 = vld [vmem:[%s9625_s13 + $0x10] sm:$0xff] }
 0x50a   : > { %v6793_v54 = vadd.f32 %v10859_v39, %v6758_v38 }
 0x50b   : > { %v6611_v45 = vpop.f32.mrf.mxu1 }
 0x50c   : > { %v6825_v35 = vadd.f32 %v6793_v54, %v6723_v37  ;;  %v6612_v3 = vadd.f32 %v6611_v45, %v10748_v50  ;;  %v10890_v54 = vpop.f32.mrf.mxu0  ;;  %v10892_v45 = vpop.f32.mrf.mxu2 }
 0x50e   : > { %v6857_v53 = vmax.f32 %v6825_v35, 0.0  ;;  %v6690_v29 = vadd.f32 %v6612_v3, %v10746_v63  ;;  %v10895_v3 = vpop.f32.mrf.mxu3 }
 0x510   : > { %6890 = vst [vmem:[%s10872_s21] sm:$0xff] %v6857_v53  ;;  %v6759_v24 = vmul.f32 %v10853_v5, %v6690_v29 }
 0x512   : > { %v6794_v50 = vadd.f32 %v10859_v39, %v6759_v24  ;;  %v6726_v24 = vld [vmem:[%s9625_s13 + $0x18] sm:$0xff] }
 0x513   : > { %v6614_v63 = vpop.f32.mrf.mxu1 }
 0x514   : > { %v6826_v17 = vadd.f32 %v6794_v50, %v6724_v30  ;;  %v6615_v47 = vadd.f32 %v6614_v63, %v10760_v16  ;;  %v9173_v30 = vld [vmem:[#allocation3 + $0x130] sm:$0xf0]  ;;  %v8617_v63 = vld [vmem:[#allocation3 + $0x128] sm:$0xf] }
 0x516   : > { %v6858_v43 = vmax.f32 %v6826_v17, 0.0  ;;  %v6691_v13 = vadd.f32 %v6615_v47, %v10758_v0  ;;  %6653 = vmatmul.bf16.gmra.mxu1 %v8606_v9  ;;  %v10903_v47 = vpop.f32.mrf.mxu0  ;;  %v10905_v9 = vpop.f32.mrf.mxu2 }
 0x518   : > { %6891 = vst [vmem:[%s10872_s21 + $0x8] sm:$0xff] %v6858_v43  ;;  %v6760_v15 = vmul.f32 %v10853_v5, %v6691_v13  ;;  %v10908_v13 = vpop.f32.mrf.mxu3 }
 0x51a   : > { %v6795_v38 = vadd.f32 %v10859_v39, %v6760_v15 }
 0x51b   : > { %v6616_v37 = vpop.f32.mrf.mxu1 }
 0x51c   : > { %v6827_v35 = vadd.f32 %v6795_v38, %v6725_v12  ;;  %v6617_v16 = vadd.f32 %v6616_v37, %v10772_v18  ;;  %v8618_v18 = vor.u32 %v9173_v30, %v8617_v63  ;;  %v6727_v12 = vld [vmem:[%s9625_s13 + $0x20] sm:$0xff]  ;;  %v6728_v30 = vld [vmem:[%s9625_s13 + $0x28] sm:$0xff] }
 0x51e   : > { %v6859_v53 = vmax.f32 %v6827_v35, 0.0  ;;  %v6692_v0 = vadd.f32 %v6617_v16, %v10770_v11 }
 0x520   : > { %6892 = vst [vmem:[%s10872_s21 + $0x10] sm:$0xff] %v6859_v53  ;;  %v6761_v29 = vmul.f32 %v10853_v5, %v6692_v0  ;;  %v10916_v0 = vpop.f32.mrf.mxu0 }
 0x522   : > { %v6796_v28 = vadd.f32 %v10859_v39, %v6761_v29 }
 0x523   : > { %v6619_v50 = vpop.f32.mrf.mxu1 }
 0x524   : > { %v6828_v25 = vadd.f32 %v6796_v28, %v6726_v24  ;;  %v6620_v17 = vadd.f32 %v6619_v50, %v10784_v2  ;;  %v10922_v24 = vpop.f32.mrf.mxu3  ;;  %v9176_v28 = vld [vmem:[#allocation3 + $0x148] sm:$0xf0]  ;;  %v6536_v50 = vadd.f32 %v10845_v57, %v10847_v32  ;;  %v6538_v57 = vadd.f32 %v10861_v27, %v10864_v33  ;;  %v9179_v27 = vld [vmem:[#allocation3 + $0x160] sm:$0xf0] }
 0x525   : > { %v6541_v33 = vadd.f32 %v10877_v52, %v10882_v46  ;;  %v6731_v46 = vld [vmem:[%s9625_s13 + $0x40] sm:$0xff] }
 0x526   : > { %v6860_v11 = vmax.f32 %v6828_v25, 0.0  ;;  %v6693_v43 = vadd.f32 %v6620_v17, %v10782_v7  ;;  %6658 = vmatmul.bf16.gmra.mxu1 %v8618_v18  ;;  %v10918_v7 = vpop.f32.mrf.mxu2 }
 0x528   : > { %6893 = vst [vmem:[%s10872_s21 + $0x18] sm:$0xff] %v6860_v11  ;;  %v6762_v15 = vmul.f32 %v10853_v5, %v6693_v43  ;;  %v10934_v32 = vpop.f32.mrf.mxu0 }
 0x52a   : > { %v6797_v38 = vadd.f32 %v10859_v39, %v6762_v15 }
 0x52b   : > { %v6621_v2 = vpop.f32.mrf.mxu1 }
 0x52c   : > { %v6829_v37 = vadd.f32 %v6797_v38, %v6727_v12  ;;  %v6622_v35 = vadd.f32 %v6621_v2, %v10792_v40  ;;  %v6729_v12 = vld [vmem:[%s9625_s13 + $0x30] sm:$0xff] }
 0x52e   : > { %v6861_v16 = vmax.f32 %v6829_v37, 0.0  ;;  %v6694_v53 = vadd.f32 %v6622_v35, %v10790_v1  ;;  %v8629_v1 = vld [vmem:[#allocation3 + $0x140] sm:$0xf]  ;;  %v10936_v38 = vpop.f32.mrf.mxu2  ;;  %v10939_v37 = vpop.f32.mrf.mxu3 }
 0x52f   : > { %v8630_v18 = vor.u32 %v9176_v28, %v8629_v1  ;;  %v6730_v28 = vld [vmem:[%s9625_s13 + $0x38] sm:$0xff]  ;;  %v5848_v1 = vadd.f32 %v10879_v26, %v10697_v21  ;;  %v6543_v21 = vadd.f32 %v10890_v54, %v10895_v3  ;;  %v8669_v54 = vld [vmem:[#allocation3 + $0x198] sm:$0xf]  ;;  %v9187_v3 = vld [vmem:[#allocation3 + $0x1a0] sm:$0xf0] }
 0x530   : > { %6894 = vst [vmem:[%s10872_s21 + $0x20] sm:$0xff] %v6861_v16  ;;  %v6763_v29 = vmul.f32 %v10853_v5, %v6694_v53 }
 0x532   : > { %v6798_v40 = vadd.f32 %v10859_v39, %v6763_v29 }
 0x533   : > { %v6624_v63 = vpop.f32.mrf.mxu1 }
 0x534   : > { %v6830_v25 = vadd.f32 %v6798_v40, %v6728_v30  ;;  %v6625_v17 = vadd.f32 %v6624_v63, %v6536_v50  ;;  %v8641_v63 = vld [vmem:[#allocation3 + $0x158] sm:$0xf] }
 0x536   : > { %v6862_v11 = vmax.f32 %v6830_v25, 0.0  ;;  %v6695_v43 = vadd.f32 %v6625_v17, %v10798_v61  ;;  %6663 = vmatmul.bf16.gmra.mxu1 %v8630_v18  ;;  %v10950_v25 = vpop.f32.mrf.mxu0 }
 0x538   : > { %6895 = vst [vmem:[%s10872_s21 + $0x28] sm:$0xff] %v6862_v11  ;;  %v6764_v15 = vmul.f32 %v10853_v5, %v6695_v43  ;;  %v8642_v11 = vor.u32 %v9179_v27, %v8641_v63  ;;  %v10954_v43 = vpop.f32.mrf.mxu3 }
 0x53a   : > { %v6799_v2 = vadd.f32 %v10859_v39, %v6764_v15 }
 0x53b   : > { %v6626_v35 = vpop.f32.mrf.mxu1 }
 0x53c   : > { %v6831_v16 = vadd.f32 %v6799_v2, %v6729_v12  ;;  %v6627_v61 = vadd.f32 %v6626_v35, %v6538_v57  ;;  %v5850_v2 = vadd.f32 %v10892_v45, %v10709_v48  ;;  %v6546_v48 = vadd.f32 %v10903_v47, %v10908_v13  ;;  %v9186_v13 = vld [vmem:[#allocation3 + $0x19c] sm:$0xf] }
 0x53e   : > { %v6863_v53 = vmax.f32 %v6831_v16, 0.0  ;;  %v6696_v29 = vadd.f32 %v6627_v61, %v10804_v22  ;;  %v10952_v22 = vpop.f32.mrf.mxu2  ;;  %v10964_v61 = vpop.f32.mrf.mxu0 }
 0x540   : > { %6896 = vst [vmem:[%s10872_s21 + $0x30] sm:$0xff] %v6863_v53  ;;  %v6765_v30 = vmul.f32 %v10853_v5, %v6696_v29 }
 0x542   : > { %v6800_v50 = vadd.f32 %v10859_v39, %v6765_v30 }
 0x543   : > { %v6629_v40 = vpop.f32.mrf.mxu1 }
 0x544   : > { %v6832_v17 = vadd.f32 %v6800_v50, %v6730_v28  ;;  %v6630_v18 = vadd.f32 %v6629_v40, %v6541_v33  ;;  %v10968_v28 = vpop.f32.mrf.mxu3  ;;  %v6732_v33 = vld [vmem:[%s9625_s13 + $0x48] sm:$0xff]  ;;  %v8670_v40 = vor.u32 %v9187_v3, %v8669_v54 }
 0x545   : > { %v9182_v50 = vld [vmem:[#allocation3 + $0x178] sm:$0xf0] }
 0x546   : > { %v6864_v15 = vmax.f32 %v6832_v17, 0.0  ;;  %v6697_v12 = vadd.f32 %v6630_v18, %v5848_v1  ;;  %6668 = vmatmul.bf16.gmra.mxu1 %v8642_v11  ;;  %v10966_v53 = vpop.f32.mrf.mxu2  ;;  %v8653_v1 = vld [vmem:[#allocation3 + $0x170] sm:$0xf]  ;;  %6505 = vmatmul.bf16.gmra.mxu3 %v8670_v40  ;;  %v5853_v17 = vadd.f32 %v10905_v9, %v10721_v10  ;;  %v6733_v10 = vld [vmem:[%s9625_s13 + $0x50] sm:$0xff]  ;;  %v9185_v40 = vld [vmem:[#allocation3 + $0x190] sm:$0xf0] }
 0x548   : > { %6897 = vst [vmem:[%s10872_s21 + $0x38] sm:$0xff] %v6864_v15  ;;  %v6766_v52 = vmul.f32 %v10853_v5, %v6697_v12  ;;  %v8654_v15 = vor.u32 %v9182_v50, %v8653_v1  ;;  %v6734_v50 = vld [vmem:[%s9625_s13 + $0x58] sm:$0xff]  ;;  %v5858_v1 = vadd.f32 %v10936_v38, %v10743_v31  ;;  %v5860_v31 = vadd.f32 %v10952_v22, %v10755_v49 }
 0x54a   : > { %v6801_v26 = vadd.f32 %v10859_v39, %v6766_v52 }
 0x54b   : > { %v6631_v57 = vpop.f32.mrf.mxu1 }
 0x54c   : > { %v6833_v35 = vadd.f32 %v6801_v26, %v6731_v46  ;;  %v6632_v16 = vadd.f32 %v6631_v57, %v6543_v21  ;;  %v10978_v46 = vpop.f32.mrf.mxu0  ;;  %v8671_v26 = vld [vmem:[#allocation3 + $0x1a4] sm:$0xf0]  ;;  %v10984_v57 = vpop.f32.mrf.mxu3 }
 0x54d   : > { %v8674_v9 = vor.u32 %v9186_v13, %v8671_v26 }
 0x54e   : > { %v6865_v29 = vmax.f32 %v6833_v35, 0.0  ;;  %v6698_v30 = vadd.f32 %v6632_v16, %v5850_v2  ;;  %v10980_v21 = vpop.f32.mrf.mxu2  ;;  %v6548_v2 = vadd.f32 %v10916_v0, %v10922_v24  ;;  %v6551_v0 = vadd.f32 %v10934_v32, %v10939_v37  ;;  %v6735_v37 = vld [vmem:[%s9625_s13 + $0x60] sm:$0xff] }
 0x54f   : > { %6594 = vmatmul.bf16.gmra.mxu0 %v8674_v9 }
 0x550   : > { %6898 = vst [vmem:[%s10872_s21 + $0x40] sm:$0xff] %v6865_v29  ;;  %v6767_v27 = vmul.f32 %v10853_v5, %v6698_v30  ;;  %v5855_v29 = vadd.f32 %v10918_v7, %v10731_v56 }
 0x552   : > { %v6802_v45 = vadd.f32 %v10859_v39, %v6767_v27 }
 0x553   : > { %v6634_v63 = vpop.f32.mrf.mxu1 }
 0x554   : > { %v6834_v18 = vadd.f32 %v6802_v45, %v6732_v33  ;;  %v6635_v11 = vadd.f32 %v6634_v63, %v6546_v48  ;;  %v6560_v24 = vpop.f32.mrf.mxu0  ;;  %v6471_v56 = vpop.f32.mrf.mxu3  ;;  %v8665_v63 = vld [vmem:[#allocation3 + $0x188] sm:$0xf] }
 0x556   : > { %v6866_v12 = vmax.f32 %v6834_v18, 0.0  ;;  %v6699_v52 = vadd.f32 %v6635_v11, %v5853_v17  ;;  %6673 = vmatmul.bf16.gmra.mxu1 %v8654_v15  ;;  %v10997_v48 = vpop.f32.mrf.mxu2  ;;  %v8666_v11 = vor.u32 %v9185_v40, %v8665_v63 }
 0x558   : > { %6899 = vst [vmem:[%s10872_s21 + $0x48] sm:$0xff] %v6866_v12  ;;  %v6768_v47 = vmul.f32 %v10853_v5, %v6699_v52  ;;  %v6553_v52 = vadd.f32 %v10950_v25, %v10954_v43  ;;  %v6736_v25 = vld [vmem:[%s9625_s13 + $0x68] sm:$0xff]  ;;  %v6556_v43 = vadd.f32 %v10964_v61, %v10968_v28  ;;  %v6737_v28 = vld [vmem:[%s9625_s13 + $0x70] sm:$0xff] }
 0x55a   : > { %v6803_v35 = vadd.f32 %v10859_v39, %v6768_v47 }
 0x55b   : > { %v6636_v16 = vpop.f32.mrf.mxu1 }
 0x55c   : > { %v6835_v30 = vadd.f32 %v6803_v35, %v6733_v10  ;;  %v6637_v27 = vadd.f32 %v6636_v16, %v6548_v2  ;;  %v6562_v38 = vpop.f32.mrf.mxu0  ;;  %v6473_v2 = vpop.f32.mrf.mxu3 }
 0x55e   : > { %v6867_v54 = vmax.f32 %v6835_v30, 0.0  ;;  %v6700_v3 = vadd.f32 %v6637_v27, %v5855_v29  ;;  %v5869_v26 = vpop.f32.mrf.mxu2  ;;  %v8677_v29 = vld [vmem:[#allocation3 + $0x1a0] sm:$0xf]  ;;  %v9188_v30 = vld [vmem:[#allocation3 + $0x1a8] sm:$0xf0] }
 0x55f   : > { %v8678_v22 = vor.u32 %v9188_v30, %v8677_v29  ;;  %v6739_v29 = vld [vmem:[%s9625_s13 + $0x80] sm:$0xff]  ;;  %v6563_v30 = vadd.f32 %v6562_v38, %v6473_v2 }
 0x560   : > { %6900 = vst [vmem:[%s10872_s21 + $0x50] sm:$0xff] %v6867_v54  ;;  %v6769_v33 = vmul.f32 %v10853_v5, %v6700_v3  ;;  %v5863_v3 = vadd.f32 %v10966_v53, %v10767_v23  ;;  %v5865_v53 = vadd.f32 %v10980_v21, %v10779_v8  ;;  %v5868_v8 = vadd.f32 %v10997_v48, %v10787_v51 }
 0x562   : > { %v6804_v45 = vadd.f32 %v10859_v39, %v6769_v33 }
 0x563   : > { %v6639_v7 = vpop.f32.mrf.mxu1 }
 0x564   : > { %v6836_v17 = vadd.f32 %v6804_v45, %v6734_v50  ;;  %v6640_v18 = vadd.f32 %v6639_v7, %v6551_v0  ;;  %v6565_v40 = vpop.f32.mrf.mxu0  ;;  %v6476_v63 = vpop.f32.mrf.mxu3 }
 0x566   : > { %v6868_v15 = vmax.f32 %v6836_v17, 0.0  ;;  %v6701_v12 = vadd.f32 %v6640_v18, %v5858_v1  ;;  %6678 = vmatmul.bf16.gmra.mxu1 %v8666_v11  ;;  %v5872_v0 = vpop.f32.mrf.mxu2  ;;  %v6558_v1 = vadd.f32 %v10978_v46, %v10984_v57  ;;  %v6561_v46 = vadd.f32 %v6560_v24, %v6471_v56 }
 0x568   : > { %6901 = vst [vmem:[%s10872_s21 + $0x58] sm:$0xff] %v6868_v15  ;;  %v6770_v32 = vmul.f32 %v10853_v5, %v6701_v12 }
 0x56a   : > { %v6805_v47 = vadd.f32 %v10859_v39, %v6770_v32 }
 0x56b   : > { %v6641_v13 = vpop.f32.mrf.mxu1 }
 0x56c   : > { %v6837_v10 = vadd.f32 %v6805_v47, %v6735_v37  ;;  %v6642_v9 = vadd.f32 %v6641_v13, %v6553_v52  ;;  %v6567_v32 = vpop.f32.mrf.mxu0  ;;  %v6478_v47 = vpop.f32.mrf.mxu3  ;;  %v6738_v13 = vld [vmem:[%s9625_s13 + $0x78] sm:$0xff] }
 0x56e   : > { %v6869_v35 = vmax.f32 %v6837_v10, 0.0  ;;  %v6702_v16 = vadd.f32 %v6642_v9, %v5860_v31  ;;  %v5874_v37 = vpop.f32.mrf.mxu2 }
 0x570   : > { %6902 = vst [vmem:[%s10872_s21 + $0x60] sm:$0xff] %v6869_v35  ;;  %v6771_v27 = vmul.f32 %v10853_v5, %v6702_v16 }
 0x572   : > { %v6806_v49 = vadd.f32 %v10859_v39, %v6771_v27 }
 0x573   : > { %v6644_v54 = vpop.f32.mrf.mxu1 }
 0x574   : > { %v6838_v33 = vadd.f32 %v6806_v49, %v6736_v25  ;;  %v6645_v50 = vadd.f32 %v6644_v54, %v6556_v43  ;;  %v6570_v27 = vpop.f32.mrf.mxu0  ;;  %v6481_v56 = vpop.f32.mrf.mxu3  ;;  %v5870_v49 = vadd.f32 %v5869_v26, %v10795_v34 }
 0x576   : > { %v6870_v45 = vmax.f32 %v6838_v33, 0.0  ;;  %v6703_v7 = vadd.f32 %v6645_v50, %v5863_v3  ;;  %6683 = vmatmul.bf16.gmra.mxu1 %v8678_v22  ;;  %v5877_v25 = vpop.f32.mrf.mxu2  ;;  %v6740_v33 = vld [vmem:[%s9625_s13 + $0x88] sm:$0xff]  ;;  %v6566_v50 = vadd.f32 %v6565_v40, %v6476_v63 }
 0x578   : > { %6903 = vst [vmem:[%s10872_s21 + $0x68] sm:$0xff] %v6870_v45  ;;  %v6772_v61 = vmul.f32 %v10853_v5, %v6703_v7  ;;  %v5873_v45 = vadd.f32 %v5872_v0, %v10801_v42 }
 0x57a   : > { %v6807_v17 = vadd.f32 %v10859_v39, %v6772_v61 }
 0x57b   : > { %v6646_v23 = vpop.f32.mrf.mxu1 }
 0x57c   : > { %v6839_v18 = vadd.f32 %v6807_v17, %v6737_v28  ;;  %v6647_v11 = vadd.f32 %v6646_v23, %v6558_v1  ;;  %v6572_v7 = vpop.f32.mrf.mxu0  ;;  %v6483_v26 = vpop.f32.mrf.mxu3 }
 0x57e   : > { %v6871_v15 = vmax.f32 %v6839_v18, 0.0  ;;  %v6704_v12 = vadd.f32 %v6647_v11, %v5865_v53  ;;  %v5879_v61 = vpop.f32.mrf.mxu2  ;;  %v6741_v53 = vld [vmem:[%s9625_s13 + $0x90] sm:$0xff]  ;;  %v6568_v18 = vadd.f32 %v6567_v32, %v6478_v47  ;;  %v5875_v11 = vadd.f32 %v5874_v37, %v10807_v6 }
 0x580   : > { %6904 = vst [vmem:[%s10872_s21 + $0x70] sm:$0xff] %v6871_v15  ;;  %v6773_v52 = vmul.f32 %v10853_v5, %v6704_v12 }
 0x582   : > { %v6808_v57 = vadd.f32 %v10859_v39, %v6773_v52 }
 0x583   : > { %v6649_v31 = vpop.f32.mrf.mxu1 }
 0x584   : > { %v6840_v21 = vadd.f32 %v6808_v57, %v6738_v13  ;;  %v6650_v10 = vadd.f32 %v6649_v31, %v6561_v46  ;;  %v6575_v15 = vpop.f32.mrf.mxu0  ;;  %v6486_v46 = vpop.f32.mrf.mxu3  ;;  %v6742_v31 = vld [vmem:[%s9625_s13 + $0x98] sm:$0xff] }
 0x586   : > { %v6872_v9 = vmax.f32 %v6840_v21, 0.0  ;;  %v6705_v35 = vadd.f32 %v6650_v10, %v5868_v8  ;;  %v5882_v12 = vpop.f32.mrf.mxu2  ;;  %v6571_v8 = vadd.f32 %v6570_v27, %v6481_v56  ;;  %v5878_v21 = vadd.f32 %v5877_v25, %v10810_v36 }
 0x588   : > { %6905 = vst [vmem:[%s10872_s21 + $0x78] sm:$0xff] %v6872_v9  ;;  %v6774_v16 = vmul.f32 %v10853_v5, %v6705_v35 }
 0x58a   : > { %v6809_v24 = vadd.f32 %v10859_v39, %v6774_v16 }
 0x58b   : > { %v6651_v43 = vpop.f32.mrf.mxu1 }
 0x58c   : > { %v6841_v51 = vadd.f32 %v6809_v24, %v6739_v29  ;;  %v6652_v48 = vadd.f32 %v6651_v43, %v6563_v30  ;;  %v6577_v35 = vpop.f32.mrf.mxu0  ;;  %v6488_v30 = vpop.f32.mrf.mxu3  ;;  %v6743_v24 = vld [vmem:[%s9625_s13 + $0xa0] sm:$0xff]  ;;  %v6573_v43 = vadd.f32 %v6572_v7, %v6483_v26  ;;  %v5883_v7 = vadd.f32 %v5882_v12, %v10816_v19 }
 0x58e   : > { %v6873_v22 = vmax.f32 %v6841_v51, 0.0  ;;  %v6706_v54 = vadd.f32 %v6652_v48, %v5870_v49  ;;  %v5884_v16 = vpop.f32.mrf.mxu2  ;;  %v5880_v49 = vadd.f32 %v5879_v61, %v10813_v20 }
 0x590   : > { %6906 = vst [vmem:[%s10872_s21 + $0x80] sm:$0xff] %v6873_v22  ;;  %v6775_v3 = vmul.f32 %v10853_v5, %v6706_v54  ;;  %v6744_v54 = vld [vmem:[%s9625_s13 + $0xa8] sm:$0xff] }
 0x592   : > { %v6810_v38 = vadd.f32 %v10859_v39, %v6775_v3  ;;  %v6576_v3 = vadd.f32 %v6575_v15, %v6486_v46 }
 0x593   : > { %v6654_v2 = vpop.f32.mrf.mxu1 }
 0x594   : > { %v6842_v28 = vadd.f32 %v6810_v38, %v6740_v33  ;;  %v6655_v34 = vadd.f32 %v6654_v2, %v6566_v50  ;;  %v6580_v33 = vpop.f32.mrf.mxu0  ;;  %v6491_v2 = vpop.f32.mrf.mxu3 }
 0x596   : > { %v6874_v1 = vmax.f32 %v6842_v28, 0.0  ;;  %v6707_v17 = vadd.f32 %v6655_v34, %v5873_v45  ;;  %v5887_v50 = vpop.f32.mrf.mxu2 }
 0x598   : > { %6907 = vst [vmem:[%s10872_s21 + $0x88] sm:$0xff] %v6874_v1  ;;  %v6776_v23 = vmul.f32 %v10853_v5, %v6707_v17  ;;  %v6745_v1 = vld [vmem:[%s9625_s13 + $0xb0] sm:$0xff]  ;;  %v6578_v17 = vadd.f32 %v6577_v35, %v6488_v30 }
 0x59a   : > { %v6811_v40 = vadd.f32 %v10859_v39, %v6776_v23 }
 0x59b   : > { %v6656_v63 = vpop.f32.mrf.mxu1 }
 0x59c   : > { %v6843_v42 = vadd.f32 %v6811_v40, %v6741_v53  ;;  %v6657_v0 = vadd.f32 %v6656_v63, %v6568_v18  ;;  %v5885_v18 = vadd.f32 %v5884_v16, %v10819_v60  ;;  %v6582_v40 = vpop.f32.mrf.mxu0 }
 0x59e   : > { %v6875_v52 = vmax.f32 %v6843_v42, 0.0  ;;  %v6708_v13 = vadd.f32 %v6657_v0, %v5875_v11  ;;  %v5889_v63 = vpop.f32.mrf.mxu2  ;;  %v6493_v42 = vpop.f32.mrf.mxu3 }
 0x59f   : > { %v6583_v35 = vadd.f32 %v6582_v40, %v6493_v42  ;;  %v5890_v30 = vadd.f32 %v5889_v63, %v10825_v41  ;;  %v6750_v40 = vld [vmem:[%s9625_s13 + $0xd8] sm:$0xff] }
 0x5a0   : > { %6908 = vst [vmem:[%s10872_s21 + $0x90] sm:$0xff] %v6875_v52  ;;  %v6777_v57 = vmul.f32 %v10853_v5, %v6708_v13  ;;  %v6746_v52 = vld [vmem:[%s9625_s13 + $0xb8] sm:$0xff]  ;;  %v6581_v13 = vadd.f32 %v6580_v33, %v6491_v2 }
 0x5a2   : > { %v6812_v32 = vadd.f32 %v10859_v39, %v6777_v57 }
 0x5a3   : > { %v6659_v47 = vpop.f32.mrf.mxu1 }
 0x5a4   : > { %v6844_v6 = vadd.f32 %v6812_v32, %v6742_v31  ;;  %v6660_v37 = vadd.f32 %v6659_v47, %v6571_v8  ;;  %v5888_v31 = vadd.f32 %v5887_v50, %v10822_v44  ;;  %v6585_v32 = vpop.f32.mrf.mxu0 }
 0x5a6   : > { %v6876_v10 = vmax.f32 %v6844_v6, 0.0  ;;  %v6709_v9 = vadd.f32 %v6660_v37, %v5878_v21  ;;  %v5892_v47 = vpop.f32.mrf.mxu2  ;;  %v6496_v37 = vpop.f32.mrf.mxu3 }
 0x5a8   : > { %6909 = vst [vmem:[%s10872_s21 + $0x98] sm:$0xff] %v6876_v10  ;;  %v6778_v29 = vmul.f32 %v10853_v5, %v6709_v9  ;;  %v6747_v9 = vld [vmem:[%s9625_s13 + $0xc0] sm:$0xff] }
 0x5aa   : > { %v6813_v27 = vadd.f32 %v10859_v39, %v6778_v29 }
 0x5ab   : > { %v6661_v56 = vpop.f32.mrf.mxu1 }
 0x5ac   : > { %v6845_v36 = vadd.f32 %v6813_v27, %v6743_v24  ;;  %v6662_v25 = vadd.f32 %v6661_v56, %v6573_v43  ;;  %v6587_v56 = vpop.f32.mrf.mxu0 }
 0x5ae   : > { %v6877_v51 = vmax.f32 %v6845_v36, 0.0  ;;  %v6710_v48 = vadd.f32 %v6662_v25, %v5880_v49  ;;  %v5894_v49 = vpop.f32.mrf.mxu2  ;;  %v6498_v25 = vpop.f32.mrf.mxu3 }
 0x5b0   : > { %6910 = vst [vmem:[%s10872_s21 + $0xa0] sm:$0xff] %v6877_v51  ;;  %v6779_v22 = vmul.f32 %v10853_v5, %v6710_v48  ;;  %v6748_v51 = vld [vmem:[%s9625_s13 + $0xc8] sm:$0xff]  ;;  %v6586_v48 = vadd.f32 %v6585_v32, %v6496_v37 }
 0x5b2   : > { %v6814_v38 = vadd.f32 %v10859_v39, %v6779_v22 }
 0x5b3   : > { %v6664_v45 = vpop.f32.mrf.mxu1 }
 0x5b4   : > { %v6846_v20 = vadd.f32 %v6814_v38, %v6744_v54  ;;  %v6665_v61 = vadd.f32 %v6664_v45, %v6576_v3  ;;  %v5893_v3 = vadd.f32 %v5892_v47, %v10828_v14  ;;  %v6749_v45 = vld [vmem:[%s9625_s13 + $0xd0] sm:$0xff] }
 0x5b6   : > { %v6878_v28 = vmax.f32 %v6846_v20, 0.0  ;;  %v6711_v34 = vadd.f32 %v6665_v61, %v5883_v7  ;;  %v6588_v7 = vadd.f32 %v6587_v56, %v6498_v25  ;;  %v6590_v20 = vpop.f32.mrf.mxu0  ;;  %v5897_v61 = vpop.f32.mrf.mxu2 }
 0x5b7   : > { %v5898_v42 = vadd.f32 %v5897_v61, %v10834_v59 }
 0x5b8   : > { %6911 = vst [vmem:[%s10872_s21 + $0xa8] sm:$0xff] %v6878_v28  ;;  %v6780_v26 = vmul.f32 %v10853_v5, %v6711_v34  ;;  %v6501_v34 = vpop.f32.mrf.mxu3 }
 0x5b9   : > { %v6591_v63 = vadd.f32 %v6590_v20, %v6501_v34 }
 0x5ba   : > { %v6815_v23 = vadd.f32 %v10859_v39, %v6780_v26 }
 0x5bb   : > { %v6666_v53 = vpop.f32.mrf.mxu1 }
 0x5bc   : > { %v6847_v11 = vadd.f32 %v6815_v23, %v6745_v1  ;;  %v6667_v19 = vadd.f32 %v6666_v53, %v6578_v17  ;;  %v5895_v1 = vadd.f32 %v5894_v49, %v10831_v55 }
 0x5be   : > { %v6879_v0 = vmax.f32 %v6847_v11, 0.0  ;;  %v6712_v15 = vadd.f32 %v6667_v19, %v5885_v18  ;;  %v5899_v55 = vpop.f32.mrf.mxu2 }
 0x5bf   : > { %v5900_v47 = vadd.f32 %v5899_v55, %v10837_v62 }
 0x5c0   : > { %6912 = vst [vmem:[%s10872_s21 + $0xb0] sm:$0xff] %v6879_v0  ;;  %v6781_v12 = vmul.f32 %v10853_v5, %v6712_v15  ;;  %v6592_v0 = vpop.f32.mrf.mxu0 }
 0x5c2   : > { %v6816_v46 = vadd.f32 %v10859_v39, %v6781_v12 }
 0x5c3   : > { %v6669_v57 = vpop.f32.mrf.mxu1 }
 0x5c4   : > { %v6848_v60 = vadd.f32 %v6816_v46, %v6746_v52  ;;  %v6670_v8 = vadd.f32 %v6669_v57, %v6581_v13  ;;  %v6503_v52 = vpop.f32.mrf.mxu3 }
 0x5c6   : > { %v6880_v21 = vmax.f32 %v6848_v60, 0.0  ;;  %v6713_v6 = vadd.f32 %v6670_v8, %v5888_v31  ;;  %v6751_v31 = vld [vmem:[%s9625_s13 + $0xe0] sm:$0xff]  ;;  %v6593_v60 = vadd.f32 %v6592_v0, %v6503_v52 }
 0x5c8   : > { %6913 = vst [vmem:[%s10872_s21 + $0xb8] sm:$0xff] %v6880_v21  ;;  %v6782_v10 = vmul.f32 %v10853_v5, %v6713_v6 }
 0x5ca   : > { %v6817_v16 = vadd.f32 %v10859_v39, %v6782_v10 }
 0x5cb   : > { %v6671_v29 = vpop.f32.mrf.mxu1 }
 0x5cc   : > { %v6849_v44 = vadd.f32 %v6817_v16, %v6747_v9  ;;  %v6672_v24 = vadd.f32 %v6671_v29, %v6583_v35  ;;  %v6506_v6 = vpop.f32.mrf.mxu3  ;;  %v6595_v37 = vpop.f32.mrf.mxu0 }
 0x5cd   : > { %v5902_v35 = vpop.f32.mrf.mxu2  ;;  %v6596_v16 = vadd.f32 %v6595_v37, %v6506_v6 }
 0x5ce   : > { %v6881_v43 = vmax.f32 %v6849_v44, 0.0  ;;  %v6714_v27 = vadd.f32 %v6672_v24, %v5890_v30  ;;  %v6752_v30 = vld [vmem:[%s9625_s13 + $0xe8] sm:$0xff] }
 0x5d0   : > { %6914 = vst [vmem:[%s10872_s21 + $0xc0] sm:$0xff] %v6881_v43  ;;  %v6783_v36 = vmul.f32 %v10853_v5, %v6714_v27  ;;  %v5903_v43 = vadd.f32 %v5902_v35, %v10840_v58 }
 0x5d2   : > { %v6818_v22 = vadd.f32 %v10859_v39, %v6783_v36 }
 0x5d3   : > { %v6674_v54 = vpop.f32.mrf.mxu1 }
 0x5d4   : > { %v6850_v41 = vadd.f32 %v6818_v22, %v6748_v51  ;;  %v6675_v33 = vadd.f32 %v6674_v54, %v6586_v48  ;;  %v6508_v36 = vpop.f32.mrf.mxu3  ;;  %v6597_v25 = vpop.f32.mrf.mxu0  ;;  %v6753_v22 = vld [vmem:[%s9625_s13 + $0xf0] sm:$0xff] }
 0x5d5   : > { %v5904_v48 = vpop.f32.mrf.mxu2  ;;  %v6598_v54 = vadd.f32 %v6597_v25, %v6508_v36 }
 0x5d6   : > { %v6882_v50 = vmax.f32 %v6850_v41, 0.0  ;;  %v6715_v38 = vadd.f32 %v6675_v33, %v5893_v3  ;;  %v5905_v58 = vadd.f32 %v5904_v48, %v10843_v4 }
 0x5d8   : > { %6915 = vst [vmem:[%s10872_s21 + $0xc8] sm:$0xff] %v6882_v50  ;;  %v6784_v2 = vmul.f32 %v10853_v5, %v6715_v38 }
 0x5da   : > { %v6819_v28 = vadd.f32 %v10859_v39, %v6784_v2 }
 0x5db   : > { %v6676_v26 = vpop.f32.mrf.mxu1 }
 0x5dc   : > { %v6851_v14 = vadd.f32 %v6819_v28, %v6749_v45  ;;  %v6677_v17 = vadd.f32 %v6676_v26, %v6588_v7  ;;  %v6754_v7 = vld [vmem:[%s9625_s13 + $0xf8] sm:$0xff]  ;;  %s9422_s13 = scalar_lea.hbm %s11153_s7, 512 }
 0x5dd   : > { %p9424_p2 = scmp.lt.s32.totalorder %s9422_s13, %s9418_s1 }
 0x5de   : > { %v6883_v23 = vmax.f32 %v6851_v14, 0.0  ;;  %v6716_v53 = vadd.f32 %v6677_v17, %v5895_v1 }
 0x5df   : > { %p9425_p9 = por %p9424_p2, %p9423_p11 }
 0x5e0   : > { %6916 = vst [vmem:[%s10872_s21 + $0xd0] sm:$0xff] %v6883_v23  ;;  %v6785_v18 = vmul.f32 %v10853_v5, %v6716_v53 }
 0x5e1   : > { %p9426_p10 = pnand %p9425_p9, %p9421_p8 }
 0x5e2   : > { %v6820_v11 = vadd.f32 %v10859_v39, %v6785_v18 }
 0x5e3   : > { %v6679_v19 = vpop.f32.mrf.mxu1 }
 0x5e4   : > { %v6852_v15 = vadd.f32 %v6820_v11, %v6750_v40  ;;  %v6680_v12 = vadd.f32 %v6679_v19, %v6591_v63 }
 0x5e6   : > { %v6884_v13 = vmax.f32 %v6852_v15, 0.0  ;;  %v6717_v46 = vadd.f32 %v6680_v12, %v5898_v42 }
 0x5e8   : > { %6917 = vst [vmem:[%s10872_s21 + $0xd8] sm:$0xff] %v6884_v13  ;;  %v6786_v57 = vmul.f32 %v10853_v5, %v6717_v46 }
 0x5ea   : > { %v6821_v8 = vadd.f32 %v10859_v39, %v6786_v57 }
 0x5eb   : > { %v6681_v32 = vpop.f32.mrf.mxu1 }
 0x5ec   : > { %v6853_v59 = vadd.f32 %v6821_v8, %v6751_v31  ;;  %v6682_v21 = vadd.f32 %v6681_v32, %v6593_v60 }
 0x5ee   : > { %v6885_v10 = vmax.f32 %v6853_v59, 0.0  ;;  %v6718_v9 = vadd.f32 %v6682_v21, %v5900_v47 }
 0x5f0   : > { %6918 = vst [vmem:[%s10872_s21 + $0xe0] sm:$0xff] %v6885_v10  ;;  %v6787_v29 = vmul.f32 %v10853_v5, %v6718_v9 }
 0x5f2   : > { %v6822_v44 = vadd.f32 %v10859_v39, %v6787_v29 }
 0x5f3   : > { %v6684_v24 = vpop.f32.mrf.mxu1 }
 0x5f4   : > { %v6854_v62 = vadd.f32 %v6822_v44, %v6752_v30  ;;  %v6685_v27 = vadd.f32 %v6684_v24, %v6596_v16 }
 0x5f6   : > { %v6886_v56 = vmax.f32 %v6854_v62, 0.0  ;;  %v6719_v49 = vadd.f32 %v6685_v27, %v5903_v43 }
 0x5f8   : > { %6919 = vst [vmem:[%s10872_s21 + $0xe8] sm:$0xff] %v6886_v56  ;;  %v6788_v51 = vmul.f32 %v10853_v5, %v6719_v49 }
 0x5fa   : > { %v6823_v3 = vadd.f32 %v10859_v39, %v6788_v51 }
 0x5fb   : > { %v6686_v41 = vpop.f32.mrf.mxu1 }
 0x5fc   : > { %v6855_v33 = vadd.f32 %v6823_v3, %v6753_v22  ;;  %v6687_v50 = vadd.f32 %v6686_v41, %v6598_v54 }
 0x5fe   : > { %v6887_v38 = vmax.f32 %v6855_v33, 0.0  ;;  %v6720_v2 = vadd.f32 %v6687_v50, %v5905_v58 }
 0x600   : > { %6920 = vst [vmem:[%s10872_s21 + $0xf0] sm:$0xff] %v6887_v38  ;;  %v6789_v45 = vmul.f32 %v10853_v5, %v6720_v2 }
 0x602   : > { %v6824_v20 = vadd.f32 %v10859_v39, %v6789_v45 }
 0x604   : > { %v6856_v4 = vadd.f32 %v6824_v20, %v6754_v7 }
 0x606   : > { %v6888_v61 = vmax.f32 %v6856_v4, 0.0 }
 0x608   : > { %6921 = vst [vmem:[%s10872_s21 + $0xf8] sm:$0xff] %v6888_v61 }
 0x609   : > { %9429 = shalt.err (!%p9426_p10)
}
 0x60a   : > { %s9481_s14 = smov 128   ;;  %s9482_s21 = smov 8  }
 0x60b   : > { %9240 = dma.vmem_to_hbm [thread:$0]  (%p9589_p3), %s6936_s17, 4096, %s6938_s11, %s6923_s28, %s9481_s14, %s9481_s14, %s9482_s21  }
 0x60c PF: > { %s6952_s29 = sand.u32 1, %s9460_s24   ;;  %p11199_p12 = scmp.ge.s32.totalorder %s9472_s27, 2 }
 0x60d   : > { %s6953_s23 = scalar_lea.sflag [#allocation6], %s6952_s29 }
 0x60e   : > { %p9254_p13 = pnand %p11199_p12, %p9558_p6 }
 0x610   : > { %p9255_p0 = pneg %p9254_p13 }
 0x612   : > { %9455 = dma.done.wait (%p9255_p0), %s6953_s23, 4096  }
 0x613   : > { %9457 = vsyncadd (%p9255_p0), %s6953_s23, 4294963200  ;;  %p21_p5 = scmp.ge.s32.totalorder %s9579_s22, 4   ;;  %s11200_s24 = smov %s9464_s25 }
 0x614   : > { %s11201_s25 = smov %s9468_s26  ;;  %s11202_s26 = smov %s9595_s10 }
 0x615   : > { %s11203_s27 = smov %s9579_s22  ;;  %23 = sbr.rel (!%p21_p5) target bundleno = 8 (0x8), region = 117 }
 0x61a   :  { %6959 = vsyncpa [#allocation5], 1 }
 0x61b   :  { %6961 = vsyncpa [#allocation5 + $0x1], 1 }
 0x61c   :  { %6962 = vsyncpa [#allocation8], 1 }
 0x61d   :  { %6963 = vsyncpa [#allocation6], 1 }
 0x61e   :  { %6965 = vsyncpa [#allocation6 + $0x1], 1 }

</bundles_post_ra>
